<compile_context>
chip_gen: v6e
topology: v6e:2x2x1
jax: 0.10.0
libtpu: 0.0.40
codegen_flags: <defaults>
</compile_context>

<pallas_src>
import numpy as np
import jax
import jax.numpy as jnp
from jax import lax
from jax.experimental import pallas as pl
from jax.experimental.pallas import tpu as pltpu


# Network geometry — fixed by nn.Linear(107008, 3): 64 * (1680 - 4*2) = 107008.
CONV_DEFS = [  # (C_in, C_out, K)
    (2, 16, 3),
    (16, 32, 3),
    (32, 32, 3),
    (32, 64, 3),
]
L_IN = 1680
L_OUT_FINAL = L_IN - 2 * len(CONV_DEFS)       # 1672
F_IN = CONV_DEFS[-1][1] * L_OUT_FINAL         # 107008
N_CLASSES = 3
BN_EPS = 1e-5


# ----------------------------------------------------------------------------
# Conv helpers (operate on VMEM values / resident weight refs)
# ----------------------------------------------------------------------------
def _conv_relu_rowstack(x, w_ref, b_ref):
    """Layer-1 conv (C_in=2): taps stacked along OUTPUT rows, one MXU dot.

    x     : (C_in, L_in) f32
    w_ref : (3*C_out, C_in) Ref, row k*C_out + o == torch_weight[o, c, k]
    b_ref : (C_out, 1) Ref
    returns (C_out, L_in - 2)
    """
    c_out = w_ref.shape[0] // 3
    l_out = x.shape[1] - 2
    y = jnp.dot(w_ref[...], x, preferred_element_type=jnp.float32)  # (3*C_out, L_in)
    acc = (y[0:c_out, 0:l_out]
           + y[c_out:2 * c_out, 1:1 + l_out]
           + y[2 * c_out:3 * c_out, 2:2 + l_out])
    return jnp.maximum(acc + b_ref[...], 0.0)


def _conv_relu_im2col(x, w_ref, b_ref):
    """Conv1d(K=3, valid) with taps folded into the CONTRACTION dim (im2col).

    x     : (C_in, L_in) f32  (C_in in {16, 32} -> sublane-aligned stacking)
    w_ref : (C_out, 3*C_in) Ref, column k*C_in + c == torch_weight[o, c, k]
    b_ref : (C_out, 1) Ref
    returns (C_out, L_in - 2)
    """
    l_out = x.shape[1] - 2
    x_stk = jnp.concatenate(
        [x[:, 0:l_out], x[:, 1:1 + l_out], x[:, 2:2 + l_out]], axis=0)  # (3*C_in, l_out)
    y = jnp.dot(w_ref[...], x_stk, preferred_element_type=jnp.float32)  # (C_out, l_out)
    return jnp.maximum(y + b_ref[...], 0.0)


# ----------------------------------------------------------------------------
# Fused kernel: conv stack + Linear, NB batch elements per (parallel) grid step
# ----------------------------------------------------------------------------
def fused_convnet_kernel(x_ref,
                         w1_ref, b1_ref, w2_ref, b2_ref,
                         w3_ref, b3_ref, w4_ref, b4_ref,
                         fcw_ref, fcb_ref,
                         logits_ref):
    # x_ref: (NB, 2, 1680)   fcw_ref: (3, 64, 1672)   fcb_ref: (3, 1)
    # logits_ref: (NB, 3, 1)
    nb = x_ref.shape[0]
    for i in range(nb):                                  # NB is a small static int
        a = _conv_relu_rowstack(x_ref[i], w1_ref, b1_ref)   # (16, 1678)
        a = _conv_relu_im2col(a, w2_ref, b2_ref)            # (32, 1676)
        a = _conv_relu_im2col(a, w3_ref, b3_ref)            # (32, 1674)
        a = _conv_relu_im2col(a, w4_ref, b4_ref)            # (64, 1672)

        # Linear(107008 -> 3): torch flatten order f = c*1672 + l is matched by
        # fc_w.reshape(3, 64, 1672).  One lane reduce for all 3 classes, then a
        # tiny 64-wide reduce; output laid out (3, 1) so no transpose is needed.
        p = jnp.sum(a[None, :, :] * fcw_ref[...], axis=2)            # (3, 64)
        logits = jnp.sum(p, axis=1, keepdims=True) + fcb_ref[...]    # (3, 1)
        logits_ref[i] = logits


# ----------------------------------------------------------------------------
# Tiny epilogue kernel: BatchNorm1d (batch stats) + Softmax over features
# ----------------------------------------------------------------------------
def bn_softmax_kernel(y_ref, g_ref, beta_ref, o_ref):
    # y_ref: (B, 3). Training-mode BatchNorm1d (batch mean, biased variance),
    # then Softmax over dim=1 — matches the PyTorch forward of a fresh module.
    y = y_ref[...]
    mean = jnp.mean(y, axis=0, keepdims=True)
    var = jnp.mean((y - mean) ** 2, axis=0, keepdims=True)
    z = (y - mean) * lax.rsqrt(var + BN_EPS) * g_ref[...] + beta_ref[...]
    z = z - jnp.max(z, axis=-1, keepdims=True)
    e = jnp.exp(z)
    o_ref[...] = e / jnp.sum(e, axis=-1, keepdims=True)


# ----------------------------------------------------------------------------
# Wrappers
# ----------------------------------------------------------------------------
def _pick_block_batch(b):
    """Largest divisor of b that is <= 4 while keeping >= 2 grid steps (v7x TCs)."""
    target = min(4, max(1, b // 2))
    for nb in range(target, 0, -1):
        if b % nb == 0:
            return nb
    return 1


def convnet_forward(x, params):
    """x: (B, 2, 1680) f32 -> (B, 3) softmax probabilities."""
    B = x.shape[0]
    nb = _pick_block_batch(B)
    grid = (B // nb,)

    # Cost hint for XLA scheduling around the fused call.
    flops = 0
    l = L_IN
    for (ci, co, k) in CONV_DEFS:
        l -= (k - 1)
        flops += 2 * co * (k * ci) * l
    flops += 2 * N_CLASSES * F_IN
    flops *= B
    bytes_accessed = 4 * (x.size + params["fc_w"].size + params["fc_b"].size
                          + B * N_CLASSES
                          + sum(w.size + b.size for (w, b) in params["convs"]))

    in_specs = [pl.BlockSpec((nb, 2, L_IN), lambda bi: (bi, 0, 0))]
    conv_args = []
    for (w, b) in params["convs"]:
        in_specs.append(pl.BlockSpec(w.shape, lambda bi: (0, 0)))   # VMEM-resident
        in_specs.append(pl.BlockSpec(b.shape, lambda bi: (0, 0)))   # VMEM-resident
        conv_args.extend([w, b])
    in_specs.append(pl.BlockSpec(params["fc_w"].shape, lambda bi: (0, 0, 0)))
    in_specs.append(pl.BlockSpec(params["fc_b"].shape, lambda bi: (0, 0)))

    logits = pl.pallas_call(
        fused_convnet_kernel,
        out_shape=jax.ShapeDtypeStruct((B, N_CLASSES, 1), jnp.float32),
        grid=grid,
        in_specs=in_specs,
        out_specs=pl.BlockSpec((nb, N_CLASSES, 1), lambda bi: (bi, 0, 0)),
        compiler_params=pltpu.CompilerParams(
            dimension_semantics=("parallel",),     # >= 2 steps -> both TCs on v7x
            # ~2.6 MB double-buffered fc_w + <=4 x ~2 MB live activations + input
            # buffers fits comfortably in the 32 MiB scoped budget (v7x-safe).
            vmem_limit_bytes=32 * 1024 * 1024),
        cost_estimate=pl.CostEstimate(
            flops=int(flops), transcendentals=0, bytes_accessed=int(bytes_accessed)),
    )(x, *conv_args, params["fc_w"], params["fc_b"])

    logits = logits.reshape(B, N_CLASSES)   # (B,3,1) -> (B,3): metadata-only

    # Cross-batch BN + softmax (needs the whole batch -> separate tiny call).
    return pl.pallas_call(
        bn_softmax_kernel,
        out_shape=jax.ShapeDtypeStruct((B, N_CLASSES), jnp.float32),
    )(logits, params["bn_gamma"], params["bn_beta"])


# ----------------------------------------------------------------------------
# Parameter construction (deterministic, PyTorch-style uniform(-1/sqrt(fan_in)))
# ----------------------------------------------------------------------------
def init_params(key):
    params = {"convs": []}
    for li, (c_in, c_out, k) in enumerate(CONV_DEFS):
        key, kw, kb = jax.random.split(key, 3)
        bound = 1.0 / np.sqrt(c_in * k)
        w = jax.random.uniform(kw, (c_out, c_in, k), jnp.float32, -bound, bound)
        b = jax.random.uniform(kb, (c_out,), jnp.float32, -bound, bound)
        if li == 0:
            # Layer 1 (C_in=2): taps stacked along OUTPUT rows -> (K*C_out, C_in),
            # row index = k*C_out + o.
            w_stk = jnp.transpose(w, (2, 0, 1)).reshape(k * c_out, c_in)
        else:
            # Layers 2-4: im2col, taps folded into the CONTRACTION dim
            # -> (C_out, K*C_in), column index = k*C_in + c.
            w_stk = jnp.transpose(w, (0, 2, 1)).reshape(c_out, k * c_in)
        params["convs"].append((w_stk, b.reshape(c_out, 1)))

    key, kw, kb = jax.random.split(key, 3)
    bound = 1.0 / np.sqrt(F_IN)
    fc_w = jax.random.uniform(kw, (N_CLASSES, F_IN), jnp.float32, -bound, bound)
    # Contract over (C, L) in-kernel: feature index f = c*L_OUT_FINAL + l.
    params["fc_w"] = fc_w.reshape(N_CLASSES, CONV_DEFS[-1][1], L_OUT_FINAL)
    params["fc_b"] = jax.random.uniform(
        kb, (N_CLASSES,), jnp.float32, -bound, bound).reshape(N_CLASSES, 1)
    params["bn_gamma"] = jnp.ones((1, N_CLASSES), jnp.float32)
    params["bn_beta"] = jnp.zeros((1, N_CLASSES), jnp.float32)
    return params


if __name__ == "__main__":
    B = 2
    assert CONV_DEFS[-1][1] * (L_IN - 8) == 107008  # matches nn.Linear(107008, 3)

    key = jax.random.PRNGKey(0)
    key, kx = jax.random.split(key)
    x = jax.random.normal(kx, (B, 2, L_IN), jnp.float32)
    params = init_params(key)

    out = jax.block_until_ready(convnet_forward(x, params))

    assert out.shape == (B, N_CLASSES), out.shape
    row_sums = np.asarray(jnp.sum(out, axis=-1))
    assert np.allclose(row_sums, 1.0, atol=1e-5), row_sums
    assert np.all(np.isfinite(np.asarray(out)))
    print("KERNEL_OK")
</pallas_src>

<mosaic_0001>
module attributes {stable_mosaic.version = 11 : i64} {
  func.func @fused_convnet_kernel(%arg0: i32, %arg1: memref<1x2x1680xf32, #tpu.memory_space<vmem>>, %arg2: memref<48x2xf32, #tpu.memory_space<vmem>>, %arg3: memref<16x1xf32, #tpu.memory_space<vmem>>, %arg4: memref<32x48xf32, #tpu.memory_space<vmem>>, %arg5: memref<32x1xf32, #tpu.memory_space<vmem>>, %arg6: memref<32x96xf32, #tpu.memory_space<vmem>>, %arg7: memref<32x1xf32, #tpu.memory_space<vmem>>, %arg8: memref<64x96xf32, #tpu.memory_space<vmem>>, %arg9: memref<64x1xf32, #tpu.memory_space<vmem>>, %arg10: memref<3x64x1672xf32, #tpu.memory_space<vmem>>, %arg11: memref<3x1xf32, #tpu.memory_space<vmem>>, %arg12: memref<1x3x1xf32, #tpu.memory_space<vmem>>) attributes {dimension_semantics = [#tpu.dimension_semantics<parallel>], iteration_bounds = array<i64: 2>, scalar_prefetch = 0 : i64, scratch_operands = 0 : i64, tpu.core_type = #tpu.core_type<tc>, window_params = [{transform_indices = @transform_0, window_bounds = array<i64: 1, 2, 1680>}, {pipeline_mode = #tpu.pipeline_mode<synchronous>, transform_indices = @transform_1, window_bounds = array<i64: 48, 2>}, {pipeline_mode = #tpu.pipeline_mode<synchronous>, transform_indices = @transform_2, window_bounds = array<i64: 16, 1>}, {pipeline_mode = #tpu.pipeline_mode<synchronous>, transform_indices = @transform_3, window_bounds = array<i64: 32, 48>}, {pipeline_mode = #tpu.pipeline_mode<synchronous>, transform_indices = @transform_4, window_bounds = array<i64: 32, 1>}, {pipeline_mode = #tpu.pipeline_mode<synchronous>, transform_indices = @transform_5, window_bounds = array<i64: 32, 96>}, {pipeline_mode = #tpu.pipeline_mode<synchronous>, transform_indices = @transform_6, window_bounds = array<i64: 32, 1>}, {pipeline_mode = #tpu.pipeline_mode<synchronous>, transform_indices = @transform_7, window_bounds = array<i64: 64, 96>}, {pipeline_mode = #tpu.pipeline_mode<synchronous>, transform_indices = @transform_8, window_bounds = array<i64: 64, 1>}, {pipeline_mode = #tpu.pipeline_mode<synchronous>, transform_indices = @transform_9, window_bounds = array<i64: 3, 64, 1672>}, {pipeline_mode = #tpu.pipeline_mode<synchronous>, transform_indices = @transform_10, window_bounds = array<i64: 3, 1>}, {transform_indices = @transform_11, window_bounds = array<i64: 1, 3, 1>}]} {
    %c0 = arith.constant 0 : index
    %c0_0 = arith.constant 0 : index
    %c0_1 = arith.constant 0 : index
    %0 = vector.load %arg1[%c0, %c0_0, %c0_1] : memref<1x2x1680xf32, #tpu.memory_space<vmem>>, vector<1x2x1680xf32>
    %1 = vector.shape_cast %0 : vector<1x2x1680xf32> to vector<2x1680xf32>
    %c0_2 = arith.constant 0 : index
    %c0_3 = arith.constant 0 : index
    %2 = vector.load %arg2[%c0_2, %c0_3] : memref<48x2xf32, #tpu.memory_space<vmem>>, vector<48x2xf32>
    %cst = arith.constant dense<0.000000e+00> : vector<48x1680xf32>
    %3 = tpu.matmul %2, %1, %cst {dimension_numbers = #tpu.dot_dimension_numbers<[1], [0], [0], [1], [0, 0, 1, 1], [], []>} : vector<48x2xf32>, vector<2x1680xf32>, vector<48x1680xf32> -> vector<48x1680xf32>
    %4 = vector.extract_strided_slice %3 {offsets = [0, 0], sizes = [16, 1678], strides = [1, 1]} : vector<48x1680xf32> to vector<16x1678xf32>
    %5 = vector.extract_strided_slice %3 {offsets = [16, 1], sizes = [16, 1678], strides = [1, 1]} : vector<48x1680xf32> to vector<16x1678xf32>
    %6 = arith.addf %4, %5 : vector<16x1678xf32>
    %7 = vector.extract_strided_slice %3 {offsets = [32, 2], sizes = [16, 1678], strides = [1, 1]} : vector<48x1680xf32> to vector<16x1678xf32>
    %8 = arith.addf %6, %7 : vector<16x1678xf32>
    %c0_4 = arith.constant 0 : index
    %c0_5 = arith.constant 0 : index
    %9 = vector.load %arg3[%c0_4, %c0_5] : memref<16x1xf32, #tpu.memory_space<vmem>>, vector<16x1xf32>
    %10 = vector.broadcast %9 : vector<16x1xf32> to vector<16x1678xf32>
    %11 = arith.addf %8, %10 : vector<16x1678xf32>
    %cst_6 = arith.constant 0.000000e+00 : f32
    %12 = vector.broadcast %cst_6 : f32 to vector<16x1678xf32>
    %13 = arith.maximumf %11, %12 : vector<16x1678xf32>
    %14 = vector.extract_strided_slice %13 {offsets = [0, 0], sizes = [16, 1676], strides = [1, 1]} : vector<16x1678xf32> to vector<16x1676xf32>
    %15 = vector.extract_strided_slice %13 {offsets = [0, 1], sizes = [16, 1676], strides = [1, 1]} : vector<16x1678xf32> to vector<16x1676xf32>
    %16 = vector.extract_strided_slice %13 {offsets = [0, 2], sizes = [16, 1676], strides = [1, 1]} : vector<16x1678xf32> to vector<16x1676xf32>
    %17 = tpu.concatenate %14, %15, %16 in 0 : vector<16x1676xf32>, vector<16x1676xf32>, vector<16x1676xf32> -> vector<48x1676xf32>
    %c0_7 = arith.constant 0 : index
    %c0_8 = arith.constant 0 : index
    %18 = vector.load %arg4[%c0_7, %c0_8] : memref<32x48xf32, #tpu.memory_space<vmem>>, vector<32x48xf32>
    %cst_9 = arith.constant dense<0.000000e+00> : vector<32x1676xf32>
    %19 = tpu.matmul %18, %17, %cst_9 {dimension_numbers = #tpu.dot_dimension_numbers<[1], [0], [0], [1], [0, 0, 1, 1], [], []>} : vector<32x48xf32>, vector<48x1676xf32>, vector<32x1676xf32> -> vector<32x1676xf32>
    %c0_10 = arith.constant 0 : index
    %c0_11 = arith.constant 0 : index
    %20 = vector.load %arg5[%c0_10, %c0_11] : memref<32x1xf32, #tpu.memory_space<vmem>>, vector<32x1xf32>
    %21 = vector.broadcast %20 : vector<32x1xf32> to vector<32x1676xf32>
    %22 = arith.addf %19, %21 : vector<32x1676xf32>
    %cst_12 = arith.constant 0.000000e+00 : f32
    %23 = vector.broadcast %cst_12 : f32 to vector<32x1676xf32>
    %24 = arith.maximumf %22, %23 : vector<32x1676xf32>
    %25 = vector.extract_strided_slice %24 {offsets = [0, 0], sizes = [32, 1674], strides = [1, 1]} : vector<32x1676xf32> to vector<32x1674xf32>
    %26 = vector.extract_strided_slice %24 {offsets = [0, 1], sizes = [32, 1674], strides = [1, 1]} : vector<32x1676xf32> to vector<32x1674xf32>
    %27 = vector.extract_strided_slice %24 {offsets = [0, 2], sizes = [32, 1674], strides = [1, 1]} : vector<32x1676xf32> to vector<32x1674xf32>
    %28 = tpu.concatenate %25, %26, %27 in 0 : vector<32x1674xf32>, vector<32x1674xf32>, vector<32x1674xf32> -> vector<96x1674xf32>
    %c0_13 = arith.constant 0 : index
    %c0_14 = arith.constant 0 : index
    %29 = vector.load %arg6[%c0_13, %c0_14] : memref<32x96xf32, #tpu.memory_space<vmem>>, vector<32x96xf32>
    %cst_15 = arith.constant dense<0.000000e+00> : vector<32x1674xf32>
    %30 = tpu.matmul %29, %28, %cst_15 {dimension_numbers = #tpu.dot_dimension_numbers<[1], [0], [0], [1], [0, 0, 1, 1], [], []>} : vector<32x96xf32>, vector<96x1674xf32>, vector<32x1674xf32> -> vector<32x1674xf32>
    %c0_16 = arith.constant 0 : index
    %c0_17 = arith.constant 0 : index
    %31 = vector.load %arg7[%c0_16, %c0_17] : memref<32x1xf32, #tpu.memory_space<vmem>>, vector<32x1xf32>
    %32 = vector.broadcast %31 : vector<32x1xf32> to vector<32x1674xf32>
    %33 = arith.addf %30, %32 : vector<32x1674xf32>
    %cst_18 = arith.constant 0.000000e+00 : f32
    %34 = vector.broadcast %cst_18 : f32 to vector<32x1674xf32>
    %35 = arith.maximumf %33, %34 : vector<32x1674xf32>
    %36 = vector.extract_strided_slice %35 {offsets = [0, 0], sizes = [32, 1672], strides = [1, 1]} : vector<32x1674xf32> to vector<32x1672xf32>
    %37 = vector.extract_strided_slice %35 {offsets = [0, 1], sizes = [32, 1672], strides = [1, 1]} : vector<32x1674xf32> to vector<32x1672xf32>
    %38 = vector.extract_strided_slice %35 {offsets = [0, 2], sizes = [32, 1672], strides = [1, 1]} : vector<32x1674xf32> to vector<32x1672xf32>
    %39 = tpu.concatenate %36, %37, %38 in 0 : vector<32x1672xf32>, vector<32x1672xf32>, vector<32x1672xf32> -> vector<96x1672xf32>
    %c0_19 = arith.constant 0 : index
    %c0_20 = arith.constant 0 : index
    %40 = vector.load %arg8[%c0_19, %c0_20] : memref<64x96xf32, #tpu.memory_space<vmem>>, vector<64x96xf32>
    %cst_21 = arith.constant dense<0.000000e+00> : vector<64x1672xf32>
    %41 = tpu.matmul %40, %39, %cst_21 {dimension_numbers = #tpu.dot_dimension_numbers<[1], [0], [0], [1], [0, 0, 1, 1], [], []>} : vector<64x96xf32>, vector<96x1672xf32>, vector<64x1672xf32> -> vector<64x1672xf32>
    %c0_22 = arith.constant 0 : index
    %c0_23 = arith.constant 0 : index
    %42 = vector.load %arg9[%c0_22, %c0_23] : memref<64x1xf32, #tpu.memory_space<vmem>>, vector<64x1xf32>
    %43 = vector.broadcast %42 : vector<64x1xf32> to vector<64x1672xf32>
    %44 = arith.addf %41, %43 : vector<64x1672xf32>
    %cst_24 = arith.constant 0.000000e+00 : f32
    %45 = vector.broadcast %cst_24 : f32 to vector<64x1672xf32>
    %46 = arith.maximumf %44, %45 : vector<64x1672xf32>
    %47 = vector.shape_cast %46 : vector<64x1672xf32> to vector<1x64x1672xf32>
    %c0_25 = arith.constant 0 : index
    %c0_26 = arith.constant 0 : index
    %c0_27 = arith.constant 0 : index
    %48 = vector.load %arg10[%c0_25, %c0_26, %c0_27] : memref<3x64x1672xf32, #tpu.memory_space<vmem>>, vector<3x64x1672xf32>
    %49 = vector.broadcast %47 : vector<1x64x1672xf32> to vector<3x64x1672xf32>
    %50 = arith.mulf %49, %48 : vector<3x64x1672xf32>
    %cst_28 = arith.constant dense<0.000000e+00> : vector<3x64xf32>
    %51 = vector.multi_reduction <add>, %50, %cst_28 [2] : vector<3x64x1672xf32> to vector<3x64xf32>
    %cst_29 = arith.constant dense<0.000000e+00> : vector<3xf32>
    %52 = vector.multi_reduction <add>, %51, %cst_29 [1] : vector<3x64xf32> to vector<3xf32>
    %53 = vector.shape_cast %52 : vector<3xf32> to vector<3x1xf32>
    %c0_30 = arith.constant 0 : index
    %c0_31 = arith.constant 0 : index
    %54 = vector.load %arg11[%c0_30, %c0_31] : memref<3x1xf32, #tpu.memory_space<vmem>>, vector<3x1xf32>
    %55 = arith.addf %53, %54 : vector<3x1xf32>
    %c0_32 = arith.constant 0 : index
    %c0_33 = arith.constant 0 : index
    %c0_34 = arith.constant 0 : index
    %56 = vector.load %arg12[%c0_32, %c0_33, %c0_34] : memref<1x3x1xf32, #tpu.memory_space<vmem>>, vector<1x3x1xf32>
    %57 = vector.shape_cast %56 : vector<1x3x1xf32> to vector<3x1xf32>
    %58 = vector.shape_cast %55 : vector<3x1xf32> to vector<1x3x1xf32>
    tpu.vector_store %arg12[%c0_32, %c0_33, %c0_34], %58 {strides = array<i32>} : memref<1x3x1xf32, #tpu.memory_space<vmem>>, vector<1x3x1xf32>,
    return
  }
  func.func @transform_0(%arg0: i32) -> (i32, i32, i32) {
    %c0_i32 = arith.constant 0 : i32
    %c0_i32_0 = arith.constant 0 : i32
    %c0_i32_1 = arith.constant 0 : i32
    return %arg0, %c0_i32, %c0_i32_0 : i32, i32, i32
  }
  func.func @transform_1(%arg0: i32) -> (i32, i32) {
    %c0_i32 = arith.constant 0 : i32
    %c0_i32_0 = arith.constant 0 : i32
    %c0_i32_1 = arith.constant 0 : i32
    return %c0_i32, %c0_i32_0 : i32, i32
  }
  func.func @transform_2(%arg0: i32) -> (i32, i32) {
    %c0_i32 = arith.constant 0 : i32
    %c0_i32_0 = arith.constant 0 : i32
    %c0_i32_1 = arith.constant 0 : i32
    return %c0_i32, %c0_i32_0 : i32, i32
  }
  func.func @transform_3(%arg0: i32) -> (i32, i32) {
    %c0_i32 = arith.constant 0 : i32
    %c0_i32_0 = arith.constant 0 : i32
    %c0_i32_1 = arith.constant 0 : i32
    return %c0_i32, %c0_i32_0 : i32, i32
  }
  func.func @transform_4(%arg0: i32) -> (i32, i32) {
    %c0_i32 = arith.constant 0 : i32
    %c0_i32_0 = arith.constant 0 : i32
    %c0_i32_1 = arith.constant 0 : i32
    return %c0_i32, %c0_i32_0 : i32, i32
  }
  func.func @transform_5(%arg0: i32) -> (i32, i32) {
    %c0_i32 = arith.constant 0 : i32
    %c0_i32_0 = arith.constant 0 : i32
    %c0_i32_1 = arith.constant 0 : i32
    return %c0_i32, %c0_i32_0 : i32, i32
  }
  func.func @transform_6(%arg0: i32) -> (i32, i32) {
    %c0_i32 = arith.constant 0 : i32
    %c0_i32_0 = arith.constant 0 : i32
    %c0_i32_1 = arith.constant 0 : i32
    return %c0_i32, %c0_i32_0 : i32, i32
  }
  func.func @transform_7(%arg0: i32) -> (i32, i32) {
    %c0_i32 = arith.constant 0 : i32
    %c0_i32_0 = arith.constant 0 : i32
    %c0_i32_1 = arith.constant 0 : i32
    return %c0_i32, %c0_i32_0 : i32, i32
  }
  func.func @transform_8(%arg0: i32) -> (i32, i32) {
    %c0_i32 = arith.constant 0 : i32
    %c0_i32_0 = arith.constant 0 : i32
    %c0_i32_1 = arith.constant 0 : i32
    return %c0_i32, %c0_i32_0 : i32, i32
  }
  func.func @transform_9(%arg0: i32) -> (i32, i32, i32) {
    %c0_i32 = arith.constant 0 : i32
    %c0_i32_0 = arith.constant 0 : i32
    %c0_i32_1 = arith.constant 0 : i32
    %c0_i32_2 = arith.constant 0 : i32
    return %c0_i32, %c0_i32_0, %c0_i32_1 : i32, i32, i32
  }
  func.func @transform_10(%arg0: i32) -> (i32, i32) {
    %c0_i32 = arith.constant 0 : i32
    %c0_i32_0 = arith.constant 0 : i32
    %c0_i32_1 = arith.constant 0 : i32
    return %c0_i32, %c0_i32_0 : i32, i32
  }
  func.func @transform_11(%arg0: i32) -> (i32, i32, i32) {
    %c0_i32 = arith.constant 0 : i32
    %c0_i32_0 = arith.constant 0 : i32
    %c0_i32_1 = arith.constant 0 : i32
    return %arg0, %c0_i32, %c0_i32_0 : i32, i32, i32
  }
}

</mosaic_0001>

<bundles_post_ra>
// kernel: tpu_custom_call.1
= control target key start
LH: loop header
LB: loop body
LE: loop exit
PB: predicated region body
PF: predicated region fallthrough
CT: control target
= control target key end

     0   :  { %s11060_s0 = inlined_call_operand.hbm [shape: f32[2,2,1680], index: 0, kind: input, shape index: {}]   ;;  %s11061_s1 = inlined_call_operand.vmem [shape: f32[48,2], index: 1, kind: input, shape index: {}]   ;;  %s11062_s2 = inlined_call_operand.vmem [shape: f32[16,1], index: 2, kind: input, shape index: {}]   ;;  %s11063_s3 = inlined_call_operand.hbm [shape: f32[32,48], index: 3, kind: input, shape index: {}]   ;;  %s11064_s4 = inlined_call_operand.vmem [shape: f32[32,1], index: 4, kind: input, shape index: {}]   ;;  %s11065_s5 = inlined_call_operand.hbm [shape: f32[32,96], index: 5, kind: input, shape index: {}]   ;;  %s11066_s6 = inlined_call_operand.vmem [shape: f32[32,1], index: 6, kind: input, shape index: {}]   ;;  %s11067_s7 = inlined_call_operand.hbm [shape: f32[64,96], index: 7, kind: input, shape index: {}]   ;;  %s11068_s8 = inlined_call_operand.vmem [shape: f32[64,1], index: 8, kind: input, shape index: {}]   ;;  %s11069_s9 = inlined_call_operand.hbm [shape: f32[3,64,1672], index: 9, kind: input, shape index: {}]   ;;  %s11070_s10 = inlined_call_operand.vmem [shape: f32[3,1], index: 10, kind: input, shape index: {}]   ;;  %s11071_s11 = inlined_call_operand.vmem [shape: f32[2,3,1], index: 11, kind: output, shape index: {}]  }
   0x1   :  { %11163 = sst [smem:[#allocation48_spill]] %s11063_s3 }
   0x2   :  { %11164 = sst [smem:[#allocation49_spill]] %s11065_s5 }
   0x3   :  { %16 = vsyncpa [#allocation3], 0 }
   0x4   :  { %18 = vsyncpa [#allocation3 + $0x1], 0 }
   0x5   :  { %19 = vsyncpa [#allocation5], 0 }
   0x6   :  { %20 = vsyncpa [#allocation8], 0  ;;  %s7218_s17 = smov 0   ;;  %s7220_s18 = smov 0  }
   0x7   :  { %s7222_s19 = smov 0   ;;  %s7224_s20 = smov 0  }
   0x8 LB: > { %s7144_s21 = smov [#allocation4]   ;;  %s7239_s23 = sadd.s32 4294967295, %s7142_s20   ;;  %s7142_s20 = sphi %s7224_s20, %s11378_s20   ;;  %s7138_s19 = sphi %s7222_s19, %s11377_s19   ;;  %s7134_s18 = sphi %s7220_s18, %s11376_s18   ;;  %s7130_s17 = sphi %s7218_s17, %s11375_s17  }
   0x9   : > { %s311_s22 = sshll.u32 %s7144_s21, 4  ;;  %p6685_p0 = scmp.ge.s32.totalorder %s7142_s20, 1  ;;  %s312_s22 = int_to_ptr.vmem [resolvable:$true] %s311_s22 }
   0xa   : > { %p11072_p1 = scmp.eq.s32.totalorder %s7239_s23, 0  ;;  %p293_p2 = scmp.lt.s32.totalorder %s7142_s20, 3 }
   0xb   : > { %s7145_s25 = smov [#allocation7]   ;;  %s7146_s28 = smov [#allocation6]  }
   0xc   : > { %p7244_p3 = pnand %p6685_p0, %p293_p2  ;;  %s343_s26 = sshll.u32 %s7145_s25, 4  ;;  %s7256_s26 = int_to_ptr.vmem [resolvable:$true] %s343_s26 }
   0xd   : > { %s327_s29 = sshll.u32 %s7146_s28, 4  ;;  %s6979_s30 = scalar_lea.vmem %s312_s22, 512  ;;  %s7258_s29 = int_to_ptr.vmem [resolvable:$true] %s327_s29 }
   0xe   : > { %s11165_s24 = scalar_select %p7244_p3, 1, 0 }
   0xf   : > { %p6892_p4 = pneg %p7244_p3  ;;  %p6980_p7 = scmp.ne.s32.totalorder %s312_s22, %s6979_s30 }
  0x10   : > { %p6987_p10 = scmp.lt.s32.totalorder %s312_s22, %s312_s22  ;;  %p6988_p11 = scmp.lt.s32.totalorder %s6979_s30, %s6979_s30 }
  0x11   : > { %p7252_p5 = pnand %p6892_p4, %p11072_p1 }
  0x12   : > { %p6989_p12 = por %p6988_p11, %p6987_p10 }
  0x13   : > { %p6970_p6 = pneg %p7252_p5 }
  0x15   : > { %p6982_p8 = pnand %p6980_p7, %p6970_p6 }
  0x17   : > { %p6983_p9 = pneg %p6982_p8 }
  0x19   : > { %p6990_p13 = pnand %p6989_p12, %p6983_p9 }
  0x1b   : > { %6993 = shalt.err (!%p6990_p13)
}
  0x1c   : > { %s7147_s12 = smov 128   ;;  %s7148_s13 = smov 8  }
  0x1d   : > { %s11167_s3 = sld [smem:[#allocation48_spill]]  ;;  %s7005_s16 = scalar_lea.vmem %s7256_s26, 1024 }
  0x1e   : > { %p7006_p0 = scmp.ne.s32.totalorder %s7256_s26, %s7005_s16  ;;  %p7013_p7 = scmp.lt.s32.totalorder %s7256_s26, %s7256_s26 }
  0x1f   : > { %p7014_p8 = scmp.lt.s32.totalorder %s7005_s16, %s7005_s16 }
  0x20   : > { %p7008_p2 = pnand %p7006_p0, %p6970_p6 }
  0x21   : > { %p7015_p9 = por %p7014_p8, %p7013_p7 }
  0x22   : > { %p7009_p4 = pneg %p7008_p2 }
  0x23   : > { %6895 = dma.hbm_to_vmem [thread:$0]  (!%p7252_p5), %s11167_s3, 512, %s312_s22, [#allocation5], %s7147_s12, %s7147_s12, %s7148_s13  }
  0x24   : > { %p7016_p10 = pnand %p7015_p9, %p7009_p4 }
  0x26   : > { %7019 = shalt.err (!%p7016_p10)
}
  0x27   : > { %6901 = dma.hbm_to_vmem [thread:$0]  (!%p7252_p5), %s11067_s7, 1024, %s7256_s26, [#allocation8], %s7147_s12, %s7147_s12, %s7148_s13  }
  0x28   : > { %s7031_s22 = scalar_lea.vmem %s7258_s29, 512  ;;  %p7039_p0 = scmp.lt.s32.totalorder %s7258_s29, %s7258_s29 }
  0x29   : > { %p7032_p11 = scmp.ne.s32.totalorder %s7258_s29, %s7031_s22  ;;  %p7040_p2 = scmp.lt.s32.totalorder %s7031_s22, %s7031_s22 }
  0x2b   : > { %p7034_p12 = pnand %p7032_p11, %p6970_p6  ;;  %p7041_p4 = por %p7040_p2, %p7039_p0 }
  0x2d   : > { %p7035_p13 = pneg %p7034_p12 }
  0x2f   : > { %p7042_p7 = pnand %p7041_p4, %p7035_p13 }
  0x31   : > { %7045 = shalt.err (!%p7042_p7)
}
  0x32   : > { %s11168_s5 = sld [smem:[#allocation49_spill]]  ;;  %s7149_s26 = smov [#allocation9]  }
  0x33   : > { %s359_s14 = sshll.u32 %s7149_s26, 4  ;;  %s360_s14 = int_to_ptr.vmem [resolvable:$true] %s359_s14 }
  0x34   : > { %s7057_s15 = scalar_lea.vmem %s360_s14, 43008  ;;  %p7065_p11 = scmp.lt.s32.totalorder %s360_s14, %s360_s14 }
  0x35   : > { %p7058_p8 = scmp.ne.s32.totalorder %s360_s14, %s7057_s15  ;;  %p7066_p12 = scmp.lt.s32.totalorder %s7057_s15, %s7057_s15 }
  0x37   : > { %p7060_p9 = pnand %p7058_p8, %p6970_p6  ;;  %p7067_p13 = por %p7066_p12, %p7065_p11 }
  0x38   : > { %6898 = dma.hbm_to_vmem [thread:$0]  (!%p7252_p5), %s11168_s5, 512, %s7258_s29, [#allocation5], %s7147_s12, %s7147_s12, %s7148_s13  }
  0x39   : > { %p7061_p10 = pneg %p7060_p9 }
  0x3b   : > { %p7068_p0 = pnand %p7067_p13, %p7061_p10 }
  0x3d   : > { %7071 = shalt.err (!%p7068_p0)
}
  0x3e   : > { %s7150_s16 = smov 1792   ;;  %s7151_s29 = smov 112  }
  0x3f   : > { %6904 = dma.hbm_to_vmem [thread:$0]  (!%p7252_p5), %s11069_s9, 43008, %s360_s14, [#allocation8], %s7150_s16, %s7150_s16, %s7151_s29  }
  0x40   : > { %s7305_s21 = sadd.s32 1, %s7142_s20   ;;  %s33_s25 = sadd.s32 1, %s7138_s19 }
  0x41   : > { %s30_s22 = ssub.s32 %s7142_s20, %s7305_s21  ;;  %p40_p6 = scmp.ne.s32.totalorder %s7138_s19, %s7134_s18 }
  0x42   : > { %p31_p2 = scmp.eq.s32.totalorder %s30_s22, 0  ;;  %p41_p4 = scmp.eq.s32.totalorder %s7142_s20, 0 }
  0x43   : > { %p46_p7 = scmp.ne.s32.totalorder %s7134_s18, %s7130_s17  ;;  %p6913_p8 = scmp.lt.s32.totalorder %s7142_s20, 2 }
  0x44   : > { %s7317_s28 = scalar_select %p31_p2, %s7138_s19, %s33_s25  }
  0x45   : > { %p42_p9 = por %p41_p4, %p40_p6  ;;  %p7321_p10 = por %p11072_p1, %p46_p7 }
  0x46   : > { %s376_s30 = sand.u32 1, %s7138_s19   ;;  %s6872_s26 = smul.u32 448, %s7142_s20 }
  0x47   : > { %s11169_s27 = scalar_select %p7321_p10, 1, 0 }
  0x48   : > { %s6871_s14 = smul.u32 28, %s376_s30  ;;  %p7327_p5 = pnand %p6913_p8, %p42_p9 }
  0x49   : > { %s7334_s17 = scalar_lea.hbm %s11060_s0, %s6872_s26  ;;  %s377_s25 = scalar_lea.sflag [#allocation3], %s376_s30 }
  0x4a   : > { %s380_s12 = scalar_lea.vmem [#allocation2], %s6871_s14  ;;  %s7072_s22 = scalar_lea.hbm %s7334_s17, 448 }
  0x4b   : > { %s388_s13 = sshll.u32 %s380_s12, 4  ;;  %p7073_p11 = scmp.ne.s32.totalorder %s7334_s17, %s7072_s22  ;;  %s389_s13 = int_to_ptr.vmem [resolvable:$true] %s388_s13 }
  0x4c   : > { %p7074_p12 = pneg %p7327_p5  ;;  %s7077_s16 = scalar_lea.hbm %s11060_s0, 896 }
  0x4d   : > { %p7078_p6 = scmp.lt.s32.totalorder %s7334_s17, %s11060_s0  ;;  %p7079_p2 = scmp.lt.s32.totalorder %s7077_s16, %s7072_s22 }
  0x4e   : > { %p7075_p13 = pnand %p7074_p12, %p7073_p11 }
  0x4f   : > { %p7080_p4 = por %p7079_p2, %p7078_p6 }
  0x50   : > { %p7076_p0 = pneg %p7075_p13 }
  0x52   : > { %p7081_p7 = pnand %p7080_p4, %p7076_p0 }
  0x54   : > { %7084 = shalt.err (!%p7081_p7)
}
  0x55   : > { %s7085_s14 = scalar_lea.vmem %s389_s13, 448  ;;  %s7152_s30 = smov [#allocation2]  }
  0x56   : > { %p7086_p8 = scmp.ne.s32.totalorder %s389_s13, %s7085_s14  ;;  %s7090_s12 = sshll.u32 %s7152_s30, 4  ;;  %s7091_s12 = int_to_ptr.vmem [resolvable:$false] %s7090_s12 }
  0x57   : > { %s7092_s5 = scalar_lea.vmem %s7091_s12, 896  ;;  %p7093_p11 = scmp.lt.s32.totalorder %s389_s13, %s7091_s12 }
  0x58   : > { %p7088_p9 = pnand %p7086_p8, %p7074_p12  ;;  %p7094_p13 = scmp.lt.s32.totalorder %s7092_s5, %s7085_s14 }
  0x5a   : > { %p7089_p1 = pneg %p7088_p9  ;;  %p7095_p10 = por %p7094_p13, %p7093_p11 }
  0x5c   : > { %p7096_p3 = pnand %p7095_p10, %p7089_p1 }
  0x5e   : > { %7099 = shalt.err (!%p7096_p3)
}
  0x5f   : > { %6908 = dma.hbm_to_vmem [thread:$0]  (!%p7327_p5), %s7334_s17, 448, %s389_s13, %s377_s25  }
  0x60   : > { %p11171_p0 = scmp.ne.s32.totalorder %s11165_s24, 0 }
  0x62   : > { %397 = sbr.rel (%p11171_p0) target bundleno = 2160 (0x870), region = 64 }
  0x67   : > { %s399_s3 = sand.u32 1, %s7134_s18   ;;  %p11172_p12 = scmp.ne.s32.totalorder %s11169_s27, 0 }
  0x68   : > { %s6873_s22 = smul.u32 28, %s399_s3  ;;  %s400_s20 = scalar_lea.sflag [#allocation3], %s399_s3 }
  0x6a   : > { %s7353_s16 = scalar_lea.vmem [#allocation2], %s6873_s22 }
  0x6b   : > { %7117 = dma.done.wait (%p11172_p12), %s400_s20, 448  }
  0x6c   : > { %7119 = vsyncadd (%p11172_p12), %s400_s20, 4294966848  ;;  %p11173_p1 = scmp.eq.s32.totalorder %s7239_s23, 0 }
  0x6e   : > { %7121 = dma.done.wait (%p11173_p1), [#allocation5], 1024   ;;  %p11174_p3 = pmov %p11173_p1 }
  0x6f   : > { %p11175_p10 = pmov %p11173_p1 }
  0x70   : > { %7123 = vsyncadd (%p11174_p3), [#allocation5], 4294966272 }
  0x71   : > { %7125 = dma.done.wait (%p11175_p10), [#allocation8], 44032   ;;  %p11176_p5 = pmov %p11173_p1 }
  0x72   : > { %v11075_v0 = vlaneseq  ;;  %v7153_v1 = vmov 1983009808   ;;  %v11076_v3 = vmov 0.0   ;;  %v7155_v5 = vmov 0   ;;  %v461_v8 = vld [vmem:[%s7353_s16] sm:$0xff]  ;;  %v462_v11 = vld [vmem:[%s7353_s16 + $0x8] sm:$0xff] }
  0x73   : > { %7127 = vsyncadd (%p11176_p5), [#allocation8], 4294923264  ;;  %v477_v2 = vunpack.c.l.s4 %v7153_v1  ;;  %646 = vmatprep.mubr.f32.mxu0 %v11076_v3  ;;  %670 = vmatprep.mubr.f32.mxu1 %v11076_v3  ;;  %v475_v9 = vcombine.high %v461_v8, %v461_v8  ;;  %vm553_vm0 = vcmask 1041408   ;;  %v463_v12 = vld [vmem:[%s7353_s16 + $0x10] sm:$0xff]  ;;  %v492_v16 = vcombine.high %v462_v11, %v462_v11  ;;  %v7382_v18 = vld [vmem:[%s11061_s1] sm:$0xff]  ;;  %s7157_s24 = smov 127  }
  0x74   : > { %v7370_v4 = vshrl.u32 %v11075_v0, 7  ;;  %6963 = vset.pattern.permute.xlu1 %v7155_v5  ;;  %6964 = vset.pattern.permute.xlu0 %v7155_v5  ;;  %v1624_v17 = vld [vmem:[%s11062_s2 + $0x8] sm:$0xff]  ;;  %vm534_vm1 = vcmask 15360   ;;  %v7387_v19 = vld [vmem:[%s11061_s1 + $0x20] sm:$0xff]  ;;  %v509_v24 = vcombine.high %v463_v12, %v463_v12  ;;  %v7425_v31 = vld [vmem:[%s11061_s1 + $0x10] sm:$0xff]  ;;  %vm1373_vm2 = vcmask 1039360  }
  0x75   : > { %v478_v6 = vunpack.c.0.s8 %v477_v2  ;;  %1632 = vperm.xlu1 %6963, %v1624_v17   ;;  %v7402_v25 = vld [vmem:[%s11061_s1 + $0x8] sm:$0xff]  ;;  %v1623_v30 = vld [vmem:[%s11062_s2] sm:$0xff]  ;;  %v7438_v33 = vld [vmem:[%s11061_s1 + $0x18] sm:$0xff]  ;;  %vm1540_vm3 = vcmask 1031168   ;;  %vm1967_vm4 = vcmask 392192   ;;  %vm3183_vm5 = vcmask 785408  }
  0x76   : > { %11177 = vst [vmem:[#allocation13_spill] sm:$0xff] %v7370_v4  ;;  %v7407_v26 = vld [vmem:[%s11061_s1 + $0x28] sm:$0xff]  ;;  %v6698_v34 = vld.sshfl [vmem:[%s7353_s16 + $0x18] sm:$0x33 pattern:$0x76325410] }
  0x77   : > { %v481_v7 = vsub.s32 %v478_v6, %v7370_v4  ;;  %v533_v35 = vcombine.high %v6698_v34, %v6698_v34  ;;  %s7156_s16 = smov 126   ;;  %vm6038_vm6 = vcmask 64512   ;;  %vm6446_vm7 = vcmask 130112   ;;  %p457_p6 = scmp.lt.s32.totalorder %s7239_s23, 1 }
  0x78   : > { %vm6453_vm8 = vcmask 195712   ;;  %vm6460_vm9 = vcmask 261312   ;;  %vm6467_vm10 = vcmask 326912   ;;  %vm6474_vm11 = vcmask 392512  }
  0x79   : > { %v482_v10 = vrot.slane %v461_v8, %v481_v7  ;;  %v489_v14 = vrot.slane %v475_v9, %v481_v7  ;;  %v499_v15 = vrot.slane %v462_v11, %v481_v7  ;;  %v516_v20 = vrot.slane %v463_v12, %v481_v7  ;;  %1627 = vperm.xlu1 %6963, %v1623_v30   ;;  %s11380_s23 = smov (!%p457_p6, %s7239_s23), 1 }
  0x7a   : > { %v506_v23 = vrot.slane %v492_v16, %v481_v7  ;;  %v523_v29 = vrot.slane %v509_v24, %v481_v7  ;;  %vm6481_vm12 = vcmask 458112   ;;  %vm6488_vm13 = vcmask 523712   ;;  %s6697_s17 = sshll.u32 %s11380_s23, 2 }
  0x7b   : > { %v490_v13 = vcombine.high %v482_v10, %v482_v10  ;;  %v491_v21 = vcombine.high %v489_v14, %v489_v14  ;;  %v507_v22 = vcombine.high %v499_v15, %v499_v15  ;;  %v524_v28 = vcombine.high %v516_v20, %v516_v20  ;;  %s460_s26 = scalar_lea.vmem %s11071_s11, %s6697_s17 }
  0x7c   : > { %v508_v27 = vcombine.high %v506_v23, %v506_v23  ;;  %v525_v32 = vcombine.high %v523_v29, %v523_v29  ;;  %vm6568_vm14 = vcmask 1041409   ;;  %vm6570_vm15 = vcmask 1042434  }
  0x7d   : > { %6699 = vmatprep.subr.msk.mxu0 %vm553_vm0, %v490_v13  ;;  %6869 = vmatprep.subr.msk.mxu1 %vm553_vm0, %v490_v13 }
  0x7e   : > { %6700 = vmatpush1.msk.msra.mxu0 %vm553_vm0, %v482_v10  ;;  %6870 = vmatpush1.msk.msra.mxu1 %vm553_vm0, %v482_v10 }
  0x7f   : > { %6701 = vmatmul.mubr.msk.f32.vlgmr.msra.gmra.mxu0 %vm534_vm1, %v7382_v18  ;;  %6705 = vmatmul.mubr.msk.f32.vlgmr.msra.gmra.mxu1 %vm534_vm1, %v7387_v19 }
  0x80   : > { %652 = vmatprep.mubr.f32.mxu0 %v11076_v3  ;;  %676 = vmatprep.mubr.f32.mxu1 %v11076_v3 }
  0x81   : > { %6707 = vmatprep.subr.msk.mxu1 %vm553_vm0, %v491_v21  ;;  %6715 = vmatprep.subr.msk.mxu0 %vm553_vm0, %v507_v22 }
  0x82   : > { %6708 = vmatpush1.msk.msra.mxu1 %vm553_vm0, %v489_v14  ;;  %6716 = vmatpush1.msk.msra.mxu0 %vm553_vm0, %v499_v15 }
  0x83   : > { %6702 = vmatmul.mubr.msk.f32.gmra.mxu0 %vm534_vm1, %v7402_v25  ;;  %6706 = vmatmul.mubr.msk.f32.gmra.mxu1 %vm534_vm1, %v7407_v26 }
  0x84   : > { %658 = vmatprep.mubr.f32.mxu0 %v11076_v3  ;;  %747 = vmatprep.mubr.f32.mxu1 %v11076_v3 }
  0x85   : > { %6723 = vmatprep.subr.msk.mxu1 %vm553_vm0, %v508_v27  ;;  %6731 = vmatprep.subr.msk.mxu0 %vm553_vm0, %v524_v28 }
  0x87   : > { %6703 = vmatmul.mubr.msk.f32.gmra.mxu0 %vm534_vm1, %v7425_v31  ;;  %6709 = vmatmul.mubr.msk.f32.vlgmr.msra.gmra.mxu1 %vm534_vm1, %v7382_v18 }
  0x88   : > { %664 = vmatprep.mubr.f32.mxu0 %v11076_v3  ;;  %753 = vmatprep.mubr.f32.mxu1 %v11076_v3 }
  0x89   : > { %6724 = vmatpush1.msk.msra.mxu1 %vm553_vm0, %v506_v23 }
  0x8a   : > { %6739 = vmatprep.subr.msk.mxu1 %vm553_vm0, %v525_v32 }
  0x8b   : > { %6704 = vmatmul.mubr.msk.f32.gmra.mxu0 %vm534_vm1, %v7438_v33  ;;  %6710 = vmatmul.mubr.msk.f32.gmra.mxu1 %vm534_vm1, %v7402_v25 }
  0x8c   : > { %759 = vmatprep.mubr.f32.mxu1 %v11076_v3  ;;  %848 = vmatprep.mubr.f32.mxu0 %v11076_v3 }
  0x8f   : > { %6711 = vmatmul.mubr.msk.f32.gmra.mxu1 %vm534_vm1, %v7425_v31  ;;  %6717 = vmatmul.mubr.msk.f32.vlgmr.msra.gmra.mxu0 %vm534_vm1, %v7382_v18 }
  0x90   : > { %765 = vmatprep.mubr.f32.mxu1 %v11076_v3  ;;  %854 = vmatprep.mubr.f32.mxu0 %v11076_v3 }
  0x91   : > { %6732 = vmatpush1.msk.msra.mxu0 %vm553_vm0, %v516_v20 }
  0x92   : > { %6747 = vmatprep.subr.msk.mxu0 %vm553_vm0, %v533_v35 }
  0x93   : > { %6712 = vmatmul.mubr.msk.f32.gmra.mxu1 %vm534_vm1, %v7438_v33  ;;  %6718 = vmatmul.mubr.msk.f32.gmra.mxu0 %vm534_vm1, %v7402_v25 }
  0x94   : > { %771 = vmatprep.mubr.f32.mxu1 %v11076_v3  ;;  %860 = vmatprep.mubr.f32.mxu0 %v11076_v3 }
  0x97   : > { %6713 = vmatmul.mubr.msk.f32.gmra.mxu1 %vm534_vm1, %v7387_v19  ;;  %6719 = vmatmul.mubr.msk.f32.gmra.mxu0 %vm534_vm1, %v7425_v31 }
  0x98   : > { %777 = vmatprep.mubr.f32.mxu1 %v11076_v3  ;;  %866 = vmatprep.mubr.f32.mxu0 %v11076_v3 }
  0x9b   : > { %6714 = vmatmul.mubr.msk.f32.gmra.mxu1 %vm534_vm1, %v7407_v26  ;;  %6720 = vmatmul.mubr.msk.f32.gmra.mxu0 %vm534_vm1, %v7438_v33 }
  0x9c   : > { %872 = vmatprep.mubr.f32.mxu0 %v11076_v3  ;;  %949 = vmatprep.mubr.f32.mxu1 %v11076_v3 }
  0x9f   : > { %6721 = vmatmul.mubr.msk.f32.gmra.mxu0 %vm534_vm1, %v7387_v19  ;;  %6725 = vmatmul.mubr.msk.f32.vlgmr.msra.gmra.mxu1 %vm534_vm1, %v7382_v18 }
  0xa0   : > { %878 = vmatprep.mubr.f32.mxu0 %v11076_v3  ;;  %955 = vmatprep.mubr.f32.mxu1 %v11076_v3 }
  0xa1   : > { %6740 = vmatpush1.msk.msra.mxu1 %vm553_vm0, %v523_v29 }
  0xa3   : > { %6722 = vmatmul.mubr.msk.f32.gmra.mxu0 %vm534_vm1, %v7407_v26  ;;  %6726 = vmatmul.mubr.msk.f32.gmra.mxu1 %vm534_vm1, %v7402_v25 }
  0xa4   : > { %961 = vmatprep.mubr.f32.mxu1 %v11076_v3  ;;  %1050 = vmatprep.mubr.f32.mxu0 %v11076_v3 }
  0xa7   : > { %6727 = vmatmul.mubr.msk.f32.gmra.mxu1 %vm534_vm1, %v7425_v31  ;;  %6733 = vmatmul.mubr.msk.f32.vlgmr.msra.gmra.mxu0 %vm534_vm1, %v7382_v18 }
  0xa8   : > { %967 = vmatprep.mubr.f32.mxu1 %v11076_v3  ;;  %1056 = vmatprep.mubr.f32.mxu0 %v11076_v3 }
  0xa9   : > { %6748 = vmatpush1.msk.msra.mxu0 %vm553_vm0, %v6698_v34  ;;  %vm6573_vm0 = vcmask 518144  }
  0xab   : > { %6728 = vmatmul.mubr.msk.f32.gmra.mxu1 %vm534_vm1, %v7438_v33  ;;  %6734 = vmatmul.mubr.msk.f32.gmra.mxu0 %vm534_vm1, %v7402_v25 }
  0xac   : > { %973 = vmatprep.mubr.f32.mxu1 %v11076_v3  ;;  %1062 = vmatprep.mubr.f32.mxu0 %v11076_v3 }
  0xaf   : > { %6729 = vmatmul.mubr.msk.f32.gmra.mxu1 %vm534_vm1, %v7387_v19  ;;  %6735 = vmatmul.mubr.msk.f32.gmra.mxu0 %vm534_vm1, %v7425_v31 }
  0xb0   : > { %979 = vmatprep.mubr.f32.mxu1 %v11076_v3  ;;  %1068 = vmatprep.mubr.f32.mxu0 %v11076_v3 }
  0xb3   : > { %6730 = vmatmul.mubr.msk.f32.gmra.mxu1 %vm534_vm1, %v7407_v26  ;;  %6736 = vmatmul.mubr.msk.f32.gmra.mxu0 %vm534_vm1, %v7438_v33 }
  0xb4   : > { %1074 = vmatprep.mubr.f32.mxu0 %v11076_v3  ;;  %1151 = vmatprep.mubr.f32.mxu1 %v11076_v3 }
  0xb7   : > { %6737 = vmatmul.mubr.msk.f32.gmra.mxu0 %vm534_vm1, %v7387_v19  ;;  %6741 = vmatmul.mubr.msk.f32.vlgmr.msra.gmra.mxu1 %vm534_vm1, %v7382_v18 }
  0xb8   : > { %1080 = vmatprep.mubr.f32.mxu0 %v11076_v3  ;;  %1157 = vmatprep.mubr.f32.mxu1 %v11076_v3 }
  0xbb   : > { %6738 = vmatmul.mubr.msk.f32.gmra.mxu0 %vm534_vm1, %v7407_v26  ;;  %6742 = vmatmul.mubr.msk.f32.gmra.mxu1 %vm534_vm1, %v7402_v25 }
  0xbc   : > { %1163 = vmatprep.mubr.f32.mxu1 %v11076_v3  ;;  %1252 = vmatprep.mubr.f32.mxu0 %v11076_v3 }
  0xbf   : > { %6743 = vmatmul.mubr.msk.f32.gmra.mxu1 %vm534_vm1, %v7425_v31  ;;  %6749 = vmatmul.mubr.msk.f32.vlgmr.msra.gmra.mxu0 %vm534_vm1, %v7382_v18 }
  0xc0   : > { %1169 = vmatprep.mubr.f32.mxu1 %v11076_v3  ;;  %1258 = vmatprep.mubr.f32.mxu0 %v11076_v3 }
  0xc3   : > { %6744 = vmatmul.mubr.msk.f32.gmra.mxu1 %vm534_vm1, %v7438_v33  ;;  %6750 = vmatmul.mubr.msk.f32.gmra.mxu0 %vm534_vm1, %v7402_v25 }
  0xc4   : > { %1175 = vmatprep.mubr.f32.mxu1 %v11076_v3  ;;  %1264 = vmatprep.mubr.f32.mxu0 %v11076_v3 }
  0xc7   : > { %6745 = vmatmul.mubr.msk.f32.gmra.mxu1 %vm534_vm1, %v7387_v19  ;;  %6751 = vmatmul.mubr.msk.f32.gmra.mxu0 %vm534_vm1, %v7425_v31 }
  0xc8   : > { %1181 = vmatprep.mubr.f32.mxu1 %v11076_v3  ;;  %1270 = vmatprep.mubr.f32.mxu0 %v11076_v3 }
  0xcb   : > { %6746 = vmatmul.mubr.msk.f32.gmra.mxu1 %vm534_vm1, %v7407_v26  ;;  %6752 = vmatmul.mubr.msk.f32.gmra.mxu0 %vm534_vm1, %v7438_v33 }
  0xcc   : > { %1276 = vmatprep.mubr.f32.mxu0 %v11076_v3  ;;  %2044 = vmatprep.mubr.f32.mxu1 %v11076_v3 }
  0xcf   : > { %6753 = vmatmul.mubr.msk.f32.gmra.mxu0 %vm534_vm1, %v7387_v19 }
  0xd0   : > { %1282 = vmatprep.mubr.f32.mxu0 %v11076_v3 }
  0xd3   : > { %6754 = vmatmul.mubr.msk.f32.gmra.mxu0 %vm534_vm1, %v7407_v26  ;;  %vm6579_vm1 = vcmask 2048  }
  0xd4   : > { %2222 = vmatprep.mubr.f32.mxu0 %v11076_v3 }
 0x13f   : > { %v7555_v36 = vpop.f32.mrf.mxu0  ;;  %v672_v37 = vpop.f32.mrf.mxu1 }
 0x140   : > { %1484 = vrot.lane.b32.xlu1 %v672_v37, %s7156_s16 }
 0x141   : > { %v7558_v38 = vpop.f32.mrf.mxu0  ;;  %v674_v39 = vpop.f32.mrf.mxu1 }
 0x142   : > { %1486 = vrot.lane.b32.xlu0 %v674_v39, %s7156_s16 }
 0x143   : > { %v7561_v40 = vpop.f32.mrf.mxu0  ;;  %v678_v41 = vpop.f32.mrf.mxu1 }
 0x144   : > { %1512 = vrot.lane.b32.xlu1 %v678_v41, %s7156_s16 }
 0x145   : > { %v7564_v42 = vpop.f32.mrf.mxu0  ;;  %v680_v43 = vpop.f32.mrf.mxu1 }
 0x146   : > { %1514 = vrot.lane.b32.xlu0 %v680_v43, %s7156_s16 }
 0x147   : > { %v660_v44 = vpop.f32.mrf.mxu0  ;;  %v7567_v45 = vpop.f32.mrf.mxu1 }
 0x149   : > { %v662_v46 = vpop.f32.mrf.mxu0  ;;  %v7569_v47 = vpop.f32.mrf.mxu1 }
 0x14a   : > { %1317 = vrot.lane.b32.xlu0 %v660_v44, %s7157_s24  ;;  %1319 = vrot.lane.b32.xlu1 %v662_v46, %s7157_s24 }
 0x14b   : > { %v666_v48 = vpop.f32.mrf.mxu0  ;;  %v7573_v49 = vpop.f32.mrf.mxu1 }
 0x14d   : > { %v668_v50 = vpop.f32.mrf.mxu0  ;;  %v7575_v51 = vpop.f32.mrf.mxu1 }
 0x14e   : > { %1345 = vrot.lane.b32.xlu0 %v666_v48, %s7157_s24 }
 0x14f   : > { %v761_v52 = vpop.f32.mrf.mxu1  ;;  %v7578_v53 = vpop.f32.mrf.mxu0 }
 0x151   : > { %v763_v54 = vpop.f32.mrf.mxu1  ;;  %v7580_v55 = vpop.f32.mrf.mxu0 }
 0x152   : > { %1347 = vrot.lane.b32.xlu0 %v668_v50, %s7157_s24  ;;  %1323 = vrot.lane.b32.xlu1 %v763_v54, %s7157_s24 }
 0x153   : > { %v767_v56 = vpop.f32.mrf.mxu1  ;;  %v7584_v57 = vpop.f32.mrf.mxu0 }
 0x155   : > { %v769_v58 = vpop.f32.mrf.mxu1  ;;  %v7586_v59 = vpop.f32.mrf.mxu0 }
 0x156   : > { %1321 = vrot.lane.b32.xlu0 %v761_v52, %s7157_s24  ;;  %1351 = vrot.lane.b32.xlu1 %v769_v58, %s7157_s24 }
 0x157   : > { %v773_v60 = vpop.f32.mrf.mxu1  ;;  %v862_v61 = vpop.f32.mrf.mxu0 }
 0x159   : > { %v864_v62 = vpop.f32.mrf.mxu0  ;;  %v775_v63 = vpop.f32.mrf.mxu1 }
 0x15a   : > { %1349 = vrot.lane.b32.xlu0 %v767_v56, %s7157_s24  ;;  %1488 = vrot.lane.b32.xlu1 %v773_v60, %s7156_s16 }
 0x15b   : > { %v779_v1 = vpop.f32.mrf.mxu1  ;;  %v868_v2 = vpop.f32.mrf.mxu0 }
 0x15d   : > { %v781_v5 = vpop.f32.mrf.mxu1  ;;  %v870_v6 = vpop.f32.mrf.mxu0 }
 0x15e   : > { %1325 = vrot.lane.b32.xlu0 %v862_v61, %s7157_s24  ;;  %1327 = vrot.lane.b32.xlu1 %v864_v62, %s7157_s24 }
 0x15f   : > { %v874_v7 = vpop.f32.mrf.mxu0  ;;  %v7594_v8 = vpop.f32.mrf.mxu1 }
 0x161   : > { %v876_v9 = vpop.f32.mrf.mxu0  ;;  %v7596_v10 = vpop.f32.mrf.mxu1 }
 0x162   : > { %1490 = vrot.lane.b32.xlu0 %v775_v63, %s7156_s16  ;;  %1516 = vrot.lane.b32.xlu1 %v779_v1, %s7156_s16 }
 0x163   : > { %v880_v11 = vpop.f32.mrf.mxu0  ;;  %v7600_v12 = vpop.f32.mrf.mxu1 }
 0x165   : > { %v882_v13 = vpop.f32.mrf.mxu0  ;;  %v7602_v14 = vpop.f32.mrf.mxu1 }
 0x166   : > { %1353 = vrot.lane.b32.xlu0 %v868_v2, %s7157_s24  ;;  %1355 = vrot.lane.b32.xlu1 %v870_v6, %s7157_s24 }
 0x167   : > { %v963_v15 = vpop.f32.mrf.mxu1  ;;  %v7606_v16 = vpop.f32.mrf.mxu0 }
 0x169   : > { %v965_v17 = vpop.f32.mrf.mxu1  ;;  %v7608_v18 = vpop.f32.mrf.mxu0 }
 0x16a   : > { %1494 = vrot.lane.b32.xlu1 %v876_v9, %s7156_s16  ;;  %1518 = vrot.lane.b32.xlu0 %v781_v5, %s7156_s16  ;;  %v7662_v9 = vpop.permute.xlu1 %1632 }
 0x16b   : > { %v969_v19 = vpop.f32.mrf.mxu1  ;;  %v7612_v20 = vpop.f32.mrf.mxu0 }
 0x16d   : > { %v971_v21 = vpop.f32.mrf.mxu1  ;;  %v7614_v22 = vpop.f32.mrf.mxu0 }
 0x16e   : > { %1522 = vrot.lane.b32.xlu1 %v882_v13, %s7156_s16  ;;  %1492 = vrot.lane.b32.xlu0 %v874_v7, %s7156_s16 }
 0x16f   : > { %v975_v23 = vpop.f32.mrf.mxu1  ;;  %v1064_v24 = vpop.f32.mrf.mxu0 }
 0x171   : > { %v977_v25 = vpop.f32.mrf.mxu1  ;;  %v1066_v26 = vpop.f32.mrf.mxu0 }
 0x172   : > { %1520 = vrot.lane.b32.xlu0 %v880_v11, %s7156_s16  ;;  %1331 = vrot.lane.b32.xlu1 %v965_v17, %s7157_s24 }
 0x173   : > { %v981_v27 = vpop.f32.mrf.mxu1  ;;  %v1070_v28 = vpop.f32.mrf.mxu0 }
 0x175   : > { %v983_v29 = vpop.f32.mrf.mxu1  ;;  %v1072_v30 = vpop.f32.mrf.mxu0 }
 0x176   : > { %1329 = vrot.lane.b32.xlu0 %v963_v15, %s7157_s24  ;;  %1359 = vrot.lane.b32.xlu1 %v971_v21, %s7157_s24  ;;  %v7666_v15 = vpop.permute.xlu1 %1627 }
 0x177   : > { %v1076_v31 = vpop.f32.mrf.mxu0  ;;  %v7622_v32 = vpop.f32.mrf.mxu1 }
 0x179   : > { %v1078_v33 = vpop.f32.mrf.mxu0  ;;  %v7624_v34 = vpop.f32.mrf.mxu1 }
 0x17a   : > { %1357 = vrot.lane.b32.xlu0 %v969_v19, %s7157_s24  ;;  %1498 = vrot.lane.b32.xlu1 %v977_v25, %s7156_s16 }
 0x17b   : > { %v1082_v35 = vpop.f32.mrf.mxu0  ;;  %v7628_v37 = vpop.f32.mrf.mxu1 }
 0x17d   : > { %v1084_v39 = vpop.f32.mrf.mxu0  ;;  %v7632_v41 = vpop.f32.mrf.mxu1 }
 0x17e   : > { %1496 = vrot.lane.b32.xlu0 %v975_v23, %s7156_s16  ;;  %1335 = vrot.lane.b32.xlu1 %v1066_v26, %s7157_s24 }
 0x17f   : > { %v7634_v43 = vpop.f32.mrf.mxu0  ;;  %v1165_v44 = vpop.f32.mrf.mxu1 }
 0x181   : > { %v7638_v46 = vpop.f32.mrf.mxu0  ;;  %v1167_v48 = vpop.f32.mrf.mxu1 }
 0x182   : > { %1333 = vrot.lane.b32.xlu0 %v1064_v24, %s7157_s24  ;;  %1526 = vrot.lane.b32.xlu1 %v983_v29, %s7156_s16 }
 0x183   : > { %v7642_v50 = vpop.f32.mrf.mxu0  ;;  %v1171_v52 = vpop.f32.mrf.mxu1 }
 0x185   : > { %v7646_v54 = vpop.f32.mrf.mxu0  ;;  %v1173_v56 = vpop.f32.mrf.mxu1 }
 0x186   : > { %1524 = vrot.lane.b32.xlu0 %v981_v27, %s7156_s16  ;;  %1363 = vrot.lane.b32.xlu1 %v1072_v30, %s7157_s24 }
 0x187   : > { %v1266_v58 = vpop.f32.mrf.mxu0  ;;  %v1177_v60 = vpop.f32.mrf.mxu1 }
 0x189   : > { %v1268_v61 = vpop.f32.mrf.mxu0  ;;  %v1179_v62 = vpop.f32.mrf.mxu1 }
 0x18a   : > { %1361 = vrot.lane.b32.xlu0 %v1070_v28, %s7157_s24  ;;  %1502 = vrot.lane.b32.xlu1 %v1078_v33, %s7156_s16 }
 0x18b   : > { %v1272_v63 = vpop.f32.mrf.mxu0  ;;  %v1183_v1 = vpop.f32.mrf.mxu1 }
 0x18d   : > { %v1274_v2 = vpop.f32.mrf.mxu0  ;;  %v1185_v5 = vpop.f32.mrf.mxu1 }
 0x18e   : > { %1500 = vrot.lane.b32.xlu0 %v1076_v31, %s7156_s16  ;;  %1530 = vrot.lane.b32.xlu1 %v1084_v39, %s7156_s16 }
 0x18f   : > { %v1278_v6 = vpop.f32.mrf.mxu0 }
 0x191   : > { %v1280_v7 = vpop.f32.mrf.mxu0 }
 0x192   : > { %1528 = vrot.lane.b32.xlu0 %v1082_v35, %s7156_s16  ;;  %1339 = vrot.lane.b32.xlu1 %v1167_v48, %s7157_s24 }
 0x193   : > { %v1284_v11 = vpop.f32.mrf.mxu0 }
 0x195   : > { %v1286_v13 = vpop.f32.mrf.mxu0 }
 0x196   : > { %1337 = vrot.lane.b32.xlu0 %v1165_v44, %s7157_s24  ;;  %1367 = vrot.lane.b32.xlu1 %v1173_v56, %s7157_s24 }
 0x19a   : > { %1365 = vrot.lane.b32.xlu0 %v1171_v52, %s7157_s24  ;;  %1506 = vrot.lane.b32.xlu1 %v1179_v62, %s7156_s16 }
 0x19e   : > { %1504 = vrot.lane.b32.xlu0 %v1177_v60, %s7156_s16  ;;  %1343 = vrot.lane.b32.xlu1 %v1268_v61, %s7157_s24 }
 0x1a2   : > { %1341 = vrot.lane.b32.xlu0 %v1266_v58, %s7157_s24  ;;  %1534 = vrot.lane.b32.xlu1 %v1185_v5, %s7156_s16 }
 0x1a6   : > { %1532 = vrot.lane.b32.xlu0 %v1183_v1, %s7156_s16  ;;  %1371 = vrot.lane.b32.xlu1 %v1274_v2, %s7157_s24 }
 0x1aa   : > { %1369 = vrot.lane.b32.xlu0 %v1272_v63, %s7157_s24  ;;  %1510 = vrot.lane.b32.xlu1 %v1280_v7, %s7156_s16 }
 0x1ae   : > { %1508 = vrot.lane.b32.xlu0 %v1278_v6, %s7156_s16  ;;  %1538 = vrot.lane.b32.xlu1 %v1286_v13, %s7156_s16 }
 0x1b2   : > { %v1485_v17 = vpop.permute.xlu1 %1484  ;;  %1536 = vrot.lane.b32.xlu0 %v1284_v11, %s7156_s16 }
 0x1b4   : > { %v1487_v19 = vpop.permute.xlu0 %1486 }
 0x1b5   : > { %v1541_v28 = vsel %vm1540_vm3, %v1485_v17, %v1487_v19 }
 0x1b6   : > { %v1513_v21 = vpop.permute.xlu1 %1512 }
 0x1b8   : > { %v1515_v23 = vpop.permute.xlu0 %1514 }
 0x1b9   : > { %v1554_v52 = vsel %vm1540_vm3, %v1513_v21, %v1515_v23 }
 0x1bc   : > { %v1318_v24 = vpop.permute.xlu0 %1317  ;;  %v1320_v25 = vpop.permute.xlu1 %1319 }
 0x1bd   : > { %v1374_v26 = vsel %vm1373_vm2, %v1318_v24, %v1320_v25 }
 0x1be   : > { %v1428_v27 = vadd.f32 %v1374_v26, %v7555_v36 }
 0x1c0   : > { %v1346_v29 = vpop.permute.xlu0 %1345  ;;  %v1595_v30 = vadd.f32 %v1541_v28, %v1428_v27 }
 0x1c2   : > { %v1635_v31 = vadd.f32 %v7666_v15, %v1595_v30 }
 0x1c4   : > { %v1348_v33 = vpop.permute.xlu0 %1347  ;;  %v1324_v35 = vpop.permute.xlu1 %1323  ;;  %v7675_v39 = vmax.f32 %v1635_v31, 0.0 }
 0x1c5   : > { %v1387_v44 = vsel %vm1373_vm2, %v1346_v29, %v1348_v33 }
 0x1c6   : > { %v1442_v48 = vadd.f32 %v1387_v44, %v7561_v40  ;;  %1829 = vrot.lane.b32.xlu1 %v7675_v39, %s7156_s16 }
 0x1c8   : > { %v1322_v36 = vpop.permute.xlu0 %1321  ;;  %v1352_v56 = vpop.permute.xlu1 %1351  ;;  %v1609_v58 = vadd.f32 %v1554_v52, %v1442_v48 }
 0x1c9   : > { %v1375_v60 = vsel %vm1373_vm2, %v1320_v25, %v1322_v36  ;;  %v1376_v13 = vsel %vm1373_vm2, %v1322_v36, %v1324_v35 }
 0x1ca   : > { %1719 = vrot.lane.b32.xlu1 %v7675_v39, %s7157_s24  ;;  %v1649_v61 = vadd.f32 %v7662_v9, %v1609_v58  ;;  %v1429_v62 = vadd.f32 %v1375_v60, %v7558_v38  ;;  %v1430_v17 = vadd.f32 %v1376_v13, %v7567_v45 }
 0x1cc   : > { %v1350_v63 = vpop.permute.xlu0 %1349  ;;  %v1489_v1 = vpop.permute.xlu1 %1488  ;;  %v7687_v40 = vmax.f32 %v1649_v61, 0.0 }
 0x1cd   : > { %v1542_v2 = vsel %vm1540_vm3, %v1487_v19, %v1489_v1  ;;  %v1388_v24 = vsel %vm1373_vm2, %v1348_v33, %v1350_v63  ;;  %v1389_v31 = vsel %vm1373_vm2, %v1350_v63, %v1352_v56 }
 0x1ce   : > { %v1596_v5 = vadd.f32 %v1542_v2, %v1429_v62  ;;  %1857 = vrot.lane.b32.xlu0 %v7687_v40, %s7156_s16  ;;  %v1443_v28 = vadd.f32 %v1388_v24, %v7564_v42  ;;  %v1444_v33 = vadd.f32 %v1389_v31, %v7573_v49 }
 0x1d0   : > { %v1326_v6 = vpop.permute.xlu0 %1325  ;;  %v7692_v7 = vpop.permute.xlu1 %1327  ;;  %v1636_v11 = vadd.f32 %v7666_v15, %v1596_v5 }
 0x1d1   : > { %v1377_v42 = vsel %vm1373_vm2, %v1324_v35, %v1326_v6 }
 0x1d2   : > { %1747 = vrot.lane.b32.xlu0 %v7687_v40, %s7157_s24  ;;  %v7698_v38 = vmax.f32 %v1636_v11, 0.0  ;;  %v1431_v62 = vadd.f32 %v1377_v42, %v7569_v47 }
 0x1d4   : > { %v1491_v21 = vpop.permute.xlu0 %1490  ;;  %v1517_v19 = vpop.permute.xlu1 %1516  ;;  %1831 = vrot.lane.b32.xlu1 %v7698_v38, %s7156_s16 }
 0x1d5   : > { %v1543_v25 = vsel %vm1540_vm3, %v1489_v1, %v1491_v21  ;;  %v1555_v27 = vsel %vm1540_vm3, %v1515_v23, %v1517_v19  ;;  %v1378_v23 = vsel %vm1373_vm2, %v1326_v6, %v7692_v7 }
 0x1d6   : > { %v1597_v26 = vadd.f32 %v1543_v25, %v1430_v17  ;;  %v1610_v44 = vadd.f32 %v1555_v27, %v1443_v28  ;;  %v1432_v63 = vadd.f32 %v1378_v23, %v7578_v53 }
 0x1d8   : > { %v1354_v29 = vpop.permute.xlu0 %1353  ;;  %v7707_v30 = vpop.permute.xlu1 %1355  ;;  %1721 = vrot.lane.b32.xlu1 %v7698_v38, %s7157_s24  ;;  %v1637_v45 = vadd.f32 %v7666_v15, %v1597_v26  ;;  %v1650_v61 = vadd.f32 %v7662_v9, %v1610_v44 }
 0x1da   : > { %v7713_v48 = vmax.f32 %v1637_v45, 0.0  ;;  %v7732_v13 = vmax.f32 %v1650_v61, 0.0 }
 0x1dc   : > { %v1495_v52 = vpop.permute.xlu1 %1494  ;;  %v1519_v36 = vpop.permute.xlu0 %1518  ;;  %1833 = vrot.lane.b32.xlu0 %v7713_v48, %s7156_s16 }
 0x1dd   : > { %v1556_v58 = vsel %vm1540_vm3, %v1517_v19, %v1519_v36  ;;  %v1390_v19 = vsel %vm1373_vm2, %v1352_v56, %v1354_v29 }
 0x1de   : > { %v1611_v60 = vadd.f32 %v1556_v58, %v1444_v33  ;;  %v1445_v28 = vadd.f32 %v1390_v19, %v7575_v51 }
 0x1e0   : > { %v7725_v49 = vpop.permute.xlu1 %1522  ;;  %v1493_v1 = vpop.permute.xlu0 %1492  ;;  %1723 = vrot.lane.b32.xlu0 %v7713_v48, %s7157_s24  ;;  %v1651_v35 = vadd.f32 %v7662_v9, %v1611_v60 }
 0x1e1   : > { %v1544_v2 = vsel %vm1540_vm3, %v1491_v21, %v1493_v1  ;;  %v1545_v5 = vsel %vm1540_vm3, %v1493_v1, %v1495_v52  ;;  %v1391_v21 = vsel %vm1373_vm2, %v1354_v29, %v7707_v30 }
 0x1e2   : > { %v1598_v6 = vadd.f32 %v1544_v2, %v1431_v62  ;;  %v1599_v11 = vadd.f32 %v1545_v5, %v1432_v63  ;;  %v7734_v17 = vmax.f32 %v1651_v35, 0.0  ;;  %v1446_v45 = vadd.f32 %v1391_v21, %v7584_v57 }
 0x1e4   : > { %v1521_v47 = vpop.permute.xlu0 %1520  ;;  %v7736_v53 = vpop.permute.xlu1 %1331  ;;  %1859 = vrot.lane.b32.xlu0 %v7732_v13, %s7156_s16  ;;  %1861 = vrot.lane.b32.xlu1 %v7734_v17, %s7156_s16  ;;  %v1638_v24 = vadd.f32 %v7666_v15, %v1598_v6  ;;  %v1639_v25 = vadd.f32 %v7666_v15, %v1599_v11 }
 0x1e5   : > { %v1557_v26 = vsel %vm1540_vm3, %v1519_v36, %v1521_v47  ;;  %v1558_v27 = vsel %vm1540_vm3, %v1521_v47, %v7725_v49 }
 0x1e6   : > { %v1612_v56 = vadd.f32 %v1557_v26, %v1445_v28  ;;  %v1613_v29 = vadd.f32 %v1558_v27, %v1446_v45  ;;  %v7758_v33 = vmax.f32 %v1638_v24, 0.0  ;;  %v7760_v36 = vmax.f32 %v1639_v25, 0.0 }
 0x1e8   : > { %v1330_v31 = vpop.permute.xlu0 %1329  ;;  %v7752_v44 = vpop.permute.xlu1 %1359  ;;  %1749 = vrot.lane.b32.xlu0 %v7732_v13, %s7157_s24  ;;  %1751 = vrot.lane.b32.xlu1 %v7734_v17, %s7157_s24  ;;  %v1652_v58 = vadd.f32 %v7662_v9, %v1612_v56  ;;  %v1653_v60 = vadd.f32 %v7662_v9, %v1613_v29 }
 0x1e9   : > { %v1379_v51 = vsel %vm1373_vm2, %v7692_v7, %v1330_v31  ;;  %v1380_v57 = vsel %vm1373_vm2, %v1330_v31, %v7736_v53 }
 0x1ea   : > { %v1433_v61 = vadd.f32 %v1379_v51, %v7580_v55  ;;  %v1434_v62 = vadd.f32 %v1380_v57, %v7594_v8  ;;  %v7782_v6 = vmax.f32 %v1652_v58, 0.0  ;;  %v7784_v55 = vmax.f32 %v1653_v60, 0.0 }
 0x1ec   : > { %v1358_v42 = vpop.permute.xlu0 %1357  ;;  %v1499_v23 = vpop.permute.xlu1 %1498  ;;  %1835 = vrot.lane.b32.xlu0 %v7758_v33, %s7156_s16  ;;  %1837 = vrot.lane.b32.xlu1 %v7760_v36, %s7156_s16 }
 0x1ed   : > { %v1392_v47 = vsel %vm1373_vm2, %v7707_v30, %v1358_v42 }
 0x1ee   : > { %v1447_v24 = vadd.f32 %v1392_v47, %v7586_v59 }
 0x1f0   : > { %v1497_v63 = vpop.permute.xlu0 %1496  ;;  %v7774_v1 = vpop.permute.xlu1 %1335  ;;  %1725 = vrot.lane.b32.xlu0 %v7758_v33, %s7157_s24  ;;  %1727 = vrot.lane.b32.xlu1 %v7760_v36, %s7157_s24 }
 0x1f1   : > { %v1546_v7 = vsel %vm1540_vm3, %v1495_v52, %v1497_v63  ;;  %v1547_v35 = vsel %vm1540_vm3, %v1497_v63, %v1499_v23  ;;  %v1393_v52 = vsel %vm1373_vm2, %v1358_v42, %v7752_v44 }
 0x1f2   : > { %v1600_v2 = vadd.f32 %v1546_v7, %v1433_v61  ;;  %v1601_v5 = vadd.f32 %v1547_v35, %v1434_v62  ;;  %v1448_v25 = vadd.f32 %v1393_v52, %v7600_v12 }
 0x1f4   : > { %v1334_v8 = vpop.permute.xlu0 %1333  ;;  %v1527_v11 = vpop.permute.xlu1 %1526  ;;  %1863 = vrot.lane.b32.xlu0 %v7782_v6, %s7156_s16  ;;  %1865 = vrot.lane.b32.xlu1 %v7784_v55, %s7156_s16  ;;  %v1640_v19 = vadd.f32 %v7666_v15, %v1600_v2  ;;  %v1641_v21 = vadd.f32 %v7666_v15, %v1601_v5 }
 0x1f5   : > { %v1381_v51 = vsel %vm1373_vm2, %v7736_v53, %v1334_v8  ;;  %v1382_v57 = vsel %vm1373_vm2, %v1334_v8, %v7774_v1 }
 0x1f6   : > { %v7807_v56 = vmax.f32 %v1640_v19, 0.0  ;;  %v7809_v59 = vmax.f32 %v1641_v21, 0.0  ;;  %v1435_v61 = vadd.f32 %v1381_v51, %v7596_v10  ;;  %v1436_v62 = vadd.f32 %v1382_v57, %v7606_v16 }
 0x1f8   : > { %v1525_v26 = vpop.permute.xlu0 %1524  ;;  %v7798_v27 = vpop.permute.xlu1 %1363  ;;  %1753 = vrot.lane.b32.xlu0 %v7782_v6, %s7157_s24  ;;  %1755 = vrot.lane.b32.xlu1 %v7784_v55, %s7157_s24 }
 0x1f9   : > { %v1559_v30 = vsel %vm1540_vm3, %v7725_v49, %v1525_v26  ;;  %v1560_v28 = vsel %vm1540_vm3, %v1525_v26, %v1527_v11 }
 0x1fa   : > { %v1614_v45 = vadd.f32 %v1559_v30, %v1447_v24  ;;  %v1615_v31 = vadd.f32 %v1560_v28, %v1448_v25 }
 0x1fc   : > { %v1362_v12 = vpop.permute.xlu0 %1361  ;;  %v1503_v29 = vpop.permute.xlu1 %1502  ;;  %1839 = vrot.lane.b32.xlu0 %v7807_v56, %s7156_s16  ;;  %1841 = vrot.lane.b32.xlu1 %v7809_v59, %s7156_s16  ;;  %v1654_v42 = vadd.f32 %v7662_v9, %v1614_v45  ;;  %v1655_v49 = vadd.f32 %v7662_v9, %v1615_v31 }
 0x1fd   : > { %v1394_v10 = vsel %vm1373_vm2, %v7752_v44, %v1362_v12  ;;  %v1395_v16 = vsel %vm1373_vm2, %v1362_v12, %v7798_v27 }
 0x1fe   : > { %v7821_v58 = vmax.f32 %v1654_v42, 0.0  ;;  %v7823_v60 = vmax.f32 %v1655_v49, 0.0  ;;  %v1449_v24 = vadd.f32 %v1394_v10, %v7602_v14  ;;  %v1450_v25 = vadd.f32 %v1395_v16, %v7612_v20 }
 0x200   : > { %v1501_v63 = vpop.permute.xlu0 %1500  ;;  %v1531_v7 = vpop.permute.xlu1 %1530  ;;  %1867 = vrot.lane.b32.xlu0 %v7821_v58, %s7156_s16  ;;  %1869 = vrot.lane.b32.xlu1 %v7823_v60, %s7156_s16 }
 0x201   : > { %v1548_v53 = vsel %vm1540_vm3, %v1499_v23, %v1501_v63  ;;  %v1549_v35 = vsel %vm1540_vm3, %v1501_v63, %v1503_v29 }
 0x202   : > { %v1602_v2 = vadd.f32 %v1548_v53, %v1435_v61  ;;  %v1603_v5 = vadd.f32 %v1549_v35, %v1436_v62 }
 0x204   : > { %v1529_v8 = vpop.permute.xlu0 %1528  ;;  %v7833_v47 = vpop.permute.xlu1 %1339  ;;  %1757 = vrot.lane.b32.xlu0 %v7821_v58, %s7157_s24  ;;  %1759 = vrot.lane.b32.xlu1 %v7823_v60, %s7157_s24  ;;  %v1642_v23 = vadd.f32 %v7666_v15, %v1602_v2  ;;  %v1643_v52 = vadd.f32 %v7666_v15, %v1603_v5 }
 0x205   : > { %v1561_v19 = vsel %vm1540_vm3, %v1527_v11, %v1529_v8  ;;  %v1562_v21 = vsel %vm1540_vm3, %v1529_v8, %v1531_v7 }
 0x206   : > { %v1616_v44 = vadd.f32 %v1561_v19, %v1449_v24  ;;  %v1617_v28 = vadd.f32 %v1562_v21, %v1450_v25  ;;  %v7855_v45 = vmax.f32 %v1642_v23, 0.0  ;;  %v7857_v11 = vmax.f32 %v1643_v52, 0.0 }
 0x208   : > { %v1338_v26 = vpop.permute.xlu0 %1337  ;;  %v7849_v30 = vpop.permute.xlu1 %1367  ;;  %1729 = vrot.lane.b32.xlu0 %v7807_v56, %s7157_s24  ;;  %1731 = vrot.lane.b32.xlu1 %v7809_v59, %s7157_s24  ;;  %v1656_v42 = vadd.f32 %v7662_v9, %v1616_v44  ;;  %v1657_v49 = vadd.f32 %v7662_v9, %v1617_v28 }
 0x209   : > { %v1383_v14 = vsel %vm1373_vm2, %v7774_v1, %v1338_v26  ;;  %v1384_v20 = vsel %vm1373_vm2, %v1338_v26, %v7833_v47 }
 0x20a   : > { %v1437_v51 = vadd.f32 %v1383_v14, %v7608_v18  ;;  %v1438_v57 = vadd.f32 %v1384_v20, %v7622_v32  ;;  %v7879_v2 = vmax.f32 %v1656_v42, 0.0  ;;  %v7881_v18 = vmax.f32 %v1657_v49, 0.0 }
 0x20c   : > { %v1366_v31 = vpop.permute.xlu0 %1365  ;;  %v1507_v12 = vpop.permute.xlu1 %1506  ;;  %1843 = vrot.lane.b32.xlu0 %v7855_v45, %s7156_s16  ;;  %1845 = vrot.lane.b32.xlu1 %v7857_v11, %s7156_s16 }
 0x20d   : > { %v1396_v8 = vsel %vm1373_vm2, %v7798_v27, %v1366_v31 }
 0x20e   : > { %v1451_v23 = vadd.f32 %v1396_v8, %v7614_v22 }
 0x210   : > { %v1505_v61 = vpop.permute.xlu0 %1504  ;;  %v7871_v62 = vpop.permute.xlu1 %1343  ;;  %1733 = vrot.lane.b32.xlu0 %v7855_v45, %s7157_s24  ;;  %1735 = vrot.lane.b32.xlu1 %v7857_v11, %s7157_s24 }
 0x211   : > { %v1550_v1 = vsel %vm1540_vm3, %v1503_v29, %v1505_v61  ;;  %v1551_v63 = vsel %vm1540_vm3, %v1505_v61, %v1507_v12  ;;  %v1397_v29 = vsel %vm1373_vm2, %v1366_v31, %v7849_v30 }
 0x212   : > { %v1604_v53 = vadd.f32 %v1550_v1, %v1437_v51  ;;  %v1605_v35 = vadd.f32 %v1551_v63, %v1438_v57  ;;  %v1452_v52 = vadd.f32 %v1397_v29, %v7628_v37 }
 0x214   : > { %v1342_v32 = vpop.permute.xlu0 %1341  ;;  %1871 = vrot.lane.b32.xlu0 %v7879_v2, %s7156_s16  ;;  %1873 = vrot.lane.b32.xlu1 %v7881_v18, %s7156_s16  ;;  %v1535_v5 = vpop.permute.xlu1 %1534  ;;  %v1644_v10 = vadd.f32 %v7666_v15, %v1604_v53  ;;  %v1645_v16 = vadd.f32 %v7666_v15, %v1605_v35 }
 0x215   : > { %v1385_v31 = vsel %vm1373_vm2, %v7833_v47, %v1342_v32  ;;  %v1386_v57 = vsel %vm1373_vm2, %v1342_v32, %v7871_v62 }
 0x216   : > { %v7901_v44 = vmax.f32 %v1644_v10, 0.0  ;;  %v7903_v28 = vmax.f32 %v1645_v16, 0.0  ;;  %v1439_v42 = vadd.f32 %v1385_v31, %v7624_v34  ;;  %v1440_v63 = vadd.f32 %v1386_v57, %v7634_v43 }
 0x218   : > { %1761 = vrot.lane.b32.xlu0 %v7879_v2, %s7157_s24  ;;  %v1533_v19 = vpop.permute.xlu0 %1532  ;;  %1763 = vrot.lane.b32.xlu1 %v7881_v18, %s7157_s24  ;;  %v1372_v26 = vpop.permute.xlu1 %1371 }
 0x219   : > { %v1563_v27 = vsel %vm1540_vm3, %v1531_v7, %v1533_v19  ;;  %v1564_v21 = vsel %vm1540_vm3, %v1533_v19, %v1535_v5 }
 0x21a   : > { %v1618_v24 = vadd.f32 %v1563_v27, %v1451_v23  ;;  %v1619_v25 = vadd.f32 %v1564_v21, %v1452_v52  ;;  %v1441_v27 = vadd.f32 %v7871_v62, %v7638_v46  ;;  %v1455_v21 = vadd.f32 %v1372_v26, %v7646_v54 }
 0x21c   : > { %1847 = vrot.lane.b32.xlu0 %v7901_v44, %s7156_s16  ;;  %v1370_v22 = vpop.permute.xlu0 %1369  ;;  %1849 = vrot.lane.b32.xlu1 %v7903_v28, %s7156_s16  ;;  %v1658_v37 = vadd.f32 %v7662_v9, %v1618_v24  ;;  %v1659_v7 = vadd.f32 %v7662_v9, %v1619_v25  ;;  %v1511_v49 = vpop.permute.xlu1 %1510 }
 0x21d   : > { %v1398_v53 = vsel %vm1373_vm2, %v7849_v30, %v1370_v22  ;;  %v1399_v35 = vsel %vm1373_vm2, %v1370_v22, %v1372_v26  ;;  %v1608_v24 = vadd.f32 %v1511_v49, %v1441_v27 }
 0x21e   : > { %v7913_v14 = vmax.f32 %v1658_v37, 0.0  ;;  %v7915_v20 = vmax.f32 %v1659_v7, 0.0  ;;  %v1453_v10 = vadd.f32 %v1398_v53, %v7632_v41  ;;  %v1454_v16 = vadd.f32 %v1399_v35, %v7642_v50 }
 0x21f   : > { %v1648_v46 = vadd.f32 %v7666_v15, %v1608_v24  ;;  %v8018_v24 = vld [vmem:[#allocation4 + $0x8] sm:$0xff] }
 0x220   : > { %1875 = vrot.lane.b32.xlu0 %v7913_v14, %s7156_s16  ;;  %v1509_v51 = vpop.permute.xlu0 %1508  ;;  %1877 = vrot.lane.b32.xlu1 %v7915_v20, %s7156_s16  ;;  %v1539_v8 = vpop.permute.xlu1 %1538 }
 0x221   : > { %v1552_v61 = vsel %vm1540_vm3, %v1507_v12, %v1509_v51  ;;  %v1553_v1 = vsel %vm1540_vm3, %v1509_v51, %v1511_v49  ;;  %v1622_v25 = vadd.f32 %v1539_v8, %v1455_v21  ;;  %v7975_v62 = vmax.f32 %v1648_v46, 0.0  ;;  %v1943_v49 = vld [vmem:[%s11064_s4] sm:$0xff] }
 0x222   : > { %v1606_v47 = vadd.f32 %v1552_v61, %v1439_v42  ;;  %v1607_v32 = vadd.f32 %v1553_v1, %v1440_v63  ;;  %v1944_v42 = vld [vmem:[%s11064_s4 + $0x8] sm:$0xff] }
 0x223   : > { %v1662_v54 = vadd.f32 %v7662_v9, %v1622_v25 }
 0x224   : > { %1765 = vrot.lane.b32.xlu0 %v7913_v14, %s7157_s24  ;;  %v1537_v34 = vpop.permute.xlu0 %1536  ;;  %1767 = vrot.lane.b32.xlu1 %v7915_v20, %s7157_s24  ;;  %v1646_v12 = vadd.f32 %v7666_v15, %v1606_v47  ;;  %v1647_v30 = vadd.f32 %v7666_v15, %v1607_v32  ;;  %v1946_v15 = vld [vmem:[%s11064_s4 + $0x18] sm:$0xff] }
 0x225   : > { %v1565_v29 = vsel %vm1540_vm3, %v1535_v5, %v1537_v34  ;;  %v1566_v43 = vsel %vm1540_vm3, %v1537_v34, %v1539_v8  ;;  %v7977_v26 = vmax.f32 %v1662_v54, 0.0 }
 0x226   : > { %v7944_v23 = vmax.f32 %v1646_v12, 0.0  ;;  %v1620_v52 = vadd.f32 %v1565_v29, %v1453_v10  ;;  %v1621_v19 = vadd.f32 %v1566_v43, %v1454_v16  ;;  %v7950_v41 = vmax.f32 %v1647_v30, 0.0 }
 0x228   : > { %1737 = vrot.lane.b32.xlu0 %v7901_v44, %s7157_s24  ;;  %1739 = vrot.lane.b32.xlu1 %v7903_v28, %s7157_s24  ;;  %v1660_v50 = vadd.f32 %v7662_v9, %v1620_v52  ;;  %v1661_v5 = vadd.f32 %v7662_v9, %v1621_v19  ;;  %v1945_v9 = vld [vmem:[%s11064_s4 + $0x10] sm:$0xff] }
 0x22a   : > { %v7961_v22 = vmax.f32 %v1660_v50, 0.0  ;;  %v7963_v37 = vmax.f32 %v1661_v5, 0.0  ;;  %v8009_v5 = vld [vmem:[#allocation4] sm:$0xff] }
 0x22c   : > { %1851 = vrot.lane.b32.xlu0 %v7944_v23, %s7156_s16  ;;  %1741 = vrot.lane.b32.xlu1 %v7944_v23, %s7157_s24 }
 0x230   : > { %1743 = vrot.lane.b32.xlu0 %v7950_v41, %s7157_s24  ;;  %1853 = vrot.lane.b32.xlu1 %v7950_v41, %s7156_s16 }
 0x234   : > { %1879 = vrot.lane.b32.xlu0 %v7961_v22, %s7156_s16  ;;  %1881 = vrot.lane.b32.xlu1 %v7963_v37, %s7156_s16 }
 0x238   : > { %1769 = vrot.lane.b32.xlu0 %v7961_v22, %s7157_s24  ;;  %1771 = vrot.lane.b32.xlu1 %v7963_v37, %s7157_s24  ;;  %v1830_v7 = vpop.permute.xlu1 %1829 }
 0x23c   : > { %1883 = vrot.lane.b32.xlu0 %v7977_v26, %s7156_s16  ;;  %1855 = vrot.lane.b32.xlu1 %v7975_v62, %s7156_s16  ;;  %v1720_v51 = vpop.permute.xlu1 %1719 }
 0x240   : > { %1773 = vrot.lane.b32.xlu0 %v7977_v26, %s7157_s24  ;;  %1745 = vrot.lane.b32.xlu1 %v7975_v62, %s7157_s24  ;;  %v1858_v31 = vpop.permute.xlu0 %1857 }
 0x244   : > { %1959 = vperm.xlu1 %6963, %v1945_v9   ;;  %1964 = vperm.xlu0 %6964, %v1946_v15   ;;  %v1748_v57 = vpop.permute.xlu0 %1747 }
 0x246   : > { %v1832_v61 = vpop.permute.xlu1 %1831 }
 0x247   : > { %v1885_v43 = vsel %vm1540_vm3, %v1830_v7, %v1832_v61 }
 0x248   : > { %1954 = vperm.xlu1 %6963, %v1944_v42   ;;  %1949 = vperm.xlu0 %6964, %v1943_v49   ;;  %v8036_v49 = vld [vmem:[#allocation4 + $0x18] sm:$0xff] }
 0x24a   : > { %v1722_v1 = vpop.permute.xlu1 %1721 }
 0x24b   : > { %v1775_v50 = vsel %vm1373_vm2, %v1720_v51, %v1722_v1 }
 0x24e   : > { %v1834_v47 = vpop.permute.xlu0 %1833 }
 0x24f   : > { %v1886_v12 = vsel %vm1540_vm3, %v1832_v61, %v1834_v47 }
 0x252   : > { %v1724_v63 = vpop.permute.xlu0 %1723 }
 0x253   : > { %v1776_v30 = vsel %vm1373_vm2, %v1722_v1, %v1724_v63 }
 0x256   : > { %v1860_v34 = vpop.permute.xlu0 %1859  ;;  %v1862_v53 = vpop.permute.xlu1 %1861 }
 0x257   : > { %v1899_v35 = vsel %vm1540_vm3, %v1860_v34, %v1862_v53  ;;  %v1898_v32 = vsel %vm1540_vm3, %v1858_v31, %v1860_v34 }
 0x258   : > { %2000 = vmatprep.subr.mxu1 %v1899_v35 }
 0x259   : > { %2001 = vmatpush1.msra.mxu1 %v1898_v32 }
 0x25a   : > { %v1750_v8 = vpop.permute.xlu0 %1749  ;;  %2002 = vmatprep.subr.mxu1 %v1886_v12  ;;  %v1752_v29 = vpop.permute.xlu1 %1751 }
 0x25b   : > { %2003 = vmatpush1.msra.mxu1 %v1885_v43  ;;  %v1789_v10 = vsel %vm1373_vm2, %v1750_v8, %v1752_v29  ;;  %v1788_v16 = vsel %vm1373_vm2, %v1748_v57, %v1750_v8 }
 0x25c   : > { %2004 = vmatprep.subr.mxu1 %v1789_v10 }
 0x25d   : > { %2005 = vmatpush1.msra.mxu1 %v1788_v16 }
 0x25e   : > { %v1836_v52 = vpop.permute.xlu0 %1835  ;;  %2006 = vmatprep.subr.mxu1 %v1776_v30  ;;  %v1838_v19 = vpop.permute.xlu1 %1837 }
 0x25f   : > { %2007 = vmatpush1.msra.mxu1 %v1775_v50  ;;  %v1887_v15 = vsel %vm1540_vm3, %v1834_v47, %v1836_v52 }
 0x260   : > { %2008 = vmatprep.subr.mxu1 %v7732_v13 }
 0x261   : > { %2009 = vmatpush1.msra.mxu1 %v7687_v40 }
 0x262   : > { %v1726_v27 = vpop.permute.xlu0 %1725  ;;  %2010 = vmatprep.subr.mxu1 %v7698_v38  ;;  %v8012_v21 = vpop.permute.xlu1 %1727  ;;  %v8026_v38 = vld [vmem:[#allocation4 + $0x10] sm:$0xff] }
 0x263   : > { %2011 = vmatpush1.msra.mxu1 %v7675_v39  ;;  %v1888_v39 = vsel %vm1540_vm3, %v1836_v52, %v1838_v19  ;;  %v1778_v42 = vsel %vm1373_vm2, %v1726_v27, %v8012_v21  ;;  %v1777_v61 = vsel %vm1373_vm2, %v1724_v63, %v1726_v27 }
 0x264   : > { %6755 = vmatmul.mubr.msk.f32.vlgmr.msra.gmra.mxu1 %vm1967_vm4, %v8009_v5 }
 0x265   : > { %2050 = vmatprep.mubr.f32.mxu1 %v11076_v3 }
 0x266   : > { %v1864_v13 = vpop.permute.xlu0 %1863  ;;  %v1866_v25 = vpop.permute.xlu1 %1865 }
 0x267   : > { %v1901_v40 = vsel %vm1540_vm3, %v1864_v13, %v1866_v25  ;;  %v1900_v46 = vsel %vm1540_vm3, %v1862_v53, %v1864_v13 }
 0x268   : > { %6756 = vmatmul.mubr.msk.f32.gmra.mxu1 %vm1967_vm4, %v8018_v24  ;;  %2089 = vmatprep.subr.mxu1 %v1901_v40 }
 0x269   : > { %2090 = vmatpush1.msra.mxu1 %v1900_v46  ;;  %2056 = vmatprep.mubr.f32.mxu1 %v11076_v3 }
 0x26a   : > { %v1754_v54 = vpop.permute.xlu0 %1753  ;;  %2091 = vmatprep.subr.mxu1 %v1888_v39  ;;  %v1756_v9 = vpop.permute.xlu1 %1755 }
 0x26b   : > { %2092 = vmatpush1.msra.mxu1 %v1887_v15  ;;  %v1791_v7 = vsel %vm1373_vm2, %v1754_v54, %v1756_v9  ;;  %v1790_v31 = vsel %vm1373_vm2, %v1752_v29, %v1754_v54 }
 0x26c   : > { %6757 = vmatmul.mubr.msk.f32.gmra.mxu1 %vm1967_vm4, %v8026_v38  ;;  %2093 = vmatprep.subr.mxu1 %v1791_v7 }
 0x26d   : > { %2094 = vmatpush1.msra.mxu1 %v1790_v31  ;;  %2062 = vmatprep.mubr.f32.mxu1 %v11076_v3 }
 0x26e   : > { %v1840_v51 = vpop.permute.xlu0 %1839  ;;  %2095 = vmatprep.subr.mxu1 %v1778_v42  ;;  %v8038_v57 = vpop.permute.xlu1 %1841 }
 0x26f   : > { %2096 = vmatpush1.msra.mxu1 %v1777_v61  ;;  %v1889_v53 = vsel %vm1540_vm3, %v1838_v19, %v1840_v51 }
 0x270   : > { %6758 = vmatmul.mubr.msk.f32.gmra.mxu1 %vm1967_vm4, %v8036_v49  ;;  %2097 = vmatprep.subr.mxu1 %v7782_v6 }
 0x271   : > { %2098 = vmatpush1.msra.mxu1 %v7734_v17  ;;  %2133 = vmatprep.mubr.f32.mxu1 %v11076_v3  ;;  %v1890_v17 = vsel %vm1540_vm3, %v1840_v51, %v8038_v57 }
 0x272   : > { %v1868_v47 = vpop.permute.xlu0 %1867  ;;  %2099 = vmatprep.subr.mxu1 %v7758_v33  ;;  %v1870_v1 = vpop.permute.xlu1 %1869 }
 0x273   : > { %2100 = vmatpush1.msra.mxu1 %v7713_v48  ;;  %v1903_v34 = vsel %vm1540_vm3, %v1868_v47, %v1870_v1  ;;  %v1902_v63 = vsel %vm1540_vm3, %v1866_v25, %v1868_v47 }
 0x274   : > { %6759 = vmatmul.mubr.msk.f32.vlgmr.msra.gmra.mxu1 %vm1967_vm4, %v8009_v5  ;;  %2178 = vmatprep.subr.mxu0 %v1903_v34 }
 0x275   : > { %2179 = vmatpush1.msra.mxu0 %v1902_v63  ;;  %2139 = vmatprep.mubr.f32.mxu1 %v11076_v3 }
 0x276   : > { %v1758_v6 = vpop.permute.xlu0 %1757  ;;  %2180 = vmatprep.subr.mxu0 %v1890_v17  ;;  %v1760_v33 = vpop.permute.xlu1 %1759 }
 0x277   : > { %2181 = vmatpush1.msra.mxu0 %v1889_v53  ;;  %v1793_v48 = vsel %vm1373_vm2, %v1758_v6, %v1760_v33  ;;  %v1792_v35 = vsel %vm1373_vm2, %v1756_v9, %v1758_v6 }
 0x278   : > { %6760 = vmatmul.mubr.msk.f32.gmra.mxu1 %vm1967_vm4, %v8018_v24  ;;  %2182 = vmatprep.subr.mxu0 %v1793_v48 }
 0x279   : > { %2183 = vmatpush1.msra.mxu0 %v1792_v35  ;;  %2145 = vmatprep.mubr.f32.mxu1 %v11076_v3 }
 0x27a   : > { %v1730_v32 = vpop.permute.xlu0 %1729  ;;  %v1732_v12 = vpop.permute.xlu1 %1731 }
 0x27b   : > { %v1780_v8 = vsel %vm1373_vm2, %v1730_v32, %v1732_v12  ;;  %v1779_v29 = vsel %vm1373_vm2, %v8012_v21, %v1730_v32 }
 0x27c   : > { %6761 = vmatmul.mubr.msk.f32.gmra.mxu1 %vm1967_vm4, %v8026_v38  ;;  %2184 = vmatprep.subr.mxu0 %v1780_v8 }
 0x27d   : > { %2185 = vmatpush1.msra.mxu0 %v1779_v29  ;;  %2151 = vmatprep.mubr.f32.mxu1 %v11076_v3 }
 0x27e   : > { %v1844_v43 = vpop.permute.xlu0 %1843  ;;  %2186 = vmatprep.subr.mxu0 %v7821_v58  ;;  %v1846_v10 = vpop.permute.xlu1 %1845 }
 0x27f   : > { %2187 = vmatpush1.msra.mxu0 %v7784_v55  ;;  %v1891_v27 = vsel %vm1540_vm3, %v8038_v57, %v1844_v43 }
 0x280   : > { %6762 = vmatmul.mubr.msk.f32.gmra.mxu1 %vm1967_vm4, %v8036_v49  ;;  %2188 = vmatprep.subr.mxu0 %v7807_v56  ;;  %v1892_v56 = vsel %vm1540_vm3, %v1844_v43, %v1846_v10 }
 0x281   : > { %2189 = vmatpush1.msra.mxu0 %v7760_v36  ;;  %2311 = vmatprep.mubr.f32.mxu1 %v11076_v3 }
 0x282   : > { %v1734_v16 = vpop.permute.xlu0 %1733  ;;  %6763 = vmatmul.mubr.msk.f32.vlgmr.msra.gmra.mxu0 %vm1967_vm4, %v8009_v5  ;;  %v1736_v30 = vpop.permute.xlu1 %1735 }
 0x283   : > { %2228 = vmatprep.mubr.f32.mxu0 %v11076_v3  ;;  %v1782_v25 = vsel %vm1373_vm2, %v1734_v16, %v1736_v30  ;;  %v1781_v39 = vsel %vm1373_vm2, %v1732_v12, %v1734_v16 }
 0x286   : > { %v1872_v58 = vpop.permute.xlu0 %1871  ;;  %6764 = vmatmul.mubr.msk.f32.gmra.mxu0 %vm1967_vm4, %v8018_v24  ;;  %v1874_v55 = vpop.permute.xlu1 %1873 }
 0x287   : > { %v1905_v52 = vsel %vm1540_vm3, %v1872_v58, %v1874_v55  ;;  %2234 = vmatprep.mubr.f32.mxu0 %v11076_v3  ;;  %v1904_v36 = vsel %vm1540_vm3, %v1870_v1, %v1872_v58 }
 0x288   : > { %2267 = vmatprep.subr.mxu1 %v1905_v52 }
 0x289   : > { %2268 = vmatpush1.msra.mxu1 %v1904_v36 }
 0x28a   : > { %v1762_v19 = vpop.permute.xlu0 %1761  ;;  %6765 = vmatmul.mubr.msk.f32.gmra.mxu0 %vm1967_vm4, %v8026_v38  ;;  %2269 = vmatprep.subr.mxu1 %v1892_v56  ;;  %v1764_v50 = vpop.permute.xlu1 %1763 }
 0x28b   : > { %2270 = vmatpush1.msra.mxu1 %v1891_v27  ;;  %v1795_v21 = vsel %vm1373_vm2, %v1762_v19, %v1764_v50  ;;  %2240 = vmatprep.mubr.f32.mxu0 %v11076_v3  ;;  %v1794_v13 = vsel %vm1373_vm2, %v1760_v33, %v1762_v19 }
 0x28c   : > { %2271 = vmatprep.subr.mxu1 %v1795_v21 }
 0x28d   : > { %2272 = vmatpush1.msra.mxu1 %v1794_v13 }
 0x28e   : > { %v1848_v40 = vpop.permute.xlu0 %1847  ;;  %6766 = vmatmul.mubr.msk.f32.gmra.mxu0 %vm1967_vm4, %v8036_v49  ;;  %2273 = vmatprep.subr.mxu1 %v1782_v25  ;;  %v1850_v46 = vpop.permute.xlu1 %1849 }
 0x28f   : > { %2274 = vmatpush1.msra.mxu1 %v1781_v39  ;;  %2400 = vmatprep.mubr.f32.mxu0 %v11076_v3  ;;  %v1894_v31 = vsel %vm1540_vm3, %v1848_v40, %v1850_v46 }
 0x290   : > { %2275 = vmatprep.subr.mxu1 %v7879_v2 }
 0x291   : > { %2276 = vmatpush1.msra.mxu1 %v7823_v60 }
 0x292   : > { %v1876_v54 = vpop.permute.xlu0 %1875  ;;  %2277 = vmatprep.subr.mxu1 %v7855_v45  ;;  %v1878_v9 = vpop.permute.xlu1 %1877  ;;  %v1893_v45 = vsel %vm1540_vm3, %v1846_v10, %v1848_v40 }
 0x293   : > { %2278 = vmatpush1.msra.mxu1 %v7809_v59  ;;  %v1907_v15 = vsel %vm1540_vm3, %v1876_v54, %v1878_v9  ;;  %v1906_v7 = vsel %vm1540_vm3, %v1874_v55, %v1876_v54 }
 0x294   : > { %6767 = vmatmul.mubr.msk.f32.vlgmr.msra.gmra.mxu1 %vm1967_vm4, %v8009_v5  ;;  %2356 = vmatprep.subr.mxu0 %v1907_v15 }
 0x295   : > { %2357 = vmatpush1.msra.mxu0 %v1906_v7  ;;  %2317 = vmatprep.mubr.f32.mxu1 %v11076_v3 }
 0x296   : > { %v1766_v60 = vpop.permute.xlu0 %1765  ;;  %2358 = vmatprep.subr.mxu0 %v1894_v31  ;;  %v1768_v2 = vpop.permute.xlu1 %1767 }
 0x297   : > { %2359 = vmatpush1.msra.mxu0 %v1893_v45  ;;  %v1797_v59 = vsel %vm1373_vm2, %v1766_v60, %v1768_v2  ;;  %v1796_v42 = vsel %vm1373_vm2, %v1764_v50, %v1766_v60 }
 0x298   : > { %6768 = vmatmul.mubr.msk.f32.gmra.mxu1 %vm1967_vm4, %v8018_v24  ;;  %2360 = vmatprep.subr.mxu0 %v1797_v59 }
 0x299   : > { %2361 = vmatpush1.msra.mxu0 %v1796_v42  ;;  %2323 = vmatprep.mubr.f32.mxu1 %v11076_v3 }
 0x29a   : > { %v1738_v51 = vpop.permute.xlu0 %1737  ;;  %v1740_v57 = vpop.permute.xlu1 %1739 }
 0x29b   : > { %v1784_v61 = vsel %vm1373_vm2, %v1738_v51, %v1740_v57  ;;  %v1783_v47 = vsel %vm1373_vm2, %v1736_v30, %v1738_v51 }
 0x29c   : > { %6769 = vmatmul.mubr.msk.f32.gmra.mxu1 %vm1967_vm4, %v8026_v38  ;;  %2362 = vmatprep.subr.mxu0 %v1784_v61 }
 0x29d   : > { %2363 = vmatpush1.msra.mxu0 %v1783_v47  ;;  %2329 = vmatprep.mubr.f32.mxu1 %v11076_v3 }
 0x29e   : > { %v1852_v1 = vpop.permute.xlu0 %1851  ;;  %2364 = vmatprep.subr.mxu0 %v7913_v14  ;;  %v1742_v34 = vpop.permute.xlu1 %1741 }
 0x29f   : > { %2365 = vmatpush1.msra.mxu0 %v7881_v18  ;;  %v1895_v48 = vsel %vm1540_vm3, %v1850_v46, %v1852_v1  ;;  %v1785_v43 = vsel %vm1373_vm2, %v1740_v57, %v1742_v34 }
 0x2a0   : > { %6770 = vmatmul.mubr.msk.f32.gmra.mxu1 %vm1967_vm4, %v8036_v49  ;;  %2366 = vmatprep.subr.mxu0 %v7901_v44 }
 0x2a1   : > { %2367 = vmatpush1.msra.mxu0 %v7857_v11  ;;  %2489 = vmatprep.mubr.f32.mxu1 %v11076_v3 }
 0x2a2   : > { %v1744_v63 = vpop.permute.xlu0 %1743  ;;  %6771 = vmatmul.mubr.msk.f32.vlgmr.msra.gmra.mxu0 %vm1967_vm4, %v8009_v5  ;;  %v1854_v17 = vpop.permute.xlu1 %1853 }
 0x2a3   : > { %2406 = vmatprep.mubr.f32.mxu0 %v11076_v3  ;;  %v1896_v44 = vsel %vm1540_vm3, %v1852_v1, %v1854_v17  ;;  %v1786_v12 = vsel %vm1373_vm2, %v1742_v34, %v1744_v63 }
 0x2a6   : > { %v1880_v14 = vpop.permute.xlu0 %1879  ;;  %6772 = vmatmul.mubr.msk.f32.gmra.mxu0 %vm1967_vm4, %v8018_v24  ;;  %v1882_v18 = vpop.permute.xlu1 %1881 }
 0x2a7   : > { %v1909_v6 = vsel %vm1540_vm3, %v1880_v14, %v1882_v18  ;;  %2412 = vmatprep.mubr.f32.mxu0 %v11076_v3  ;;  %v1908_v11 = vsel %vm1540_vm3, %v1878_v9, %v1880_v14 }
 0x2a8   : > { %2445 = vmatprep.subr.mxu1 %v1909_v6 }
 0x2a9   : > { %2446 = vmatpush1.msra.mxu1 %v1908_v11 }
 0x2aa   : > { %v1770_v33 = vpop.permute.xlu0 %1769  ;;  %6773 = vmatmul.mubr.msk.f32.gmra.mxu0 %vm1967_vm4, %v8026_v38  ;;  %2447 = vmatprep.subr.mxu1 %v1896_v44  ;;  %v1772_v53 = vpop.permute.xlu1 %1771 }
 0x2ab   : > { %2448 = vmatpush1.msra.mxu1 %v1895_v48  ;;  %v1799_v35 = vsel %vm1373_vm2, %v1770_v33, %v1772_v53  ;;  %2418 = vmatprep.mubr.f32.mxu0 %v11076_v3  ;;  %v1798_v32 = vsel %vm1373_vm2, %v1768_v2, %v1770_v33 }
 0x2ac   : > { %2449 = vmatprep.subr.mxu1 %v1799_v35 }
 0x2ad   : > { %2450 = vmatpush1.msra.mxu1 %v1798_v32 }
 0x2ae   : > { %v1884_v8 = vpop.permute.xlu0 %1883  ;;  %6774 = vmatmul.mubr.msk.f32.gmra.mxu0 %vm1967_vm4, %v8036_v49  ;;  %2451 = vmatprep.subr.mxu1 %v1786_v12  ;;  %v1856_v29 = vpop.permute.xlu1 %1855 }
 0x2af   : > { %2452 = vmatpush1.msra.mxu1 %v1785_v43  ;;  %2534 = vmatprep.subr.mxu0 %v1884_v8  ;;  %v1910_v10 = vsel %vm1540_vm3, %v1882_v18, %v1884_v8  ;;  %v1897_v16 = vsel %vm1540_vm3, %v1854_v17, %v1856_v29 }
 0x2b0   : > { %2453 = vmatprep.subr.mxu1 %v7961_v22  ;;  %2535 = vmatpush1.msra.mxu0 %v1910_v10 }
 0x2b1   : > { %2454 = vmatpush1.msra.mxu1 %v7915_v20  ;;  %2536 = vmatprep.subr.mxu0 %v1856_v29 }
 0x2b2   : > { %v1774_v30 = vpop.permute.xlu0 %1773  ;;  %2455 = vmatprep.subr.mxu1 %v7944_v23  ;;  %2537 = vmatpush1.msra.mxu0 %v1897_v16  ;;  %v1746_v58 = vpop.permute.xlu1 %1745 }
 0x2b3   : > { %2456 = vmatpush1.msra.mxu1 %v7903_v28  ;;  %2538 = vmatprep.subr.mxu0 %v1774_v30  ;;  %v1800_v55 = vsel %vm1373_vm2, %v1772_v53, %v1774_v30  ;;  %v1787_v20 = vsel %vm1373_vm2, %v1744_v63, %v1746_v58 }
 0x2b4   : > { %6775 = vmatmul.mubr.msk.f32.vlgmr.msra.gmra.mxu1 %vm1967_vm4, %v8009_v5  ;;  %2539 = vmatpush1.msra.mxu0 %v1800_v55 }
 0x2b5   : > { %2540 = vmatprep.subr.mxu0 %v1746_v58  ;;  %2495 = vmatprep.mubr.f32.mxu1 %v11076_v3 }
 0x2b6   : > { %2541 = vmatpush1.msra.mxu0 %v1787_v20  ;;  %2578 = vmatprep.mubr.f32.mxu0 %v11076_v3 }
 0x2b7   : > { %2542 = vmatprep.subr.mxu0 %v7977_v26 }
 0x2b8   : > { %6776 = vmatmul.mubr.msk.f32.gmra.mxu1 %vm1967_vm4, %v8018_v24  ;;  %2543 = vmatpush1.msra.mxu0 %v7963_v37 }
 0x2b9   : > { %2544 = vmatprep.subr.mxu0 %v7975_v62  ;;  %2501 = vmatprep.mubr.f32.mxu1 %v11076_v3 }
 0x2ba   : > { %2545 = vmatpush1.msra.mxu0 %v7950_v41 }
 0x2bb   : > { %6779 = vmatmul.mubr.msk.f32.vlgmr.msra.gmra.mxu0 %vm1967_vm4, %v8009_v5 }
 0x2bc   : > { %6777 = vmatmul.mubr.msk.f32.gmra.mxu1 %vm1967_vm4, %v8026_v38  ;;  %2584 = vmatprep.mubr.f32.mxu0 %v11076_v3 }
 0x2bd   : > { %2507 = vmatprep.mubr.f32.mxu1 %v11076_v3 }
 0x2bf   : > { %6780 = vmatmul.mubr.msk.f32.gmra.mxu0 %vm1967_vm4, %v8018_v24  ;;  %v8179_v28 = vpop.permute.xlu0 %1964  ;;  %v8181_v23 = vpop.permute.xlu1 %1959 }
 0x2c0   : > { %6778 = vmatmul.mubr.msk.f32.gmra.mxu1 %vm1967_vm4, %v8036_v49  ;;  %2590 = vmatprep.mubr.f32.mxu0 %v11076_v3 }
 0x2c1   : > { %3260 = vmatprep.mubr.f32.mxu1 %v11076_v3 }
 0x2c3   : > { %6781 = vmatmul.mubr.msk.f32.gmra.mxu0 %vm1967_vm4, %v8026_v38  ;;  %v8183_v41 = vpop.permute.xlu0 %1949  ;;  %v8188_v5 = vpop.permute.xlu1 %1954 }
 0x2c4   : > { %2596 = vmatprep.mubr.f32.mxu0 %v11076_v3 }
 0x2c7   : > { %6782 = vmatmul.mubr.msk.f32.gmra.mxu0 %vm1967_vm4, %v8036_v49 }
 0x2c8   : > { %3349 = vmatprep.mubr.f32.mxu0 %v11076_v3 }
 0x324   : > { %v2046_v22 = vpop.f32.mrf.mxu1 }
 0x325   : > { %v2047_v37 = vadd.f32 %v2046_v22, %v8183_v41 }
 0x326   : > { %v2048_v62 = vpop.f32.mrf.mxu1 }
 0x327   : > { %v8186_v26 = vmax.f32 %v2047_v37, 0.0  ;;  %v2049_v52 = vadd.f32 %v2048_v62, %v8183_v41 }
 0x328   : > { %v2052_v24 = vpop.f32.mrf.mxu1 }
 0x329   : > { %v2053_v38 = vadd.f32 %v2052_v24, %v8188_v5  ;;  %2935 = vrot.lane.b32.xlu0 %v8186_v26, %s7156_s16  ;;  %v8200_v50 = vmax.f32 %v2049_v52, 0.0 }
 0x32a   : > { %v2054_v49 = vpop.f32.mrf.mxu1 }
 0x32b   : > { %v8194_v36 = vmax.f32 %v2053_v38, 0.0  ;;  %v2055_v27 = vadd.f32 %v2054_v49, %v8188_v5 }
 0x32c   : > { %v2058_v56 = vpop.f32.mrf.mxu1 }
 0x32d   : > { %2715 = vrot.lane.b32.xlu0 %v8186_v26, %s7157_s24  ;;  %2963 = vrot.lane.b32.xlu1 %v8194_v36, %s7156_s16  ;;  %v8207_v13 = vmax.f32 %v2055_v27, 0.0  ;;  %v2059_v25 = vadd.f32 %v2058_v56, %v8181_v23 }
 0x32e   : > { %v2060_v19 = vpop.f32.mrf.mxu1 }
 0x32f   : > { %v8214_v46 = vmax.f32 %v2059_v25, 0.0  ;;  %v2061_v9 = vadd.f32 %v2060_v19, %v8181_v23 }
 0x330   : > { %v2064_v21 = vpop.f32.mrf.mxu1 }
 0x331   : > { %2937 = vrot.lane.b32.xlu0 %v8200_v50, %s7156_s16  ;;  %2743 = vrot.lane.b32.xlu1 %v8194_v36, %s7157_s24  ;;  %v2065_v39 = vadd.f32 %v2064_v21, %v8179_v28  ;;  %v8228_v31 = vmax.f32 %v2061_v9, 0.0 }
 0x332   : > { %v2066_v40 = vpop.f32.mrf.mxu1 }
 0x333   : > { %v8222_v15 = vmax.f32 %v2065_v39, 0.0  ;;  %v2067_v60 = vadd.f32 %v2066_v40, %v8179_v28 }
 0x334   : > { %v2135_v54 = vpop.f32.mrf.mxu1 }
 0x335   : > { %2717 = vrot.lane.b32.xlu0 %v8200_v50, %s7157_s24  ;;  %2965 = vrot.lane.b32.xlu1 %v8207_v13, %s7156_s16  ;;  %v8235_v45 = vmax.f32 %v2067_v60, 0.0  ;;  %v2136_v42 = vadd.f32 %v2135_v54, %v8183_v41 }
 0x336   : > { %v2137_v7 = vpop.f32.mrf.mxu1 }
 0x337   : > { %v8249_v61 = vmax.f32 %v2136_v42, 0.0  ;;  %v2138_v1 = vadd.f32 %v2137_v7, %v8183_v41 }
 0x338   : > { %v2141_v2 = vpop.f32.mrf.mxu1 }
 0x339   : > { %2991 = vrot.lane.b32.xlu0 %v8214_v46, %s7156_s16  ;;  %2745 = vrot.lane.b32.xlu1 %v8207_v13, %s7157_s24  ;;  %v2142_v59 = vadd.f32 %v2141_v2, %v8188_v5  ;;  %11179 = vst [vmem:[#allocation15_spill] sm:$0xff] %v8249_v61  ;;  %v8263_v14 = vmax.f32 %v2138_v1, 0.0 }
 0x33a   : > { %v2143_v57 = vpop.f32.mrf.mxu1 }
 0x33b   : > { %v8243_v51 = vmax.f32 %v2142_v59, 0.0  ;;  %v2144_v47 = vadd.f32 %v2143_v57, %v8188_v5  ;;  %11181 = vst [vmem:[#allocation17_spill] sm:$0xff] %v8263_v14 }
 0x33c   : > { %v2147_v63 = vpop.f32.mrf.mxu1 }
 0x33d   : > { %2771 = vrot.lane.b32.xlu0 %v8214_v46, %s7157_s24  ;;  %3019 = vrot.lane.b32.xlu1 %v8222_v15, %s7156_s16  ;;  %11178 = vst [vmem:[#allocation14_spill] sm:$0xff] %v8243_v51  ;;  %v8257_v34 = vmax.f32 %v2144_v47, 0.0  ;;  %v2148_v11 = vadd.f32 %v2147_v63, %v8181_v23 }
 0x33e   : > { %v2149_v6 = vpop.f32.mrf.mxu1 }
 0x33f   : > { %11180 = vst [vmem:[#allocation16_spill] sm:$0xff] %v8257_v34  ;;  %v8277_v53 = vmax.f32 %v2148_v11, 0.0  ;;  %v2150_v32 = vadd.f32 %v2149_v6, %v8181_v23 }
 0x340   : > { %v2153_v33 = vpop.f32.mrf.mxu1 }
 0x341   : > { %2993 = vrot.lane.b32.xlu0 %v8228_v31, %s7156_s16  ;;  %2799 = vrot.lane.b32.xlu1 %v8222_v15, %s7157_s24  ;;  %11183 = vst [vmem:[#allocation19_spill] sm:$0xff] %v8277_v53  ;;  %v2154_v48 = vadd.f32 %v2153_v33, %v8179_v28  ;;  %v8291_v43 = vmax.f32 %v2150_v32, 0.0 }
 0x342   : > { %v2224_v17 = vpop.f32.mrf.mxu0  ;;  %v2155_v8 = vpop.f32.mrf.mxu1 }
 0x343   : > { %v2225_v18 = vadd.f32 %v2224_v17, %v8183_v41  ;;  %v8285_v12 = vmax.f32 %v2154_v48, 0.0  ;;  %v2156_v10 = vadd.f32 %v2155_v8, %v8179_v28 }
 0x344   : > { %v2226_v35 = vpop.f32.mrf.mxu0 }
 0x345   : > { %2773 = vrot.lane.b32.xlu0 %v8228_v31, %s7157_s24  ;;  %3021 = vrot.lane.b32.xlu1 %v8235_v45, %s7156_s16  ;;  %v8271_v44 = vmax.f32 %v2225_v18, 0.0  ;;  %v8298_v30 = vmax.f32 %v2156_v10, 0.0  ;;  %v2227_v58 = vadd.f32 %v2226_v35, %v8183_v41 }
 0x346   : > { %v2230_v29 = vpop.f32.mrf.mxu0 }
 0x347   : > { %11182 = vst [vmem:[#allocation18_spill] sm:$0xff] %v8271_v44  ;;  %v8305_v20 = vmax.f32 %v2227_v58, 0.0  ;;  %v2231_v37 = vadd.f32 %v2230_v29, %v8188_v5 }
 0x348   : > { %v2232_v16 = vpop.f32.mrf.mxu0 }
 0x349   : > { %2967 = vrot.lane.b32.xlu0 %v8243_v51, %s7156_s16  ;;  %2801 = vrot.lane.b32.xlu1 %v8235_v45, %s7157_s24  ;;  %11184 = vst [vmem:[#allocation20_spill] sm:$0xff] %v8305_v20  ;;  %v8319_v38 = vmax.f32 %v2231_v37, 0.0  ;;  %v2233_v56 = vadd.f32 %v2232_v16, %v8188_v5 }
 0x34a   : > { %v2236_v55 = vpop.f32.mrf.mxu0 }
 0x34b   : > { %v2237_v22 = vadd.f32 %v2236_v55, %v8181_v23  ;;  %11186 = vst [vmem:[#allocation22_spill] sm:$0xff] %v8319_v38  ;;  %v8333_v21 = vmax.f32 %v2233_v56, 0.0 }
 0x34c   : > { %v2238_v40 = vpop.f32.mrf.mxu0 }
 0x34d   : > { %2747 = vrot.lane.b32.xlu0 %v8243_v51, %s7157_s24  ;;  %2939 = vrot.lane.b32.xlu1 %v8249_v61, %s7156_s16  ;;  %v8313_v62 = vmax.f32 %v2237_v22, 0.0  ;;  %11188 = vst [vmem:[#allocation24_spill] sm:$0xff] %v8333_v21  ;;  %v2239_v54 = vadd.f32 %v2238_v40, %v8181_v23 }
 0x34e   : > { %v2242_v63 = vpop.f32.mrf.mxu0 }
 0x34f   : > { %11185 = vst [vmem:[#allocation21_spill] sm:$0xff] %v8313_v62  ;;  %v8347_v60 = vmax.f32 %v2239_v54, 0.0  ;;  %v2243_v6 = vadd.f32 %v2242_v63, %v8179_v28 }
 0x350   : > { %v2244_v18 = vpop.f32.mrf.mxu0 }
 0x351   : > { %2969 = vrot.lane.b32.xlu0 %v8257_v34, %s7156_s16  ;;  %2719 = vrot.lane.b32.xlu1 %v8249_v61, %s7157_s24  ;;  %11190 = vst [vmem:[#allocation26_spill] sm:$0xff] %v8347_v60  ;;  %v8375_v48 = vmax.f32 %v2243_v6, 0.0  ;;  %v2245_v8 = vadd.f32 %v2244_v18, %v8179_v28 }
 0x353   : > { %11194 = vst [vmem:[#allocation30_spill] sm:$0xff] %v8375_v48  ;;  %v8389_v16 = vmax.f32 %v2245_v8, 0.0 }
 0x354   : > { %v2313_v24 = vpop.f32.mrf.mxu1 }
 0x355   : > { %2749 = vrot.lane.b32.xlu0 %v8257_v34, %s7157_s24  ;;  %2941 = vrot.lane.b32.xlu1 %v8263_v14, %s7156_s16  ;;  %v2314_v49 = vadd.f32 %v2313_v24, %v8183_v41  ;;  %11196 = vst [vmem:[#allocation32_spill] sm:$0xff] %v8389_v16 }
 0x356   : > { %v2315_v52 = vpop.f32.mrf.mxu1 }
 0x357   : > { %v8327_v19 = vmax.f32 %v2314_v49, 0.0  ;;  %v2316_v2 = vadd.f32 %v2315_v52, %v8183_v41 }
 0x358   : > { %v2319_v27 = vpop.f32.mrf.mxu1 }
 0x359   : > { %2943 = vrot.lane.b32.xlu0 %v8271_v44, %s7156_s16  ;;  %2721 = vrot.lane.b32.xlu1 %v8263_v14, %s7157_s24  ;;  %11187 = vst [vmem:[#allocation23_spill] sm:$0xff] %v8327_v19  ;;  %v2320_v25 = vadd.f32 %v2319_v27, %v8188_v5  ;;  %v8355_v57 = vmax.f32 %v2316_v2, 0.0 }
 0x35a   : > { %v2321_v39 = vpop.f32.mrf.mxu1 }
 0x35b   : > { %v8341_v9 = vmax.f32 %v2320_v25, 0.0  ;;  %11191 = vst [vmem:[#allocation27_spill] sm:$0xff] %v8355_v57  ;;  %v2322_v58 = vadd.f32 %v2321_v39, %v8188_v5 }
 0x35c   : > { %v2325_v7 = vpop.f32.mrf.mxu1 }
 0x35d   : > { %2723 = vrot.lane.b32.xlu0 %v8271_v44, %s7157_s24  ;;  %2995 = vrot.lane.b32.xlu1 %v8277_v53, %s7156_s16  ;;  %11189 = vst [vmem:[#allocation25_spill] sm:$0xff] %v8341_v9  ;;  %v2326_v59 = vadd.f32 %v2325_v7, %v8181_v23  ;;  %v8399_v24 = vmax.f32 %v2322_v58, 0.0 }
 0x35e   : > { %v2327_v42 = vpop.f32.mrf.mxu1 }
 0x35f   : > { %v8357_v47 = vmax.f32 %v2326_v59, 0.0  ;;  %11197 = vst [vmem:[#allocation33_spill] sm:$0xff] %v8399_v24  ;;  %v2328_v7 = vadd.f32 %v2327_v42, %v8181_v23 }
 0x360   : > { %v2331_v1 = vpop.f32.mrf.mxu1 }
 0x361   : > { %3023 = vrot.lane.b32.xlu0 %v8285_v12, %s7156_s16  ;;  %2775 = vrot.lane.b32.xlu1 %v8277_v53, %s7157_s24  ;;  %11192 = vst [vmem:[#allocation28_spill] sm:$0xff] %v8357_v47  ;;  %v2332_v17 = vadd.f32 %v2331_v1, %v8179_v28  ;;  %v8431_v18 = vmax.f32 %v2328_v7, 0.0 }
 0x362   : > { %v2402_v33 = vpop.f32.mrf.mxu0  ;;  %v2333_v54 = vpop.f32.mrf.mxu1 }
 0x363   : > { %v8369_v11 = vmax.f32 %v2332_v17, 0.0  ;;  %v2403_v35 = vadd.f32 %v2402_v33, %v8183_v41  ;;  %11200 = vst [vmem:[#allocation36_spill] sm:$0xff] %v8431_v18  ;;  %v2334_v8 = vadd.f32 %v2333_v54, %v8179_v28 }
 0x364   : > { %v2404_v32 = vpop.f32.mrf.mxu0 }
 0x365   : > { %2803 = vrot.lane.b32.xlu0 %v8285_v12, %s7157_s24  ;;  %2997 = vrot.lane.b32.xlu1 %v8291_v43, %s7156_s16  ;;  %11193 = vst [vmem:[#allocation29_spill] sm:$0xff] %v8369_v11  ;;  %v8383_v29 = vmax.f32 %v2403_v35, 0.0  ;;  %v8454_v7 = vmax.f32 %v2334_v8, 0.0  ;;  %v2405_v0 = vadd.f32 %v2404_v32, %v8183_v41 }
 0x366   : > { %v2408_v10 = vpop.f32.mrf.mxu0 }
 0x367   : > { %11195 = vst [vmem:[#allocation31_spill] sm:$0xff] %v8383_v29  ;;  %v2409_v55 = vadd.f32 %v2408_v10, %v8188_v5  ;;  %11201 = vst [vmem:[#allocation37_spill] sm:$0xff] %v8454_v7 }
 0x368   : > { %v2410_v37 = vpop.f32.mrf.mxu0 }
 0x369   : > { %3025 = vrot.lane.b32.xlu0 %v8298_v30, %s7156_s16  ;;  %2777 = vrot.lane.b32.xlu1 %v8291_v43, %s7157_s24  ;;  %v8401_v49 = vmax.f32 %v2409_v55, 0.0 }
 0x36a   : > { %v2414_v27 = vpop.f32.mrf.mxu0 }
 0x36b   : > { %11198 = vst [vmem:[#allocation34_spill] sm:$0xff] %v8401_v49  ;;  %v2415_v25 = vadd.f32 %v2414_v27, %v8181_v23 }
 0x36c   : > { %v2416_v63 = vpop.f32.mrf.mxu0 }
 0x36d   : > { %2805 = vrot.lane.b32.xlu0 %v8298_v30, %s7157_s24  ;;  %2945 = vrot.lane.b32.xlu1 %v8305_v20, %s7156_s16  ;;  %v8421_v2 = vmax.f32 %v2415_v25, 0.0 }
 0x36e   : > { %v2420_v35 = vpop.f32.mrf.mxu0 }
 0x36f   : > { %11199 = vst [vmem:[#allocation35_spill] sm:$0xff] %v8421_v2  ;;  %v2421_v10 = vadd.f32 %v2420_v35, %v8179_v28 }
 0x371   : > { %2999 = vrot.lane.b32.xlu0 %v8313_v62, %s7156_s16  ;;  %2725 = vrot.lane.b32.xlu1 %v8305_v20, %s7157_s24 }
 0x374   : > { %v2491_v17 = vpop.f32.mrf.mxu1 }
 0x375   : > { %2779 = vrot.lane.b32.xlu0 %v8313_v62, %s7157_s24  ;;  %2971 = vrot.lane.b32.xlu1 %v8319_v38, %s7156_s16  ;;  %v2492_v6 = vadd.f32 %v2491_v17, %v8183_v41  ;;  %v8456_v17 = vmax.f32 %v2421_v10, 0.0 }
 0x376   : > { %v2493_v25 = vpop.f32.mrf.mxu1 }
 0x377   : > { %v8444_v58 = vmax.f32 %v2492_v6, 0.0  ;;  %11202 = vst [vmem:[#allocation38_spill] sm:$0xff] %v8456_v17 }
 0x378   : > { %v2497_v6 = vpop.f32.mrf.mxu1 }
 0x379   : > { %2947 = vrot.lane.b32.xlu0 %v8327_v19, %s7156_s16  ;;  %2751 = vrot.lane.b32.xlu1 %v8319_v38, %s7157_s24  ;;  %v2498_v3 = vadd.f32 %v2497_v6, %v8188_v5 }
 0x37a   : > { %v2499_v10 = vpop.f32.mrf.mxu1 }
 0x37d   : > { %2727 = vrot.lane.b32.xlu0 %v8327_v19, %s7157_s24  ;;  %2973 = vrot.lane.b32.xlu1 %v8333_v21, %s7156_s16  ;;  %v2503_v19 = vpop.f32.mrf.mxu1 }
 0x381   : > { %2975 = vrot.lane.b32.xlu0 %v8341_v9, %s7156_s16  ;;  %2753 = vrot.lane.b32.xlu1 %v8333_v21, %s7157_s24 }
 0x385   : > { %2755 = vrot.lane.b32.xlu0 %v8341_v9, %s7157_s24  ;;  %3001 = vrot.lane.b32.xlu1 %v8347_v60, %s7156_s16 }
 0x389   : > { %3003 = vrot.lane.b32.xlu0 %v8357_v47, %s7156_s16  ;;  %2949 = vrot.lane.b32.xlu1 %v8355_v57, %s7156_s16 }
 0x38d   : > { %2783 = vrot.lane.b32.xlu0 %v8357_v47, %s7157_s24  ;;  %2781 = vrot.lane.b32.xlu1 %v8347_v60, %s7157_s24 }
 0x391   : > { %3031 = vrot.lane.b32.xlu0 %v8369_v11, %s7156_s16  ;;  %2729 = vrot.lane.b32.xlu1 %v8355_v57, %s7157_s24 }
 0x395   : > { %2811 = vrot.lane.b32.xlu0 %v8369_v11, %s7157_s24  ;;  %3027 = vrot.lane.b32.xlu1 %v8375_v48, %s7156_s16  ;;  %v2505_v11 = vpop.f32.mrf.mxu1 }
 0x397   : > { %v2509_v20 = vpop.f32.mrf.mxu1 }
 0x399   : > { %2951 = vrot.lane.b32.xlu0 %v8383_v29, %s7156_s16  ;;  %2807 = vrot.lane.b32.xlu1 %v8375_v48, %s7157_s24 }
 0x39b   : > { %v8393_v22 = vpop.permute.xlu0 %2935 }
 0x39d   : > { %2731 = vrot.lane.b32.xlu0 %v8383_v29, %s7157_s24  ;;  %3029 = vrot.lane.b32.xlu1 %v8389_v16, %s7156_s16  ;;  %v8476_v29 = vmax.f32 %v2405_v0, 0.0  ;;  %v2504_v0 = vadd.f32 %v2503_v19, %v8181_v23 }
 0x39f   : > { %v8403_v52 = vpop.permute.xlu0 %2715  ;;  %v8405_v56 = vpop.permute.xlu1 %2963 }
 0x3a1   : > { %2979 = vrot.lane.b32.xlu0 %v8401_v49, %s7156_s16  ;;  %2977 = vrot.lane.b32.xlu1 %v8399_v24, %s7156_s16 }
 0x3a3   : > { %v8412_v40 = vpop.permute.xlu0 %2937  ;;  %v8414_v39 = vpop.permute.xlu1 %2743 }
 0x3a5   : > { %2759 = vrot.lane.b32.xlu0 %v8401_v49, %s7157_s24  ;;  %2809 = vrot.lane.b32.xlu1 %v8389_v16, %s7157_s24  ;;  %v2411_v49 = vadd.f32 %v2410_v37, %v8188_v5 }
 0x3a7   : > { %v8423_v59 = vpop.permute.xlu0 %2717  ;;  %v8425_v1 = vpop.permute.xlu1 %2965  ;;  %v8489_v57 = vmax.f32 %v2411_v49, 0.0 }
 0x3a9   : > { %3007 = vrot.lane.b32.xlu0 %v8421_v2, %s7156_s16  ;;  %2757 = vrot.lane.b32.xlu1 %v8399_v24, %s7157_s24  ;;  %11204 = vst [vmem:[#allocation40_spill] sm:$0xff] %v8489_v57  ;;  %v2417_v24 = vadd.f32 %v2416_v63, %v8181_v23 }
 0x3ab   : > { %v8434_v33 = vpop.permute.xlu0 %2991  ;;  %v8436_v42 = vpop.permute.xlu1 %2745 }
 0x3ad   : > { %2787 = vrot.lane.b32.xlu0 %v8421_v2, %s7157_s24  ;;  %3005 = vrot.lane.b32.xlu1 %v8431_v18, %s7156_s16  ;;  %v8479_v2 = vmax.f32 %v2498_v3, 0.0 }
 0x3af   : > { %v8446_v55 = vpop.permute.xlu0 %2771  ;;  %v8448_v27 = vpop.permute.xlu1 %3019  ;;  %11203 = vst [vmem:[#allocation39_spill] sm:$0xff] %v8479_v2 }
 0x3b1   : > { %2955 = vrot.lane.b32.xlu0 %v8444_v58, %s7156_s16  ;;  %2785 = vrot.lane.b32.xlu1 %v8431_v18, %s7157_s24  ;;  %v8502_v18 = vmax.f32 %v2504_v0, 0.0 }
 0x3b3   : > { %v8458_v54 = vpop.permute.xlu0 %2993  ;;  %v8460_v35 = vpop.permute.xlu1 %2799  ;;  %11205 = vst [vmem:[#allocation41_spill] sm:$0xff] %v8502_v18 }
 0x3b5   : > { %3035 = vrot.lane.b32.xlu0 %v8456_v17, %s7156_s16  ;;  %3033 = vrot.lane.b32.xlu1 %v8454_v7, %s7156_s16 }
 0x3b7   : > { %v8468_v4 = vpop.permute.xlu0 %2773  ;;  %v8470_v8 = vpop.permute.xlu1 %3021 }
 0x3b9   : > { %2815 = vrot.lane.b32.xlu0 %v8456_v17, %s7157_s24  ;;  %2813 = vrot.lane.b32.xlu1 %v8454_v7, %s7157_s24  ;;  %v2422_v17 = vpop.f32.mrf.mxu0  ;;  %v2494_v7 = vadd.f32 %v2493_v25, %v8183_v41 }
 0x3ba   : > { %v2423_v21 = vadd.f32 %v2422_v17, %v8179_v28 }
 0x3bb   : > { %v8481_v32 = vpop.permute.xlu0 %2967  ;;  %v8483_v6 = vpop.permute.xlu1 %2801 }
 0x3bc   : > { %v2580_v37 = vpop.f32.mrf.mxu0 }
 0x3bd   : > { %2983 = vrot.lane.b32.xlu0 %v8479_v2, %s7156_s16  ;;  %2953 = vrot.lane.b32.xlu1 %v8476_v29, %s7156_s16  ;;  %v2581_v47 = vadd.f32 %v2580_v37, %v8183_v41 }
 0x3be   : > { %v8521_v44 = vpop.f32.mrf.mxu0 }
 0x3bf   : > { %v8492_v9 = vpop.permute.xlu0 %2747  ;;  %v8494_v3 = vpop.permute.xlu1 %2939  ;;  %v8515_v63 = vmax.f32 %v2581_v47, 0.0 }
 0x3c0   : > { %v2586_v38 = vpop.f32.mrf.mxu0 }
 0x3c1   : > { %2763 = vrot.lane.b32.xlu0 %v8479_v2, %s7157_s24  ;;  %2981 = vrot.lane.b32.xlu1 %v8489_v57, %s7156_s16  ;;  %v8512_v2 = vmax.f32 %v2417_v24, 0.0  ;;  %11207 = vst [vmem:[#allocation43_spill] sm:$0xff] %v8515_v63  ;;  %v2510_v24 = vadd.f32 %v2509_v20, %v8179_v28  ;;  %v2587_v62 = vadd.f32 %v2586_v38, %v8188_v5 }
 0x3c2   : > { %v8546_v48 = vpop.f32.mrf.mxu0 }
 0x3c3   : > { %v8504_v49 = vpop.permute.xlu0 %2969  ;;  %v8506_v19 = vpop.permute.xlu1 %2719  ;;  %11206 = vst [vmem:[#allocation42_spill] sm:$0xff] %v8512_v2  ;;  %v8540_v60 = vmax.f32 %v2510_v24, 0.0  ;;  %v8554_v16 = vmax.f32 %v2587_v62, 0.0  ;;  %v2500_v24 = vadd.f32 %v2499_v10, %v8188_v5  ;;  %v3086_v62 = vsel %vm1540_vm3, %v8448_v27, %v8470_v8 }
 0x3c4   : > { %v2592_v61 = vpop.f32.mrf.mxu0 }
 0x3c5   : > { %3011 = vrot.lane.b32.xlu0 %v8502_v18, %s7156_s16  ;;  %2761 = vrot.lane.b32.xlu1 %v8489_v57, %s7157_s24  ;;  %v8527_v57 = vmax.f32 %v2494_v7, 0.0  ;;  %11208 = vst [vmem:[#allocation44_spill] sm:$0xff] %v8554_v16  ;;  %v8579_v34 = vmax.f32 %v2500_v24, 0.0  ;;  %v2506_v24 = vadd.f32 %v2505_v11, %v8181_v23  ;;  %v2866_v11 = vsel %vm1373_vm2, %v8460_v35, %v8483_v6 }
 0x3c6   : > { %v8581_v53 = vpop.f32.mrf.mxu0  ;;  %v2841_v35 = vsel %vm1373_vm2, %v8436_v42, %v8492_v9 }
 0x3c7   : > { %v8517_v37 = vpop.permute.xlu0 %2749  ;;  %v8519_v0 = vpop.permute.xlu1 %2941 }
 0x3c9   : > { %2959 = vrot.lane.b32.xlu0 %v8515_v63, %s7156_s16  ;;  %3009 = vrot.lane.b32.xlu1 %v8512_v2, %s7156_s16 }
 0x3cb   : > { %v8530_v25 = vpop.permute.xlu0 %2943  ;;  %v8532_v47 = vpop.permute.xlu1 %2721 }
 0x3cd   : > { %2791 = vrot.lane.b32.xlu0 %v8502_v18, %s7157_s24  ;;  %2957 = vrot.lane.b32.xlu1 %v8527_v57, %s7156_s16  ;;  %v8552_v18 = vmax.f32 %v2423_v21, 0.0  ;;  %v2593_v21 = vadd.f32 %v2592_v61, %v8181_v23  ;;  %v3061_v61 = vsel %vm1540_vm3, %v8425_v1, %v8481_v32 }
 0x3cf   : > { %v8542_v7 = vpop.permute.xlu0 %2723  ;;  %v8544_v20 = vpop.permute.xlu1 %2995  ;;  %v8596_v27 = vmax.f32 %v2593_v21, 0.0 }
 0x3d1   : > { %3039 = vrot.lane.b32.xlu0 %v8540_v60, %s7156_s16  ;;  %2789 = vrot.lane.b32.xlu1 %v8512_v2, %s7157_s24  ;;  %v3074_v2 = vsel %vm1540_vm3, %v8458_v54, %v8544_v20  ;;  %11209 = vst [vmem:[#allocation45_spill] sm:$0xff] %v8596_v27 }
 0x3d3   : > { %v8556_v17 = vpop.permute.xlu0 %3023  ;;  %v8558_v38 = vpop.permute.xlu1 %2775 }
 0x3d4   : > { %v3087_v14 = vsel %vm1540_vm3, %v8470_v8, %v8556_v17 }
 0x3d5   : > { %2987 = vrot.lane.b32.xlu0 %v8554_v16, %s7156_s16  ;;  %3037 = vrot.lane.b32.xlu1 %v8552_v18, %s7156_s16 }
 0x3d6   : > { %3204 = vmatprep.subr.mxu1 %v3087_v14  ;;  %v3073_v14 = vsel %vm1540_vm3, %v8434_v33, %v8458_v54  ;;  %v3048_v54 = vsel %vm1540_vm3, %v8412_v40, %v8494_v3 }
 0x3d7   : > { %3205 = vmatpush1.msra.mxu1 %v3086_v62  ;;  %v8572_v10 = vpop.permute.xlu0 %2803  ;;  %v8577_v51 = vpop.permute.xlu1 %2997 }
 0x3d8   : > { %3206 = vmatprep.subr.mxu1 %v3074_v2  ;;  %v3060_v2 = vsel %vm1540_vm3, %v8405_v56, %v8425_v1  ;;  %v2598_v62 = vpop.f32.mrf.mxu0  ;;  %v2867_v56 = vsel %vm1373_vm2, %v8483_v6, %v8572_v10  ;;  %v2840_v6 = vsel %vm1373_vm2, %v8414_v39, %v8436_v42 }
 0x3d9   : > { %3207 = vmatpush1.msra.mxu1 %v3073_v14  ;;  %2819 = vrot.lane.b32.xlu0 %v8540_v60, %s7157_s24  ;;  %v3047_v14 = vsel %vm1540_vm3, %v8393_v22, %v8412_v40  ;;  %v2599_v1 = vadd.f32 %v2598_v62, %v8179_v28  ;;  %v2854_v40 = vsel %vm1373_vm2, %v8468_v4, %v8558_v38 }
 0x3da   : > { %2985 = vrot.lane.b32.xlu1 %v8579_v34, %s7156_s16  ;;  %3208 = vmatprep.subr.mxu1 %v3061_v61  ;;  %v8627_v61 = vmax.f32 %v2506_v24, 0.0 }
 0x3db   : > { %3209 = vmatpush1.msra.mxu1 %v3060_v2  ;;  %v8598_v33 = vpop.permute.xlu0 %3025  ;;  %v8603_v8 = vpop.permute.xlu1 %2777  ;;  %v2853_v2 = vsel %vm1373_vm2, %v8446_v55, %v8468_v4  ;;  %v8642_v24 = vmax.f32 %v2599_v1, 0.0  ;;  %v2828_v55 = vsel %vm1373_vm2, %v8423_v59, %v8506_v19  ;;  %v8709_v1 = vld [vmem:[#allocation6 + $0x10] sm:$0xff] }
 0x3dc   : > { %3210 = vmatprep.subr.mxu1 %v3048_v54  ;;  %v2511_v54 = vpop.f32.mrf.mxu1 }
 0x3dd   : > { %3211 = vmatpush1.msra.mxu1 %v3047_v14  ;;  %3015 = vrot.lane.b32.xlu0 %v8596_v27, %s7156_s16  ;;  %v2512_v14 = vadd.f32 %v2511_v54, %v8179_v28 }
 0x3de   : > { %2817 = vrot.lane.b32.xlu1 %v8552_v18, %s7157_s24  ;;  %3212 = vmatprep.subr.mxu1 %v2867_v56  ;;  %v2827_v56 = vsel %vm1373_vm2, %v8403_v52, %v8423_v59  ;;  %v8679_v52 = vld [vmem:[#allocation6] sm:$0xff] }
 0x3df   : > { %3213 = vmatpush1.msra.mxu1 %v2866_v11  ;;  %v8620_v22 = vpop.permute.xlu0 %2805  ;;  %v8625_v21 = vpop.permute.xlu1 %2945  ;;  %v8665_v11 = vmax.f32 %v2512_v14, 0.0 }
 0x3e0   : > { %3214 = vmatprep.subr.mxu1 %v2854_v40  ;;  %v2600_v40 = vpop.f32.mrf.mxu0 }
 0x3e1   : > { %3215 = vmatpush1.msra.mxu1 %v2853_v2  ;;  %2795 = vrot.lane.b32.xlu0 %v8596_v27, %s7157_s24  ;;  %v3159_v27 = vld [vmem:[%s11066_s6] sm:$0xff] }
 0x3e2   : > { %3013 = vrot.lane.b32.xlu1 %v8627_v61, %s7156_s16  ;;  %3216 = vmatprep.subr.mxu1 %v2841_v35  ;;  %v8726_v35 = vld [vmem:[#allocation6 + $0x18] sm:$0xff] }
 0x3e3   : > { %3217 = vmatpush1.msra.mxu1 %v2840_v6  ;;  %v8644_v4 = vpop.permute.xlu0 %2999  ;;  %v8649_v62 = vpop.permute.xlu1 %2725  ;;  %v2601_v6 = vadd.f32 %v2600_v40, %v8179_v28  ;;  %v2589_v28 = vadd.f32 %v8546_v48, %v8188_v5 }
 0x3e4   : > { %3218 = vmatprep.subr.mxu1 %v2828_v55 }
 0x3e5   : > { %3219 = vmatpush1.msra.mxu1 %v2827_v56  ;;  %3043 = vrot.lane.b32.xlu0 %v8642_v24, %s7156_s16  ;;  %v8744_v14 = vmax.f32 %v2601_v6, 0.0  ;;  %v8754_v40 = vmax.f32 %v2589_v28, 0.0 }
 0x3e6   : > { %2793 = vrot.lane.b32.xlu1 %v8627_v61, %s7157_s24  ;;  %3220 = vmatprep.subr.mxu1 %v8235_v45 }
 0x3e7   : > { %3221 = vmatpush1.msra.mxu1 %v8222_v15  ;;  %v8661_v39 = vpop.permute.xlu0 %2779  ;;  %v8663_v42 = vpop.permute.xlu1 %2971 }
 0x3e8   : > { %3222 = vmatprep.subr.mxu1 %v8228_v31  ;;  %v8694_v31 = vld [vmem:[#allocation6 + $0x8] sm:$0xff] }
 0x3e9   : > { %3223 = vmatpush1.msra.mxu1 %v8214_v46  ;;  %2735 = vrot.lane.b32.xlu0 %v8444_v58, %s7157_s24  ;;  %v11210_v46 = vmov 0.0  }
 0x3ea   : > { %3041 = vrot.lane.b32.xlu1 %v8665_v11, %s7156_s16  ;;  %3224 = vmatprep.subr.mxu1 %v8207_v13 }
 0x3eb   : > { %3225 = vmatpush1.msra.mxu1 %v8194_v36  ;;  %v8675_v15 = vpop.permute.xlu0 %2947  ;;  %v8677_v45 = vpop.permute.xlu1 %2751 }
 0x3ec   : > { %3226 = vmatprep.subr.mxu1 %v8200_v50 }
 0x3ed   : > { %3227 = vmatpush1.msra.mxu1 %v8186_v26  ;;  %2823 = vrot.lane.b32.xlu0 %v8642_v24, %s7157_s24  ;;  %v2595_v26 = vadd.f32 %v8581_v53, %v8181_v23  ;;  %v2583_v23 = vadd.f32 %v8521_v44, %v8183_v41 }
 0x3ee   : > { %2733 = vrot.lane.b32.xlu1 %v8476_v29, %s7157_s24  ;;  %6783 = vmatmul.mubr.msk.f32.vlgmr.msra.gmra.mxu1 %vm3183_vm5, %v8679_v52 }
 0x3ef   : > { %v8689_v36 = vpop.permute.xlu0 %2727  ;;  %v8691_v13 = vpop.permute.xlu1 %2973  ;;  %3266 = vmatprep.mubr.f32.mxu1 %v11210_v46  ;;  %v8719_v53 = vmax.f32 %v2595_v26, 0.0  ;;  %v8735_v41 = vmax.f32 %v2583_v23, 0.0  ;;  %v3161_v23 = vld [vmem:[%s11066_s6 + $0x10] sm:$0xff] }
 0x3f1   : > { %2767 = vrot.lane.b32.xlu0 %v8554_v16, %s7157_s24  ;;  %11211 = vst [vmem:[#allocation46_spill] sm:$0xff] %v8719_v53  ;;  %11212 = vst [vmem:[#allocation47_spill] sm:$0xff] %v8735_v41  ;;  %v3088_v16 = vsel %vm1540_vm3, %v8556_v17, %v8598_v33  ;;  %v3075_v17 = vsel %vm1540_vm3, %v8544_v20, %v8577_v51 }
 0x3f2   : > { %2821 = vrot.lane.b32.xlu1 %v8665_v11, %s7157_s24  ;;  %6784 = vmatmul.mubr.msk.f32.gmra.mxu1 %vm3183_vm5, %v8694_v31 }
 0x3f3   : > { %v8704_v50 = vpop.permute.xlu0 %2975  ;;  %v8706_v59 = vpop.permute.xlu1 %2753  ;;  %3272 = vmatprep.mubr.f32.mxu1 %v11210_v46 }
 0x3f5   : > { %2739 = vrot.lane.b32.xlu0 %v8515_v63, %s7157_s24 }
 0x3f6   : > { %2765 = vrot.lane.b32.xlu1 %v8579_v34, %s7157_s24  ;;  %6785 = vmatmul.mubr.msk.f32.gmra.mxu1 %vm3183_vm5, %v8709_v1 }
 0x3f7   : > { %v8721_v2 = vpop.permute.xlu0 %2755  ;;  %v8723_v54 = vpop.permute.xlu1 %3001  ;;  %3278 = vmatprep.mubr.f32.mxu1 %v11210_v46 }
 0x3f9   : > { %3017 = vrot.lane.b32.xlu0 %v8719_v53, %s7156_s16 }
 0x3fa   : > { %2737 = vrot.lane.b32.xlu1 %v8527_v57, %s7157_s24  ;;  %6786 = vmatmul.mubr.msk.f32.gmra.mxu1 %vm3183_vm5, %v8726_v35 }
 0x3fb   : > { %v8737_v44 = vpop.permute.xlu0 %3003  ;;  %v8739_v55 = vpop.permute.xlu1 %2949  ;;  %3438 = vmatprep.mubr.f32.mxu1 %v11210_v46 }
 0x3fd   : > { %2961 = vrot.lane.b32.xlu0 %v8735_v41, %s7156_s16 }
 0x3fe   : > { %3045 = vrot.lane.b32.xlu1 %v8744_v14, %s7156_s16 }
 0x3ff   : > { %v8750_v56 = vpop.permute.xlu0 %2783  ;;  %v8752_v26 = vpop.permute.xlu1 %2781 }
 0x401   : > { %2797 = vrot.lane.b32.xlu0 %v8719_v53, %s7157_s24 }
 0x402   : > { %2989 = vrot.lane.b32.xlu1 %v8754_v40, %s7156_s16 }
 0x403   : > { %v8760_v5 = vpop.permute.xlu0 %3031  ;;  %v8762_v48 = vpop.permute.xlu1 %2729 }
 0x405   : > { %2741 = vrot.lane.b32.xlu0 %v8735_v41, %s7157_s24  ;;  %v3076_v41 = vsel %vm1540_vm3, %v8577_v51, %v8644_v4  ;;  %v3050_v51 = vsel %vm1540_vm3, %v8519_v0, %v8530_v25 }
 0x406   : > { %2825 = vrot.lane.b32.xlu1 %v8744_v14, %s7157_s24 }
 0x407   : > { %v8771_v6 = vpop.permute.xlu0 %2811  ;;  %v3028_v28 = vpop.permute.xlu1 %3027 }
 0x408   : > { %v3089_v63 = vsel %vm1540_vm3, %v8598_v33, %v3028_v28  ;;  %v3063_v33 = vsel %vm1540_vm3, %v8504_v49, %v8663_v42 }
 0x409   : > { %3175 = vperm.xlu0 %6964, %v3161_v23   ;;  %3293 = vmatprep.subr.mxu0 %v3089_v63 }
 0x40a   : > { %2769 = vrot.lane.b32.xlu1 %v8754_v40, %s7157_s24  ;;  %3294 = vmatpush1.msra.mxu0 %v3088_v16  ;;  %v3162_v16 = vld [vmem:[%s11066_s6 + $0x18] sm:$0xff] }
 0x40b   : > { %v8786_v53 = vpop.permute.xlu0 %2951  ;;  %3295 = vmatprep.subr.mxu0 %v3076_v41  ;;  %v2808_v63 = vpop.permute.xlu1 %2807  ;;  %v3062_v41 = vsel %vm1540_vm3, %v8481_v32, %v8504_v49 }
 0x40c   : > { %3296 = vmatpush1.msra.mxu0 %v3075_v17  ;;  %v3049_v17 = vsel %vm1540_vm3, %v8494_v3, %v8519_v0  ;;  %v2869_v32 = vsel %vm1373_vm2, %v8620_v22, %v2808_v63  ;;  %v2856_v3 = vsel %vm1373_vm2, %v8603_v8, %v8661_v39 }
 0x40d   : > { %3165 = vperm.xlu0 %6964, %v3159_v27   ;;  %3297 = vmatprep.subr.mxu0 %v3063_v33  ;;  %v3160_v27 = vld [vmem:[%s11066_s6 + $0x8] sm:$0xff]  ;;  %v2868_v33 = vsel %vm1373_vm2, %v8572_v10, %v8620_v22  ;;  %v2855_v10 = vsel %vm1373_vm2, %v8558_v38, %v8603_v8  ;;  %v3077_v22 = vsel %vm1540_vm3, %v8644_v4, %v8723_v54 }
 0x40e   : > { %3180 = vperm.xlu1 %6963, %v3162_v16   ;;  %3298 = vmatpush1.msra.mxu0 %v3062_v41  ;;  %v2842_v38 = vsel %vm1373_vm2, %v8492_v9, %v8517_v37  ;;  %v3064_v8 = vsel %vm1540_vm3, %v8663_v42, %v8691_v13  ;;  %v2830_v4 = vsel %vm1373_vm2, %v8532_v47, %v8542_v7 }
 0x40f   : > { %v8803_v20 = vpop.permute.xlu0 %2731  ;;  %3299 = vmatprep.subr.mxu0 %v3050_v51  ;;  %v3030_v23 = vpop.permute.xlu1 %3029  ;;  %v2843_v51 = vsel %vm1373_vm2, %v8517_v37, %v8677_v45  ;;  %v2829_v9 = vsel %vm1373_vm2, %v8506_v19, %v8532_v47  ;;  %v3051_v37 = vsel %vm1540_vm3, %v8530_v25, %v8625_v21  ;;  %v2858_v19 = vsel %vm1373_vm2, %v8752_v26, %v8750_v56  ;;  %v11213_v47 = vld [vmem:[#allocation19_spill] sm:$0xff] }
 0x410   : > { %3300 = vmatpush1.msra.mxu0 %v3049_v17  ;;  %v3091_v49 = vsel %vm1540_vm3, %v3030_v23, %v8760_v5  ;;  %v3090_v16 = vsel %vm1540_vm3, %v3028_v28, %v3030_v23  ;;  %v3078_v28 = vsel %vm1540_vm3, %v8723_v54, %v8737_v44  ;;  %v3065_v23 = vsel %vm1540_vm3, %v8691_v13, %v8704_v50 }
 0x411   : > { %3301 = vmatprep.subr.mxu0 %v2869_v32  ;;  %3382 = vmatprep.subr.mxu1 %v3091_v49  ;;  %v3052_v17 = vsel %vm1540_vm3, %v8625_v21, %v8675_v15  ;;  %v11215_v21 = vld [vmem:[#allocation14_spill] sm:$0xff] }
 0x412   : > { %3170 = vperm.xlu1 %6963, %v3160_v27   ;;  %3302 = vmatpush1.msra.mxu0 %v2868_v33  ;;  %v11217_v33 = vld [vmem:[#allocation15_spill] sm:$0xff] }
 0x413   : > { %3383 = vmatpush1.msra.mxu1 %v3090_v16  ;;  %v8822_v0 = vpop.permute.xlu0 %2979  ;;  %3303 = vmatprep.subr.mxu0 %v2856_v3  ;;  %v8827_v41 = vpop.permute.xlu1 %2977  ;;  %v11216_v16 = vld [vmem:[#allocation17_spill] sm:$0xff]  ;;  %v2831_v3 = vsel %vm1373_vm2, %v8542_v7, %v8649_v62  ;;  %v11222_v7 = vld [vmem:[#allocation24_spill] sm:$0xff] }
 0x414   : > { %3384 = vmatprep.subr.mxu1 %v3078_v28  ;;  %3304 = vmatpush1.msra.mxu0 %v2855_v10 }
 0x415   : > { %3385 = vmatpush1.msra.mxu1 %v3077_v22  ;;  %3305 = vmatprep.subr.mxu0 %v2843_v51  ;;  %v11220_v22 = vld [vmem:[#allocation26_spill] sm:$0xff]  ;;  %v11221_v51 = vld [vmem:[#allocation21_spill] sm:$0xff] }
 0x416   : > { %3386 = vmatprep.subr.mxu1 %v3065_v23  ;;  %3306 = vmatpush1.msra.mxu0 %v2842_v38 }
 0x417   : > { %3387 = vmatpush1.msra.mxu1 %v3064_v8  ;;  %v8850_v54 = vpop.permute.xlu0 %2759  ;;  %3307 = vmatprep.subr.mxu0 %v2830_v4  ;;  %v2810_v27 = vpop.permute.xlu1 %2809  ;;  %v11224_v8 = vld [vmem:[#allocation20_spill] sm:$0xff] }
 0x418   : > { %3388 = vmatprep.subr.mxu1 %v3052_v17  ;;  %3308 = vmatpush1.msra.mxu0 %v2829_v9  ;;  %v2871_v42 = vsel %vm1373_vm2, %v2810_v27, %v8771_v6  ;;  %v2870_v13 = vsel %vm1373_vm2, %v2808_v63, %v2810_v27  ;;  %v2844_v63 = vsel %vm1373_vm2, %v8677_v45, %v8706_v59  ;;  %v11218_v45 = vld [vmem:[#allocation32_spill] sm:$0xff]  ;;  %v11225_v27 = vld [vmem:[#allocation18_spill] sm:$0xff] }
 0x419   : > { %3389 = vmatpush1.msra.mxu1 %v3051_v37  ;;  %3309 = vmatprep.subr.mxu0 %v8298_v30  ;;  %v2857_v30 = vsel %vm1373_vm2, %v8661_v39, %v8752_v26  ;;  %v2832_v39 = vsel %vm1373_vm2, %v8649_v62, %v8689_v36  ;;  %v11223_v62 = vld [vmem:[#allocation22_spill] sm:$0xff] }
 0x41a   : > { %3390 = vmatprep.subr.mxu1 %v2871_v42  ;;  %3310 = vmatpush1.msra.mxu0 %v8285_v12  ;;  %v11214_v12 = vld [vmem:[#allocation16_spill] sm:$0xff] }
 0x41b   : > { %3391 = vmatpush1.msra.mxu1 %v2870_v13  ;;  %v8866_v32 = vpop.permute.xlu0 %3007  ;;  %3311 = vmatprep.subr.mxu0 %v8291_v43  ;;  %v8872_v25 = vpop.permute.xlu1 %2757  ;;  %v2845_v43 = vsel %vm1373_vm2, %v8706_v59, %v8721_v2  ;;  %v11219_v59 = vld [vmem:[#allocation30_spill] sm:$0xff]  ;;  %v3067_v13 = vsel %vm1540_vm3, %v8827_v41, %v8822_v0 }
 0x41c   : > { %3392 = vmatprep.subr.mxu1 %v2858_v19  ;;  %3312 = vmatpush1.msra.mxu0 %v11213_v47  ;;  %v3066_v19 = vsel %vm1540_vm3, %v8704_v50, %v8827_v41 }
 0x41d   : > { %3393 = vmatpush1.msra.mxu1 %v2857_v30  ;;  %3313 = vmatprep.subr.mxu0 %v11214_v12  ;;  %v3053_v12 = vsel %vm1540_vm3, %v8675_v15, %v8739_v55 }
 0x41e   : > { %3394 = vmatprep.subr.mxu1 %v2845_v43  ;;  %3314 = vmatpush1.msra.mxu0 %v11215_v21 }
 0x41f   : > { %3395 = vmatpush1.msra.mxu1 %v2844_v63  ;;  %v8886_v49 = vpop.permute.xlu0 %2787  ;;  %3315 = vmatprep.subr.mxu0 %v11216_v16  ;;  %v3006_v26 = vpop.permute.xlu1 %3005  ;;  %v2846_v63 = vsel %vm1373_vm2, %v8721_v2, %v8872_v25 }
 0x420   : > { %3396 = vmatprep.subr.mxu1 %v2832_v39  ;;  %3316 = vmatpush1.msra.mxu0 %v11217_v33  ;;  %v3080_v37 = vsel %vm1540_vm3, %v3006_v26, %v8866_v32  ;;  %v11226_v33 = vld [vmem:[#allocation37_spill] sm:$0xff] }
 0x421   : > { %3397 = vmatpush1.msra.mxu1 %v2831_v3  ;;  %6787 = vmatmul.mubr.msk.f32.vlgmr.msra.gmra.mxu0 %vm3183_vm5, %v8679_v52  ;;  %v11227_v3 = vld [vmem:[#allocation29_spill] sm:$0xff] }
 0x422   : > { %3398 = vmatprep.subr.mxu1 %v11218_v45  ;;  %3355 = vmatprep.mubr.f32.mxu0 %v11210_v46  ;;  %v11228_v45 = vld [vmem:[#allocation36_spill] sm:$0xff] }
 0x423   : > { %3399 = vmatpush1.msra.mxu1 %v11219_v59  ;;  %v8901_v28 = vpop.permute.xlu0 %2955  ;;  %v2786_v10 = vpop.permute.xlu1 %2785  ;;  %v11229_v59 = vld [vmem:[#allocation28_spill] sm:$0xff] }
 0x424   : > { %3400 = vmatprep.subr.mxu1 %v11220_v22  ;;  %v2860_v15 = vsel %vm1373_vm2, %v2786_v10, %v8886_v49 }
 0x425   : > { %3401 = vmatpush1.msra.mxu1 %v11221_v51  ;;  %6788 = vmatmul.mubr.msk.f32.gmra.mxu0 %vm3183_vm5, %v8694_v31 }
 0x426   : > { %3402 = vmatprep.subr.mxu1 %v11222_v7  ;;  %3361 = vmatprep.mubr.f32.mxu0 %v11210_v46  ;;  %v11231_v7 = vld [vmem:[#allocation25_spill] sm:$0xff] }
 0x427   : > { %3403 = vmatpush1.msra.mxu1 %v11223_v62  ;;  %v8910_v23 = vpop.permute.xlu0 %3035  ;;  %v3034_v38 = vpop.permute.xlu1 %3033 }
 0x428   : > { %3404 = vmatprep.subr.mxu1 %v11224_v8  ;;  %v3093_v4 = vsel %vm1540_vm3, %v3034_v38, %v8910_v23  ;;  %v3092_v17 = vsel %vm1540_vm3, %v8760_v5, %v3034_v38  ;;  %v3079_v5 = vsel %vm1540_vm3, %v8737_v44, %v3006_v26  ;;  %v3054_v44 = vsel %vm1540_vm3, %v8739_v55, %v8786_v53 }
 0x429   : > { %3405 = vmatpush1.msra.mxu1 %v11225_v27  ;;  %6789 = vmatmul.mubr.msk.f32.gmra.mxu0 %vm3183_vm5, %v8709_v1  ;;  %v2859_v55 = vsel %vm1373_vm2, %v8750_v56, %v2786_v10  ;;  %v2834_v56 = vsel %vm1373_vm2, %v8762_v48, %v8803_v20  ;;  %v2833_v26 = vsel %vm1373_vm2, %v8689_v36, %v8762_v48  ;;  %v11230_v10 = vld [vmem:[#allocation33_spill] sm:$0xff]  ;;  %v11232_v36 = vld [vmem:[#allocation27_spill] sm:$0xff] }
 0x42a   : > { %6791 = vmatmul.mubr.msk.f32.vlgmr.msra.gmra.mxu1 %vm3183_vm5, %v8679_v52  ;;  %3471 = vmatprep.subr.mxu0 %v3093_v4  ;;  %v11233_v48 = vld [vmem:[#allocation23_spill] sm:$0xff] }
 0x42b   : > { %3472 = vmatpush1.msra.mxu0 %v3092_v17  ;;  %v8922_v9 = vpop.permute.xlu0 %2815  ;;  %v2814_v42 = vpop.permute.xlu1 %2813  ;;  %3367 = vmatprep.mubr.f32.mxu0 %v11210_v46 }
 0x42c   : > { %3473 = vmatprep.subr.mxu0 %v3080_v37  ;;  %3444 = vmatprep.mubr.f32.mxu1 %v11210_v46  ;;  %v2873_v50 = vsel %vm1373_vm2, %v2814_v42, %v8922_v9  ;;  %v2872_v41 = vsel %vm1373_vm2, %v8771_v6, %v2814_v42  ;;  %v2847_v6 = vsel %vm1373_vm2, %v8872_v25, %v8850_v54 }
 0x42d   : > { %3474 = vmatpush1.msra.mxu0 %v3079_v5 }
 0x42e   : > { %6790 = vmatmul.mubr.msk.f32.gmra.mxu0 %vm3183_vm5, %v8726_v35  ;;  %6792 = vmatmul.mubr.msk.f32.gmra.mxu1 %vm3183_vm5, %v8694_v31 }
 0x42f   : > { %3475 = vmatprep.subr.mxu0 %v3067_v13  ;;  %v8940_v47 = vpop.permute.xlu0 %2983  ;;  %v8942_v30 = vpop.permute.xlu1 %2953  ;;  %3450 = vmatprep.mubr.f32.mxu1 %v11210_v46 }
 0x430   : > { %3476 = vmatpush1.msra.mxu0 %v3066_v19  ;;  %3527 = vmatprep.mubr.f32.mxu0 %v11210_v46 }
 0x431   : > { %3477 = vmatprep.subr.mxu0 %v3054_v44  ;;  %v3056_v44 = vsel %vm1540_vm3, %v8942_v30, %v8901_v28 }
 0x432   : > { %3478 = vmatpush1.msra.mxu0 %v3053_v12  ;;  %6793 = vmatmul.mubr.msk.f32.gmra.mxu1 %vm3183_vm5, %v8709_v1  ;;  %v3055_v12 = vsel %vm1540_vm3, %v8786_v53, %v8942_v30 }
 0x433   : > { %3479 = vmatprep.subr.mxu0 %v2873_v50  ;;  %v8958_v43 = vpop.permute.xlu0 %2763  ;;  %v2982_v21 = vpop.permute.xlu1 %2981  ;;  %3456 = vmatprep.mubr.f32.mxu1 %v11210_v46 }
 0x434   : > { %3480 = vmatpush1.msra.mxu0 %v2872_v41  ;;  %v3068_v19 = vsel %vm1540_vm3, %v8822_v0, %v2982_v21 }
 0x435   : > { %3481 = vmatprep.subr.mxu0 %v2860_v15 }
 0x436   : > { %3482 = vmatpush1.msra.mxu0 %v2859_v55  ;;  %6794 = vmatmul.mubr.msk.f32.gmra.mxu1 %vm3183_vm5, %v8726_v35 }
 0x437   : > { %3483 = vmatprep.subr.mxu0 %v2847_v6  ;;  %v8973_v16 = vpop.permute.xlu0 %3011  ;;  %v8975_v39 = vpop.permute.xlu1 %2761  ;;  %3616 = vmatprep.mubr.f32.mxu1 %v11210_v46 }
 0x438   : > { %3484 = vmatpush1.msra.mxu0 %v2846_v63  ;;  %v2849_v30 = vsel %vm1373_vm2, %v8975_v39, %v8958_v43 }
 0x439   : > { %3485 = vmatprep.subr.mxu0 %v2834_v56 }
 0x43a   : > { %3486 = vmatpush1.msra.mxu0 %v2833_v26 }
 0x43b   : > { %3487 = vmatprep.subr.mxu0 %v11226_v33  ;;  %v8985_v2 = vpop.permute.xlu0 %2959  ;;  %v3010_v25 = vpop.permute.xlu1 %3009 }
 0x43c   : > { %3488 = vmatpush1.msra.mxu0 %v11227_v3  ;;  %v3082_v37 = vsel %vm1540_vm3, %v3010_v25, %v8973_v16  ;;  %v3081_v5 = vsel %vm1540_vm3, %v8866_v32, %v3010_v25 }
 0x43d   : > { %3489 = vmatprep.subr.mxu0 %v11228_v45 }
 0x43e   : > { %3490 = vmatpush1.msra.mxu0 %v11229_v59 }
 0x43f   : > { %3491 = vmatprep.subr.mxu0 %v11230_v10  ;;  %v8991_v22 = vpop.permute.xlu0 %2791  ;;  %v8993_v51 = vpop.permute.xlu1 %2957 }
 0x440   : > { %3492 = vmatpush1.msra.mxu0 %v11231_v7 }
 0x441   : > { %3493 = vmatprep.subr.mxu0 %v11232_v36 }
 0x442   : > { %3494 = vmatpush1.msra.mxu0 %v11233_v48 }
 0x443   : > { %6795 = vmatmul.mubr.msk.f32.vlgmr.msra.gmra.mxu0 %vm3183_vm5, %v8679_v52  ;;  %v3040_v62 = vpop.permute.xlu0 %3039  ;;  %v2790_v38 = vpop.permute.xlu1 %2789 }
 0x444   : > { %3533 = vmatprep.mubr.f32.mxu0 %v11210_v46  ;;  %v2862_v15 = vsel %vm1373_vm2, %v2790_v38, %v8991_v22  ;;  %v2861_v53 = vsel %vm1373_vm2, %v8886_v49, %v2790_v38 }
 0x447   : > { %6796 = vmatmul.mubr.msk.f32.gmra.mxu0 %vm3183_vm5, %v8694_v31  ;;  %v9003_v8 = vpop.permute.xlu0 %2987  ;;  %v3038_v4 = vpop.permute.xlu1 %3037 }
 0x448   : > { %3539 = vmatprep.mubr.f32.mxu0 %v11210_v46  ;;  %v3095_v17 = vsel %vm1540_vm3, %v3038_v4, %v3040_v62  ;;  %v3094_v27 = vsel %vm1540_vm3, %v8910_v23, %v3038_v4  ;;  %v3069_v23 = vsel %vm1540_vm3, %v2982_v21, %v8940_v47  ;;  %v11235_v4 = vld [vmem:[#allocation42_spill] sm:$0xff] }
 0x449   : > { %3560 = vmatprep.subr.mxu1 %v3095_v17  ;;  %v11236_v17 = vld [vmem:[#allocation35_spill] sm:$0xff] }
 0x44a   : > { %3561 = vmatpush1.msra.mxu1 %v3094_v27 }
 0x44b   : > { %6797 = vmatmul.mubr.msk.f32.gmra.mxu0 %vm3183_vm5, %v8709_v1  ;;  %v9013_v42 = vpop.permute.xlu0 %2819  ;;  %3562 = vmatprep.subr.mxu1 %v3082_v37 }
 0x44c   : > { %v2986_v13 = vpop.permute.xlu1 %2985  ;;  %3545 = vmatprep.mubr.f32.mxu0 %v11210_v46  ;;  %3563 = vmatpush1.msra.mxu1 %v3081_v5  ;;  %v11238_v5 = vld [vmem:[#allocation34_spill] sm:$0xff] }
 0x44d   : > { %3564 = vmatprep.subr.mxu1 %v3069_v23  ;;  %v3071_v59 = vsel %vm1540_vm3, %v2986_v13, %v9003_v8  ;;  %v3070_v7 = vsel %vm1540_vm3, %v8940_v47, %v2986_v13  ;;  %v11239_v23 = vld [vmem:[#allocation31_spill] sm:$0xff] }
 0x44e   : > { %3565 = vmatpush1.msra.mxu1 %v3068_v19 }
 0x44f   : > { %6798 = vmatmul.mubr.msk.f32.gmra.mxu0 %vm3183_vm5, %v8726_v35  ;;  %v9027_v32 = vpop.permute.xlu0 %3015  ;;  %3566 = vmatprep.subr.mxu1 %v3056_v44 }
 0x450   : > { %v2818_v50 = vpop.permute.xlu1 %2817  ;;  %3567 = vmatpush1.msra.mxu1 %v3055_v12  ;;  %3705 = vmatprep.mubr.f32.mxu0 %v11210_v46 }
 0x451   : > { %v2875_v0 = vsel %vm1373_vm2, %v2818_v50, %v9013_v42  ;;  %v2874_v41 = vsel %vm1373_vm2, %v8922_v9, %v2818_v50  ;;  %v2848_v9 = vsel %vm1373_vm2, %v8850_v54, %v8975_v39 }
 0x452   : > { %3568 = vmatprep.subr.mxu1 %v2875_v0  ;;  %v11240_v0 = vld [vmem:[#allocation41_spill] sm:$0xff] }
 0x453   : > { %3569 = vmatpush1.msra.mxu1 %v2874_v41  ;;  %v9037_v21 = vpop.permute.xlu0 %2795 }
 0x454   : > { %3570 = vmatprep.subr.mxu1 %v2862_v15  ;;  %v3014_v55 = vpop.permute.xlu1 %3013 }
 0x455   : > { %3571 = vmatpush1.msra.mxu1 %v2861_v53  ;;  %v3084_v3 = vsel %vm1540_vm3, %v3014_v55, %v9027_v32  ;;  %v3083_v39 = vsel %vm1540_vm3, %v8973_v16, %v3014_v55  ;;  %v3058_v16 = vsel %vm1540_vm3, %v8993_v51, %v8985_v2 }
 0x456   : > { %3572 = vmatprep.subr.mxu1 %v2849_v30  ;;  %v11243_v30 = vld [vmem:[#allocation45_spill] sm:$0xff] }
 0x457   : > { %3573 = vmatpush1.msra.mxu1 %v2848_v9  ;;  %v9049_v6 = vpop.permute.xlu0 %3043  ;;  %v11244_v9 = vld [vmem:[#allocation44_spill] sm:$0xff] }
 0x458   : > { %v2794_v63 = vpop.permute.xlu1 %2793 }
 0x459   : > { %v2863_v37 = vsel %vm1373_vm2, %v8991_v22, %v2794_v63 }
 0x45b   : > { %v2736_v56 = vpop.permute.xlu0 %2735 }
 0x45c   : > { %v3042_v26 = vpop.permute.xlu1 %3041 }
 0x45d   : > { %v3097_v33 = vsel %vm1540_vm3, %v3042_v26, %v9049_v6  ;;  %v3096_v49 = vsel %vm1540_vm3, %v3040_v62, %v3042_v26  ;;  %v11234_v62 = vld [vmem:[#allocation38_spill] sm:$0xff] }
 0x45e   : > { %3649 = vmatprep.subr.mxu0 %v3097_v33 }
 0x45f   : > { %3650 = vmatpush1.msra.mxu0 %v3096_v49  ;;  %v9054_v25 = vpop.permute.xlu0 %2823 }
 0x460   : > { %3651 = vmatprep.subr.mxu0 %v3084_v3  ;;  %v2734_v54 = vpop.permute.xlu1 %2733 }
 0x461   : > { %3652 = vmatpush1.msra.mxu0 %v3083_v39  ;;  %v2836_v45 = vsel %vm1373_vm2, %v2734_v54, %v2736_v56  ;;  %v2835_v10 = vsel %vm1373_vm2, %v8803_v20, %v2734_v54  ;;  %v3057_v20 = vsel %vm1540_vm3, %v8901_v28, %v8993_v51  ;;  %v2864_v28 = vsel %vm1373_vm2, %v2794_v63, %v9037_v21  ;;  %v11237_v51 = vld [vmem:[#allocation40_spill] sm:$0xff] }
 0x462   : > { %3574 = vmatprep.subr.mxu1 %v2836_v45  ;;  %3653 = vmatprep.subr.mxu0 %v3071_v59 }
 0x463   : > { %3575 = vmatpush1.msra.mxu1 %v2835_v10  ;;  %3654 = vmatpush1.msra.mxu0 %v3070_v7  ;;  %v9067_v36 = vpop.permute.xlu0 %2767 }
 0x464   : > { %3576 = vmatprep.subr.mxu1 %v8552_v18  ;;  %3655 = vmatprep.subr.mxu0 %v3058_v16  ;;  %v2822_v48 = vpop.permute.xlu1 %2821 }
 0x465   : > { %3577 = vmatpush1.msra.mxu1 %v11234_v62  ;;  %3656 = vmatpush1.msra.mxu0 %v3057_v20  ;;  %v2877_v47 = vsel %vm1373_vm2, %v2822_v48, %v9054_v25  ;;  %v2876_v38 = vsel %vm1373_vm2, %v9013_v42, %v2822_v48 }
 0x466   : > { %3578 = vmatprep.subr.mxu1 %v11235_v4  ;;  %3657 = vmatprep.subr.mxu0 %v2877_v47 }
 0x467   : > { %3579 = vmatpush1.msra.mxu1 %v11236_v17  ;;  %3658 = vmatpush1.msra.mxu0 %v2876_v38  ;;  %v9083_v18 = vpop.permute.xlu0 %2739 }
 0x468   : > { %3580 = vmatprep.subr.mxu1 %v11237_v51  ;;  %3659 = vmatprep.subr.mxu0 %v2864_v28  ;;  %v2766_v27 = vpop.permute.xlu1 %2765 }
 0x469   : > { %3581 = vmatpush1.msra.mxu1 %v11238_v5  ;;  %3660 = vmatpush1.msra.mxu0 %v2863_v37  ;;  %v2851_v42 = vsel %vm1373_vm2, %v2766_v27, %v9067_v36  ;;  %v2850_v13 = vsel %vm1373_vm2, %v8958_v43, %v2766_v27 }
 0x46a   : > { %3582 = vmatprep.subr.mxu1 %v8476_v29  ;;  %3661 = vmatprep.subr.mxu0 %v2851_v42 }
 0x46b   : > { %3583 = vmatpush1.msra.mxu1 %v11239_v23  ;;  %3662 = vmatpush1.msra.mxu0 %v2850_v13  ;;  %v3018_v19 = vpop.permute.xlu0 %3017 }
 0x46c   : > { %6799 = vmatmul.mubr.msk.f32.vlgmr.msra.gmra.mxu1 %vm3183_vm5, %v8679_v52  ;;  %v2738_v22 = vpop.permute.xlu1 %2737 }
 0x46d   : > { %v2838_v44 = vsel %vm1373_vm2, %v2738_v22, %v9083_v18  ;;  %3622 = vmatprep.mubr.f32.mxu1 %v11210_v46  ;;  %v2837_v12 = vsel %vm1373_vm2, %v2736_v56, %v2738_v22 }
 0x46e   : > { %3663 = vmatprep.subr.mxu0 %v2838_v44 }
 0x46f   : > { %3664 = vmatpush1.msra.mxu0 %v2837_v12  ;;  %v2962_v50 = vpop.permute.xlu0 %2961 }
 0x470   : > { %6800 = vmatmul.mubr.msk.f32.gmra.mxu1 %vm3183_vm5, %v8694_v31  ;;  %3665 = vmatprep.subr.mxu0 %v8665_v11  ;;  %v3046_v29 = vpop.permute.xlu1 %3045  ;;  %v3085_v11 = vsel %vm1540_vm3, %v9027_v32, %v3018_v19 }
 0x471   : > { %3666 = vmatpush1.msra.mxu0 %v8540_v60  ;;  %3738 = vmatprep.subr.mxu1 %v3046_v29  ;;  %v3098_v43 = vsel %vm1540_vm3, %v9049_v6, %v3046_v29  ;;  %v11245_v6 = vld [vmem:[#allocation47_spill] sm:$0xff] }
 0x472   : > { %3667 = vmatprep.subr.mxu0 %v8627_v61  ;;  %3739 = vmatpush1.msra.mxu1 %v3098_v43  ;;  %v11241_v61 = vld [vmem:[#allocation39_spill] sm:$0xff] }
 0x473   : > { %3628 = vmatprep.mubr.f32.mxu1 %v11210_v46  ;;  %3668 = vmatpush1.msra.mxu0 %v11240_v0  ;;  %v2798_v15 = vpop.permute.xlu0 %2797 }
 0x474   : > { %3740 = vmatprep.subr.mxu1 %v3018_v19  ;;  %6801 = vmatmul.mubr.msk.f32.gmra.mxu1 %vm3183_vm5, %v8709_v1  ;;  %v2990_v60 = vpop.permute.xlu1 %2989 }
 0x475   : > { %3669 = vmatprep.subr.mxu0 %v8579_v34  ;;  %3741 = vmatpush1.msra.mxu1 %v3085_v11  ;;  %v3072_v41 = vsel %vm1540_vm3, %v9003_v8, %v2990_v60  ;;  %v3059_v34 = vsel %vm1540_vm3, %v8985_v2, %v2962_v50 }
 0x476   : > { %3670 = vmatpush1.msra.mxu0 %v11241_v61  ;;  %3742 = vmatprep.subr.mxu1 %v2990_v60 }
 0x477   : > { %3671 = vmatprep.subr.mxu0 %v8527_v57  ;;  %3743 = vmatpush1.msra.mxu1 %v3072_v41  ;;  %v2742_v32 = vpop.permute.xlu0 %2741 }
 0x478   : > { %3634 = vmatprep.mubr.f32.mxu1 %v11210_v46  ;;  %3672 = vmatpush1.msra.mxu0 %v8444_v58  ;;  %v2826_v55 = vpop.permute.xlu1 %2825  ;;  %v2865_v58 = vsel %vm1373_vm2, %v9037_v21, %v2798_v15  ;;  %v2839_v53 = vsel %vm1373_vm2, %v9083_v18, %v2742_v32  ;;  %v11242_v21 = vld [vmem:[#allocation46_spill] sm:$0xff] }
 0x479   : > { %3744 = vmatprep.subr.mxu1 %v2962_v50  ;;  %6802 = vmatmul.mubr.msk.f32.gmra.mxu1 %vm3183_vm5, %v8726_v35  ;;  %v2878_v8 = vsel %vm1373_vm2, %v9054_v25, %v2826_v55 }
 0x47a   : > { %6803 = vmatmul.mubr.msk.f32.vlgmr.msra.gmra.mxu0 %vm3183_vm5, %v8679_v52  ;;  %3745 = vmatpush1.msra.mxu1 %v3059_v34 }
 0x47b   : > { %3746 = vmatprep.subr.mxu1 %v2826_v55  ;;  %3711 = vmatprep.mubr.f32.mxu0 %v11210_v46 }
 0x47c   : > { %3747 = vmatpush1.msra.mxu1 %v2878_v8  ;;  %v2770_v57 = vpop.permute.xlu1 %2769  ;;  %3794 = vmatprep.mubr.f32.mxu1 %v11210_v46 }
 0x47d   : > { %3748 = vmatprep.subr.mxu1 %v2798_v15  ;;  %v2852_v2 = vsel %vm1373_vm2, %v9067_v36, %v2770_v57 }
 0x47e   : > { %6804 = vmatmul.mubr.msk.f32.gmra.mxu0 %vm3183_vm5, %v8694_v31  ;;  %3749 = vmatpush1.msra.mxu1 %v2865_v58 }
 0x47f   : > { %3750 = vmatprep.subr.mxu1 %v2770_v57  ;;  %3717 = vmatprep.mubr.f32.mxu0 %v11210_v46 }
 0x480   : > { %3751 = vmatpush1.msra.mxu1 %v2852_v2 }
 0x481   : > { %3752 = vmatprep.subr.mxu1 %v2742_v32 }
 0x482   : > { %6805 = vmatmul.mubr.msk.f32.gmra.mxu0 %vm3183_vm5, %v8709_v1  ;;  %3753 = vmatpush1.msra.mxu1 %v2839_v53 }
 0x483   : > { %3754 = vmatprep.subr.mxu1 %v8744_v14  ;;  %3723 = vmatprep.mubr.f32.mxu0 %v11210_v46  ;;  %v11246_v14 = vld [vmem:[#allocation43_spill] sm:$0xff] }
 0x484   : > { %3755 = vmatpush1.msra.mxu1 %v8642_v24  ;;  %v9168_v24 = vpop.permute.xlu0 %3175 }
 0x485   : > { %3756 = vmatprep.subr.mxu1 %v11242_v21 }
 0x486   : > { %6806 = vmatmul.mubr.msk.f32.gmra.mxu0 %vm3183_vm5, %v8726_v35  ;;  %3757 = vmatpush1.msra.mxu1 %v11243_v30 }
 0x487   : > { %3758 = vmatprep.subr.mxu1 %v8754_v40  ;;  %4515 = vmatprep.mubr.f32.mxu0 %v11210_v46 }
 0x488   : > { %3759 = vmatpush1.msra.mxu1 %v11244_v9  ;;  %v9172_v40 = vpop.permute.xlu0 %3165 }
 0x489   : > { %3760 = vmatprep.subr.mxu1 %v11245_v6 }
 0x48a   : > { %3761 = vmatpush1.msra.mxu1 %v11246_v14 }
 0x48b   : > { %6807 = vmatmul.mubr.msk.f32.vlgmr.msra.gmra.mxu1 %vm3183_vm5, %v8679_v52  ;;  %v9170_v52 = vpop.permute.xlu1 %3180 }
 0x48c   : > { %3800 = vmatprep.mubr.f32.mxu1 %v11210_v46 }
 0x48f   : > { %6808 = vmatmul.mubr.msk.f32.gmra.mxu1 %vm3183_vm5, %v8694_v31 }
 0x490   : > { %3806 = vmatprep.mubr.f32.mxu1 %v11210_v46 }
 0x493   : > { %6809 = vmatmul.mubr.msk.f32.gmra.mxu1 %vm3183_vm5, %v8709_v1  ;;  %v9177_v1 = vpop.permute.xlu1 %3170 }
 0x494   : > { %3812 = vmatprep.mubr.f32.mxu1 %v11210_v46 }
 0x497   : > { %6810 = vmatmul.mubr.msk.f32.gmra.mxu1 %vm3183_vm5, %v8726_v35 }
 0x498   : > { %4628 = vmatprep.mubr.f32.mxu1 %v11210_v46 }
 0x4ae   : > { %v3262_v63 = vpop.f32.mrf.mxu1 }
 0x4af   : > { %v3263_v31 = vadd.f32 %v3262_v63, %v9172_v40 }
 0x4b0   : > { %v3264_v56 = vpop.f32.mrf.mxu1 }
 0x4b1   : > { %v9175_v26 = vmax.f32 %v3263_v31, 0.0  ;;  %v3265_v35 = vadd.f32 %v3264_v56, %v9172_v40 }
 0x4b2   : > { %v3268_v33 = vpop.f32.mrf.mxu1 }
 0x4b3   : > { %v3269_v49 = vadd.f32 %v3268_v33, %v9177_v1  ;;  %4151 = vrot.lane.b32.xlu0 %v9175_v26, %s7156_s16  ;;  %v9189_v54 = vmax.f32 %v3265_v35, 0.0 }
 0x4b4   : > { %v3270_v3 = vpop.f32.mrf.mxu1 }
 0x4b5   : > { %v9183_v25 = vmax.f32 %v3269_v49, 0.0  ;;  %v3271_v39 = vadd.f32 %v3270_v3, %v9177_v1 }
 0x4b6   : > { %v3274_v45 = vpop.f32.mrf.mxu1 }
 0x4b7   : > { %3931 = vrot.lane.b32.xlu0 %v9175_v26, %s7157_s24  ;;  %4179 = vrot.lane.b32.xlu1 %v9183_v25, %s7156_s16  ;;  %v9196_v59 = vmax.f32 %v3271_v39, 0.0  ;;  %v3275_v10 = vadd.f32 %v3274_v45, %v9168_v24 }
 0x4b8   : > { %v3276_v36 = vpop.f32.mrf.mxu1 }
 0x4b9   : > { %v9203_v7 = vmax.f32 %v3275_v10, 0.0  ;;  %v3277_v16 = vadd.f32 %v3276_v36, %v9168_v24 }
 0x4ba   : > { %v3280_v5 = vpop.f32.mrf.mxu1 }
 0x4bb   : > { %4153 = vrot.lane.b32.xlu0 %v9189_v54, %s7156_s16  ;;  %3959 = vrot.lane.b32.xlu1 %v9183_v25, %s7157_s24  ;;  %v9212_v48 = vmax.f32 %v3277_v16, 0.0  ;;  %v3281_v19 = vadd.f32 %v3280_v5, %v9170_v52 }
 0x4bc   : > { %v3282_v22 = vpop.f32.mrf.mxu1 }
 0x4bd   : > { %v9245_v29 = vmax.f32 %v3281_v19, 0.0  ;;  %v3283_v0 = vadd.f32 %v3282_v22, %v9170_v52 }
 0x4bf   : > { %3933 = vrot.lane.b32.xlu0 %v9189_v54, %s7157_s24  ;;  %4181 = vrot.lane.b32.xlu1 %v9196_v59, %s7156_s16  ;;  %v9259_v41 = vmax.f32 %v3283_v0, 0.0 }
 0x4c3   : > { %4207 = vrot.lane.b32.xlu0 %v9203_v7, %s7156_s16  ;;  %3961 = vrot.lane.b32.xlu1 %v9196_v59, %s7157_s24 }
 0x4c7   : > { %3987 = vrot.lane.b32.xlu0 %v9203_v7, %s7157_s24 }
 0x4cb   : > { %4209 = vrot.lane.b32.xlu0 %v9212_v48, %s7156_s16 }
 0x4cf   : > { %3989 = vrot.lane.b32.xlu0 %v9212_v48, %s7157_s24 }
 0x4e1   : > { %v3351_v20 = vpop.f32.mrf.mxu0 }
 0x4e2   : > { %v3352_v62 = vadd.f32 %v3351_v20, %v9172_v40 }
 0x4e3   : > { %v3353_v47 = vpop.f32.mrf.mxu0 }
 0x4e4   : > { %v9219_v38 = vmax.f32 %v3352_v62, 0.0  ;;  %v3354_v28 = vadd.f32 %v3353_v47, %v9172_v40 }
 0x4e5   : > { %v3357_v4 = vpop.f32.mrf.mxu0 }
 0x4e6   : > { %11247 = vst [vmem:[#allocation19_spill] sm:$0xff] %v9219_v38  ;;  %v3358_v17 = vadd.f32 %v3357_v4, %v9177_v1  ;;  %4155 = vrot.lane.b32.xlu1 %v9219_v38, %s7156_s16  ;;  %v9231_v42 = vmax.f32 %v3354_v28, 0.0 }
 0x4e7   : > { %v3359_v18 = vpop.f32.mrf.mxu0 }
 0x4e8   : > { %v9225_v51 = vmax.f32 %v3358_v17, 0.0  ;;  %11248 = vst [vmem:[#allocation16_spill] sm:$0xff] %v9231_v42  ;;  %v3360_v55 = vadd.f32 %v3359_v18, %v9177_v1 }
 0x4e9   : > { %v3363_v27 = vpop.f32.mrf.mxu0 }
 0x4ea   : > { %4183 = vrot.lane.b32.xlu0 %v9225_v51, %s7156_s16  ;;  %3935 = vrot.lane.b32.xlu1 %v9219_v38, %s7157_s24  ;;  %v3440_v12 = vpop.f32.mrf.mxu1  ;;  %v9273_v57 = vmax.f32 %v3360_v55, 0.0  ;;  %v3364_v53 = vadd.f32 %v3363_v27, %v9168_v24 }
 0x4eb   : > { %v3365_v37 = vpop.f32.mrf.mxu0  ;;  %v3441_v43 = vadd.f32 %v3440_v12, %v9172_v40 }
 0x4ec   : > { %v3442_v50 = vpop.f32.mrf.mxu1  ;;  %v9288_v9 = vmax.f32 %v3364_v53, 0.0  ;;  %v3366_v63 = vadd.f32 %v3365_v37, %v9168_v24 }
 0x4ed   : > { %v9253_v11 = vmax.f32 %v3441_v43, 0.0  ;;  %v3443_v20 = vadd.f32 %v3442_v50, %v9172_v40 }
 0x4ee   : > { %v3369_v13 = vpop.f32.mrf.mxu0  ;;  %3963 = vrot.lane.b32.xlu0 %v9225_v51, %s7157_s24  ;;  %4157 = vrot.lane.b32.xlu1 %v9231_v42, %s7156_s16  ;;  %v3446_v60 = vpop.f32.mrf.mxu1  ;;  %v9301_v33 = vmax.f32 %v3366_v63, 0.0 }
 0x4ef   : > { %v3370_v23 = vadd.f32 %v3369_v13, %v9170_v52  ;;  %11249 = vst [vmem:[#allocation14_spill] sm:$0xff] %v9253_v11  ;;  %v3447_v61 = vadd.f32 %v3446_v60, %v9177_v1  ;;  %v9329_v47 = vmax.f32 %v3443_v20, 0.0 }
 0x4f0   : > { %v3448_v15 = vpop.f32.mrf.mxu1  ;;  %v3371_v58 = vpop.f32.mrf.mxu0 }
 0x4f1   : > { %v9239_v44 = vmax.f32 %v3370_v23, 0.0  ;;  %v9267_v34 = vmax.f32 %v3447_v61, 0.0  ;;  %v3372_v3 = vadd.f32 %v3371_v58, %v9170_v52  ;;  %11255 = vst [vmem:[#allocation21_spill] sm:$0xff] %v9329_v47  ;;  %v3449_v18 = vadd.f32 %v3448_v15, %v9177_v1 }
 0x4f2   : > { %3937 = vrot.lane.b32.xlu1 %v9231_v42, %s7157_s24  ;;  %v3452_v8 = vpop.f32.mrf.mxu1 }
 0x4f3   : > { %4239 = vrot.lane.b32.xlu0 %v9239_v44, %s7156_s16  ;;  %11250 = vst [vmem:[#allocation17_spill] sm:$0xff] %v9267_v34  ;;  %v3453_v2 = vadd.f32 %v3452_v8, %v9168_v24  ;;  %v9316_v10 = vmax.f32 %v3372_v3, 0.0  ;;  %v9343_v37 = vmax.f32 %v3449_v18, 0.0 }
 0x4f4   : > { %v3454_v14 = vpop.f32.mrf.mxu1 }
 0x4f5   : > { %v9281_v21 = vmax.f32 %v3453_v2, 0.0  ;;  %11257 = vst [vmem:[#allocation22_spill] sm:$0xff] %v9343_v37  ;;  %v3455_v23 = vadd.f32 %v3454_v14, %v9168_v24 }
 0x4f6   : > { %4235 = vrot.lane.b32.xlu1 %v9245_v29, %s7156_s16  ;;  %v3458_v31 = vpop.f32.mrf.mxu1 }
 0x4f7   : > { %4019 = vrot.lane.b32.xlu0 %v9239_v44, %s7157_s24  ;;  %11251 = vst [vmem:[#allocation15_spill] sm:$0xff] %v9281_v21  ;;  %v3459_v49 = vadd.f32 %v3458_v31, %v9170_v52  ;;  %v9359_v43 = vmax.f32 %v3455_v23, 0.0 }
 0x4f8   : > { %v3460_v19 = vpop.f32.mrf.mxu1 }
 0x4f9   : > { %v9309_v39 = vmax.f32 %v3459_v49, 0.0  ;;  %11259 = vst [vmem:[#allocation18_spill] sm:$0xff] %v9359_v43  ;;  %v3461_v53 = vadd.f32 %v3460_v19, %v9170_v52 }
 0x4fa   : > { %4015 = vrot.lane.b32.xlu1 %v9245_v29, %s7157_s24 }
 0x4fb   : > { %4159 = vrot.lane.b32.xlu0 %v9253_v11, %s7156_s16  ;;  %11253 = vst [vmem:[#allocation30_spill] sm:$0xff] %v9309_v39 }
 0x4fe   : > { %4237 = vrot.lane.b32.xlu1 %v9259_v41, %s7156_s16 }
 0x4ff   : > { %3939 = vrot.lane.b32.xlu0 %v9253_v11, %s7157_s24 }
 0x502   : > { %4017 = vrot.lane.b32.xlu1 %v9259_v41, %s7157_s24 }
 0x503   : > { %4187 = vrot.lane.b32.xlu0 %v9267_v34, %s7156_s16  ;;  %v3529_v32 = vpop.f32.mrf.mxu0 }
 0x504   : > { %v3530_v30 = vadd.f32 %v3529_v32, %v9172_v40 }
 0x505   : > { %v3531_v56 = vpop.f32.mrf.mxu0 }
 0x506   : > { %4185 = vrot.lane.b32.xlu1 %v9273_v57, %s7156_s16  ;;  %v9290_v6 = vmax.f32 %v3530_v30, 0.0  ;;  %v3532_v61 = vadd.f32 %v3531_v56, %v9172_v40  ;;  %v9399_v56 = vmax.f32 %v3461_v53, 0.0 }
 0x507   : > { %3967 = vrot.lane.b32.xlu0 %v9267_v34, %s7157_s24  ;;  %v3535_v35 = vpop.f32.mrf.mxu0 }
 0x508   : > { %11252 = vst [vmem:[#allocation32_spill] sm:$0xff] %v9290_v6  ;;  %v3536_v45 = vadd.f32 %v3535_v35, %v9177_v1  ;;  %v9379_v58 = vmax.f32 %v3532_v61, 0.0  ;;  %11263 = vst [vmem:[#allocation28_spill] sm:$0xff] %v9399_v56 }
 0x509   : > { %v3537_v16 = vpop.f32.mrf.mxu0 }
 0x50a   : > { %3965 = vrot.lane.b32.xlu1 %v9273_v57, %s7157_s24  ;;  %v9318_v36 = vmax.f32 %v3536_v45, 0.0  ;;  %11261 = vst [vmem:[#allocation29_spill] sm:$0xff] %v9379_v58  ;;  %v3538_v20 = vadd.f32 %v3537_v16, %v9177_v1 }
 0x50b   : > { %4215 = vrot.lane.b32.xlu0 %v9281_v21, %s7156_s16  ;;  %v3541_v62 = vpop.f32.mrf.mxu0 }
 0x50c   : > { %11254 = vst [vmem:[#allocation26_spill] sm:$0xff] %v9318_v36  ;;  %v3542_v4 = vadd.f32 %v3541_v62, %v9168_v24 }
 0x50d   : > { %v3543_v17 = vpop.f32.mrf.mxu0 }
 0x50e   : > { %4211 = vrot.lane.b32.xlu1 %v9288_v9, %s7156_s16  ;;  %v9337_v28 = vmax.f32 %v3542_v4, 0.0  ;;  %v3544_v16 = vadd.f32 %v3543_v17, %v9168_v24 }
 0x50f   : > { %4163 = vrot.lane.b32.xlu0 %v9290_v6, %s7156_s16  ;;  %v3547_v27 = vpop.f32.mrf.mxu0 }
 0x510   : > { %11256 = vst [vmem:[#allocation24_spill] sm:$0xff] %v9337_v28  ;;  %v3548_v5 = vadd.f32 %v3547_v27, %v9170_v52  ;;  %v9418_v27 = vmax.f32 %v3538_v20, 0.0 }
 0x511   : > { %v3549_v49 = vpop.f32.mrf.mxu0 }
 0x512   : > { %3991 = vrot.lane.b32.xlu1 %v9288_v9, %s7157_s24  ;;  %v9353_v22 = vmax.f32 %v3548_v5, 0.0  ;;  %11265 = vst [vmem:[#allocation25_spill] sm:$0xff] %v9418_v27  ;;  %v3550_v17 = vadd.f32 %v3549_v49, %v9170_v52 }
 0x513   : > { %3995 = vrot.lane.b32.xlu0 %v9281_v21, %s7157_s24 }
 0x514   : > { %11258 = vst [vmem:[#allocation20_spill] sm:$0xff] %v9353_v22 }
 0x516   : > { %4213 = vrot.lane.b32.xlu1 %v9301_v33, %s7156_s16 }
 0x517   : > { %3943 = vrot.lane.b32.xlu0 %v9290_v6, %s7157_s24 }
 0x51a   : > { %3993 = vrot.lane.b32.xlu1 %v9301_v33, %s7157_s24 }
 0x51b   : > { %4243 = vrot.lane.b32.xlu0 %v9309_v39, %s7156_s16 }
 0x51e   : > { %4241 = vrot.lane.b32.xlu1 %v9316_v10, %s7156_s16 }
 0x51f   : > { %4191 = vrot.lane.b32.xlu0 %v9318_v36, %s7156_s16 }
 0x522   : > { %4021 = vrot.lane.b32.xlu1 %v9316_v10, %s7157_s24 }
 0x523   : > { %4023 = vrot.lane.b32.xlu0 %v9309_v39, %s7157_s24 }
 0x525   : > { %v9346_v13 = vpop.permute.xlu0 %4151 }
 0x526   : > { %4161 = vrot.lane.b32.xlu1 %v9329_v47, %s7156_s16 }
 0x527   : > { %3971 = vrot.lane.b32.xlu0 %v9318_v36, %s7157_s24 }
 0x529   : > { %v9361_v50 = vpop.permute.xlu0 %3931  ;;  %v9393_v63 = vpop.permute.xlu1 %4179 }
 0x52a   : > { %3941 = vrot.lane.b32.xlu1 %v9329_v47, %s7157_s24 }
 0x52b   : > { %4219 = vrot.lane.b32.xlu0 %v9337_v28, %s7156_s16 }
 0x52c   : > { %v3618_v12 = vpop.f32.mrf.mxu1 }
 0x52d   : > { %v3619_v0 = vadd.f32 %v3618_v12, %v9172_v40  ;;  %v9373_v55 = vpop.permute.xlu0 %4153  ;;  %v9409_v62 = vpop.permute.xlu1 %3959 }
 0x52e   : > { %4189 = vrot.lane.b32.xlu1 %v9343_v37, %s7156_s16  ;;  %v9364_v60 = vpop.f32.mrf.mxu1 }
 0x52f   : > { %3999 = vrot.lane.b32.xlu0 %v9337_v28, %s7157_s24  ;;  %v9371_v15 = vmax.f32 %v3619_v0, 0.0 }
 0x530   : > { %v3624_v8 = vpop.f32.mrf.mxu1 }
 0x531   : > { %11260 = vst [vmem:[#allocation37_spill] sm:$0xff] %v9371_v15  ;;  %v3625_v2 = vadd.f32 %v3624_v8, %v9177_v1  ;;  %v9389_v30 = vpop.permute.xlu0 %3933  ;;  %v9424_v19 = vpop.permute.xlu1 %4181  ;;  %v9437_v8 = vmax.f32 %v3544_v16, 0.0 }
 0x532   : > { %3969 = vrot.lane.b32.xlu1 %v9343_v37, %s7157_s24  ;;  %v9382_v32 = vpop.f32.mrf.mxu1 }
 0x533   : > { %4247 = vrot.lane.b32.xlu0 %v9353_v22, %s7156_s16  ;;  %v9391_v14 = vmax.f32 %v3625_v2, 0.0  ;;  %11267 = vst [vmem:[#allocation23_spill] sm:$0xff] %v9437_v8 }
 0x534   : > { %v3630_v31 = vpop.f32.mrf.mxu1 }
 0x535   : > { %11262 = vst [vmem:[#allocation36_spill] sm:$0xff] %v9391_v14  ;;  %v3631_v35 = vadd.f32 %v3630_v31, %v9168_v24  ;;  %v9402_v3 = vpop.permute.xlu0 %4207  ;;  %v9439_v2 = vpop.permute.xlu1 %3961 }
 0x536   : > { %4217 = vrot.lane.b32.xlu1 %v9359_v43, %s7156_s16  ;;  %v3632_v12 = vpop.f32.mrf.mxu1 }
 0x537   : > { %4027 = vrot.lane.b32.xlu0 %v9353_v22, %s7157_s24  ;;  %v9411_v4 = vmax.f32 %v3631_v35, 0.0 }
 0x539   : > { %11264 = vst [vmem:[#allocation33_spill] sm:$0xff] %v9411_v4  ;;  %v9420_v5 = vpop.permute.xlu0 %3987  ;;  %v3636_v31 = vpop.f32.mrf.mxu1 }
 0x53a   : > { %3997 = vrot.lane.b32.xlu1 %v9359_v43, %s7157_s24  ;;  %v3707_v45 = vpop.f32.mrf.mxu0  ;;  %v3637_v20 = vadd.f32 %v3636_v31, %v9170_v52 }
 0x53b   : > { %4167 = vrot.lane.b32.xlu0 %v9371_v15, %s7156_s16  ;;  %v3708_v18 = vadd.f32 %v3707_v45, %v9172_v40 }
 0x53c   : > { %v3709_v0 = vpop.f32.mrf.mxu0 }
 0x53d   : > { %v9422_v23 = vmax.f32 %v3708_v18, 0.0  ;;  %v9431_v61 = vpop.permute.xlu0 %4209  ;;  %v3710_v53 = vadd.f32 %v3709_v0, %v9172_v40  ;;  %v9458_v0 = vmax.f32 %v3550_v17, 0.0 }
 0x53e   : > { %4165 = vrot.lane.b32.xlu1 %v9379_v58, %s7156_s16  ;;  %v3713_v16 = vpop.f32.mrf.mxu0 }
 0x53f   : > { %3947 = vrot.lane.b32.xlu0 %v9371_v15, %s7157_s24  ;;  %11266 = vst [vmem:[#allocation27_spill] sm:$0xff] %v9422_v23  ;;  %v9452_v18 = vmax.f32 %v3710_v53, 0.0  ;;  %11268 = vst [vmem:[#allocation38_spill] sm:$0xff] %v9458_v0  ;;  %v9464_v15 = vmax.f32 %v3637_v20, 0.0  ;;  %v3621_v53 = vadd.f32 %v9364_v60, %v9172_v40 }
 0x540   : > { %v3715_v6 = vpop.f32.mrf.mxu0 }
 0x541   : > { %v9447_v35 = vpop.permute.xlu0 %3989  ;;  %11269 = vst [vmem:[#allocation42_spill] sm:$0xff] %v9464_v15  ;;  %v9483_v20 = vmax.f32 %v3621_v53, 0.0 }
 0x542   : > { %3945 = vrot.lane.b32.xlu1 %v9379_v58, %s7157_s24  ;;  %v3719_v60 = vpop.f32.mrf.mxu0 }
 0x543   : > { %4195 = vrot.lane.b32.xlu0 %v9391_v14, %s7156_s16  ;;  %11271 = vst [vmem:[#allocation40_spill] sm:$0xff] %v9483_v20 }
 0x544   : > { %v3721_v53 = vpop.f32.mrf.mxu0 }
 0x545   : > { %v3722_v37 = vadd.f32 %v3721_v53, %v9168_v24 }
 0x546   : > { %4245 = vrot.lane.b32.xlu1 %v9399_v56, %s7156_s16 }
 0x547   : > { %3975 = vrot.lane.b32.xlu0 %v9391_v14, %s7157_s24  ;;  %v3714_v14 = vadd.f32 %v3713_v16, %v9177_v1 }
 0x54a   : > { %4025 = vrot.lane.b32.xlu1 %v9399_v56, %s7157_s24 }
 0x54b   : > { %4223 = vrot.lane.b32.xlu0 %v9411_v4, %s7156_s16 }
 0x54e   : > { %4193 = vrot.lane.b32.xlu1 %v9418_v27, %s7156_s16 }
 0x54f   : > { %4171 = vrot.lane.b32.xlu0 %v9422_v23, %s7156_s16 }
 0x552   : > { %3973 = vrot.lane.b32.xlu1 %v9418_v27, %s7157_s24  ;;  %v3720_v27 = vadd.f32 %v3719_v60, %v9168_v24  ;;  %v3633_v60 = vadd.f32 %v3632_v12, %v9168_v24 }
 0x553   : > { %4003 = vrot.lane.b32.xlu0 %v9411_v4, %s7157_s24  ;;  %v9477_v4 = vmax.f32 %v3714_v14, 0.0  ;;  %v3627_v14 = vadd.f32 %v9382_v32, %v9177_v1  ;;  %v3725_v32 = vpop.f32.mrf.mxu0 }
 0x554   : > { %v9527_v12 = vmax.f32 %v3633_v60, 0.0 }
 0x555   : > { %11270 = vst [vmem:[#allocation35_spill] sm:$0xff] %v9477_v4 }
 0x556   : > { %4221 = vrot.lane.b32.xlu1 %v9437_v8, %s7156_s16  ;;  %11274 = vst [vmem:[#allocation41_spill] sm:$0xff] %v9527_v12 }
 0x557   : > { %3951 = vrot.lane.b32.xlu0 %v9422_v23, %s7157_s24 }
 0x558   : > { %v9449_v45 = vpop.permute.xlu1 %4155 }
 0x55a   : > { %4001 = vrot.lane.b32.xlu1 %v9437_v8, %s7157_s24  ;;  %v9502_v8 = vmax.f32 %v3627_v14, 0.0  ;;  %v3726_v14 = vadd.f32 %v3725_v32, %v9170_v52 }
 0x55b   : > { %4173 = vrot.lane.b32.xlu0 %v9452_v18, %s7156_s16 }
 0x55c   : > { %v9460_v23 = vpop.permute.xlu0 %4183  ;;  %v9462_v49 = vpop.permute.xlu1 %3935  ;;  %11272 = vst [vmem:[#allocation34_spill] sm:$0xff] %v9502_v8  ;;  %v9530_v21 = vmax.f32 %v3726_v14, 0.0 }
 0x55e   : > { %4249 = vrot.lane.b32.xlu1 %v9458_v0, %s7156_s16  ;;  %11275 = vst [vmem:[#allocation39_spill] sm:$0xff] %v9530_v21 }
 0x55f   : > { %4251 = vrot.lane.b32.xlu0 %v9464_v15, %s7156_s16 }
 0x560   : > { %v9473_v31 = vpop.permute.xlu0 %3963  ;;  %v9475_v17 = vpop.permute.xlu1 %4157 }
 0x562   : > { %4029 = vrot.lane.b32.xlu1 %v9458_v0, %s7157_s24 }
 0x563   : > { %4199 = vrot.lane.b32.xlu0 %v9477_v4, %s7156_s16 }
 0x564   : > { %v9485_v16 = vpop.permute.xlu1 %3937 }
 0x565   : > { %v9487_v58 = vpop.permute.xlu0 %4239 }
 0x566   : > { %4169 = vrot.lane.b32.xlu1 %v9483_v20, %s7156_s16 }
 0x567   : > { %4031 = vrot.lane.b32.xlu0 %v9464_v15, %s7157_s24  ;;  %v9506_v15 = vmax.f32 %v3720_v27, 0.0 }
 0x568   : > { %v4236_v36 = vpop.permute.xlu1 %4235 }
 0x569   : > { %v9496_v28 = vpop.permute.xlu0 %4019  ;;  %11273 = vst [vmem:[#allocation31_spill] sm:$0xff] %v9506_v15 }
 0x56a   : > { %3949 = vrot.lane.b32.xlu1 %v9483_v20, %s7157_s24  ;;  %v3638_v20 = vpop.f32.mrf.mxu1 }
 0x56b   : > { %3979 = vrot.lane.b32.xlu0 %v9477_v4, %s7157_s24 }
 0x56c   : > { %v9504_v22 = vpop.permute.xlu1 %4015  ;;  %v9521_v34 = vpop.f32.mrf.mxu1 }
 0x56d   : > { %v9508_v0 = vpop.permute.xlu0 %4159 }
 0x56e   : > { %4197 = vrot.lane.b32.xlu1 %v9502_v8, %s7156_s16 }
 0x56f   : > { %4227 = vrot.lane.b32.xlu0 %v9506_v15, %s7156_s16 }
 0x570   : > { %v4238_v11 = vpop.permute.xlu1 %4237 }
 0x571   : > { %v9516_v4 = vpop.permute.xlu0 %3939  ;;  %v4303_v27 = vsel %vm1540_vm3, %v4238_v11, %v9487_v58  ;;  %v4302_v47 = vsel %vm1540_vm3, %v4236_v36, %v4238_v11  ;;  %v3798_v11 = vpop.f32.mrf.mxu1  ;;  %v3639_v36 = vadd.f32 %v3638_v20, %v9170_v52 }
 0x572   : > { %3977 = vrot.lane.b32.xlu1 %v9502_v8, %s7157_s24  ;;  %4459 = vmatprep.subr.mxu0 %v4303_v27  ;;  %v3799_v8 = vadd.f32 %v3798_v11, %v9172_v40 }
 0x573   : > { %4007 = vrot.lane.b32.xlu0 %v9506_v15, %s7157_s24  ;;  %4460 = vmatpush1.msra.mxu0 %v4302_v47  ;;  %v9541_v47 = vmax.f32 %v3722_v37, 0.0  ;;  %v3802_v53 = vpop.f32.mrf.mxu1  ;;  %v9549_v14 = vmax.f32 %v3639_v36, 0.0  ;;  %v3716_v37 = vadd.f32 %v3715_v6, %v9177_v1  ;;  %v4289_v6 = vsel %vm1540_vm3, %v9402_v3, %v9431_v61 }
 0x574   : > { %v4018_v32 = vpop.permute.xlu1 %4017  ;;  %v9565_v36 = vmax.f32 %v3799_v8, 0.0  ;;  %v3803_v56 = vadd.f32 %v3802_v53, %v9177_v1  ;;  %v4277_v8 = vsel %vm1540_vm3, %v9424_v19, %v9460_v23 }
 0x575   : > { %v9532_v43 = vpop.permute.xlu0 %4187  ;;  %11276 = vst [vmem:[#allocation46_spill] sm:$0xff] %v9549_v14  ;;  %v9556_v39 = vpop.f32.mrf.mxu1  ;;  %v9583_v53 = vmax.f32 %v3716_v37, 0.0 }
 0x576   : > { %4225 = vrot.lane.b32.xlu1 %v9527_v12, %s7156_s16 }
 0x577   : > { %4255 = vrot.lane.b32.xlu0 %v9530_v21, %s7156_s16  ;;  %v3808_v42 = vpop.f32.mrf.mxu1 }
 0x578   : > { %v9539_v27 = vpop.permute.xlu1 %4185  ;;  %v3809_v3 = vadd.f32 %v3808_v42, %v9168_v24  ;;  %v4083_v42 = vsel %vm1373_vm2, %v4018_v32, %v9496_v28 }
 0x579   : > { %v9543_v60 = vpop.permute.xlu0 %3967  ;;  %v3810_v37 = vpop.f32.mrf.mxu1 }
 0x57a   : > { %4005 = vrot.lane.b32.xlu1 %v9527_v12, %s7157_s24 }
 0x57b   : > { %4009 = vrot.lane.b32.xlu0 %v9541_v47, %s7157_s24 }
 0x57c   : > { %v9551_v15 = vpop.permute.xlu1 %3965 }
 0x57d   : > { %v9554_v20 = vpop.permute.xlu0 %4215 }
 0x57e   : > { %4253 = vrot.lane.b32.xlu1 %v9549_v14, %s7156_s16 }
 0x57f   : > { %4035 = vrot.lane.b32.xlu0 %v9530_v21, %s7157_s24 }
 0x580   : > { %v9563_v12 = vpop.permute.xlu1 %4211 }
 0x581   : > { %v9568_v38 = vpop.permute.xlu0 %4163  ;;  %v4290_v11 = vsel %vm1540_vm3, %v9431_v61, %v9563_v12 }
 0x582   : > { %11277 = vst [vmem:[#allocation45_spill] sm:$0xff] %v9568_v38  ;;  %4033 = vrot.lane.b32.xlu1 %v9549_v14, %s7157_s24  ;;  %4461 = vmatprep.subr.mxu0 %v4290_v11  ;;  %v4276_v11 = vsel %vm1540_vm3, %v9393_v63, %v9424_v19  ;;  %v9590_v14 = vmax.f32 %v3803_v56, 0.0  ;;  %v4263_v63 = vsel %vm1540_vm3, %v9346_v13, %v9373_v55 }
 0x583   : > { %4177 = vrot.lane.b32.xlu0 %v9565_v36, %s7156_s16  ;;  %4462 = vmatpush1.msra.mxu0 %v4289_v6  ;;  %v4264_v6 = vsel %vm1540_vm3, %v9373_v55, %v9449_v45  ;;  %v4082_v19 = vsel %vm1373_vm2, %v9504_v22, %v4018_v32  ;;  %v3814_v55 = vpop.f32.mrf.mxu1  ;;  %v4069_v22 = vsel %vm1373_vm2, %v9420_v5, %v9447_v35 }
 0x584   : > { %4463 = vmatprep.subr.mxu0 %v4277_v8  ;;  %v9585_v21 = vpop.permute.xlu1 %3991  ;;  %v3727_v8 = vpop.f32.mrf.mxu0  ;;  %v3815_v5 = vadd.f32 %v3814_v55, %v9170_v52 }
 0x585   : > { %v9593_v61 = vpop.permute.xlu0 %3995  ;;  %4464 = vmatpush1.msra.mxu0 %v4276_v11  ;;  %v9609_v11 = vmax.f32 %v3809_v3, 0.0  ;;  %v4070_v13 = vsel %vm1373_vm2, %v9447_v35, %v9585_v21  ;;  %v3728_v32 = vadd.f32 %v3727_v8, %v9170_v52 }
 0x586   : > { %4201 = vrot.lane.b32.xlu1 %v9583_v53, %s7156_s16  ;;  %4465 = vmatprep.subr.mxu0 %v4264_v6  ;;  %v3811_v6 = vadd.f32 %v3810_v37, %v9168_v24  ;;  %v4057_v24 = vsel %vm1373_vm2, %v9439_v2, %v9473_v31  ;;  %v4056_v37 = vsel %vm1373_vm2, %v9409_v62, %v9439_v2  ;;  %v9651_v8 = vmax.f32 %v3815_v5, 0.0 }
 0x587   : > { %4203 = vrot.lane.b32.xlu0 %v9590_v14, %s7156_s16  ;;  %4466 = vmatpush1.msra.mxu0 %v4263_v63  ;;  %v9648_v62 = vmax.f32 %v3728_v32, 0.0  ;;  %v9736_v32 = vld [vmem:[#allocation7 + $0x10] sm:$0xff]  ;;  %v4046_v5 = vsel %vm1373_vm2, %v9485_v16, %v9516_v4 }
 0x588   : > { %4467 = vmatprep.subr.mxu0 %v4083_v42  ;;  %v4214_v56 = vpop.permute.xlu1 %4213  ;;  %v9633_v63 = vmax.f32 %v3811_v6, 0.0  ;;  %v4044_v42 = vsel %vm1373_vm2, %v9389_v30, %v9462_v49 }
 0x589   : > { %v9612_v38 = vpop.permute.xlu0 %3943  ;;  %4468 = vmatpush1.msra.mxu0 %v4082_v19  ;;  %v4043_v19 = vsel %vm1373_vm2, %v9361_v50, %v9389_v30 }
 0x58a   : > { %4229 = vrot.lane.b32.xlu1 %v9541_v47, %s7156_s16  ;;  %4469 = vmatprep.subr.mxu0 %v4070_v13 }
 0x58b   : > { %4231 = vrot.lane.b32.xlu0 %v9609_v11, %s7156_s16  ;;  %4470 = vmatpush1.msra.mxu0 %v4069_v22  ;;  %v3816_v22 = vpop.f32.mrf.mxu1 }
 0x58c   : > { %4471 = vmatprep.subr.mxu0 %v4057_v24  ;;  %v9628_v3 = vpop.permute.xlu1 %3993  ;;  %v4059_v24 = vsel %vm1373_vm2, %v9551_v15, %v9543_v60 }
 0x58d   : > { %v9636_v35 = vpop.permute.xlu0 %4243  ;;  %4472 = vmatpush1.msra.mxu0 %v4056_v37  ;;  %v4058_v37 = vsel %vm1373_vm2, %v9473_v31, %v9551_v15  ;;  %v4045_v15 = vsel %vm1373_vm2, %v9462_v49, %v9485_v16  ;;  %v9759_v31 = vld [vmem:[#allocation7 + $0x18] sm:$0xff]  ;;  %v4380_v16 = vld [vmem:[%s11068_s8 + $0x8] sm:$0xff] }
 0x58e   : > { %3981 = vrot.lane.b32.xlu1 %v9583_v53, %s7157_s24  ;;  %4473 = vmatprep.subr.mxu0 %v4044_v42  ;;  %v3817_v42 = vadd.f32 %v3816_v22, %v9170_v52 }
 0x58f   : > { %4233 = vrot.lane.b32.xlu0 %v9633_v63, %s7156_s16  ;;  %4474 = vmatpush1.msra.mxu0 %v4043_v19 }
 0x590   : > { %4475 = vmatprep.subr.mxu0 %v9259_v41  ;;  %v4242_v2 = vpop.permute.xlu1 %4241  ;;  %v9770_v49 = vmax.f32 %v3817_v42, 0.0  ;;  %v4383_v42 = vld [vmem:[%s11068_s8 + $0x20] sm:$0xff] }
 0x591   : > { %v9653_v6 = vpop.permute.xlu0 %4191  ;;  %4476 = vmatpush1.msra.mxu0 %v9245_v29  ;;  %v4305_v13 = vsel %vm1540_vm3, %v4242_v2, %v9636_v35  ;;  %v4304_v50 = vsel %vm1540_vm3, %v9487_v58, %v4242_v2  ;;  %v4292_v29 = vsel %vm1540_vm3, %v4214_v56, %v9554_v20  ;;  %v4291_v58 = vsel %vm1540_vm3, %v9563_v12, %v4214_v56  ;;  %v11279_v2 = vld [vmem:[#allocation19_spill] sm:$0xff] }
 0x592   : > { %4257 = vrot.lane.b32.xlu1 %v9648_v62, %s7156_s16  ;;  %4477 = vmatprep.subr.mxu0 %v9212_v48  ;;  %v3797_v48 = vadd.f32 %v9521_v34, %v9172_v40  ;;  %v4278_v40 = vsel %vm1540_vm3, %v9460_v23, %v9539_v27  ;;  %v4266_v12 = vsel %vm1540_vm3, %v9475_v17, %v9508_v0 }
 0x593   : > { %4259 = vrot.lane.b32.xlu0 %v9651_v8, %s7156_s16  ;;  %4572 = vmatprep.subr.mxu1 %v4305_v13 }
 0x594   : > { %4478 = vmatpush1.msra.mxu0 %v9203_v7  ;;  %4573 = vmatpush1.msra.mxu1 %v4304_v50  ;;  %v4022_v41 = vpop.permute.xlu1 %4021  ;;  %v9683_v7 = vld [vmem:[#allocation7] sm:$0xff]  ;;  %v9697_v56 = vmax.f32 %v3797_v48, 0.0 }
 0x595   : > { %v9668_v30 = vpop.permute.xlu0 %4023  ;;  %4479 = vmatprep.subr.mxu0 %v9196_v59  ;;  %4574 = vmatprep.subr.mxu1 %v4292_v29  ;;  %v4279_v59 = vsel %vm1540_vm3, %v9539_v27, %v9532_v43  ;;  %v9710_v27 = vld [vmem:[#allocation7 + $0x8] sm:$0xff]  ;;  %v9812_v29 = vld [vmem:[#allocation7 + $0x30] sm:$0xff] }
 0x596   : > { %4480 = vmatpush1.msra.mxu0 %v9183_v25  ;;  %4575 = vmatpush1.msra.mxu1 %v4291_v58  ;;  %v4085_v23 = vsel %vm1373_vm2, %v4022_v41, %v9668_v30  ;;  %v4384_v58 = vld [vmem:[%s11068_s8 + $0x28] sm:$0xff] }
 0x597   : > { %3983 = vrot.lane.b32.xlu0 %v9590_v14, %s7157_s24  ;;  %4037 = vrot.lane.b32.xlu1 %v9648_v62, %s7157_s24 }
 0x598   : > { %4481 = vmatprep.subr.mxu0 %v9189_v54  ;;  %4576 = vmatprep.subr.mxu1 %v4279_v59  ;;  %v9689_v25 = vpop.permute.xlu1 %4161  ;;  %v3805_v54 = vadd.f32 %v9556_v39, %v9177_v1  ;;  %v4084_v1 = vsel %vm1373_vm2, %v9496_v28, %v4022_v41  ;;  %v4071_v28 = vsel %vm1373_vm2, %v9585_v21, %v9628_v3  ;;  %v9829_v59 = vld [vmem:[#allocation7 + $0x38] sm:$0xff] }
 0x599   : > { %4482 = vmatpush1.msra.mxu0 %v9175_v26  ;;  %4577 = vmatpush1.msra.mxu1 %v4278_v40  ;;  %v9692_v34 = vpop.permute.xlu0 %3971  ;;  %v4265_v26 = vsel %vm1540_vm3, %v9449_v45, %v9475_v17  ;;  %v4072_v17 = vsel %vm1373_vm2, %v9628_v3, %v9593_v61 }
 0x59a   : > { %6811 = vmatmul.mubr.msk.f32.vlgmr.msra.gmra.mxu0 %vm3183_vm5, %v9683_v7  ;;  %4578 = vmatprep.subr.mxu1 %v4266_v12  ;;  %v9724_v55 = vmax.f32 %v3805_v54, 0.0  ;;  %v4386_v12 = vld [vmem:[%s11068_s8 + $0x38] sm:$0xff] }
 0x59b   : > { %4579 = vmatpush1.msra.mxu1 %v4265_v26  ;;  %4039 = vrot.lane.b32.xlu0 %v9651_v8, %s7157_s24  ;;  %v4379_v26 = vld [vmem:[%s11068_s8] sm:$0xff] }
 0x59c   : > { %4175 = vrot.lane.b32.xlu1 %v9697_v56, %s7156_s16  ;;  %4580 = vmatprep.subr.mxu1 %v4085_v23  ;;  %v9716_v39 = vpop.permute.xlu1 %3941 }
 0x59d   : > { %4521 = vmatprep.mubr.f32.mxu0 %v11210_v46  ;;  %4581 = vmatpush1.msra.mxu1 %v4084_v1  ;;  %v9719_v45 = vpop.permute.xlu0 %4219 }
 0x59e   : > { %6812 = vmatmul.mubr.msk.f32.gmra.mxu0 %vm3183_vm5, %v9710_v27  ;;  %4582 = vmatprep.subr.mxu1 %v4072_v17 }
 0x59f   : > { %4583 = vmatpush1.msra.mxu1 %v4071_v28  ;;  %3953 = vrot.lane.b32.xlu0 %v9452_v18, %s7157_s24  ;;  %v4381_v28 = vld [vmem:[%s11068_s8 + $0x10] sm:$0xff] }
 0x5a0   : > { %4205 = vrot.lane.b32.xlu1 %v9724_v55, %s7156_s16  ;;  %4584 = vmatprep.subr.mxu1 %v4059_v24  ;;  %v9743_v21 = vpop.permute.xlu1 %4189 }
 0x5a1   : > { %4527 = vmatprep.mubr.f32.mxu0 %v11210_v46  ;;  %4585 = vmatpush1.msra.mxu1 %v4058_v37  ;;  %v9746_v3 = vpop.permute.xlu0 %3999 }
 0x5a2   : > { %6813 = vmatmul.mubr.msk.f32.gmra.mxu0 %vm3183_vm5, %v9736_v32  ;;  %4586 = vmatprep.subr.mxu1 %v4046_v5 }
 0x5a3   : > { %4587 = vmatpush1.msra.mxu1 %v4045_v15  ;;  %4013 = vrot.lane.b32.xlu0 %v9633_v63, %s7157_s24  ;;  %v4281_v15 = vsel %vm1540_vm3, %v9743_v21, %v9653_v6 }
 0x5a4   : > { %4011 = vrot.lane.b32.xlu1 %v9609_v11, %s7157_s24  ;;  %4588 = vmatprep.subr.mxu1 %v9316_v10  ;;  %v9764_v52 = vpop.permute.xlu1 %3969  ;;  %v9778_v10 = vld [vmem:[#allocation7 + $0x20] sm:$0xff] }
 0x5a5   : > { %4533 = vmatprep.mubr.f32.mxu0 %v11210_v46  ;;  %4589 = vmatpush1.msra.mxu1 %v9239_v44  ;;  %v9768_v19 = vpop.permute.xlu0 %4247 }
 0x5a6   : > { %6814 = vmatmul.mubr.msk.f32.gmra.mxu0 %vm3183_vm5, %v9759_v31  ;;  %4590 = vmatprep.subr.mxu1 %v9301_v33  ;;  %v11278_v33 = vld [vmem:[#allocation16_spill] sm:$0xff] }
 0x5a7   : > { %4591 = vmatpush1.msra.mxu1 %v9288_v9  ;;  %3957 = vrot.lane.b32.xlu0 %v9565_v36, %s7157_s24 }
 0x5a8   : > { %4261 = vrot.lane.b32.xlu1 %v9770_v49, %s7156_s16  ;;  %4592 = vmatprep.subr.mxu1 %v9273_v57  ;;  %v4218_v44 = vpop.permute.xlu1 %4217  ;;  %v9794_v57 = vld [vmem:[#allocation7 + $0x28] sm:$0xff] }
 0x5a9   : > { %4539 = vmatprep.mubr.f32.mxu0 %v11210_v46  ;;  %4593 = vmatpush1.msra.mxu1 %v9225_v51  ;;  %v9788_v9 = vpop.permute.xlu0 %4027  ;;  %v4382_v51 = vld [vmem:[%s11068_s8 + $0x18] sm:$0xff]  ;;  %v4294_v24 = vsel %vm1540_vm3, %v4218_v44, %v9719_v45 }
 0x5aa   : > { %6815 = vmatmul.mubr.msk.f32.gmra.mxu0 %vm3183_vm5, %v9778_v10  ;;  %4594 = vmatprep.subr.mxu1 %v11278_v33  ;;  %v11280_v33 = vld [vmem:[#allocation45_spill] sm:$0xff] }
 0x5ab   : > { %4595 = vmatpush1.msra.mxu1 %v11279_v2  ;;  %4394 = vperm.xlu0 %6964, %v4380_v16   ;;  %v4268_v2 = vsel %vm1540_vm3, %v9689_v25, %v11280_v33 }
 0x5ac   : > { %3955 = vrot.lane.b32.xlu1 %v9697_v56, %s7157_s24  ;;  %6819 = vmatmul.mubr.msk.f32.vlgmr.msra.gmra.mxu1 %vm3183_vm5, %v9683_v7  ;;  %v9800_v13 = vpop.permute.xlu1 %3997 }
 0x5ad   : > { %4545 = vmatprep.mubr.f32.mxu0 %v11210_v46  ;;  %v9806_v50 = vpop.permute.xlu0 %4167  ;;  %4634 = vmatprep.mubr.f32.mxu1 %v11210_v46 }
 0x5ae   : > { %6816 = vmatmul.mubr.msk.f32.gmra.mxu0 %vm3183_vm5, %v9794_v57 }
 0x5af   : > { %4404 = vperm.xlu0 %6964, %v4382_v51   ;;  %4551 = vmatprep.mubr.f32.mxu0 %v11210_v46  ;;  %v4385_v51 = vld [vmem:[%s11068_s8 + $0x30] sm:$0xff] }
 0x5b0   : > { %4041 = vrot.lane.b32.xlu1 %v9770_v49, %s7157_s24  ;;  %6820 = vmatmul.mubr.msk.f32.gmra.mxu1 %vm3183_vm5, %v9710_v27  ;;  %v9818_v41 = vpop.permute.xlu1 %4165 }
 0x5b1   : > { %v9823_v48 = vpop.permute.xlu0 %3947  ;;  %4640 = vmatprep.mubr.f32.mxu1 %v11210_v46 }
 0x5b2   : > { %6817 = vmatmul.mubr.msk.f32.gmra.mxu0 %vm3183_vm5, %v9812_v29 }
 0x5b3   : > { %4414 = vperm.xlu0 %6964, %v4384_v58   ;;  %4557 = vmatprep.mubr.f32.mxu0 %v11210_v46  ;;  %v4267_v58 = vsel %vm1540_vm3, %v9508_v0, %v9689_v25  ;;  %v4074_v0 = vsel %vm1373_vm2, %v9800_v13, %v9746_v3  ;;  %v4073_v25 = vsel %vm1373_vm2, %v9593_v61, %v9800_v13 }
 0x5b4   : > { %3985 = vrot.lane.b32.xlu1 %v9724_v55, %s7157_s24  ;;  %6821 = vmatmul.mubr.msk.f32.gmra.mxu1 %vm3183_vm5, %v9736_v32  ;;  %v9835_v40 = vpop.permute.xlu1 %3945  ;;  %v4048_v61 = vsel %vm1373_vm2, %v9716_v39, %v9612_v38  ;;  %v4047_v13 = vsel %vm1373_vm2, %v9516_v4, %v9716_v39 }
 0x5b5   : > { %v9840_v54 = vpop.permute.xlu0 %4195  ;;  %4646 = vmatprep.mubr.f32.mxu1 %v11210_v46 }
 0x5b6   : > { %6818 = vmatmul.mubr.msk.f32.gmra.mxu0 %vm3183_vm5, %v9829_v59 }
 0x5b7   : > { %4424 = vperm.xlu0 %6964, %v4386_v12   ;;  %4741 = vmatprep.mubr.f32.mxu0 %v11210_v46 }
 0x5b8   : > { %4389 = vperm.xlu1 %6963, %v4379_v26   ;;  %6822 = vmatmul.mubr.msk.f32.gmra.mxu1 %vm3183_vm5, %v9759_v31  ;;  %v4246_v23 = vpop.permute.xlu1 %4245 }
 0x5b9   : > { %v9851_v1 = vpop.permute.xlu0 %3975  ;;  %v4306_v17 = vsel %vm1540_vm3, %v9636_v35, %v4246_v23  ;;  %4652 = vmatprep.mubr.f32.mxu1 %v11210_v46  ;;  %v4307_v22 = vsel %vm1540_vm3, %v4246_v23, %v9768_v19  ;;  %v4293_v35 = vsel %vm1540_vm3, %v9554_v20, %v4218_v44  ;;  %v4280_v20 = vsel %vm1540_vm3, %v9532_v43, %v9743_v21 }
 0x5ba   : > { %4685 = vmatprep.subr.mxu0 %v4307_v22 }
 0x5bb   : > { %4686 = vmatpush1.msra.mxu0 %v4306_v17  ;;  %v4060_v17 = vsel %vm1373_vm2, %v9543_v60, %v9764_v52 }
 0x5bc   : > { %4399 = vperm.xlu1 %6963, %v4381_v28   ;;  %6823 = vmatmul.mubr.msk.f32.gmra.mxu1 %vm3183_vm5, %v9778_v10  ;;  %v4026_v37 = vpop.permute.xlu1 %4025 }
 0x5bd   : > { %v9867_v5 = vpop.permute.xlu0 %4223  ;;  %4687 = vmatprep.subr.mxu0 %v4294_v24  ;;  %4658 = vmatprep.mubr.f32.mxu1 %v11210_v46  ;;  %v4087_v43 = vsel %vm1373_vm2, %v4026_v37, %v9788_v9  ;;  %v4086_v12 = vsel %vm1373_vm2, %v9668_v30, %v4026_v37  ;;  %v4061_v30 = vsel %vm1373_vm2, %v9764_v52, %v9692_v34  ;;  %v11281_v24 = vld [vmem:[#allocation28_spill] sm:$0xff]  ;;  %v11282_v52 = vld [vmem:[#allocation30_spill] sm:$0xff] }
 0x5be   : > { %4688 = vmatpush1.msra.mxu0 %v4293_v35  ;;  %v11283_v35 = vld [vmem:[#allocation18_spill] sm:$0xff] }
 0x5bf   : > { %4689 = vmatprep.subr.mxu0 %v4281_v15 }
 0x5c0   : > { %4409 = vperm.xlu1 %6963, %v4383_v42   ;;  %6824 = vmatmul.mubr.msk.f32.gmra.mxu1 %vm3183_vm5, %v9794_v57  ;;  %v4194_v44 = vpop.permute.xlu1 %4193  ;;  %v11284_v42 = vld [vmem:[#allocation15_spill] sm:$0xff] }
 0x5c1   : > { %4690 = vmatpush1.msra.mxu0 %v4280_v20  ;;  %v9881_v16 = vpop.permute.xlu0 %4171  ;;  %4664 = vmatprep.mubr.f32.mxu1 %v11210_v46  ;;  %v11285_v20 = vld [vmem:[#allocation22_spill] sm:$0xff] }
 0x5c2   : > { %4691 = vmatprep.subr.mxu0 %v4268_v2  ;;  %v11286_v2 = vld [vmem:[#allocation17_spill] sm:$0xff] }
 0x5c3   : > { %4692 = vmatpush1.msra.mxu0 %v4267_v58  ;;  %v11287_v58 = vld [vmem:[#allocation21_spill] sm:$0xff] }
 0x5c4   : > { %4419 = vperm.xlu1 %6963, %v4385_v51   ;;  %6825 = vmatmul.mubr.msk.f32.gmra.mxu1 %vm3183_vm5, %v9812_v29  ;;  %v9897_v21 = vpop.permute.xlu1 %3973 }
 0x5c5   : > { %4693 = vmatprep.subr.mxu0 %v4087_v43  ;;  %v9901_v26 = vpop.permute.xlu0 %4003  ;;  %4670 = vmatprep.mubr.f32.mxu1 %v11210_v46  ;;  %v11288_v43 = vld [vmem:[#allocation14_spill] sm:$0xff] }
 0x5c6   : > { %4694 = vmatpush1.msra.mxu0 %v4086_v12 }
 0x5c7   : > { %4695 = vmatprep.subr.mxu0 %v4074_v0 }
 0x5c8   : > { %4696 = vmatpush1.msra.mxu0 %v4073_v25  ;;  %6826 = vmatmul.mubr.msk.f32.gmra.mxu1 %vm3183_vm5, %v9829_v59  ;;  %v4222_v23 = vpop.permute.xlu1 %4221 }
 0x5c9   : > { %4697 = vmatprep.subr.mxu0 %v4061_v30  ;;  %v9918_v28 = vpop.permute.xlu0 %3951  ;;  %4854 = vmatprep.mubr.f32.mxu1 %v11210_v46  ;;  %v4296_v12 = vsel %vm1540_vm3, %v4222_v23, %v9867_v5  ;;  %v4295_v25 = vsel %vm1540_vm3, %v9719_v45, %v4222_v23  ;;  %v4283_v30 = vsel %vm1540_vm3, %v4194_v44, %v9840_v54 }
 0x5ca   : > { %4698 = vmatpush1.msra.mxu0 %v4060_v17  ;;  %v4282_v17 = vsel %vm1540_vm3, %v9653_v6, %v4194_v44  ;;  %v4270_v45 = vsel %vm1540_vm3, %v9818_v41, %v9806_v50 }
 0x5cb   : > { %4699 = vmatprep.subr.mxu0 %v4048_v61  ;;  %v4269_v61 = vsel %vm1540_vm3, %v11280_v33, %v9818_v41 }
 0x5cc   : > { %4700 = vmatpush1.msra.mxu0 %v4047_v13  ;;  %v4002_v22 = vpop.permute.xlu1 %4001 }
 0x5cd   : > { %4701 = vmatprep.subr.mxu0 %v11281_v24  ;;  %v9928_v60 = vpop.permute.xlu0 %4173  ;;  %v4076_v41 = vsel %vm1373_vm2, %v4002_v22, %v9901_v26  ;;  %v4075_v24 = vsel %vm1373_vm2, %v9746_v3, %v4002_v22  ;;  %v4050_v3 = vsel %vm1373_vm2, %v9835_v40, %v9823_v48 }
 0x5ce   : > { %4702 = vmatpush1.msra.mxu0 %v11282_v52  ;;  %v9934_v37 = vsel %vm1540_vm3, %v9881_v16, %v9928_v60 }
 0x5cf   : > { %4703 = vmatprep.subr.mxu0 %v11283_v35  ;;  %v4062_v35 = vsel %vm1373_vm2, %v9692_v34, %v9897_v21  ;;  %v11289_v34 = vld [vmem:[#allocation38_spill] sm:$0xff] }
 0x5d0   : > { %4704 = vmatpush1.msra.mxu0 %v11284_v42  ;;  %v4250_v15 = vpop.permute.xlu1 %4249  ;;  %v4049_v42 = vsel %vm1373_vm2, %v9612_v38, %v9835_v40  ;;  %v11291_v38 = vld [vmem:[#allocation23_spill] sm:$0xff]  ;;  %v11292_v40 = vld [vmem:[#allocation24_spill] sm:$0xff] }
 0x5d1   : > { %4705 = vmatprep.subr.mxu0 %v11285_v20  ;;  %v9939_v4 = vpop.permute.xlu0 %4251  ;;  %v4308_v39 = vsel %vm1540_vm3, %v9768_v19, %v4250_v15 }
 0x5d2   : > { %4706 = vmatpush1.msra.mxu0 %v11286_v2  ;;  %v4309_v51 = vsel %vm1540_vm3, %v4250_v15, %v9939_v4  ;;  %v11293_v2 = vld [vmem:[#allocation25_spill] sm:$0xff] }
 0x5d3   : > { %4707 = vmatprep.subr.mxu0 %v11287_v58  ;;  %4798 = vmatprep.subr.mxu1 %v4309_v51  ;;  %v11294_v51 = vld [vmem:[#allocation26_spill] sm:$0xff] }
 0x5d4   : > { %4708 = vmatpush1.msra.mxu0 %v11288_v43  ;;  %4799 = vmatpush1.msra.mxu1 %v4308_v39  ;;  %v4030_v0 = vpop.permute.xlu1 %4029 }
 0x5d5   : > { %6827 = vmatmul.mubr.msk.f32.vlgmr.msra.gmra.mxu0 %vm3183_vm5, %v9683_v7  ;;  %v9954_v19 = vpop.permute.xlu0 %4199  ;;  %4800 = vmatprep.subr.mxu1 %v4296_v12  ;;  %v4088_v44 = vsel %vm1373_vm2, %v9788_v9, %v4030_v0  ;;  %v4063_v9 = vsel %vm1373_vm2, %v9897_v21, %v9851_v1  ;;  %v11290_v21 = vld [vmem:[#allocation20_spill] sm:$0xff]  ;;  %v11295_v12 = vld [vmem:[#allocation29_spill] sm:$0xff] }
 0x5d6   : > { %4747 = vmatprep.mubr.f32.mxu0 %v11210_v46  ;;  %4801 = vmatpush1.msra.mxu1 %v4295_v25 }
 0x5d7   : > { %4802 = vmatprep.subr.mxu1 %v4283_v30 }
 0x5d8   : > { %4803 = vmatpush1.msra.mxu1 %v4282_v17  ;;  %v9964_v23 = vpop.permute.xlu1 %4169 }
 0x5d9   : > { %6828 = vmatmul.mubr.msk.f32.gmra.mxu0 %vm3183_vm5, %v9710_v27  ;;  %v9971_v13 = vpop.permute.xlu0 %4031  ;;  %4804 = vmatprep.subr.mxu1 %v4270_v45 }
 0x5da   : > { %4753 = vmatprep.mubr.f32.mxu0 %v11210_v46  ;;  %4805 = vmatpush1.msra.mxu1 %v4269_v61  ;;  %v4089_v6 = vsel %vm1373_vm2, %v4030_v0, %v9971_v13  ;;  %v11296_v0 = vld [vmem:[#allocation32_spill] sm:$0xff] }
 0x5db   : > { %4806 = vmatprep.subr.mxu1 %v4089_v6 }
 0x5dc   : > { %4807 = vmatpush1.msra.mxu1 %v4088_v44  ;;  %v9980_v33 = vpop.permute.xlu1 %3949 }
 0x5dd   : > { %6829 = vmatmul.mubr.msk.f32.gmra.mxu0 %vm3183_vm5, %v9736_v32  ;;  %v9986_v52 = vpop.permute.xlu0 %3979  ;;  %4808 = vmatprep.subr.mxu1 %v4076_v41 }
 0x5de   : > { %4759 = vmatprep.mubr.f32.mxu0 %v11210_v46  ;;  %4809 = vmatpush1.msra.mxu1 %v4075_v24 }
 0x5df   : > { %4810 = vmatprep.subr.mxu1 %v4063_v9 }
 0x5e0   : > { %4811 = vmatpush1.msra.mxu1 %v4062_v35  ;;  %v4198_v22 = vpop.permute.xlu1 %4197 }
 0x5e1   : > { %6830 = vmatmul.mubr.msk.f32.gmra.mxu0 %vm3183_vm5, %v9759_v31  ;;  %v10003_v15 = vpop.permute.xlu0 %4227  ;;  %4812 = vmatprep.subr.mxu1 %v4050_v3  ;;  %v4285_v9 = vsel %vm1540_vm3, %v4198_v22, %v9954_v19  ;;  %v4284_v35 = vsel %vm1540_vm3, %v9840_v54, %v4198_v22  ;;  %v4271_v3 = vsel %vm1540_vm3, %v9806_v50, %v9964_v23 }
 0x5e2   : > { %4765 = vmatprep.mubr.f32.mxu0 %v11210_v46  ;;  %4813 = vmatpush1.msra.mxu1 %v4049_v42 }
 0x5e3   : > { %4814 = vmatprep.subr.mxu1 %v11289_v34 }
 0x5e4   : > { %4815 = vmatpush1.msra.mxu1 %v11290_v21  ;;  %v10008_v20 = vpop.permute.xlu1 %3977 }
 0x5e5   : > { %6831 = vmatmul.mubr.msk.f32.gmra.mxu0 %vm3183_vm5, %v9778_v10  ;;  %v10012_v39 = vpop.permute.xlu0 %4007  ;;  %4816 = vmatprep.subr.mxu1 %v11291_v38  ;;  %v4064_v38 = vsel %vm1373_vm2, %v9851_v1, %v10008_v20  ;;  %v11297_v1 = vld [vmem:[#allocation46_spill] sm:$0xff] }
 0x5e6   : > { %4771 = vmatprep.mubr.f32.mxu0 %v11210_v46  ;;  %4817 = vmatpush1.msra.mxu1 %v11292_v40  ;;  %v4051_v40 = vsel %vm1373_vm2, %v9823_v48, %v9980_v33 }
 0x5e7   : > { %4818 = vmatprep.subr.mxu1 %v11293_v2 }
 0x5e8   : > { %4819 = vmatpush1.msra.mxu1 %v11294_v51  ;;  %v4226_v58 = vpop.permute.xlu1 %4225 }
 0x5e9   : > { %6832 = vmatmul.mubr.msk.f32.gmra.mxu0 %vm3183_vm5, %v9794_v57  ;;  %v10021_v43 = vpop.permute.xlu0 %4255  ;;  %4820 = vmatprep.subr.mxu1 %v11295_v12  ;;  %v4298_v44 = vsel %vm1540_vm3, %v4226_v58, %v10003_v15  ;;  %v4297_v41 = vsel %vm1540_vm3, %v9867_v5, %v4226_v58  ;;  %v4272_v5 = vsel %vm1540_vm3, %v9964_v23, %v9881_v16  ;;  %v11299_v58 = vld [vmem:[#allocation41_spill] sm:$0xff] }
 0x5ea   : > { %4777 = vmatprep.mubr.f32.mxu0 %v11210_v46  ;;  %4821 = vmatpush1.msra.mxu1 %v11296_v0  ;;  %v11300_v0 = vld [vmem:[#allocation33_spill] sm:$0xff] }
 0x5eb   : > { %6835 = vmatmul.mubr.msk.f32.vlgmr.msra.gmra.mxu1 %vm3183_vm5, %v9683_v7 }
 0x5ec   : > { %v4006_v25 = vpop.permute.xlu1 %4005  ;;  %4860 = vmatprep.mubr.f32.mxu1 %v11210_v46 }
 0x5ed   : > { %6833 = vmatmul.mubr.msk.f32.gmra.mxu0 %vm3183_vm5, %v9812_v29  ;;  %v10031_v30 = vpop.permute.xlu0 %4009  ;;  %v4078_v50 = vsel %vm1373_vm2, %v4006_v25, %v10012_v39  ;;  %v4077_v16 = vsel %vm1373_vm2, %v9901_v26, %v4006_v25  ;;  %v4052_v26 = vsel %vm1373_vm2, %v9980_v33, %v9918_v28  ;;  %v11301_v25 = vld [vmem:[#allocation34_spill] sm:$0xff] }
 0x5ee   : > { %4783 = vmatprep.mubr.f32.mxu0 %v11210_v46 }
 0x5ef   : > { %6836 = vmatmul.mubr.msk.f32.gmra.mxu1 %vm3183_vm5, %v9710_v27 }
 0x5f0   : > { %v4254_v17 = vpop.permute.xlu1 %4253  ;;  %4866 = vmatprep.mubr.f32.mxu1 %v11210_v46 }
 0x5f1   : > { %6834 = vmatmul.mubr.msk.f32.gmra.mxu0 %vm3183_vm5, %v9829_v59  ;;  %v10039_v45 = vpop.permute.xlu0 %4035  ;;  %v4310_v61 = vsel %vm1540_vm3, %v9939_v4, %v4254_v17  ;;  %v4311_v6 = vsel %vm1540_vm3, %v4254_v17, %v10021_v43 }
 0x5f2   : > { %4911 = vmatprep.subr.mxu0 %v4311_v6  ;;  %4967 = vmatprep.mubr.f32.mxu0 %v11210_v46 }
 0x5f3   : > { %6837 = vmatmul.mubr.msk.f32.gmra.mxu1 %vm3183_vm5, %v9736_v32  ;;  %4912 = vmatpush1.msra.mxu0 %v4310_v61  ;;  %v11302_v61 = vld [vmem:[#allocation36_spill] sm:$0xff] }
 0x5f4   : > { %4913 = vmatprep.subr.mxu0 %v4298_v44  ;;  %v4034_v24 = vpop.permute.xlu1 %4033  ;;  %4872 = vmatprep.mubr.f32.mxu1 %v11210_v46 }
 0x5f5   : > { %v10053_v4 = vpop.permute.xlu0 %4177  ;;  %4914 = vmatpush1.msra.mxu0 %v4297_v41  ;;  %v4091_v54 = vsel %vm1373_vm2, %v4034_v24, %v10039_v45  ;;  %v4090_v22 = vsel %vm1373_vm2, %v9971_v13, %v4034_v24  ;;  %v4065_v13 = vsel %vm1373_vm2, %v10008_v20, %v9986_v52  ;;  %v11298_v20 = vld [vmem:[#allocation42_spill] sm:$0xff]  ;;  %v11303_v41 = vld [vmem:[#allocation40_spill] sm:$0xff] }
 0x5f6   : > { %4915 = vmatprep.subr.mxu0 %v4285_v9  ;;  %v11304_v9 = vld [vmem:[#allocation37_spill] sm:$0xff] }
 0x5f7   : > { %6838 = vmatmul.mubr.msk.f32.gmra.mxu1 %vm3183_vm5, %v9759_v31  ;;  %4916 = vmatpush1.msra.mxu0 %v4284_v35 }
 0x5f8   : > { %4917 = vmatprep.subr.mxu0 %v4272_v5  ;;  %v4202_v42 = vpop.permute.xlu1 %4201  ;;  %4878 = vmatprep.mubr.f32.mxu1 %v11210_v46 }
 0x5f9   : > { %v10068_v34 = vpop.permute.xlu0 %4203  ;;  %4918 = vmatpush1.msra.mxu0 %v4271_v3  ;;  %v4286_v5 = vsel %vm1540_vm3, %v9954_v19, %v4202_v42 }
 0x5fa   : > { %4919 = vmatprep.subr.mxu0 %v4091_v54  ;;  %v4287_v35 = vsel %vm1540_vm3, %v4202_v42, %v10068_v34 }
 0x5fb   : > { %6839 = vmatmul.mubr.msk.f32.gmra.mxu1 %vm3183_vm5, %v9778_v10  ;;  %4920 = vmatpush1.msra.mxu0 %v4090_v22 }
 0x5fc   : > { %4921 = vmatprep.subr.mxu0 %v4078_v50  ;;  %v4230_v23 = vpop.permute.xlu1 %4229  ;;  %4884 = vmatprep.mubr.f32.mxu1 %v11210_v46 }
 0x5fd   : > { %v10081_v21 = vpop.permute.xlu0 %4231  ;;  %4922 = vmatpush1.msra.mxu0 %v4077_v16  ;;  %v4299_v44 = vsel %vm1540_vm3, %v10003_v15, %v4230_v23 }
 0x5fe   : > { %4923 = vmatprep.subr.mxu0 %v4065_v13  ;;  %v4300_v6 = vsel %vm1540_vm3, %v4230_v23, %v10081_v21 }
 0x5ff   : > { %6840 = vmatmul.mubr.msk.f32.gmra.mxu1 %vm3183_vm5, %v9794_v57  ;;  %4924 = vmatpush1.msra.mxu0 %v4064_v38 }
 0x600   : > { %4925 = vmatprep.subr.mxu0 %v4052_v26  ;;  %v3982_v2 = vpop.permute.xlu1 %3981  ;;  %4890 = vmatprep.mubr.f32.mxu1 %v11210_v46 }
 0x601   : > { %v10098_v51 = vpop.permute.xlu0 %4233  ;;  %4926 = vmatpush1.msra.mxu0 %v4051_v40  ;;  %v4066_v16 = vsel %vm1373_vm2, %v9986_v52, %v3982_v2 }
 0x602   : > { %4927 = vmatprep.subr.mxu0 %v11297_v1  ;;  %v11305_v1 = vld [vmem:[#allocation39_spill] sm:$0xff] }
 0x603   : > { %6841 = vmatmul.mubr.msk.f32.gmra.mxu1 %vm3183_vm5, %v9812_v29  ;;  %4928 = vmatpush1.msra.mxu0 %v11298_v20  ;;  %v11306_v20 = vld [vmem:[#allocation31_spill] sm:$0xff] }
 0x604   : > { %4929 = vmatprep.subr.mxu0 %v11299_v58  ;;  %v4258_v12 = vpop.permute.xlu1 %4257  ;;  %4896 = vmatprep.mubr.f32.mxu1 %v11210_v46  ;;  %v11307_v58 = vld [vmem:[#allocation35_spill] sm:$0xff] }
 0x605   : > { %v4260_v48 = vpop.permute.xlu0 %4259  ;;  %v4312_v33 = vsel %vm1540_vm3, %v10021_v43, %v4258_v12  ;;  %4930 = vmatpush1.msra.mxu0 %v11300_v0 }
 0x606   : > { %4931 = vmatprep.subr.mxu0 %v11301_v25  ;;  %v4313_v17 = vsel %vm1540_vm3, %v4258_v12, %v4260_v48 }
 0x607   : > { %6842 = vmatmul.mubr.msk.f32.gmra.mxu1 %vm3183_vm5, %v9829_v59  ;;  %5024 = vmatprep.subr.mxu1 %v4313_v17 }
 0x608   : > { %4932 = vmatpush1.msra.mxu0 %v11302_v61  ;;  %5025 = vmatpush1.msra.mxu1 %v4312_v33  ;;  %v5368_v61 = vld [vmem:[#allocation9 + $0x70] sm:$0xff] }
 0x609   : > { %v10118_v43 = vpop.permute.xlu0 %3983  ;;  %4933 = vmatprep.subr.mxu0 %v11303_v41  ;;  %5026 = vmatprep.subr.mxu1 %v4300_v6  ;;  %v4038_v24 = vpop.permute.xlu1 %4037  ;;  %v5480_v6 = vld [vmem:[#allocation9 + $0x3f0] sm:$0xff] }
 0x60a   : > { %4934 = vmatpush1.msra.mxu0 %v11304_v9  ;;  %5027 = vmatpush1.msra.mxu1 %v4299_v44  ;;  %v4092_v42 = vsel %vm1373_vm2, %v10039_v45, %v4038_v24  ;;  %v4067_v45 = vsel %vm1373_vm2, %v3982_v2, %v10118_v43  ;;  %v5592_v44 = vld [vmem:[#allocation9 + $0x770] sm:$0xff]  ;;  %v5481_v9 = vld [vmem:[#allocation9 + $0x3f8] sm:$0xff] }
 0x60b   : > { %6843 = vmatmul.mubr.msk.f32.vlgmr.msra.gmra.mxu0 %vm3183_vm5, %v9683_v7  ;;  %5028 = vmatprep.subr.mxu1 %v4287_v35  ;;  %v5593_v35 = vld [vmem:[#allocation9 + $0x778] sm:$0xff] }
 0x60c   : > { %5029 = vmatpush1.msra.mxu1 %v4286_v5  ;;  %4973 = vmatprep.mubr.f32.mxu0 %v11210_v46 }
 0x60d   : > { %5080 = vmatprep.mubr.f32.mxu1 %v11210_v46  ;;  %v4040_v15 = vpop.permute.xlu0 %4039 }
 0x60e   : > { %v4176_v3 = vpop.permute.xlu1 %4175  ;;  %v4093_v19 = vsel %vm1373_vm2, %v4038_v24, %v4040_v15  ;;  %v5369_v24 = vld [vmem:[#allocation9 + $0x78] sm:$0xff] }
 0x60f   : > { %6844 = vmatmul.mubr.msk.f32.gmra.mxu0 %vm3183_vm5, %v9710_v27  ;;  %v4274_v54 = vsel %vm1540_vm3, %v9928_v60, %v4176_v3 }
 0x610   : > { %5030 = vmatprep.subr.mxu1 %v4274_v54  ;;  %4979 = vmatprep.mubr.f32.mxu0 %v11210_v46 }
 0x611   : > { %5031 = vmatpush1.msra.mxu1 %v9934_v37  ;;  %v4079_v37 = vsel %vm1373_vm2, %v10012_v39, %v10031_v30  ;;  %v4301_v39 = vsel %vm1540_vm3, %v10081_v21, %v10098_v51  ;;  %v4275_v21 = vsel %vm1540_vm3, %v4176_v3, %v10053_v4 }
 0x612   : > { %5032 = vmatprep.subr.mxu1 %v4093_v19  ;;  %v4206_v22 = vpop.permute.xlu1 %4205 }
 0x613   : > { %5033 = vmatpush1.msra.mxu1 %v4092_v42  ;;  %6845 = vmatmul.mubr.msk.f32.gmra.mxu0 %vm3183_vm5, %v9736_v32  ;;  %v4288_v26 = vsel %vm1540_vm3, %v10068_v34, %v4206_v22 }
 0x614   : > { %4985 = vmatprep.mubr.f32.mxu0 %v11210_v46 }
 0x616   : > { %v4012_v50 = vpop.permute.xlu1 %4011 }
 0x617   : > { %6846 = vmatmul.mubr.msk.f32.gmra.mxu0 %vm3183_vm5, %v9759_v31  ;;  %v4080_v60 = vsel %vm1373_vm2, %v10031_v30, %v4012_v50  ;;  %v3954_v30 = vpop.permute.xlu0 %3953 }
 0x618   : > { %5034 = vmatprep.subr.mxu1 %v4080_v60  ;;  %4991 = vmatprep.mubr.f32.mxu0 %v11210_v46  ;;  %v4053_v40 = vsel %vm1373_vm2, %v9918_v28, %v3954_v30 }
 0x619   : > { %5035 = vmatpush1.msra.mxu1 %v4079_v37 }
 0x61a   : > { %5036 = vmatprep.subr.mxu1 %v4067_v45  ;;  %v4262_v23 = vpop.permute.xlu1 %4261 }
 0x61b   : > { %v4314_v13 = vsel %vm1540_vm3, %v4260_v48, %v4262_v23  ;;  %5037 = vmatpush1.msra.mxu1 %v4066_v16  ;;  %5137 = vmatprep.subr.mxu0 %v4262_v23  ;;  %v11308_v48 = vld [vmem:[#allocation27_spill] sm:$0xff] }
 0x61c   : > { %6847 = vmatmul.mubr.msk.f32.gmra.mxu0 %vm3183_vm5, %v9778_v10 }
 0x61d   : > { %5138 = vmatpush1.msra.mxu0 %v4314_v13  ;;  %4997 = vmatprep.mubr.f32.mxu0 %v11210_v46 }
 0x61e   : > { %5139 = vmatprep.subr.mxu0 %v10098_v51  ;;  %v3956_v52 = vpop.permute.xlu1 %3955  ;;  %v4014_v51 = vpop.permute.xlu0 %4013 }
 0x61f   : > { %5140 = vmatpush1.msra.mxu0 %v4301_v39  ;;  %v4054_v38 = vsel %vm1373_vm2, %v3954_v30, %v3956_v52  ;;  %v5382_v39 = vld [vmem:[#allocation9 + $0xe0] sm:$0xff] }
 0x620   : > { %5141 = vmatprep.subr.mxu0 %v4206_v22  ;;  %6848 = vmatmul.mubr.msk.f32.gmra.mxu0 %vm3183_vm5, %v9794_v57  ;;  %v5494_v30 = vld [vmem:[#allocation9 + $0x460] sm:$0xff] }
 0x621   : > { %5038 = vmatprep.subr.mxu1 %v4054_v38  ;;  %5142 = vmatpush1.msra.mxu0 %v4288_v26 }
 0x622   : > { %5039 = vmatpush1.msra.mxu1 %v4053_v40  ;;  %5143 = vmatprep.subr.mxu0 %v10053_v4  ;;  %v4042_v2 = vpop.permute.xlu1 %4041  ;;  %v4081_v4 = vsel %vm1373_vm2, %v4012_v50, %v4014_v51  ;;  %v5383_v40 = vld [vmem:[#allocation9 + $0xe8] sm:$0xff] }
 0x623   : > { %5040 = vmatprep.subr.mxu1 %v9648_v62  ;;  %5144 = vmatpush1.msra.mxu0 %v4275_v21  ;;  %v4094_v34 = vsel %vm1373_vm2, %v4040_v15, %v4042_v2  ;;  %v5495_v21 = vld [vmem:[#allocation9 + $0x468] sm:$0xff] }
 0x624   : > { %5003 = vmatprep.mubr.f32.mxu0 %v11210_v46  ;;  %5041 = vmatpush1.msra.mxu1 %v11305_v1 }
 0x625   : > { %5145 = vmatprep.subr.mxu0 %v4042_v2  ;;  %6849 = vmatmul.mubr.msk.f32.gmra.mxu0 %vm3183_vm5, %v9812_v29  ;;  %v5607_v2 = vld [vmem:[#allocation9 + $0x7e8] sm:$0xff] }
 0x626   : > { %5042 = vmatprep.subr.mxu1 %v9541_v47  ;;  %5146 = vmatpush1.msra.mxu0 %v4094_v34  ;;  %v3986_v28 = vpop.permute.xlu1 %3985  ;;  %v3958_v47 = vpop.permute.xlu0 %3957 }
 0x627   : > { %5043 = vmatpush1.msra.mxu1 %v11306_v20  ;;  %5147 = vmatprep.subr.mxu0 %v4014_v51  ;;  %v4068_v62 = vsel %vm1373_vm2, %v10118_v43, %v3986_v28  ;;  %v4055_v12 = vsel %vm1373_vm2, %v3956_v52, %v3958_v47  ;;  %v5606_v52 = vld [vmem:[#allocation9 + $0x7e0] sm:$0xff] }
 0x628   : > { %5044 = vmatprep.subr.mxu1 %v9583_v53  ;;  %5148 = vmatpush1.msra.mxu0 %v4081_v4 }
 0x629   : > { %5009 = vmatprep.mubr.f32.mxu0 %v11210_v46  ;;  %5045 = vmatpush1.msra.mxu1 %v11307_v58 }
 0x62a   : > { %5149 = vmatprep.subr.mxu0 %v3986_v28  ;;  %6850 = vmatmul.mubr.msk.f32.gmra.mxu0 %vm3183_vm5, %v9829_v59 }
 0x62b   : > { %5046 = vmatprep.subr.mxu1 %v9452_v18  ;;  %5150 = vmatpush1.msra.mxu0 %v4068_v62 }
 0x62c   : > { %5047 = vmatpush1.msra.mxu1 %v11308_v48  ;;  %5151 = vmatprep.subr.mxu0 %v3958_v47 }
 0x62d   : > { %6851 = vmatmul.mubr.msk.f32.vlgmr.msra.gmra.mxu1 %vm3183_vm5, %v9683_v7  ;;  %5152 = vmatpush1.msra.mxu0 %v4055_v12 }
 0x62e   : > { %5153 = vmatprep.subr.mxu0 %v9770_v49  ;;  %5086 = vmatprep.mubr.f32.mxu1 %v11210_v46 }
 0x62f   : > { %5154 = vmatpush1.msra.mxu0 %v9651_v8  ;;  %5193 = vmatprep.mubr.f32.mxu0 %v11210_v46  ;;  %v5466_v8 = vld [vmem:[#allocation9 + $0x380] sm:$0xff] }
 0x630   : > { %5155 = vmatprep.subr.mxu0 %v9633_v63  ;;  %v5354_v63 = vld [vmem:[#allocation9] sm:$0xff] }
 0x631   : > { %6852 = vmatmul.mubr.msk.f32.gmra.mxu1 %vm3183_vm5, %v9710_v27  ;;  %5156 = vmatpush1.msra.mxu0 %v9609_v11 }
 0x632   : > { %5157 = vmatprep.subr.mxu0 %v9724_v55  ;;  %5092 = vmatprep.mubr.f32.mxu1 %v11210_v46  ;;  %v5467_v55 = vld [vmem:[#allocation9 + $0x388] sm:$0xff] }
 0x633   : > { %5158 = vmatpush1.msra.mxu0 %v9590_v14  ;;  %v10246_v18 = vpop.permute.xlu1 %4389 }
 0x634   : > { %5159 = vmatprep.subr.mxu0 %v9565_v36 }
 0x635   : > { %6853 = vmatmul.mubr.msk.f32.gmra.mxu1 %vm3183_vm5, %v9736_v32  ;;  %5160 = vmatpush1.msra.mxu0 %v9697_v56 }
 0x636   : > { %6859 = vmatmul.mubr.msk.f32.vlgmr.msra.gmra.mxu0 %vm3183_vm5, %v9683_v7  ;;  %5098 = vmatprep.mubr.f32.mxu1 %v11210_v46  ;;  %v5578_v7 = vld [vmem:[#allocation9 + $0x700] sm:$0xff] }
 0x637   : > { %5199 = vmatprep.mubr.f32.mxu0 %v11210_v46  ;;  %v10254_v15 = vpop.permute.xlu1 %4399 }
 0x638   : > { %11310 = vst [vmem:[#allocation47_spill] sm:$0xff] %v10254_v15 }
 0x639   : > { %6854 = vmatmul.mubr.msk.f32.gmra.mxu1 %vm3183_vm5, %v9759_v31 }
 0x63a   : > { %6860 = vmatmul.mubr.msk.f32.gmra.mxu0 %vm3183_vm5, %v9710_v27  ;;  %5104 = vmatprep.mubr.f32.mxu1 %v11210_v46  ;;  %v5355_v27 = vld [vmem:[#allocation9 + $0x8] sm:$0xff] }
 0x63b   : > { %5205 = vmatprep.mubr.f32.mxu0 %v11210_v46 }
 0x63d   : > { %6855 = vmatmul.mubr.msk.f32.gmra.mxu1 %vm3183_vm5, %v9778_v10 }
 0x63e   : > { %6861 = vmatmul.mubr.msk.f32.gmra.mxu0 %vm3183_vm5, %v9736_v32  ;;  %5110 = vmatprep.mubr.f32.mxu1 %v11210_v46  ;;  %v5579_v32 = vld [vmem:[#allocation9 + $0x708] sm:$0xff] }
 0x63f   : > { %5211 = vmatprep.mubr.f32.mxu0 %v11210_v46 }
 0x641   : > { %6856 = vmatmul.mubr.msk.f32.gmra.mxu1 %vm3183_vm5, %v9794_v57 }
 0x642   : > { %6862 = vmatmul.mubr.msk.f32.gmra.mxu0 %vm3183_vm5, %v9759_v31  ;;  %5116 = vmatprep.mubr.f32.mxu1 %v11210_v46 }
 0x643   : > { %5217 = vmatprep.mubr.f32.mxu0 %v11210_v46 }
 0x645   : > { %6857 = vmatmul.mubr.msk.f32.gmra.mxu1 %vm3183_vm5, %v9812_v29 }
 0x646   : > { %6863 = vmatmul.mubr.msk.f32.gmra.mxu0 %vm3183_vm5, %v9778_v10  ;;  %5122 = vmatprep.mubr.f32.mxu1 %v11210_v46 }
 0x647   : > { %5223 = vmatprep.mubr.f32.mxu0 %v11210_v46 }
 0x649   : > { %6858 = vmatmul.mubr.msk.f32.gmra.mxu1 %vm3183_vm5, %v9829_v59 }
 0x64a   : > { %6864 = vmatmul.mubr.msk.f32.gmra.mxu0 %vm3183_vm5, %v9794_v57 }
 0x64b   : > { %5229 = vmatprep.mubr.f32.mxu0 %v11210_v46 }
 0x64e   : > { %6865 = vmatmul.mubr.msk.f32.gmra.mxu0 %vm3183_vm5, %v9812_v29 }
 0x64f   : > { %5235 = vmatprep.mubr.f32.mxu0 %v11210_v46  ;;  %v10250_v46 = vpop.permute.xlu0 %4394 }
 0x650   : > { %11309 = vst [vmem:[#allocation44_spill] sm:$0xff] %v10250_v46 }
 0x652   : > { %6866 = vmatmul.mubr.msk.f32.gmra.mxu0 %vm3183_vm5, %v9829_v59 }
 0x653   : > { %v10264_v51 = vpop.permute.xlu0 %4404 }
 0x654   : > { %11311 = vst [vmem:[#allocation43_spill] sm:$0xff] %v10264_v51 }
 0x65a   : > { %v4517_v14 = vpop.f32.mrf.mxu0 }
 0x65b   : > { %v4518_v36 = vadd.f32 %v4517_v14, %v10246_v18 }
 0x65c   : > { %v4519_v53 = vpop.f32.mrf.mxu0 }
 0x65d   : > { %v5242_v11 = vmax.f32 %v4518_v36, 0.0  ;;  %v4520_v56 = vadd.f32 %v4519_v53, %v10246_v18 }
 0x65e   : > { %v4523_v31 = vpop.f32.mrf.mxu0 }
 0x65f   : > { %v5243_v49 = vmax.f32 %v4520_v56, 0.0  ;;  %v5690_v10 = vmul.f32 %v5354_v63, %v5242_v11  ;;  %v5802_v57 = vmul.f32 %v5466_v8, %v5242_v11  ;;  %v5914_v29 = vmul.f32 %v5578_v7, %v5242_v11  ;;  %v5396_v11 = vld [vmem:[#allocation9 + $0x150] sm:$0xff] }
 0x660   : > { %v4524_v59 = vadd.f32 %v4523_v31, %v10250_v46  ;;  %v4525_v33 = vpop.f32.mrf.mxu0  ;;  %v5508_v63 = vld [vmem:[#allocation9 + $0x4d0] sm:$0xff] }
 0x661   : > { %v5691_v0 = vmul.f32 %v5355_v27, %v5243_v49  ;;  %v5803_v25 = vmul.f32 %v5467_v55, %v5243_v49  ;;  %v5915_v17 = vmul.f32 %v5579_v32, %v5243_v49  ;;  %v4526_v43 = vadd.f32 %v4525_v33, %v10250_v46  ;;  %v5620_v8 = vld [vmem:[#allocation9 + $0x850] sm:$0xff]  ;;  %v5397_v27 = vld [vmem:[#allocation9 + $0x158] sm:$0xff]  ;;  %v10274_v49 = vpop.permute.xlu1 %4409 }
 0x662   : > { %v5256_v41 = vmax.f32 %v4524_v59, 0.0  ;;  %v4529_v5 = vpop.f32.mrf.mxu0  ;;  %v5509_v55 = vld [vmem:[#allocation9 + $0x4d8] sm:$0xff]  ;;  %11315 = vst [vmem:[#allocation28_spill] sm:$0xff] %v10274_v49 }
 0x663   : > { %v10256_v3 = vadd.f32 %v5691_v0, %v5690_v10  ;;  %v10258_v54 = vadd.f32 %v5803_v25, %v5802_v57  ;;  %v10260_v19 = vadd.f32 %v5915_v17, %v5914_v29  ;;  %v5257_v42 = vmax.f32 %v4526_v43, 0.0  ;;  %v5621_v32 = vld [vmem:[#allocation9 + $0x858] sm:$0xff] }
 0x664   : > { %v5704_v22 = vmul.f32 %v5368_v61, %v5256_v41  ;;  %v5816_v50 = vmul.f32 %v5480_v6, %v5256_v41  ;;  %v5928_v60 = vmul.f32 %v5592_v44, %v5256_v41  ;;  %v4530_v37 = vadd.f32 %v4529_v5, %v10254_v15  ;;  %v4531_v45 = vpop.f32.mrf.mxu0 }
 0x665   : > { %v5705_v16 = vmul.f32 %v5369_v24, %v5257_v42  ;;  %v5817_v23 = vmul.f32 %v5481_v9, %v5257_v42  ;;  %v5929_v13 = vmul.f32 %v5593_v35, %v5257_v42  ;;  %v4532_v38 = vadd.f32 %v4531_v45, %v10254_v15  ;;  %v5410_v24 = vld [vmem:[#allocation9 + $0x1c0] sm:$0xff] }
 0x666   : > { %v5270_v26 = vmax.f32 %v4530_v37, 0.0  ;;  %v4535_v34 = vpop.f32.mrf.mxu0  ;;  %v5522_v9 = vld [vmem:[#allocation9 + $0x540] sm:$0xff] }
 0x667   : > { %v10266_v1 = vadd.f32 %v5705_v16, %v5704_v22  ;;  %v10268_v28 = vadd.f32 %v5817_v23, %v5816_v50  ;;  %v10270_v4 = vadd.f32 %v5929_v13, %v5928_v60  ;;  %v5271_v20 = vmax.f32 %v4532_v38, 0.0  ;;  %v5634_v35 = vld [vmem:[#allocation9 + $0x8c0] sm:$0xff]  ;;  %v5411_v22 = vld [vmem:[#allocation9 + $0x1c8] sm:$0xff]  ;;  %v10288_v16 = vpop.permute.xlu0 %4414 }
 0x668   : > { %v5718_v62 = vmul.f32 %v5382_v39, %v5270_v26  ;;  %v5830_v58 = vmul.f32 %v5494_v30, %v5270_v26  ;;  %v5942_v47 = vmul.f32 %v5606_v52, %v5270_v26  ;;  %v4536_v12 = vadd.f32 %v4535_v34, %v10264_v51  ;;  %v4537_v48 = vpop.f32.mrf.mxu0  ;;  %v5523_v50 = vld [vmem:[#allocation9 + $0x548] sm:$0xff]  ;;  %11316 = vst [vmem:[#allocation30_spill] sm:$0xff] %v10288_v16 }
 0x669   : > { %11312 = vst [vmem:[#allocation16_spill] sm:$0xff] %v10266_v1  ;;  %11313 = vst [vmem:[#allocation19_spill] sm:$0xff] %v10268_v28  ;;  %v5719_v14 = vmul.f32 %v5383_v40, %v5271_v20  ;;  %v5831_v36 = vmul.f32 %v5495_v21, %v5271_v20  ;;  %v5943_v53 = vmul.f32 %v5607_v2, %v5271_v20  ;;  %v5635_v60 = vld [vmem:[#allocation9 + $0x8c8] sm:$0xff] }
 0x66a   : > { %11314 = vst [vmem:[#allocation45_spill] sm:$0xff] %v10270_v4  ;;  %v4538_v7 = vadd.f32 %v4537_v48, %v10264_v51  ;;  %v5284_v56 = vmax.f32 %v4536_v12, 0.0  ;;  %v4541_v31 = vpop.f32.mrf.mxu0 }
 0x66b   : > { %v10276_v10 = vadd.f32 %v5719_v14, %v5718_v62  ;;  %v10278_v57 = vadd.f32 %v5831_v36, %v5830_v58  ;;  %v10280_v29 = vadd.f32 %v5943_v53, %v5942_v47  ;;  %v4542_v17 = vadd.f32 %v4541_v31, %v10274_v49  ;;  %v5649_v31 = vld [vmem:[#allocation9 + $0x938] sm:$0xff] }
 0x66c   : > { %v5285_v59 = vmax.f32 %v4538_v7, 0.0  ;;  %v5732_v33 = vmul.f32 %v5396_v11, %v5284_v56  ;;  %v5844_v0 = vmul.f32 %v5508_v63, %v5284_v56  ;;  %v5956_v25 = vmul.f32 %v5620_v8, %v5284_v56  ;;  %v4543_v61 = vpop.f32.mrf.mxu0  ;;  %v10283_v6 = vpop.f32.mrf.mxu1  ;;  %v5424_v63 = vld [vmem:[#allocation9 + $0x230] sm:$0xff] }
 0x66d   : > { %v4544_v5 = vadd.f32 %v4543_v61, %v10274_v49  ;;  %v5298_v42 = vmax.f32 %v4542_v17, 0.0  ;;  %v5536_v8 = vld [vmem:[#allocation9 + $0x5b0] sm:$0xff] }
 0x66e   : > { %v5733_v44 = vmul.f32 %v5397_v27, %v5285_v59  ;;  %v5845_v43 = vmul.f32 %v5509_v55, %v5285_v59  ;;  %v5957_v41 = vmul.f32 %v5621_v32, %v5285_v59  ;;  %v4547_v37 = vpop.f32.mrf.mxu0  ;;  %v10286_v45 = vpop.f32.mrf.mxu1  ;;  %v5648_v7 = vld [vmem:[#allocation9 + $0x930] sm:$0xff]  ;;  %v5425_v55 = vld [vmem:[#allocation9 + $0x238] sm:$0xff] }
 0x66f   : > { %v5299_v30 = vmax.f32 %v4544_v5, 0.0  ;;  %v5746_v52 = vmul.f32 %v5410_v24, %v5298_v42  ;;  %v5858_v38 = vmul.f32 %v5522_v9, %v5298_v42  ;;  %v5970_v26 = vmul.f32 %v5634_v35, %v5298_v42  ;;  %v10310_v27 = vpop.permute.xlu1 %4419  ;;  %v5537_v32 = vld [vmem:[#allocation9 + $0x5b8] sm:$0xff] }
 0x670   : > { %v10290_v23 = vadd.f32 %v5733_v44, %v5732_v33  ;;  %v10292_v13 = vadd.f32 %v5845_v43, %v5844_v0  ;;  %v10294_v39 = vadd.f32 %v5957_v41, %v5956_v25  ;;  %v4549_v40 = vpop.f32.mrf.mxu0  ;;  %v10296_v21 = vpop.f32.mrf.mxu1  ;;  %v4548_v62 = vadd.f32 %v4547_v37, %v10288_v16  ;;  %11318 = vst [vmem:[#allocation15_spill] sm:$0xff] %v10310_v27  ;;  %v5438_v37 = vld [vmem:[#allocation9 + $0x2a0] sm:$0xff] }
 0x671   : > { %v5747_v2 = vmul.f32 %v5411_v22, %v5299_v30  ;;  %v5859_v34 = vmul.f32 %v5523_v50, %v5299_v30  ;;  %v5971_v20 = vmul.f32 %v5635_v60, %v5299_v30  ;;  %v4550_v56 = vadd.f32 %v4549_v40, %v10288_v16  ;;  %v5550_v30 = vld [vmem:[#allocation9 + $0x620] sm:$0xff]  ;;  %v10322_v40 = vpop.permute.xlu0 %4424 }
 0x672   : > { %v4553_v58 = vpop.f32.mrf.mxu0  ;;  %v10299_v47 = vpop.f32.mrf.mxu1  ;;  %v5312_v36 = vmax.f32 %v4548_v62, 0.0  ;;  %11319 = vst [vmem:[#allocation22_spill] sm:$0xff] %v10322_v40 }
 0x673   : > { %11317 = vst [vmem:[#allocation18_spill] sm:$0xff] %v10299_v47  ;;  %v10301_v12 = vadd.f32 %v5747_v2, %v5746_v52  ;;  %v10303_v48 = vadd.f32 %v5859_v34, %v5858_v38  ;;  %v10305_v14 = vadd.f32 %v5971_v20, %v5970_v26  ;;  %v5313_v33 = vmax.f32 %v4550_v56, 0.0  ;;  %v5662_v52 = vld [vmem:[#allocation9 + $0x9a0] sm:$0xff]  ;;  %v5439_v2 = vld [vmem:[#allocation9 + $0x2a8] sm:$0xff] }
 0x674   : > { %v4555_v53 = vpop.f32.mrf.mxu0  ;;  %v10307_v11 = vpop.f32.mrf.mxu1  ;;  %v4554_v0 = vadd.f32 %v4553_v58, %v10310_v27  ;;  %v5760_v25 = vmul.f32 %v5424_v63, %v5312_v36  ;;  %v5872_v17 = vmul.f32 %v5536_v8, %v5312_v36  ;;  %v5984_v43 = vmul.f32 %v5648_v7, %v5312_v36  ;;  %v5551_v34 = vld [vmem:[#allocation9 + $0x628] sm:$0xff] }
 0x675   : > { %v5761_v41 = vmul.f32 %v5425_v55, %v5313_v33  ;;  %v5873_v24 = vmul.f32 %v5537_v32, %v5313_v33  ;;  %v5985_v9 = vmul.f32 %v5649_v31, %v5313_v33  ;;  %v4556_v35 = vadd.f32 %v4555_v53, %v10310_v27  ;;  %v5663_v20 = vld [vmem:[#allocation9 + $0x9a8] sm:$0xff] }
 0x676   : > { %v10312_v59 = vpop.f32.mrf.mxu1  ;;  %v4559_v61 = vpop.f32.mrf.mxu0  ;;  %v5326_v60 = vmax.f32 %v4554_v0, 0.0 }
 0x677   : > { %v10316_v42 = vadd.f32 %v5761_v41, %v5760_v25  ;;  %v10318_v22 = vadd.f32 %v5873_v24, %v5872_v17  ;;  %v10320_v50 = vadd.f32 %v5985_v9, %v5984_v43  ;;  %v5327_v62 = vmax.f32 %v4556_v35, 0.0  ;;  %v5452_v41 = vld [vmem:[#allocation9 + $0x310] sm:$0xff]  ;;  %v5453_v24 = vld [vmem:[#allocation9 + $0x318] sm:$0xff] }
 0x678   : > { %v4648_v44 = vpop.f32.mrf.mxu1  ;;  %v4561_v38 = vpop.f32.mrf.mxu0  ;;  %v4560_v58 = vadd.f32 %v4559_v61, %v10322_v40  ;;  %v5774_v53 = vmul.f32 %v5438_v37, %v5326_v60  ;;  %v5886_v63 = vmul.f32 %v5550_v30, %v5326_v60  ;;  %v5998_v7 = vmul.f32 %v5662_v52, %v5326_v60  ;;  %v5564_v61 = vld [vmem:[#allocation9 + $0x690] sm:$0xff]  ;;  %v5565_v60 = vld [vmem:[#allocation9 + $0x698] sm:$0xff] }
 0x679   : > { %v4562_v8 = vadd.f32 %v4561_v38, %v10322_v40  ;;  %v5775_v56 = vmul.f32 %v5439_v2, %v5327_v62  ;;  %v5887_v55 = vmul.f32 %v5551_v34, %v5327_v62  ;;  %v5999_v32 = vmul.f32 %v5663_v20, %v5327_v62  ;;  %v5676_v37 = vld [vmem:[#allocation9 + $0xa10] sm:$0xff]  ;;  %v5677_v30 = vld [vmem:[#allocation9 + $0xa18] sm:$0xff]  ;;  %v5398_v34 = vld [vmem:[#allocation9 + $0x160] sm:$0xff] }
 0x67a   : > { %v4650_v5 = vpop.f32.mrf.mxu1  ;;  %v5340_v33 = vmax.f32 %v4560_v58, 0.0  ;;  %v4649_v9 = vadd.f32 %v4648_v44, %v10264_v51  ;;  %v5510_v20 = vld [vmem:[#allocation9 + $0x4e0] sm:$0xff]  ;;  %v10339_v44 = vadd.f32 %v10307_v11, %v10254_v15 }
 0x67b   : > { %v5341_v0 = vmax.f32 %v4562_v8, 0.0  ;;  %v10326_v25 = vadd.f32 %v5775_v56, %v5774_v53  ;;  %v10328_v17 = vadd.f32 %v5887_v55, %v5886_v63  ;;  %v10330_v43 = vadd.f32 %v5999_v32, %v5998_v7  ;;  %v5622_v7 = vld [vmem:[#allocation9 + $0x860] sm:$0xff] }
 0x67c   : > { %v4654_v26 = vpop.f32.mrf.mxu1  ;;  %v5788_v52 = vmul.f32 %v5452_v41, %v5340_v33  ;;  %v5900_v38 = vmul.f32 %v5564_v61, %v5340_v33  ;;  %v6012_v58 = vmul.f32 %v5676_v37, %v5340_v33  ;;  %v5286_v8 = vmax.f32 %v4649_v9, 0.0  ;;  %v5511_v9 = vld [vmem:[#allocation9 + $0x4e8] sm:$0xff] }
 0x67d   : > { %v5789_v2 = vmul.f32 %v5453_v24, %v5341_v0  ;;  %v5901_v53 = vmul.f32 %v5565_v60, %v5341_v0  ;;  %v6013_v63 = vmul.f32 %v5677_v30, %v5341_v0  ;;  %v10335_v56 = vadd.f32 %v10283_v6, %v10246_v18  ;;  %v5399_v24 = vld [vmem:[#allocation9 + $0x168] sm:$0xff] }
 0x67e   : > { %v4656_v36 = vpop.f32.mrf.mxu1  ;;  %v4651_v32 = vadd.f32 %v4650_v5, %v10264_v51  ;;  %v5734_v33 = vmul.f32 %v5398_v34, %v5286_v8  ;;  %v5846_v0 = vmul.f32 %v5510_v20, %v5286_v8  ;;  %v5623_v37 = vld [vmem:[#allocation9 + $0x868] sm:$0xff]  ;;  %v5958_v60 = vmul.f32 %v5622_v7, %v5286_v8 }
 0x67f   : > { %v10341_v55 = vadd.f32 %v5789_v2, %v5788_v52  ;;  %v10344_v41 = vadd.f32 %v5901_v53, %v5900_v38  ;;  %v10346_v61 = vadd.f32 %v6013_v63, %v6012_v58  ;;  %v4655_v30 = vadd.f32 %v4654_v26, %v10274_v49  ;;  %v5412_v38 = vld [vmem:[#allocation9 + $0x1d0] sm:$0xff]  ;;  %v5413_v26 = vld [vmem:[#allocation9 + $0x1d8] sm:$0xff] }
 0x680   : > { %v4660_v31 = vpop.f32.mrf.mxu1  ;;  %v5287_v6 = vmax.f32 %v4651_v32, 0.0  ;;  %v4657_v11 = vadd.f32 %v4656_v36, %v10274_v49  ;;  %v6076_v52 = vadd.f32 %v10290_v23, %v5734_v33  ;;  %v6204_v5 = vadd.f32 %v10292_v13, %v5846_v0  ;;  %v5524_v2 = vld [vmem:[#allocation9 + $0x550] sm:$0xff]  ;;  %v5525_v32 = vld [vmem:[#allocation9 + $0x558] sm:$0xff]  ;;  %v5426_v33 = vld [vmem:[#allocation9 + $0x240] sm:$0xff] }
 0x681   : > { %v5636_v58 = vld [vmem:[#allocation9 + $0x8d0] sm:$0xff]  ;;  %v4661_v34 = vadd.f32 %v4660_v31, %v10288_v16  ;;  %v6332_v53 = vadd.f32 %v10294_v39, %v5958_v60  ;;  %v5637_v36 = vld [vmem:[#allocation9 + $0x8d8] sm:$0xff]  ;;  %v5300_v28 = vmax.f32 %v4655_v30, 0.0  ;;  %v5538_v13 = vld [vmem:[#allocation9 + $0x5c0] sm:$0xff] }
 0x682   : > { %v4662_v35 = vpop.f32.mrf.mxu1  ;;  %v5735_v63 = vmul.f32 %v5399_v24, %v5287_v6  ;;  %v5847_v8 = vmul.f32 %v5511_v9, %v5287_v6  ;;  %v5959_v7 = vmul.f32 %v5623_v37, %v5287_v6  ;;  %v5301_v1 = vmax.f32 %v4657_v11, 0.0  ;;  %v5427_v30 = vld [vmem:[#allocation9 + $0x248] sm:$0xff] }
 0x683   : > { %v4663_v20 = vadd.f32 %v4662_v35, %v10288_v16  ;;  %v5314_v23 = vmax.f32 %v4661_v34, 0.0  ;;  %v5650_v35 = vld [vmem:[#allocation9 + $0x940] sm:$0xff]  ;;  %v5748_v9 = vmul.f32 %v5412_v38, %v5300_v28  ;;  %v5860_v37 = vmul.f32 %v5524_v2, %v5300_v28  ;;  %v5539_v11 = vld [vmem:[#allocation9 + $0x5c8] sm:$0xff] }
 0x684   : > { %v4666_v62 = vpop.f32.mrf.mxu1  ;;  %v10355_v49 = vadd.f32 %v6076_v52, %v5735_v63  ;;  %v10357_v51 = vadd.f32 %v6204_v5, %v5847_v8  ;;  %v10359_v31 = vadd.f32 %v6332_v53, %v5959_v7  ;;  %v5972_v60 = vmul.f32 %v5636_v58, %v5300_v28  ;;  %v5651_v8 = vld [vmem:[#allocation9 + $0x948] sm:$0xff] }
 0x685   : > { %v5315_v0 = vmax.f32 %v4663_v20, 0.0  ;;  %v4667_v39 = vadd.f32 %v4666_v62, %v10310_v27  ;;  %v5749_v6 = vmul.f32 %v5413_v26, %v5301_v1  ;;  %v5861_v34 = vmul.f32 %v5525_v32, %v5301_v1  ;;  %v5552_v32 = vld [vmem:[#allocation9 + $0x630] sm:$0xff] }
 0x686   : > { %v4668_v4 = vpop.f32.mrf.mxu1  ;;  %v5973_v16 = vmul.f32 %v5637_v36, %v5301_v1  ;;  %v5762_v47 = vmul.f32 %v5426_v33, %v5314_v23  ;;  %v5874_v20 = vmul.f32 %v5538_v13, %v5314_v23  ;;  %v6092_v52 = vadd.f32 %v10301_v12, %v5748_v9  ;;  %v5441_v13 = vld [vmem:[#allocation9 + $0x2b8] sm:$0xff] }
 0x687   : > { %v6220_v5 = vadd.f32 %v10303_v48, %v5860_v37  ;;  %v6348_v53 = vadd.f32 %v10305_v14, %v5972_v60  ;;  %v5986_v63 = vmul.f32 %v5650_v35, %v5314_v23  ;;  %v5763_v28 = vmul.f32 %v5427_v30, %v5315_v0  ;;  %v5440_v48 = vld [vmem:[#allocation9 + $0x2b0] sm:$0xff]  ;;  %v5553_v35 = vld [vmem:[#allocation9 + $0x638] sm:$0xff]  ;;  %v5454_v30 = vld [vmem:[#allocation9 + $0x320] sm:$0xff] }
 0x688   : > { %v4672_v24 = vpop.f32.mrf.mxu1  ;;  %v6108_v62 = vadd.f32 %v10316_v42, %v5762_v47  ;;  %v6236_v38 = vadd.f32 %v10318_v22, %v5874_v20  ;;  %v5875_v2 = vmul.f32 %v5539_v11, %v5315_v0  ;;  %v10367_v7 = vadd.f32 %v6092_v52, %v5749_v6  ;;  %v5664_v14 = vld [vmem:[#allocation9 + $0x9b0] sm:$0xff]  ;;  %v5665_v6 = vld [vmem:[#allocation9 + $0x9b8] sm:$0xff]  ;;  %v5566_v11 = vld [vmem:[#allocation9 + $0x6a0] sm:$0xff] }
 0x689   : > { %v10369_v1 = vadd.f32 %v6220_v5, %v5861_v34  ;;  %v10371_v26 = vadd.f32 %v6348_v53, %v5973_v16  ;;  %v6364_v12 = vadd.f32 %v10320_v50, %v5986_v63  ;;  %v5987_v36 = vmul.f32 %v5651_v8, %v5315_v0  ;;  %v5678_v20 = vld [vmem:[#allocation9 + $0xa20] sm:$0xff]  ;;  %v5567_v5 = vld [vmem:[#allocation9 + $0x6a8] sm:$0xff] }
 0x68a   : > { %v4674_v58 = vpop.f32.mrf.mxu1  ;;  %v10374_v23 = vadd.f32 %v6108_v62, %v5763_v28  ;;  %v10376_v47 = vadd.f32 %v6236_v38, %v5875_v2  ;;  %v5328_v42 = vmax.f32 %v4667_v39, 0.0  ;;  %v10379_v22 = vmax.f32 %v10335_v56, 0.0 }
 0x68b   : > { %v4669_v33 = vadd.f32 %v4668_v4, %v10310_v27  ;;  %v4673_v16 = vadd.f32 %v4672_v24, %v10322_v40  ;;  %v4675_v50 = vadd.f32 %v4674_v58, %v10322_v40  ;;  %v10384_v9 = vadd.f32 %v6364_v12, %v5987_v36  ;;  %v5455_v24 = vld [vmem:[#allocation9 + $0x328] sm:$0xff] }
 0x68c   : > { %v5776_v37 = vmul.f32 %v5440_v48, %v5328_v42  ;;  %v5888_v0 = vmul.f32 %v5552_v32, %v5328_v42  ;;  %v6000_v60 = vmul.f32 %v5664_v14, %v5328_v42  ;;  %v4645_v56 = vadd.f32 %v10312_v59, %v10254_v15  ;;  %v5679_v12 = vld [vmem:[#allocation9 + $0xa28] sm:$0xff]  ;;  %v5384_v48 = vld [vmem:[#allocation9 + $0xf0] sm:$0xff] }
 0x68d   : > { %v5329_v4 = vmax.f32 %v4669_v33, 0.0  ;;  %v5342_v34 = vmax.f32 %v4673_v16, 0.0  ;;  %v5343_v52 = vmax.f32 %v4675_v50, 0.0  ;;  %v5272_v53 = vmax.f32 %v10339_v44, 0.0  ;;  %v5496_v44 = vld [vmem:[#allocation9 + $0x470] sm:$0xff] }
 0x68e   : > { %v6124_v63 = vadd.f32 %v10326_v25, %v5776_v37  ;;  %v6252_v8 = vadd.f32 %v10328_v17, %v5888_v0  ;;  %v6380_v62 = vadd.f32 %v10330_v43, %v6000_v60  ;;  %v5608_v25 = vld [vmem:[#allocation9 + $0x7f0] sm:$0xff]  ;;  %v4633_v0 = vadd.f32 %v10286_v45, %v10246_v18 }
 0x68f   : > { %v5777_v28 = vmul.f32 %v5441_v13, %v5329_v4  ;;  %v5889_v2 = vmul.f32 %v5553_v35, %v5329_v4  ;;  %v6001_v58 = vmul.f32 %v5665_v6, %v5329_v4  ;;  %v5790_v59 = vmul.f32 %v5454_v30, %v5342_v34  ;;  %v5356_v35 = vld [vmem:[#allocation9 + $0x10] sm:$0xff] }
 0x690   : > { %v5902_v32 = vmul.f32 %v5566_v11, %v5342_v34  ;;  %v6014_v14 = vmul.f32 %v5678_v20, %v5342_v34  ;;  %v5791_v36 = vmul.f32 %v5455_v24, %v5343_v52  ;;  %v5903_v42 = vmul.f32 %v5567_v5, %v5343_v52  ;;  %v5468_v50 = vld [vmem:[#allocation9 + $0x390] sm:$0xff] }
 0x691   : > { %v10398_v16 = vadd.f32 %v6124_v63, %v5777_v28  ;;  %v10400_v17 = vadd.f32 %v6252_v8, %v5889_v2  ;;  %v10402_v43 = vadd.f32 %v6380_v62, %v6001_v58  ;;  %v6140_v13 = vadd.f32 %v10341_v55, %v5790_v59  ;;  %v5580_v37 = vld [vmem:[#allocation9 + $0x710] sm:$0xff]  ;;  %v5385_v63 = vld [vmem:[#allocation9 + $0xf8] sm:$0xff] }
 0x692   : > { %v6268_v60 = vadd.f32 %v10344_v41, %v5902_v32  ;;  %v6396_v6 = vadd.f32 %v10346_v61, %v6014_v14  ;;  %v6015_v30 = vmul.f32 %v5679_v12, %v5343_v52  ;;  %v4637_v4 = vadd.f32 %v10296_v21, %v10250_v46  ;;  %v5497_v28 = vld [vmem:[#allocation9 + $0x478] sm:$0xff] }
 0x693   : > { %v5720_v34 = vmul.f32 %v5384_v48, %v5272_v53  ;;  %v5273_v20 = vmax.f32 %v4645_v56, 0.0  ;;  %v10413_v24 = vadd.f32 %v6140_v13, %v5791_v36  ;;  %v5832_v55 = vmul.f32 %v5496_v44, %v5272_v53  ;;  %v5609_v21 = vld [vmem:[#allocation9 + $0x7f8] sm:$0xff] }
 0x694   : > { %v5944_v5 = vmul.f32 %v5608_v25, %v5272_v53  ;;  %v10415_v8 = vadd.f32 %v6268_v60, %v5903_v42  ;;  %v10417_v45 = vadd.f32 %v6396_v6, %v6015_v30  ;;  %v5692_v61 = vmul.f32 %v5356_v35, %v10379_v22  ;;  %v5357_v58 = vld [vmem:[#allocation9 + $0x18] sm:$0xff]  ;;  %v5386_v6 = vld [vmem:[#allocation9 + $0x100] sm:$0xff] }
 0x695   : > { %v10386_v39 = vpop.f32.mrf.mxu0  ;;  %11322 = vst [vmem:[#allocation14_spill] sm:$0xff] %v10413_v24  ;;  %v5804_v52 = vmul.f32 %v5468_v50, %v10379_v22  ;;  %v5916_v62 = vmul.f32 %v5580_v37, %v10379_v22  ;;  %v5245_v2 = vmax.f32 %v4633_v0, 0.0  ;;  %v5469_v59 = vld [vmem:[#allocation9 + $0x398] sm:$0xff]  ;;  %v10422_v53 = vmax.f32 %v4637_v4, 0.0  ;;  %v5610_v30 = vld [vmem:[#allocation9 + $0x800] sm:$0xff] }
 0x696   : > { %11323 = vst [vmem:[#allocation38_spill] sm:$0xff] %v10415_v8  ;;  %11324 = vst [vmem:[#allocation20_spill] sm:$0xff] %v10417_v45  ;;  %v5581_v12 = vld [vmem:[#allocation9 + $0x718] sm:$0xff]  ;;  %v6060_v48 = vadd.f32 %v10276_v10, %v5720_v34  ;;  %v5721_v32 = vmul.f32 %v5385_v63, %v5273_v20  ;;  %v6188_v36 = vadd.f32 %v10278_v57, %v5832_v55  ;;  %v5370_v10 = vld [vmem:[#allocation9 + $0x80] sm:$0xff] }
 0x697   : > { %v10394_v38 = vpop.f32.mrf.mxu0  ;;  %v6316_v42 = vadd.f32 %v10280_v29, %v5944_v5  ;;  %v5833_v44 = vmul.f32 %v5497_v28, %v5273_v20  ;;  %v5945_v22 = vmul.f32 %v5609_v21, %v5273_v20  ;;  %v10429_v13 = vadd.f32 %v10256_v3, %v5692_v61  ;;  %v11325_v29 = vld [vmem:[#allocation18_spill] sm:$0xff]  ;;  %v5498_v3 = vld [vmem:[#allocation9 + $0x480] sm:$0xff]  ;;  %v11326_v20 = vld [vmem:[#allocation43_spill] sm:$0xff] }
 0x698   : > { %11320 = vst [vmem:[#allocation17_spill] sm:$0xff] %v10394_v38  ;;  %v10432_v35 = vadd.f32 %v10258_v54, %v5804_v52  ;;  %v10435_v50 = vadd.f32 %v10260_v19, %v5916_v62  ;;  %v10437_v37 = vmul.f32 %v5357_v58, %v5245_v2  ;;  %v10439_v0 = vmul.f32 %v5469_v59, %v5245_v2  ;;  %v5482_v54 = vld [vmem:[#allocation9 + $0x400] sm:$0xff]  ;;  %v5387_v62 = vld [vmem:[#allocation9 + $0x108] sm:$0xff]  ;;  %v5625_v8 = vld [vmem:[#allocation9 + $0x878] sm:$0xff] }
 0x699   : > { %v10396_v33 = vpop.f32.mrf.mxu0  ;;  %v10441_v57 = vmul.f32 %v5581_v12, %v5245_v2  ;;  %v10445_v60 = vadd.f32 %v11325_v29, %v10250_v46  ;;  %v10451_v63 = vmul.f32 %v5370_v10, %v10422_v53  ;;  %v6189_v61 = vadd.f32 %v6188_v36, %v5833_v44  ;;  %v5499_v28 = vld [vmem:[#allocation9 + $0x488] sm:$0xff]  ;;  %v5400_v29 = vld [vmem:[#allocation9 + $0x170] sm:$0xff] }
 0x69a   : > { %v6317_v52 = vadd.f32 %v6316_v42, %v5945_v22 }
 0x69b   : > { %v10409_v11 = vpop.f32.mrf.mxu0 }
 0x69c   : > { %11321 = vst [vmem:[#allocation21_spill] sm:$0xff] %v10409_v11 }
 0x69d   : > { %v4755_v41 = vpop.f32.mrf.mxu0 }
 0x69e   : > { %v4756_v14 = vadd.f32 %v4755_v41, %v10254_v15  ;;  %v6061_v41 = vadd.f32 %v6060_v48, %v5721_v32  ;;  %v5513_v48 = vld [vmem:[#allocation9 + $0x4f8] sm:$0xff] }
 0x69f   : > { %v4757_v56 = vpop.f32.mrf.mxu0  ;;  %v11327_v32 = vld [vmem:[#allocation28_spill] sm:$0xff] }
 0x6a0   : > { %v5274_v34 = vmax.f32 %v4756_v14, 0.0  ;;  %v4758_v19 = vadd.f32 %v4757_v56, %v10254_v15  ;;  %v5611_v14 = vld [vmem:[#allocation9 + $0x808] sm:$0xff]  ;;  %v5512_v56 = vld [vmem:[#allocation9 + $0x4f0] sm:$0xff]  ;;  %v5401_v15 = vld [vmem:[#allocation9 + $0x178] sm:$0xff] }
 0x6a1   : > { %v4761_v25 = vpop.f32.mrf.mxu0 }
 0x6a2   : > { %v4762_v55 = vadd.f32 %v4761_v25, %v11326_v20  ;;  %v5722_v2 = vmul.f32 %v5386_v6, %v5274_v34  ;;  %v5834_v58 = vmul.f32 %v5498_v3, %v5274_v34  ;;  %v5946_v59 = vmul.f32 %v5610_v30, %v5274_v34 }
 0x6a3   : > { %v4763_v4 = vpop.f32.mrf.mxu0  ;;  %v5275_v12 = vmax.f32 %v4758_v19, 0.0  ;;  %v10454_v25 = vmul.f32 %v5482_v54, %v10422_v53 }
 0x6a4   : > { %v4764_v5 = vadd.f32 %v4763_v4, %v11326_v20  ;;  %v5288_v4 = vmax.f32 %v4762_v55, 0.0  ;;  %v5624_v20 = vld [vmem:[#allocation9 + $0x870] sm:$0xff]  ;;  %v6062_v44 = vadd.f32 %v6061_v41, %v5722_v2  ;;  %v6190_v22 = vadd.f32 %v6189_v61, %v5834_v58  ;;  %v5594_v58 = vld [vmem:[#allocation9 + $0x780] sm:$0xff] }
 0x6a5   : > { %v4767_v21 = vpop.f32.mrf.mxu0  ;;  %v6318_v6 = vadd.f32 %v6317_v52, %v5946_v59  ;;  %v5723_v3 = vmul.f32 %v5387_v62, %v5275_v12  ;;  %v5835_v30 = vmul.f32 %v5499_v28, %v5275_v12  ;;  %v5947_v34 = vmul.f32 %v5611_v14, %v5275_v12  ;;  %v5414_v52 = vld [vmem:[#allocation9 + $0x1e0] sm:$0xff] }
 0x6a6   : > { %v5289_v10 = vmax.f32 %v4764_v5, 0.0  ;;  %v4768_v36 = vadd.f32 %v4767_v21, %v11327_v32  ;;  %v5736_v19 = vmul.f32 %v5400_v29, %v5288_v4  ;;  %v5848_v45 = vmul.f32 %v5512_v56, %v5288_v4  ;;  %v5526_v62 = vld [vmem:[#allocation9 + $0x560] sm:$0xff]  ;;  %v5527_v56 = vld [vmem:[#allocation9 + $0x568] sm:$0xff] }
 0x6a7   : > { %v4769_v42 = vpop.f32.mrf.mxu0  ;;  %v10457_v54 = vadd.f32 %v6062_v44, %v5723_v3  ;;  %v5960_v55 = vmul.f32 %v5624_v20, %v5288_v4  ;;  %v10459_v38 = vadd.f32 %v6190_v22, %v5835_v30  ;;  %v10461_v40 = vadd.f32 %v6318_v6, %v5947_v34  ;;  %v5638_v28 = vld [vmem:[#allocation9 + $0x8e0] sm:$0xff]  ;;  %v5652_v34 = vld [vmem:[#allocation9 + $0x950] sm:$0xff] }
 0x6a8   : > { %v5737_v11 = vmul.f32 %v5401_v15, %v5289_v10  ;;  %v5849_v5 = vmul.f32 %v5513_v48, %v5289_v10  ;;  %v6078_v41 = vadd.f32 %v10355_v49, %v5736_v19  ;;  %v6206_v61 = vadd.f32 %v10357_v51, %v5848_v45  ;;  %v5415_v49 = vld [vmem:[#allocation9 + $0x1e8] sm:$0xff] }
 0x6a9   : > { %v4773_v24 = vpop.f32.mrf.mxu0  ;;  %v6334_v59 = vadd.f32 %v10359_v31, %v5960_v55  ;;  %v5961_v20 = vmul.f32 %v5625_v8, %v5289_v10  ;;  %v5302_v15 = vmax.f32 %v4768_v36, 0.0  ;;  %v4770_v12 = vadd.f32 %v4769_v42, %v11327_v32  ;;  %v11329_v51 = vld [vmem:[#allocation30_spill] sm:$0xff]  ;;  %v5428_v42 = vld [vmem:[#allocation9 + $0x250] sm:$0xff]  ;;  %v5541_v55 = vld [vmem:[#allocation9 + $0x5d8] sm:$0xff] }
 0x6aa   : > { %v10469_v14 = vadd.f32 %v6078_v41, %v5737_v11  ;;  %v10471_v29 = vadd.f32 %v6206_v61, %v5849_v5  ;;  %v4774_v45 = vadd.f32 %v4773_v24, %v11329_v51  ;;  %v5639_v36 = vld [vmem:[#allocation9 + $0x8e8] sm:$0xff]  ;;  %v5540_v11 = vld [vmem:[#allocation9 + $0x5d0] sm:$0xff]  ;;  %v5930_v6 = vmul.f32 %v5594_v58, %v10422_v53  ;;  %v5429_v24 = vld [vmem:[#allocation9 + $0x258] sm:$0xff] }
 0x6ab   : > { %v4775_v21 = vpop.f32.mrf.mxu0  ;;  %v10465_v2 = vpop.f32.mrf.mxu1  ;;  %v10477_v22 = vadd.f32 %v6334_v59, %v5961_v20  ;;  %v5750_v31 = vmul.f32 %v5414_v52, %v5302_v15  ;;  %v5862_v8 = vmul.f32 %v5526_v62, %v5302_v15  ;;  %v5974_v10 = vmul.f32 %v5638_v28, %v5302_v15  ;;  %v5653_v58 = vld [vmem:[#allocation9 + $0x958] sm:$0xff] }
 0x6ac   : > { %11328 = vst [vmem:[#allocation23_spill] sm:$0xff] %v10471_v29  ;;  %v4776_v4 = vadd.f32 %v4775_v21, %v11329_v51  ;;  %v5303_v3 = vmax.f32 %v4770_v12, 0.0  ;;  %v5316_v30 = vmax.f32 %v4774_v45, 0.0 }
 0x6ad   : > { %v4779_v48 = vpop.f32.mrf.mxu0  ;;  %v10475_v44 = vpop.f32.mrf.mxu1  ;;  %11330 = vst [vmem:[#allocation24_spill] sm:$0xff] %v10477_v22  ;;  %v6094_v41 = vadd.f32 %v10367_v7, %v5750_v31  ;;  %v6222_v61 = vadd.f32 %v10369_v1, %v5862_v8  ;;  %v6350_v52 = vadd.f32 %v10371_v26, %v5974_v10 }
 0x6ae   : > { %v5317_v19 = vmax.f32 %v4776_v4, 0.0  ;;  %v4780_v62 = vadd.f32 %v4779_v48, %v10310_v27  ;;  %v5751_v28 = vmul.f32 %v5415_v49, %v5303_v3  ;;  %v5863_v21 = vmul.f32 %v5527_v56, %v5303_v3  ;;  %v5442_v49 = vld [vmem:[#allocation9 + $0x2c0] sm:$0xff] }
 0x6af   : > { %v10480_v5 = vpop.f32.mrf.mxu1  ;;  %v5975_v59 = vmul.f32 %v5639_v36, %v5303_v3  ;;  %v5764_v53 = vmul.f32 %v5428_v42, %v5316_v30  ;;  %v5876_v15 = vmul.f32 %v5540_v11, %v5316_v30  ;;  %v5988_v12 = vmul.f32 %v5652_v34, %v5316_v30  ;;  %v4781_v22 = vpop.f32.mrf.mxu0  ;;  %v5554_v56 = vld [vmem:[#allocation9 + $0x640] sm:$0xff] }
 0x6b0   : > { %v5765_v45 = vmul.f32 %v5429_v24, %v5317_v19  ;;  %v5877_v4 = vmul.f32 %v5541_v55, %v5317_v19  ;;  %v10488_v29 = vadd.f32 %v6094_v41, %v5751_v28  ;;  %v10490_v7 = vadd.f32 %v6222_v61, %v5863_v21  ;;  %v5666_v42 = vld [vmem:[#allocation9 + $0x9c0] sm:$0xff]  ;;  %v5371_v24 = vld [vmem:[#allocation9 + $0x88] sm:$0xff] }
 0x6b1   : > { %v10486_v20 = vpop.f32.mrf.mxu1  ;;  %v10492_v1 = vadd.f32 %v6350_v52, %v5975_v59  ;;  %v6110_v26 = vadd.f32 %v10374_v23, %v5764_v53  ;;  %v6238_v31 = vadd.f32 %v10376_v47, %v5876_v15  ;;  %v6366_v8 = vadd.f32 %v10384_v9, %v5988_v12  ;;  %v5483_v55 = vld [vmem:[#allocation9 + $0x408] sm:$0xff]  ;;  %v11334_v15 = vld [vmem:[#allocation45_spill] sm:$0xff] }
 0x6b2   : > { %v5989_v10 = vmul.f32 %v5653_v58, %v5317_v19  ;;  %v5330_v36 = vmax.f32 %v4780_v62, 0.0  ;;  %v5259_v11 = vmax.f32 %v10445_v60, 0.0  ;;  %v4744_v3 = vadd.f32 %v10386_v39, %v10246_v18  ;;  %v5595_v41 = vld [vmem:[#allocation9 + $0x788] sm:$0xff]  ;;  %v11332_v39 = vld [vmem:[#allocation16_spill] sm:$0xff]  ;;  %v4785_v58 = vpop.f32.mrf.mxu0 }
 0x6b3   : > { %v10495_v48 = vpop.f32.mrf.mxu1  ;;  %v10502_v30 = vadd.f32 %v6110_v26, %v5765_v45  ;;  %v4782_v23 = vadd.f32 %v4781_v22, %v10310_v27  ;;  %v10507_v47 = vadd.f32 %v6238_v31, %v5877_v4  ;;  %v10513_v60 = vadd.f32 %v10429_v13, %v10437_v37  ;;  %v11333_v22 = vld [vmem:[#allocation19_spill] sm:$0xff]  ;;  %v5443_v21 = vld [vmem:[#allocation9 + $0x2c8] sm:$0xff] }
 0x6b4   : > { %v10509_v9 = vadd.f32 %v6366_v8, %v5989_v10  ;;  %v5778_v19 = vmul.f32 %v5442_v49, %v5330_v36  ;;  %v5890_v61 = vmul.f32 %v5554_v56, %v5330_v36  ;;  %v6044_v52 = vadd.f32 %v11332_v39, %v10451_v63  ;;  %v5555_v59 = vld [vmem:[#allocation9 + $0x648] sm:$0xff] }
 0x6b5   : > { %v10505_v34 = vpop.f32.mrf.mxu1  ;;  %v6172_v62 = vadd.f32 %v11333_v22, %v10454_v25  ;;  %v6002_v28 = vmul.f32 %v5666_v42, %v5330_v36  ;;  %v5667_v53 = vld [vmem:[#allocation9 + $0x9c8] sm:$0xff]  ;;  %v6300_v12 = vadd.f32 %v11334_v15, %v5930_v6  ;;  %v5331_v26 = vmax.f32 %v4782_v23, 0.0  ;;  %v5470_v6 = vld [vmem:[#allocation9 + $0x3a0] sm:$0xff] }
 0x6b6   : > { %11331 = vst [vmem:[#allocation25_spill] sm:$0xff] %v10509_v9  ;;  %v6126_v45 = vadd.f32 %v10398_v16, %v5778_v19  ;;  %v6254_v4 = vadd.f32 %v10400_v17, %v5890_v61  ;;  %v5707_v37 = vmul.f32 %v5371_v24, %v5259_v11  ;;  %v5819_v49 = vmul.f32 %v5483_v55, %v5259_v11  ;;  %v5358_v17 = vld [vmem:[#allocation9 + $0x20] sm:$0xff]  ;;  %v11335_v23 = vld [vmem:[#allocation22_spill] sm:$0xff]  ;;  %v4787_v24 = vpop.f32.mrf.mxu0 }
 0x6b7   : > { %v10522_v13 = vpop.f32.mrf.mxu1  ;;  %v5931_v63 = vmul.f32 %v5595_v41, %v5259_v11  ;;  %v6382_v56 = vadd.f32 %v10402_v43, %v6002_v28  ;;  %v5246_v25 = vmax.f32 %v4744_v3, 0.0  ;;  %v5779_v31 = vmul.f32 %v5443_v21, %v5331_v26  ;;  %v11336_v43 = vld [vmem:[#allocation17_spill] sm:$0xff] }
 0x6b8   : > { %v5891_v8 = vmul.f32 %v5555_v59, %v5331_v26  ;;  %v6003_v10 = vmul.f32 %v5667_v53, %v5331_v26  ;;  %v6157_v36 = vadd.f32 %v10432_v35, %v10439_v0  ;;  %v10529_v16 = vadd.f32 %v10435_v50, %v10441_v57  ;;  %v5456_v0 = vld [vmem:[#allocation9 + $0x330] sm:$0xff]  ;;  %v11340_v22 = vld [vmem:[#allocation21_spill] sm:$0xff] }
 0x6b9   : > { %v4750_v42 = vadd.f32 %v10396_v33, %v10250_v46  ;;  %v4786_v11 = vadd.f32 %v4785_v58, %v11335_v23  ;;  %v4746_v3 = vadd.f32 %v11336_v43, %v10246_v18  ;;  %v10536_v55 = vadd.f32 %v6126_v45, %v5779_v31  ;;  %v5568_v50 = vld [vmem:[#allocation9 + $0x6b0] sm:$0xff]  ;;  %v10542_v19 = vpop.f32.mrf.mxu1  ;;  %v5582_v33 = vld [vmem:[#allocation9 + $0x720] sm:$0xff]  ;;  %v5457_v31 = vld [vmem:[#allocation9 + $0x338] sm:$0xff] }
 0x6ba   : > { %v10538_v41 = vadd.f32 %v6254_v4, %v5891_v8  ;;  %v10540_v35 = vadd.f32 %v6382_v56, %v6003_v10  ;;  %v5680_v57 = vld [vmem:[#allocation9 + $0xa30] sm:$0xff]  ;;  %v6045_v61 = vadd.f32 %v6044_v52, %v5707_v37  ;;  %v6173_v39 = vadd.f32 %v6172_v62, %v5819_v49  ;;  %v5569_v8 = vld [vmem:[#allocation9 + $0x6b8] sm:$0xff] }
 0x6bb   : > { %11337 = vst [vmem:[#allocation26_spill] sm:$0xff] %v10536_v55  ;;  %v4752_v28 = vadd.f32 %v11340_v22, %v10250_v46  ;;  %v5344_v21 = vmax.f32 %v4786_v11, 0.0  ;;  %v6301_v59 = vadd.f32 %v6300_v12, %v5931_v63  ;;  %v5694_v53 = vmul.f32 %v5358_v17, %v5246_v25  ;;  %v5372_v52 = vld [vmem:[#allocation9 + $0x90] sm:$0xff]  ;;  %v5681_v11 = vld [vmem:[#allocation9 + $0xa38] sm:$0xff]  ;;  %v10549_v12 = vpop.f32.mrf.mxu1 }
 0x6bc   : > { %11338 = vst [vmem:[#allocation29_spill] sm:$0xff] %v10538_v41  ;;  %11339 = vst [vmem:[#allocation32_spill] sm:$0xff] %v10540_v35  ;;  %v5806_v58 = vmul.f32 %v5470_v6, %v5246_v25  ;;  %v4788_v15 = vadd.f32 %v4787_v24, %v11335_v23  ;;  %v5260_v45 = vmax.f32 %v4750_v42, 0.0  ;;  %v5918_v10 = vmul.f32 %v5582_v33, %v5246_v25  ;;  %v5484_v62 = vld [vmem:[#allocation9 + $0x410] sm:$0xff]  ;;  %v11341_v6 = vld [vmem:[#allocation14_spill] sm:$0xff] }
 0x6bd   : > { %v5792_v4 = vmul.f32 %v5456_v0, %v5344_v21  ;;  %v5904_v26 = vmul.f32 %v5568_v50, %v5344_v21  ;;  %v6016_v56 = vmul.f32 %v5680_v57, %v5344_v21  ;;  %v5247_v43 = vmax.f32 %v4746_v3, 0.0  ;;  %v5596_v63 = vld [vmem:[#allocation9 + $0x790] sm:$0xff]  ;;  %v11342_v24 = vld [vmem:[#allocation38_spill] sm:$0xff]  ;;  %v11343_v50 = vld [vmem:[#allocation20_spill] sm:$0xff] }
 0x6be   : > { %v4857_v37 = vadd.f32 %v10465_v2, %v10246_v18  ;;  %v5345_v49 = vmax.f32 %v4788_v15, 0.0  ;;  %v5261_v17 = vmax.f32 %v4752_v28, 0.0  ;;  %v6029_v25 = vadd.f32 %v10513_v60, %v5694_v53  ;;  %v5359_v3 = vld [vmem:[#allocation9 + $0x28] sm:$0xff]  ;;  %v5373_v28 = vld [vmem:[#allocation9 + $0x98] sm:$0xff]  ;;  %v10561_v60 = vpop.f32.mrf.mxu1 }
 0x6bf   : > { %v6142_v42 = vadd.f32 %v11341_v6, %v5792_v4  ;;  %v6270_v0 = vadd.f32 %v11342_v24, %v5904_v26  ;;  %v6398_v57 = vadd.f32 %v11343_v50, %v6016_v56  ;;  %v5471_v33 = vld [vmem:[#allocation9 + $0x3a8] sm:$0xff]  ;;  %v4863_v22 = vadd.f32 %v10480_v5, %v10250_v46  ;;  %v5485_v6 = vld [vmem:[#allocation9 + $0x418] sm:$0xff] }
 0x6c0   : > { %v5793_v2 = vmul.f32 %v5457_v31, %v5345_v49  ;;  %v5905_v21 = vmul.f32 %v5569_v8, %v5345_v49  ;;  %v6158_v15 = vadd.f32 %v6157_v36, %v5806_v58  ;;  %v5583_v35 = vld [vmem:[#allocation9 + $0x728] sm:$0xff]  ;;  %v5708_v41 = vmul.f32 %v5372_v52, %v5260_v45  ;;  %v5597_v5 = vld [vmem:[#allocation9 + $0x798] sm:$0xff]  ;;  %v5360_v31 = vld [vmem:[#allocation9 + $0x30] sm:$0xff] }
 0x6c1   : > { %v5820_v55 = vmul.f32 %v5484_v62, %v5260_v45  ;;  %v6017_v9 = vmul.f32 %v5681_v11, %v5345_v49  ;;  %v5932_v4 = vmul.f32 %v5596_v63, %v5260_v45  ;;  %v5248_v26 = vmax.f32 %v4857_v37, 0.0  ;;  %v5472_v62 = vld [vmem:[#allocation9 + $0x3b0] sm:$0xff] }
 0x6c2   : > { %v10557_v24 = vadd.f32 %v6142_v42, %v5793_v2  ;;  %v10559_v56 = vadd.f32 %v6270_v0, %v5905_v21  ;;  %v5695_v53 = vmul.f32 %v5359_v3, %v5247_v43  ;;  %v5807_v50 = vmul.f32 %v5471_v33, %v5247_v43  ;;  %v5584_v42 = vld [vmem:[#allocation9 + $0x730] sm:$0xff]  ;;  %v5374_v0 = vld [vmem:[#allocation9 + $0xa0] sm:$0xff] }
 0x6c3   : > { %v4859_v36 = vadd.f32 %v10475_v44, %v10246_v18  ;;  %v10565_v58 = vadd.f32 %v6398_v57, %v6017_v9  ;;  %v6286_v8 = vadd.f32 %v10529_v16, %v5918_v10  ;;  %v5919_v45 = vmul.f32 %v5583_v35, %v5247_v43  ;;  %v11345_v3 = vld [vmem:[#allocation47_spill] sm:$0xff]  ;;  %v5486_v44 = vld [vmem:[#allocation9 + $0x420] sm:$0xff]  ;;  %v10572_v16 = vpop.f32.mrf.mxu1  ;;  %v5361_v57 = vld [vmem:[#allocation9 + $0x38] sm:$0xff] }
 0x6c4   : > { %11344 = vst [vmem:[#allocation46_spill] sm:$0xff] %v10559_v56  ;;  %v5709_v52 = vmul.f32 %v5373_v28, %v5261_v17  ;;  %v5262_v37 = vmax.f32 %v4863_v22, 0.0  ;;  %v6046_v49 = vadd.f32 %v6045_v61, %v5708_v41  ;;  %v6174_v11 = vadd.f32 %v6173_v39, %v5820_v55  ;;  %v5598_v55 = vld [vmem:[#allocation9 + $0x7a0] sm:$0xff]  ;;  %v5473_v22 = vld [vmem:[#allocation9 + $0x3b8] sm:$0xff] }
 0x6c5   : > { %v5821_v63 = vmul.f32 %v5485_v6, %v5261_v17  ;;  %v4869_v33 = vadd.f32 %v10495_v48, %v11345_v3  ;;  %v6302_v2 = vadd.f32 %v6301_v59, %v5932_v4  ;;  %v5933_v21 = vmul.f32 %v5597_v5, %v5261_v17  ;;  %v5585_v4 = vld [vmem:[#allocation9 + $0x738] sm:$0xff] }
 0x6c6   : > { %v5696_v56 = vmul.f32 %v5360_v31, %v5248_v26  ;;  %v4865_v9 = vadd.f32 %v10486_v20, %v10250_v46  ;;  %v6030_v35 = vadd.f32 %v6029_v25, %v5695_v53  ;;  %v6159_v10 = vadd.f32 %v6158_v15, %v5807_v50  ;;  %v5388_v31 = vld [vmem:[#allocation9 + $0x110] sm:$0xff] }
 0x6c7   : > { %v5808_v43 = vmul.f32 %v5472_v62, %v5248_v26  ;;  %v5249_v41 = vmax.f32 %v4859_v36, 0.0  ;;  %v6287_v61 = vadd.f32 %v6286_v8, %v5919_v45  ;;  %v5920_v39 = vmul.f32 %v5584_v42, %v5248_v26  ;;  %v10578_v36 = vpop.f32.mrf.mxu1  ;;  %v5375_v62 = vld [vmem:[#allocation9 + $0xa8] sm:$0xff] }
 0x6c8   : > { %v5710_v28 = vmul.f32 %v5374_v0, %v5262_v37  ;;  %v4871_v48 = vadd.f32 %v10505_v34, %v11345_v3  ;;  %v6047_v59 = vadd.f32 %v6046_v49, %v5709_v52  ;;  %v6175_v17 = vadd.f32 %v6174_v11, %v5821_v63  ;;  %v5487_v42 = vld [vmem:[#allocation9 + $0x428] sm:$0xff]  ;;  %v11346_v52 = vld [vmem:[#allocation43_spill] sm:$0xff] }
 0x6c9   : > { %v5822_v6 = vmul.f32 %v5486_v44, %v5262_v37  ;;  %v5276_v20 = vmax.f32 %v4869_v33, 0.0  ;;  %v6303_v25 = vadd.f32 %v6302_v2, %v5933_v21  ;;  %v6031_v15 = vadd.f32 %v6030_v35, %v5696_v56  ;;  %v5599_v34 = vld [vmem:[#allocation9 + $0x7a8] sm:$0xff]  ;;  %v5500_v2 = vld [vmem:[#allocation9 + $0x490] sm:$0xff] }
 0x6ca   : > { %v5934_v53 = vmul.f32 %v5598_v55, %v5262_v37  ;;  %v5263_v50 = vmax.f32 %v4865_v9, 0.0  ;;  %v6160_v26 = vadd.f32 %v6159_v10, %v5808_v43  ;;  %v5697_v8 = vmul.f32 %v5361_v57, %v5249_v41  ;;  %v5612_v21 = vld [vmem:[#allocation9 + $0x810] sm:$0xff]  ;;  %v5389_v9 = vld [vmem:[#allocation9 + $0x118] sm:$0xff] }
 0x6cb   : > { %v10576_v5 = vpop.f32.mrf.mxu0  ;;  %v5809_v45 = vmul.f32 %v5473_v22, %v5249_v41  ;;  %v4875_v49 = vadd.f32 %v10522_v13, %v11346_v52  ;;  %v6288_v63 = vadd.f32 %v6287_v61, %v5920_v39  ;;  %v5921_v0 = vmul.f32 %v5585_v4, %v5249_v41  ;;  %v4892_v41 = vpop.f32.mrf.mxu1 }
 0x6cc   : > { %v6048_v33 = vadd.f32 %v6047_v59, %v5710_v28  ;;  %v5277_v56 = vmax.f32 %v4871_v48, 0.0  ;;  %v6176_v37 = vadd.f32 %v6175_v17, %v5822_v6  ;;  %v5724_v44 = vmul.f32 %v5388_v31, %v5276_v20  ;;  %v5501_v28 = vld [vmem:[#allocation9 + $0x498] sm:$0xff]  ;;  %v5402_v6 = vld [vmem:[#allocation9 + $0x180] sm:$0xff] }
 0x6cd   : > { %v10582_v11 = vpop.f32.mrf.mxu0  ;;  %v4877_v35 = vadd.f32 %v10542_v19, %v11346_v52  ;;  %v4881_v10 = vadd.f32 %v10549_v12, %v11327_v32  ;;  %v6304_v13 = vadd.f32 %v6303_v25, %v5934_v53  ;;  %v5711_v55 = vmul.f32 %v5375_v62, %v5263_v50  ;;  %v5514_v31 = vld [vmem:[#allocation9 + $0x500] sm:$0xff] }
 0x6ce   : > { %v5823_v57 = vmul.f32 %v5487_v42, %v5263_v50  ;;  %v5935_v61 = vmul.f32 %v5599_v34, %v5263_v50  ;;  %v10590_v39 = vadd.f32 %v6031_v15, %v5697_v8  ;;  %v10592_v22 = vadd.f32 %v6160_v26, %v5809_v45  ;;  %v5626_v25 = vld [vmem:[#allocation9 + $0x880] sm:$0xff]  ;;  %v5613_v50 = vld [vmem:[#allocation9 + $0x818] sm:$0xff] }
 0x6cf   : > { %v10588_v43 = vpop.f32.mrf.mxu0  ;;  %v5290_v48 = vmax.f32 %v4875_v49, 0.0  ;;  %v10596_v17 = vadd.f32 %v6288_v63, %v5921_v0  ;;  %v5836_v19 = vmul.f32 %v5500_v2, %v5276_v20  ;;  %v5948_v4 = vmul.f32 %v5612_v21, %v5276_v20  ;;  %v5403_v20 = vld [vmem:[#allocation9 + $0x188] sm:$0xff]  ;;  %v5416_v49 = vld [vmem:[#allocation9 + $0x1f0] sm:$0xff] }
 0x6d0   : > { %v5725_v12 = vmul.f32 %v5389_v9, %v5277_v56  ;;  %v6064_v53 = vadd.f32 %v10457_v54, %v5724_v44  ;;  %v5291_v62 = vmax.f32 %v4877_v35, 0.0  ;;  %v5304_v15 = vmax.f32 %v4881_v10, 0.0  ;;  %v4894_v54 = vpop.f32.mrf.mxu1  ;;  %v5515_v9 = vld [vmem:[#allocation9 + $0x508] sm:$0xff] }
 0x6d1   : > { %v10594_v59 = vpop.f32.mrf.mxu0  ;;  %v4883_v26 = vadd.f32 %v10561_v60, %v11327_v32  ;;  %v10603_v45 = vadd.f32 %v6048_v33, %v5711_v55  ;;  %v10605_v42 = vadd.f32 %v6176_v37, %v5823_v57  ;;  %v10607_v34 = vadd.f32 %v6304_v13, %v5935_v61  ;;  %v5528_v60 = vld [vmem:[#allocation9 + $0x570] sm:$0xff]  ;;  %v5627_v13 = vld [vmem:[#allocation9 + $0x888] sm:$0xff] }
 0x6d2   : > { %v4887_v63 = vadd.f32 %v10572_v16, %v11329_v51  ;;  %v5837_v0 = vmul.f32 %v5501_v28, %v5277_v56  ;;  %v5738_v2 = vmul.f32 %v5402_v6, %v5290_v48  ;;  %v5850_v21 = vmul.f32 %v5514_v31, %v5290_v48  ;;  %v5640_v61 = vld [vmem:[#allocation9 + $0x8f0] sm:$0xff] }
 0x6d3   : > { %v10601_v8 = vpop.f32.mrf.mxu0  ;;  %11347 = vst [vmem:[#allocation42_spill] sm:$0xff] %v10603_v45  ;;  %11348 = vst [vmem:[#allocation41_spill] sm:$0xff] %v10605_v42  ;;  %v5962_v44 = vmul.f32 %v5626_v25, %v5290_v48  ;;  %v6192_v33 = vadd.f32 %v10459_v38, %v5836_v19  ;;  %v6320_v37 = vadd.f32 %v10461_v40, %v5948_v4  ;;  %v5305_v6 = vmax.f32 %v4883_v26, 0.0  ;;  %v5417_v25 = vld [vmem:[#allocation9 + $0x1f8] sm:$0xff]  ;;  %v4898_v38 = vpop.f32.mrf.mxu1 }
 0x6d4   : > { %11349 = vst [vmem:[#allocation33_spill] sm:$0xff] %v10607_v34  ;;  %v5949_v10 = vmul.f32 %v5613_v50, %v5277_v56  ;;  %v4893_v55 = vadd.f32 %v4892_v41, %v10310_v27  ;;  %v10616_v57 = vadd.f32 %v6064_v53, %v5725_v12  ;;  %v5739_v16 = vmul.f32 %v5403_v20, %v5291_v62  ;;  %v11351_v56 = vld [vmem:[#allocation23_spill] sm:$0xff]  ;;  %v11352_v4 = vld [vmem:[#allocation24_spill] sm:$0xff]  ;;  %v5430_v50 = vld [vmem:[#allocation9 + $0x260] sm:$0xff] }
 0x6d5   : > { %v10611_v35 = vpop.f32.mrf.mxu0  ;;  %v5752_v28 = vmul.f32 %v5416_v49, %v5304_v15  ;;  %v5851_v31 = vmul.f32 %v5515_v9, %v5291_v62  ;;  %v5864_v48 = vmul.f32 %v5528_v60, %v5304_v15  ;;  %v5318_v34 = vmax.f32 %v4887_v63, 0.0  ;;  %v5542_v20 = vld [vmem:[#allocation9 + $0x5e0] sm:$0xff] }
 0x6d6   : > { %11350 = vst [vmem:[#allocation34_spill] sm:$0xff] %v10616_v57  ;;  %v4889_v42 = vadd.f32 %v10578_v36, %v11329_v51  ;;  %v6080_v40 = vadd.f32 %v10469_v14, %v5738_v2  ;;  %v6208_v41 = vadd.f32 %v11351_v56, %v5850_v21  ;;  %v6336_v12 = vadd.f32 %v11352_v4, %v5962_v44  ;;  %v5654_v9 = vld [vmem:[#allocation9 + $0x960] sm:$0xff]  ;;  %v5529_v51 = vld [vmem:[#allocation9 + $0x578] sm:$0xff]  ;;  %v5444_v14 = vld [vmem:[#allocation9 + $0x2d0] sm:$0xff] }
 0x6d7   : > { %v10620_v19 = vpop.f32.mrf.mxu0  ;;  %v5963_v53 = vmul.f32 %v5627_v13, %v5291_v62  ;;  %v10625_v26 = vadd.f32 %v6192_v33, %v5837_v0  ;;  %v10627_v49 = vadd.f32 %v6320_v37, %v5949_v10  ;;  %v5976_v63 = vmul.f32 %v5640_v61, %v5304_v15  ;;  %v5641_v57 = vld [vmem:[#allocation9 + $0x8f8] sm:$0xff]  ;;  %v4900_v61 = vpop.f32.mrf.mxu1  ;;  %v5668_v4 = vld [vmem:[#allocation9 + $0x9d0] sm:$0xff] }
 0x6d8   : > { %v5332_v60 = vmax.f32 %v4893_v55, 0.0  ;;  %v6096_v36 = vadd.f32 %v10488_v29, %v5752_v28  ;;  %v5753_v45 = vmul.f32 %v5417_v25, %v5305_v6  ;;  %v4895_v2 = vadd.f32 %v4894_v54, %v10310_v27  ;;  %v5431_v55 = vld [vmem:[#allocation9 + $0x268] sm:$0xff] }
 0x6d9   : > { %v4899_v21 = vadd.f32 %v4898_v38, %v11335_v23  ;;  %v6224_v62 = vadd.f32 %v10490_v7, %v5864_v48  ;;  %v5766_v44 = vmul.f32 %v5430_v50, %v5318_v34  ;;  %v5878_v0 = vmul.f32 %v5542_v20, %v5318_v34  ;;  %v10633_v37 = vpop.f32.mrf.mxu0  ;;  %v5543_v38 = vld [vmem:[#allocation9 + $0x5e8] sm:$0xff]  ;;  %v5556_v48 = vld [vmem:[#allocation9 + $0x650] sm:$0xff] }
 0x6da   : > { %v5319_v33 = vmax.f32 %v4889_v42, 0.0  ;;  %v10635_v15 = vadd.f32 %v6080_v40, %v5739_v16  ;;  %v10637_v10 = vadd.f32 %v6208_v41, %v5851_v31  ;;  %v10639_v29 = vadd.f32 %v6336_v12, %v5963_v53  ;;  %v5655_v7 = vld [vmem:[#allocation9 + $0x968] sm:$0xff]  ;;  %v11353_v53 = vld [vmem:[#allocation25_spill] sm:$0xff] }
 0x6db   : > { %v5990_v13 = vmul.f32 %v5654_v9, %v5318_v34  ;;  %v6352_v54 = vadd.f32 %v10492_v1, %v5976_v63  ;;  %v5865_v28 = vmul.f32 %v5529_v51, %v5305_v6  ;;  %v5977_v25 = vmul.f32 %v5641_v57, %v5305_v6  ;;  %v5445_v1 = vld [vmem:[#allocation9 + $0x2d8] sm:$0xff]  ;;  %v5458_v51 = vld [vmem:[#allocation9 + $0x340] sm:$0xff] }
 0x6dc   : > { %v5780_v56 = vmul.f32 %v5444_v14, %v5332_v60  ;;  %v10642_v42 = vadd.f32 %v6096_v36, %v5753_v45  ;;  %v5333_v16 = vmax.f32 %v4895_v2, 0.0  ;;  %v5346_v40 = vmax.f32 %v4899_v21, 0.0  ;;  %v10649_v6 = vpop.f32.mrf.mxu0  ;;  %v5570_v9 = vld [vmem:[#allocation9 + $0x6c0] sm:$0xff]  ;;  %v11354_v14 = vld [vmem:[#allocation26_spill] sm:$0xff]  ;;  %v5557_v21 = vld [vmem:[#allocation9 + $0x658] sm:$0xff] }
 0x6dd   : > { %v4970_v31 = vadd.f32 %v10576_v5, %v10246_v18  ;;  %v6112_v34 = vadd.f32 %v10502_v30, %v5766_v44  ;;  %v6240_v41 = vadd.f32 %v10507_v47, %v5878_v0  ;;  %v5767_v12 = vmul.f32 %v5431_v55, %v5319_v33  ;;  %v5682_v2 = vld [vmem:[#allocation9 + $0xa40] sm:$0xff]  ;;  %v5669_v44 = vld [vmem:[#allocation9 + $0x9d8] sm:$0xff] }
 0x6de   : > { %v4901_v57 = vadd.f32 %v4900_v61, %v11335_v23  ;;  %v6368_v45 = vadd.f32 %v11353_v53, %v5990_v13  ;;  %v5879_v50 = vmul.f32 %v5543_v38, %v5319_v33  ;;  %v5991_v20 = vmul.f32 %v5655_v7, %v5319_v33  ;;  %v5474_v53 = vld [vmem:[#allocation9 + $0x3c0] sm:$0xff] }
 0x6df   : > { %v5892_v63 = vmul.f32 %v5556_v48, %v5332_v60  ;;  %v10652_v36 = vadd.f32 %v6224_v62, %v5865_v28  ;;  %v10654_v5 = vadd.f32 %v6352_v54, %v5977_v25  ;;  %v6004_v30 = vmul.f32 %v5668_v4, %v5332_v60  ;;  %v5362_v62 = vld [vmem:[#allocation9 + $0x40] sm:$0xff]  ;;  %v10663_v60 = vpop.f32.mrf.mxu0 }
 0x6e0   : > { %v6128_v47 = vadd.f32 %v11354_v14, %v5780_v56  ;;  %v5781_v0 = vmul.f32 %v5445_v1, %v5333_v16  ;;  %v5794_v55 = vmul.f32 %v5458_v51, %v5346_v40  ;;  %v5250_v61 = vmax.f32 %v4970_v31, 0.0  ;;  %v11355_v48 = vld [vmem:[#allocation29_spill] sm:$0xff]  ;;  %v5459_v31 = vld [vmem:[#allocation9 + $0x348] sm:$0xff]  ;;  %v11356_v1 = vld [vmem:[#allocation32_spill] sm:$0xff] }
 0x6e1   : > { %v4972_v13 = vadd.f32 %v10582_v11, %v10246_v18  ;;  %v10659_v38 = vadd.f32 %v6112_v34, %v5767_v12  ;;  %v5906_v33 = vmul.f32 %v5570_v9, %v5346_v40  ;;  %v5347_v7 = vmax.f32 %v4901_v57, 0.0  ;;  %v5571_v51 = vld [vmem:[#allocation9 + $0x6c8] sm:$0xff] }
 0x6e2   : > { %v4976_v54 = vadd.f32 %v10588_v43, %v10250_v46  ;;  %v10665_v28 = vadd.f32 %v6240_v41, %v5879_v50  ;;  %v10667_v25 = vadd.f32 %v6368_v45, %v5991_v20  ;;  %v6256_v56 = vadd.f32 %v11355_v48, %v5892_v63  ;;  %v5683_v57 = vld [vmem:[#allocation9 + $0xa48] sm:$0xff]  ;;  %v5586_v45 = vld [vmem:[#allocation9 + $0x740] sm:$0xff]  ;;  %v5376_v48 = vld [vmem:[#allocation9 + $0xb0] sm:$0xff] }
 0x6e3   : > { %v6018_v4 = vmul.f32 %v5682_v2, %v5346_v40  ;;  %v6384_v11 = vadd.f32 %v11356_v1, %v6004_v30  ;;  %v5893_v34 = vmul.f32 %v5557_v21, %v5333_v16  ;;  %v6005_v12 = vmul.f32 %v5669_v44, %v5333_v16  ;;  %v11357_v63 = vld [vmem:[#allocation46_spill] sm:$0xff]  ;;  %v10679_v21 = vpop.f32.mrf.mxu0 }
 0x6e4   : > { %v4982_v43 = vadd.f32 %v10601_v8, %v11345_v3  ;;  %v10673_v9 = vadd.f32 %v6128_v47, %v5781_v0  ;;  %v6144_v41 = vadd.f32 %v10557_v24, %v5794_v55  ;;  %v5698_v50 = vmul.f32 %v5362_v62, %v5250_v61  ;;  %v5363_v2 = vld [vmem:[#allocation9 + $0x48] sm:$0xff]  ;;  %v5488_v24 = vld [vmem:[#allocation9 + $0x430] sm:$0xff] }
 0x6e5   : > { %v5251_v20 = vmax.f32 %v4972_v13, 0.0  ;;  %v6272_v40 = vadd.f32 %v11357_v63, %v5906_v33  ;;  %v5795_v14 = vmul.f32 %v5459_v31, %v5347_v7  ;;  %v5264_v30 = vmax.f32 %v4976_v54, 0.0  ;;  %v5600_v62 = vld [vmem:[#allocation9 + $0x7b0] sm:$0xff]  ;;  %v5475_v1 = vld [vmem:[#allocation9 + $0x3c8] sm:$0xff] }
 0x6e6   : > { %v4978_v16 = vadd.f32 %v10594_v59, %v10250_v46  ;;  %v6400_v44 = vadd.f32 %v10565_v58, %v6018_v4  ;;  %v5907_v8 = vmul.f32 %v5571_v51, %v5347_v7  ;;  %v6019_v47 = vmul.f32 %v5683_v57, %v5347_v7  ;;  %v5587_v59 = vld [vmem:[#allocation9 + $0x748] sm:$0xff]  ;;  %v5390_v46 = vld [vmem:[#allocation9 + $0x120] sm:$0xff] }
 0x6e7   : > { %v5810_v0 = vmul.f32 %v5474_v53, %v5250_v61  ;;  %v10682_v55 = vadd.f32 %v6256_v56, %v5893_v34  ;;  %v10684_v13 = vadd.f32 %v6384_v11, %v6005_v12  ;;  %v5922_v33 = vmul.f32 %v5586_v45, %v5250_v61  ;;  %v10693_v61 = vpop.f32.mrf.mxu0  ;;  %v5377_v53 = vld [vmem:[#allocation9 + $0xb8] sm:$0xff] }
 0x6e8   : > { %v5278_v31 = vmax.f32 %v4982_v43, 0.0  ;;  %v6033_v54 = vadd.f32 %v10590_v39, %v5698_v50  ;;  %v5699_v63 = vmul.f32 %v5363_v2, %v5251_v20  ;;  %v4984_v58 = vadd.f32 %v10611_v35, %v11345_v3  ;;  %v5502_v50 = vld [vmem:[#allocation9 + $0x4a0] sm:$0xff] }
 0x6e9   : > { %v4988_v7 = vadd.f32 %v10620_v19, %v11346_v52  ;;  %v10691_v4 = vadd.f32 %v6144_v41, %v5795_v14  ;;  %v5712_v56 = vmul.f32 %v5376_v48, %v5264_v30  ;;  %v5824_v11 = vmul.f32 %v5488_v24, %v5264_v30  ;;  %v5489_v19 = vld [vmem:[#allocation9 + $0x438] sm:$0xff]  ;;  %v5404_v24 = vld [vmem:[#allocation9 + $0x190] sm:$0xff] }
 0x6ea   : > { %v5265_v34 = vmax.f32 %v4978_v16, 0.0  ;;  %v10695_v12 = vadd.f32 %v6272_v40, %v5907_v8  ;;  %v10697_v39 = vadd.f32 %v6400_v44, %v6019_v47  ;;  %v6162_v51 = vadd.f32 %v10592_v22, %v5810_v0  ;;  %v5601_v41 = vld [vmem:[#allocation9 + $0x7b8] sm:$0xff]  ;;  %v5614_v16 = vld [vmem:[#allocation9 + $0x820] sm:$0xff]  ;;  %v11360_v8 = vld [vmem:[#allocation42_spill] sm:$0xff] }
 0x6eb   : > { %v5936_v57 = vmul.f32 %v5600_v62, %v5264_v30  ;;  %v6290_v35 = vadd.f32 %v10596_v17, %v5922_v33  ;;  %v5811_v43 = vmul.f32 %v5475_v1, %v5251_v20  ;;  %v5923_v45 = vmul.f32 %v5587_v59, %v5251_v20  ;;  %v11361_v30 = vld [vmem:[#allocation41_spill] sm:$0xff]  ;;  %v5391_v17 = vld [vmem:[#allocation9 + $0x128] sm:$0xff]  ;;  %v5005_v33 = vpop.f32.mrf.mxu0 }
 0x6ec   : > { %11358 = vst [vmem:[#allocation36_spill] sm:$0xff] %v10697_v39  ;;  %v5726_v14 = vmul.f32 %v5390_v46, %v5278_v31  ;;  %v10701_v2 = vadd.f32 %v6033_v54, %v5699_v63  ;;  %v5279_v48 = vmax.f32 %v4984_v58, 0.0  ;;  %v5292_v40 = vmax.f32 %v4988_v7, 0.0  ;;  %v11362_v46 = vld [vmem:[#allocation33_spill] sm:$0xff]  ;;  %v5516_v63 = vld [vmem:[#allocation9 + $0x510] sm:$0xff] }
 0x6ed   : > { %v4994_v44 = vadd.f32 %v10649_v6, %v11327_v32  ;;  %v6050_v22 = vadd.f32 %v11360_v8, %v5712_v56  ;;  %v6178_v47 = vadd.f32 %v11361_v30, %v5824_v11  ;;  %v5713_v0 = vmul.f32 %v5377_v53, %v5265_v34  ;;  %v11363_v56 = vld [vmem:[#allocation34_spill] sm:$0xff]  ;;  %v5628_v53 = vld [vmem:[#allocation9 + $0x890] sm:$0xff] }
 0x6ee   : > { %11359 = vst [vmem:[#allocation40_spill] sm:$0xff] %v10701_v2  ;;  %v4990_v20 = vadd.f32 %v10633_v37, %v11346_v52  ;;  %v6306_v62 = vadd.f32 %v11362_v46, %v5936_v57  ;;  %v5825_v54 = vmul.f32 %v5489_v19, %v5265_v34  ;;  %v5937_v1 = vmul.f32 %v5601_v41, %v5265_v34  ;;  %v5503_v8 = vld [vmem:[#allocation9 + $0x4a8] sm:$0xff]  ;;  %v5530_v46 = vld [vmem:[#allocation9 + $0x580] sm:$0xff] }
 0x6ef   : > { %v5838_v59 = vmul.f32 %v5502_v50, %v5278_v31  ;;  %v10710_v58 = vadd.f32 %v6162_v51, %v5811_v43  ;;  %v10712_v6 = vadd.f32 %v6290_v35, %v5923_v45  ;;  %v5950_v7 = vmul.f32 %v5614_v16, %v5278_v31  ;;  %v5615_v30 = vld [vmem:[#allocation9 + $0x828] sm:$0xff]  ;;  %v5418_v51 = vld [vmem:[#allocation9 + $0x200] sm:$0xff]  ;;  %v5007_v31 = vpop.f32.mrf.mxu0 }
 0x6f0   : > { %v6066_v11 = vadd.f32 %v11363_v56, %v5726_v14  ;;  %v5727_v2 = vmul.f32 %v5391_v17, %v5279_v48  ;;  %v5740_v39 = vmul.f32 %v5404_v24, %v5292_v40  ;;  %v5306_v37 = vmax.f32 %v4994_v44, 0.0  ;;  %v11364_v43 = vld [vmem:[#allocation30_spill] sm:$0xff]  ;;  %v5405_v44 = vld [vmem:[#allocation9 + $0x198] sm:$0xff]  ;;  %v10726_v24 = vpop.f32.mrf.mxu1 }
 0x6f1   : > { %v4996_v57 = vadd.f32 %v10663_v60, %v11327_v32  ;;  %v10717_v19 = vadd.f32 %v6050_v22, %v5713_v0  ;;  %v5852_v34 = vmul.f32 %v5516_v63, %v5292_v40  ;;  %v5293_v41 = vmax.f32 %v4990_v20, 0.0  ;;  %v5517_v17 = vld [vmem:[#allocation9 + $0x518] sm:$0xff]  ;;  %v5419_v56 = vld [vmem:[#allocation9 + $0x208] sm:$0xff] }
 0x6f2   : > { %v5000_v35 = vadd.f32 %v10679_v21, %v11364_v43  ;;  %v10721_v45 = vadd.f32 %v6178_v47, %v5825_v54  ;;  %v10723_v50 = vadd.f32 %v6306_v62, %v5937_v1  ;;  %v6194_v14 = vadd.f32 %v10625_v26, %v5838_v59  ;;  %v5629_v20 = vld [vmem:[#allocation9 + $0x898] sm:$0xff]  ;;  %v5642_v62 = vld [vmem:[#allocation9 + $0x900] sm:$0xff] }
 0x6f3   : > { %v5964_v16 = vmul.f32 %v5628_v53, %v5292_v40  ;;  %v6322_v60 = vadd.f32 %v10627_v49, %v5950_v7  ;;  %v5839_v22 = vmul.f32 %v5503_v8, %v5279_v48  ;;  %v5951_v0 = vmul.f32 %v5615_v30, %v5279_v48  ;;  %v5011_v49 = vpop.f32.mrf.mxu0  ;;  %v5432_v30 = vld [vmem:[#allocation9 + $0x270] sm:$0xff] }
 0x6f4   : > { %v5006_v21 = vadd.f32 %v5005_v33, %v10310_v27  ;;  %v10730_v63 = vadd.f32 %v6066_v11, %v5727_v2  ;;  %v6082_v47 = vadd.f32 %v10635_v15, %v5740_v39  ;;  %v5754_v54 = vmul.f32 %v5418_v51, %v5306_v37  ;;  %v5544_v33 = vld [vmem:[#allocation9 + $0x5f0] sm:$0xff]  ;;  %v10737_v15 = vpop.f32.mrf.mxu1 }
 0x6f5   : > { %v5307_v26 = vmax.f32 %v4996_v57, 0.0  ;;  %v6210_v40 = vadd.f32 %v10637_v10, %v5852_v34  ;;  %v5741_v1 = vmul.f32 %v5405_v44, %v5293_v41  ;;  %v5853_v59 = vmul.f32 %v5517_v17, %v5293_v41  ;;  %v5656_v10 = vld [vmem:[#allocation9 + $0x970] sm:$0xff] }
 0x6f6   : > { %v5320_v53 = vmax.f32 %v5000_v35, 0.0  ;;  %v6338_v48 = vadd.f32 %v10639_v29, %v5964_v16  ;;  %v5965_v7 = vmul.f32 %v5629_v20, %v5293_v41  ;;  %v5866_v8 = vmul.f32 %v5530_v46, %v5306_v37  ;;  %v5446_v35 = vld [vmem:[#allocation9 + $0x2e0] sm:$0xff] }
 0x6f7   : > { %v5002_v2 = vadd.f32 %v10693_v61, %v11364_v43  ;;  %v10739_v39 = vadd.f32 %v6194_v14, %v5839_v22  ;;  %v5978_v11 = vmul.f32 %v5642_v62, %v5306_v37  ;;  %v5334_v57 = vmax.f32 %v5006_v21, 0.0  ;;  %v5558_v16 = vld [vmem:[#allocation9 + $0x660] sm:$0xff]  ;;  %v5531_v14 = vld [vmem:[#allocation9 + $0x588] sm:$0xff]  ;;  %v5088_v21 = vpop.f32.mrf.mxu1 }
 0x6f8   : > { %v5008_v34 = vadd.f32 %v5007_v31, %v10310_v27  ;;  %v10742_v51 = vadd.f32 %v6322_v60, %v5951_v0  ;;  %v6098_v29 = vadd.f32 %v10642_v42, %v5754_v54  ;;  %v5755_v41 = vmul.f32 %v5419_v56, %v5307_v26  ;;  %v5643_v22 = vld [vmem:[#allocation9 + $0x908] sm:$0xff]  ;;  %v5013_v42 = vpop.f32.mrf.mxu0  ;;  %v5433_v54 = vld [vmem:[#allocation9 + $0x278] sm:$0xff] }
 0x6f9   : > { %v5012_v44 = vadd.f32 %v5011_v49, %v11335_v23  ;;  %v10746_v17 = vadd.f32 %v6082_v47, %v5741_v1  ;;  %v10748_v61 = vadd.f32 %v6210_v40, %v5853_v59  ;;  %v5768_v37 = vmul.f32 %v5432_v30, %v5320_v53  ;;  %v5545_v56 = vld [vmem:[#allocation9 + $0x5f8] sm:$0xff]  ;;  %v5670_v47 = vld [vmem:[#allocation9 + $0x9e0] sm:$0xff] }
 0x6fa   : > { %v5880_v20 = vmul.f32 %v5544_v33, %v5320_v53  ;;  %v10750_v46 = vadd.f32 %v6338_v48, %v5965_v7  ;;  %v6226_v31 = vadd.f32 %v10652_v36, %v5866_v8  ;;  %v5992_v60 = vmul.f32 %v5656_v10, %v5320_v53  ;;  %v5657_v48 = vld [vmem:[#allocation9 + $0x978] sm:$0xff]  ;;  %v5447_v7 = vld [vmem:[#allocation9 + $0x2e8] sm:$0xff] }
 0x6fb   : > { %v5321_v0 = vmax.f32 %v5002_v2, 0.0  ;;  %v6354_v62 = vadd.f32 %v10654_v5, %v5978_v11  ;;  %v5782_v1 = vmul.f32 %v5446_v35, %v5334_v57  ;;  %v5894_v40 = vmul.f32 %v5558_v16, %v5334_v57  ;;  %v5559_v8 = vld [vmem:[#allocation9 + $0x668] sm:$0xff]  ;;  %v5460_v2 = vld [vmem:[#allocation9 + $0x350] sm:$0xff]  ;;  %v5090_v16 = vpop.f32.mrf.mxu1 }
 0x6fc   : > { %v5335_v59 = vmax.f32 %v5008_v34, 0.0  ;;  %v5867_v49 = vmul.f32 %v5531_v14, %v5307_v26  ;;  %v5979_v27 = vmul.f32 %v5643_v22, %v5307_v26  ;;  %v10754_v30 = vadd.f32 %v6098_v29, %v5755_v41  ;;  %v5572_v5 = vld [vmem:[#allocation9 + $0x6d0] sm:$0xff]  ;;  %v5195_v34 = vpop.f32.mrf.mxu0  ;;  %v5671_v14 = vld [vmem:[#allocation9 + $0x9e8] sm:$0xff] }
 0x6fd   : > { %v5348_v33 = vmax.f32 %v5012_v44, 0.0  ;;  %v6114_v36 = vadd.f32 %v10659_v38, %v5768_v37  ;;  %v6242_v53 = vadd.f32 %v10665_v28, %v5880_v20  ;;  %v5014_v11 = vadd.f32 %v5013_v42, %v11335_v23  ;;  %v5684_v20 = vld [vmem:[#allocation9 + $0xa50] sm:$0xff] }
 0x6fe   : > { %11365 = vst [vmem:[#allocation37_spill] sm:$0xff] %v10754_v30  ;;  %v5083_v10 = vadd.f32 %v10726_v24, %v10246_v18  ;;  %v6370_v26 = vadd.f32 %v10667_v25, %v5992_v60  ;;  %v5769_v29 = vmul.f32 %v5433_v54, %v5321_v0  ;;  %v5881_v41 = vmul.f32 %v5545_v56, %v5321_v0  ;;  %v11366_v30 = vld [vmem:[#allocation44_spill] sm:$0xff]  ;;  %v5197_v54 = vpop.f32.mrf.mxu0 }
 0x6ff   : > { %v6006_v35 = vmul.f32 %v5670_v47, %v5334_v57  ;;  %v5993_v44 = vmul.f32 %v5657_v48, %v5321_v0  ;;  %v6130_v38 = vadd.f32 %v10673_v9, %v5782_v1  ;;  %v6258_v28 = vadd.f32 %v10682_v55, %v5894_v40  ;;  %v5461_v47 = vld [vmem:[#allocation9 + $0x358] sm:$0xff]  ;;  %v5364_v40 = vld [vmem:[#allocation9 + $0x50] sm:$0xff]  ;;  %v5094_v48 = vpop.f32.mrf.mxu1 }
 0x700   : > { %v5783_v22 = vmul.f32 %v5447_v7, %v5335_v59  ;;  %v5895_v37 = vmul.f32 %v5559_v8, %v5335_v59  ;;  %v5796_v42 = vmul.f32 %v5460_v2, %v5348_v33  ;;  %v5908_v23 = vmul.f32 %v5572_v5, %v5348_v33  ;;  %v5573_v1 = vld [vmem:[#allocation9 + $0x6d8] sm:$0xff] }
 0x701   : > { %v5089_v24 = vadd.f32 %v5088_v21, %v11366_v30  ;;  %v10765_v43 = vadd.f32 %v6226_v31, %v5867_v49  ;;  %v10767_v25 = vadd.f32 %v6354_v62, %v5979_v27  ;;  %v5349_v60 = vmax.f32 %v5014_v11, 0.0  ;;  %v5476_v21 = vld [vmem:[#allocation9 + $0x3d0] sm:$0xff] }
 0x702   : > { %v5252_v57 = vmax.f32 %v5083_v10, 0.0  ;;  %v10769_v0 = vadd.f32 %v6114_v36, %v5769_v29  ;;  %v10771_v9 = vadd.f32 %v6242_v53, %v5881_v41  ;;  %v6386_v55 = vadd.f32 %v10684_v13, %v6006_v35  ;;  %v5588_v62 = vld [vmem:[#allocation9 + $0x750] sm:$0xff]  ;;  %v5378_v10 = vld [vmem:[#allocation9 + $0xc0] sm:$0xff]  ;;  %v5201_v41 = vpop.f32.mrf.mxu0 }
 0x703   : > { %v6007_v56 = vmul.f32 %v5671_v14, %v5335_v59  ;;  %v10774_v7 = vadd.f32 %v6370_v26, %v5993_v44  ;;  %v10776_v31 = vadd.f32 %v6130_v38, %v5783_v22  ;;  %v6020_v27 = vmul.f32 %v5684_v20, %v5348_v33  ;;  %v5685_v59 = vld [vmem:[#allocation9 + $0xa58] sm:$0xff]  ;;  %v5490_v26 = vld [vmem:[#allocation9 + $0x440] sm:$0xff] }
 0x704   : > { %v5085_v49 = vadd.f32 %v10737_v15, %v10246_v18  ;;  %v10780_v36 = vadd.f32 %v6258_v28, %v5895_v37  ;;  %v6146_v53 = vadd.f32 %v10691_v4, %v5796_v42  ;;  %v6274_v13 = vadd.f32 %v10695_v12, %v5908_v23  ;;  %v5602_v29 = vld [vmem:[#allocation9 + $0x7c0] sm:$0xff]  ;;  %v5096_v4 = vpop.f32.mrf.mxu1  ;;  %v11367_v28 = vld [vmem:[#allocation36_spill] sm:$0xff] }
 0x705   : > { %v5266_v8 = vmax.f32 %v5089_v24, 0.0  ;;  %v5797_v2 = vmul.f32 %v5461_v47, %v5349_v60  ;;  %v5909_v5 = vmul.f32 %v5573_v1, %v5349_v60  ;;  %v5700_v11 = vmul.f32 %v5364_v40, %v5252_v57  ;;  %v5365_v37 = vld [vmem:[#allocation9 + $0x58] sm:$0xff] }
 0x706   : > { %v5091_v33 = vadd.f32 %v5090_v16, %v11366_v30  ;;  %v10785_v35 = vadd.f32 %v6386_v55, %v6007_v56  ;;  %v5812_v15 = vmul.f32 %v5476_v21, %v5252_v57  ;;  %v5924_v44 = vmul.f32 %v5588_v62, %v5252_v57  ;;  %v5477_v20 = vld [vmem:[#allocation9 + $0x3d8] sm:$0xff]  ;;  %v5379_v21 = vld [vmem:[#allocation9 + $0xc8] sm:$0xff] }
 0x707   : > { %v5095_v38 = vadd.f32 %v5094_v48, %v11345_v3  ;;  %v6402_v23 = vadd.f32 %v11367_v28, %v6020_v27  ;;  %v6021_v12 = vmul.f32 %v5685_v59, %v5349_v60  ;;  %v5253_v14 = vmax.f32 %v5085_v49, 0.0  ;;  %v5589_v42 = vld [vmem:[#allocation9 + $0x758] sm:$0xff]  ;;  %v5203_v27 = vpop.f32.mrf.mxu0  ;;  %v5491_v62 = vld [vmem:[#allocation9 + $0x448] sm:$0xff] }
 0x708   : > { %v5196_v22 = vadd.f32 %v5195_v34, %v10246_v18  ;;  %v5714_v24 = vmul.f32 %v5378_v10, %v5266_v8  ;;  %v5826_v47 = vmul.f32 %v5490_v26, %v5266_v8  ;;  %v5938_v16 = vmul.f32 %v5602_v29, %v5266_v8  ;;  %v11368_v1 = vld [vmem:[#allocation40_spill] sm:$0xff]  ;;  %v5603_v49 = vld [vmem:[#allocation9 + $0x7c8] sm:$0xff]  ;;  %v5478_v29 = vld [vmem:[#allocation9 + $0x3e0] sm:$0xff] }
 0x709   : > { %v5198_v55 = vadd.f32 %v5197_v54, %v10246_v18  ;;  %v10791_v56 = vadd.f32 %v6146_v53, %v5797_v2  ;;  %v10793_v57 = vadd.f32 %v6274_v13, %v5909_v5  ;;  %v6035_v40 = vadd.f32 %v11368_v1, %v5700_v11  ;;  %v5100_v18 = vpop.f32.mrf.mxu1  ;;  %v5392_v2 = vld [vmem:[#allocation9 + $0x130] sm:$0xff] }
 0x70a   : > { %v5267_v48 = vmax.f32 %v5091_v33, 0.0  ;;  %v6164_v60 = vadd.f32 %v10710_v58, %v5812_v15  ;;  %v6292_v34 = vadd.f32 %v10712_v6, %v5924_v44  ;;  %v5280_v59 = vmax.f32 %v5095_v38, 0.0  ;;  %v5504_v5 = vld [vmem:[#allocation9 + $0x4b0] sm:$0xff] }
 0x70b   : > { %v5097_v8 = vadd.f32 %v5096_v4, %v11345_v3  ;;  %v5701_v54 = vmul.f32 %v5365_v37, %v5253_v14  ;;  %v5813_v53 = vmul.f32 %v5477_v20, %v5253_v14  ;;  %v5925_v13 = vmul.f32 %v5589_v42, %v5253_v14  ;;  %v5616_v6 = vld [vmem:[#allocation9 + $0x830] sm:$0xff]  ;;  %v5479_v4 = vld [vmem:[#allocation9 + $0x3e8] sm:$0xff]  ;;  %v5207_v37 = vpop.f32.mrf.mxu0 }
 0x70c   : > { %v5254_v11 = vmax.f32 %v5196_v22, 0.0  ;;  %v6052_v10 = vadd.f32 %v10717_v19, %v5714_v24  ;;  %v6180_v26 = vadd.f32 %v10721_v45, %v5826_v47  ;;  %v6308_v58 = vadd.f32 %v10723_v50, %v5938_v16  ;;  %v5102_v19 = vpop.f32.mrf.mxu1  ;;  %v5393_v50 = vld [vmem:[#allocation9 + $0x138] sm:$0xff] }
 0x70d   : > { %v5255_v33 = vmax.f32 %v5198_v55, 0.0  ;;  %v5715_v15 = vmul.f32 %v5379_v21, %v5267_v48  ;;  %v5827_v44 = vmul.f32 %v5491_v62, %v5267_v48  ;;  %v5939_v38 = vmul.f32 %v5603_v49, %v5267_v48  ;;  %v5505_v48 = vld [vmem:[#allocation9 + $0x4b8] sm:$0xff] }
 0x70e   : > { %v5101_v28 = vadd.f32 %v5100_v18, %v11346_v52  ;;  %v10803_v14 = vadd.f32 %v6402_v23, %v6021_v12  ;;  %v5728_v20 = vmul.f32 %v5392_v2, %v5280_v59  ;;  %v5840_v22 = vmul.f32 %v5504_v5, %v5280_v59  ;;  %v10815_v18 = vpop.f32.mrf.mxu0  ;;  %v5590_v5 = vld [vmem:[#allocation9 + $0x760] sm:$0xff] }
 0x70f   : > { %v5281_v42 = vmax.f32 %v5097_v8, 0.0  ;;  %v6036_v24 = vadd.f32 %v6035_v40, %v5701_v54  ;;  %v5952_v45 = vmul.f32 %v5616_v6, %v5280_v59  ;;  %v5814_v47 = vmul.f32 %v5478_v29, %v5254_v11  ;;  %v5366_v8 = vld [vmem:[#allocation9 + $0x60] sm:$0xff]  ;;  %v5617_v40 = vld [vmem:[#allocation9 + $0x838] sm:$0xff]  ;;  %v5367_v54 = vld [vmem:[#allocation9 + $0x68] sm:$0xff] }
 0x710   : > { %v5202_v16 = vadd.f32 %v5201_v41, %v11366_v30  ;;  %v6165_v55 = vadd.f32 %v6164_v60, %v5813_v53  ;;  %v10806_v1 = vadd.f32 %v6292_v34, %v5925_v13  ;;  %v5815_v21 = vmul.f32 %v5479_v4, %v5255_v33  ;;  %v5406_v53 = vld [vmem:[#allocation9 + $0x1a0] sm:$0xff] }
 0x711   : > { %v5204_v62 = vadd.f32 %v5203_v27, %v11366_v30  ;;  %v10809_v49 = vadd.f32 %v6052_v10, %v5715_v15  ;;  %v10811_v23 = vadd.f32 %v6180_v26, %v5827_v44  ;;  %v10813_v12 = vadd.f32 %v6308_v58, %v5939_v38  ;;  %v5518_v13 = vld [vmem:[#allocation9 + $0x520] sm:$0xff]  ;;  %v5106_v27 = vpop.f32.mrf.mxu1  ;;  %v5492_v44 = vld [vmem:[#allocation9 + $0x450] sm:$0xff] }
 0x712   : > { %v5294_v59 = vmax.f32 %v5101_v28, 0.0  ;;  %v6068_v41 = vadd.f32 %v10730_v63, %v5728_v20  ;;  %v6196_v60 = vadd.f32 %v10739_v39, %v5840_v22  ;;  %v5729_v34 = vmul.f32 %v5393_v50, %v5281_v42  ;;  %v5630_v26 = vld [vmem:[#allocation9 + $0x8a0] sm:$0xff]  ;;  %v5591_v63 = vld [vmem:[#allocation9 + $0x768] sm:$0xff]  ;;  %v5493_v22 = vld [vmem:[#allocation9 + $0x458] sm:$0xff] }
 0x713   : > { %v5103_v30 = vadd.f32 %v5102_v19, %v11346_v52  ;;  %v6324_v2 = vadd.f32 %v10742_v51, %v5952_v45  ;;  %v5841_v10 = vmul.f32 %v5505_v48, %v5281_v42  ;;  %v10821_v58 = vmax.f32 %v5202_v16, 0.0  ;;  %v10827_v19 = vpop.f32.mrf.mxu0 }
 0x714   : > { %v6166_v6 = vadd.f32 %v6165_v55, %v5814_v47  ;;  %v5702_v29 = vmul.f32 %v5366_v8, %v5254_v11  ;;  %v5953_v15 = vmul.f32 %v5617_v40, %v5281_v42  ;;  %v10823_v39 = vmax.f32 %v5204_v62, 0.0  ;;  %v5108_v42 = vpop.f32.mrf.mxu1 }
 0x715   : > { %v6167_v38 = vsel %vm6038_vm6, %v5815_v21, 0.0  ;;  %v5703_v4 = vmul.f32 %v5367_v54, %v5255_v33  ;;  %v5742_v28 = vmul.f32 %v5406_v53, %v5294_v59  ;;  %v5854_v20 = vmul.f32 %v5518_v13, %v5294_v59  ;;  %v5407_v21 = vld [vmem:[#allocation9 + $0x1a8] sm:$0xff] }
 0x716   : > { %v5107_v51 = vadd.f32 %v5106_v27, %v11327_v32  ;;  %v5926_v45 = vmul.f32 %v5590_v5, %v5254_v11  ;;  %v10829_v50 = vadd.f32 %v6068_v41, %v5729_v34  ;;  %v5966_v47 = vmul.f32 %v5630_v26, %v5294_v59  ;;  %v5519_v54 = vld [vmem:[#allocation9 + $0x528] sm:$0xff]  ;;  %v5420_v5 = vld [vmem:[#allocation9 + $0x210] sm:$0xff]  ;;  %v5112_v26 = vpop.f32.mrf.mxu1 }
 0x717   : > { %v5295_v16 = vmax.f32 %v5103_v30, 0.0  ;;  %v10831_v55 = vadd.f32 %v6196_v60, %v5841_v10  ;;  %v5927_v48 = vmul.f32 %v5591_v63, %v5255_v33  ;;  %v5828_v62 = vmul.f32 %v5492_v44, %v10821_v58  ;;  %v5631_v34 = vld [vmem:[#allocation9 + $0x8a8] sm:$0xff]  ;;  %v10841_v30 = vpop.f32.mrf.mxu0  ;;  %v5604_v44 = vld [vmem:[#allocation9 + $0x7d0] sm:$0xff] }
 0x718   : > { %v6168_v8 = vadd.f32 %v6167_v38, %v6166_v6  ;;  %v10834_v40 = vadd.f32 %v6324_v2, %v5953_v15  ;;  %v5829_v53 = vmul.f32 %v5493_v22, %v10823_v39  ;;  %v5208_v13 = vadd.f32 %v5207_v37, %v11345_v3 }
 0x719   : > { %v6037_v11 = vadd.f32 %v6036_v24, %v5702_v29  ;;  %v6084_v41 = vadd.f32 %v10746_v17, %v5742_v28  ;;  %v6212_v59 = vadd.f32 %v10748_v61, %v5854_v20  ;;  %v5308_v60 = vmax.f32 %v5107_v51, 0.0  ;;  %v5380_v24 = vld [vmem:[#allocation9 + $0xd0] sm:$0xff] }
 0x71a   : > { %6169 = vadd.xlane.f32.xlu0 %v6168_v8  ;;  %v6039_v33 = vsel %vm6038_vm6, %v5703_v4, 0.0  ;;  %v6340_v27 = vadd.f32 %v10750_v46, %v5966_v47  ;;  %v5743_v2 = vmul.f32 %v5407_v21, %v5295_v16  ;;  %v5109_v10 = vadd.f32 %v5108_v42, %v11327_v32  ;;  %v5532_v17 = vld [vmem:[#allocation9 + $0x590] sm:$0xff]  ;;  %v5381_v4 = vld [vmem:[#allocation9 + $0xd8] sm:$0xff]  ;;  %v11369_v47 = vld [vmem:[#allocation30_spill] sm:$0xff]  ;;  %v10852_v21 = vpop.f32.mrf.mxu0 }
 0x71b   : > { %v6040_v37 = vadd.f32 %v6039_v33, %v6037_v11  ;;  %v5855_v6 = vmul.f32 %v5519_v54, %v5295_v16  ;;  %v5644_v29 = vld [vmem:[#allocation9 + $0x910] sm:$0xff]  ;;  %v6294_v61 = vadd.f32 %v10806_v1, %v5926_v45  ;;  %v6295_v15 = vsel %vm6038_vm6, %v5927_v48, 0.0  ;;  %v5605_v46 = vld [vmem:[#allocation9 + $0x7d8] sm:$0xff]  ;;  %v5506_v8 = vld [vmem:[#allocation9 + $0x4c0] sm:$0xff] }
 0x71c   : > { %v6182_v63 = vadd.f32 %v10811_v23, %v5828_v62  ;;  %v5967_v38 = vmul.f32 %v5631_v34, %v5295_v16  ;;  %v5282_v28 = vmax.f32 %v5208_v13, 0.0  ;;  %v5210_v20 = vadd.f32 %v10815_v18, %v11345_v3  ;;  %v5394_v62 = vld [vmem:[#allocation9 + $0x140] sm:$0xff]  ;;  %v5421_v11 = vld [vmem:[#allocation9 + $0x218] sm:$0xff]  ;;  %v5114_v34 = vpop.f32.mrf.mxu1 }
 0x71d   : > { %6041 = vadd.xlane.f32.xlu1 %v6040_v37  ;;  %v6183_v22 = vsel %vm6038_vm6, %v5829_v53, 0.0  ;;  %v5756_v51 = vmul.f32 %v5420_v5, %v5308_v60  ;;  %v5113_v42 = vadd.f32 %v5112_v26, %v11369_v47  ;;  %v6296_v1 = vadd.f32 %v6295_v15, %v6294_v61  ;;  %v5645_v26 = vld [vmem:[#allocation9 + $0x918] sm:$0xff] }
 0x71e   : > { %v6184_v45 = vadd.f32 %v6183_v22, %v6182_v63  ;;  %v5716_v23 = vmul.f32 %v5380_v24, %v10821_v58  ;;  %v5868_v48 = vmul.f32 %v5532_v17, %v5308_v60  ;;  %v5980_v16 = vmul.f32 %v5644_v29, %v5308_v60  ;;  %v5533_v60 = vld [vmem:[#allocation9 + $0x598] sm:$0xff]  ;;  %v5395_v17 = vld [vmem:[#allocation9 + $0x148] sm:$0xff]  ;;  %v5434_v63 = vld [vmem:[#allocation9 + $0x280] sm:$0xff] }
 0x71f   : > { %v5309_v54 = vmax.f32 %v5109_v10, 0.0  ;;  %v5940_v13 = vmul.f32 %v5604_v44, %v10821_v58  ;;  %v10856_v3 = vadd.f32 %v6084_v41, %v5743_v2  ;;  %v5717_v18 = vmul.f32 %v5381_v4, %v10823_v39  ;;  %6297 = vadd.xlane.f32.xlu0 %v6296_v1  ;;  %v11370_v41 = vld [vmem:[#allocation37_spill] sm:$0xff]  ;;  %v5507_v29 = vld [vmem:[#allocation9 + $0x4c8] sm:$0xff] }
 0x720   : > { %v10860_v53 = vmul.f32 %v5605_v46, %v10823_v39  ;;  %v10862_v33 = vadd.f32 %v6212_v59, %v5855_v6  ;;  %v10864_v5 = vadd.f32 %v6340_v27, %v5967_v38  ;;  %v5283_v37 = vmax.f32 %v5210_v20, 0.0  ;;  %v5618_v10 = vld [vmem:[#allocation9 + $0x840] sm:$0xff]  ;;  %v10873_v6 = vpop.f32.mrf.mxu0  ;;  %v5118_v20 = vpop.f32.mrf.mxu1  ;;  %v5619_v1 = vld [vmem:[#allocation9 + $0x848] sm:$0xff] }
 0x721   : > { %v5214_v58 = vadd.f32 %v10827_v19, %v11346_v52  ;;  %6185 = vadd.xlane.f32.xlu1 %v6184_v45  ;;  %v6100_v2 = vadd.f32 %v11370_v41, %v5756_v51  ;;  %v10869_v24 = vmul.f32 %v5394_v62, %v5282_v28  ;;  %v10871_v39 = vmul.f32 %v5506_v8, %v5282_v28  ;;  %v5546_v19 = vld [vmem:[#allocation9 + $0x600] sm:$0xff]  ;;  %v5408_v62 = vld [vmem:[#allocation9 + $0x1b0] sm:$0xff] }
 0x722   : > { %v5322_v59 = vmax.f32 %v5113_v42, 0.0  ;;  %v6228_v27 = vadd.f32 %v10765_v43, %v5868_v48  ;;  %v6356_v61 = vadd.f32 %v10767_v25, %v5980_v16  ;;  %v5757_v15 = vmul.f32 %v5421_v11, %v5309_v54  ;;  %v5658_v46 = vld [vmem:[#allocation9 + $0x980] sm:$0xff]  ;;  %v5520_v8 = vld [vmem:[#allocation9 + $0x530] sm:$0xff] }
 0x723   : > { %v5115_v44 = vadd.f32 %v5114_v34, %v11369_v47  ;;  %v5869_v38 = vmul.f32 %v5533_v60, %v5309_v54  ;;  %v5981_v4 = vmul.f32 %v5645_v26, %v5309_v54  ;;  %v6054_v22 = vadd.f32 %v10809_v49, %v5716_v23  ;;  %v5632_v11 = vld [vmem:[#allocation9 + $0x8b0] sm:$0xff]  ;;  %v5225_v34 = vpop.f32.mrf.mxu0 }
 0x724   : > { %v6055_v51 = vsel %vm6038_vm6, %v5717_v18, 0.0  ;;  %v10880_v42 = vmul.f32 %v5618_v10, %v5282_v28  ;;  %v5731_v45 = vmul.f32 %v5395_v17, %v5283_v37  ;;  %v5843_v43 = vmul.f32 %v5507_v29, %v5283_v37  ;;  %v11371_v23 = vld [vmem:[#allocation15_spill] sm:$0xff]  ;;  %v5435_v29 = vld [vmem:[#allocation9 + $0x288] sm:$0xff] }
 0x725   : > { %v5296_v48 = vmax.f32 %v5214_v58, 0.0  ;;  %v5770_v25 = vmul.f32 %v5434_v63, %v5322_v59  ;;  %v5882_v16 = vmul.f32 %v5546_v19, %v5322_v59  ;;  %v5216_v54 = vadd.f32 %v10841_v30, %v11346_v52  ;;  %v5659_v19 = vld [vmem:[#allocation9 + $0x988] sm:$0xff] }
 0x726   : > { %v6056_v60 = vadd.f32 %v6055_v51, %v6054_v22  ;;  %v5994_v26 = vmul.f32 %v5658_v46, %v5322_v59  ;;  %v5323_v49 = vmax.f32 %v5115_v44, 0.0  ;;  %v5119_v18 = vadd.f32 %v5118_v20, %v11371_v23  ;;  %v5547_v59 = vld [vmem:[#allocation9 + $0x608] sm:$0xff]  ;;  %v5521_v46 = vld [vmem:[#allocation9 + $0x538] sm:$0xff] }
 0x727   : > { %v6310_v28 = vadd.f32 %v10813_v12, %v5940_v13  ;;  %v10886_v41 = vadd.f32 %v6100_v2, %v5757_v15  ;;  %v10888_v10 = vadd.f32 %v6228_v27, %v5869_v38  ;;  %v10890_v58 = vadd.f32 %v6356_v61, %v5981_v4  ;;  %v5120_v27 = vpop.f32.mrf.mxu1  ;;  %v5227_v61 = vpop.f32.mrf.mxu0  ;;  %v5409_v4 = vld [vmem:[#allocation9 + $0x1b8] sm:$0xff] }
 0x728   : > { %v5955_v17 = vmul.f32 %v5619_v1, %v5283_v37  ;;  %6057 = vadd.xlane.f32.xlu0 %v6056_v60  ;;  %v10892_v63 = vmul.f32 %v5408_v62, %v5296_v48  ;;  %v5856_v52 = vmul.f32 %v5520_v8, %v5296_v48  ;;  %v10894_v30 = vmul.f32 %v5632_v11, %v5296_v48  ;;  %v5633_v20 = vld [vmem:[#allocation9 + $0x8b8] sm:$0xff]  ;;  %v5448_v48 = vld [vmem:[#allocation9 + $0x2f0] sm:$0xff] }
 0x729   : > { %v5220_v44 = vadd.f32 %v10852_v21, %v11327_v32  ;;  %v6116_v12 = vadd.f32 %v10769_v0, %v5770_v25  ;;  %v6244_v13 = vadd.f32 %v10771_v9, %v5882_v16  ;;  %v5297_v2 = vmax.f32 %v5216_v54, 0.0  ;;  %v5560_v0 = vld [vmem:[#allocation9 + $0x670] sm:$0xff] }
 0x72a   : > { %v6311_v37 = vsel %vm6038_vm6, %v10860_v53, 0.0  ;;  %v6372_v15 = vadd.f32 %v10774_v7, %v5994_v26  ;;  %v5771_v38 = vmul.f32 %v5435_v29, %v5323_v49  ;;  %v5336_v22 = vmax.f32 %v5119_v18, 0.0  ;;  %v5672_v16 = vld [vmem:[#allocation9 + $0x9f0] sm:$0xff]  ;;  %v5231_v26 = vpop.f32.mrf.mxu0 }
 0x72b   : > { %v6312_v51 = vadd.f32 %v6311_v37, %v6310_v28  ;;  %v5883_v1 = vmul.f32 %v5547_v59, %v5323_v49  ;;  %v5995_v21 = vmul.f32 %v5659_v19, %v5323_v49  ;;  %v6198_v9 = vadd.f32 %v10831_v55, %v10871_v39  ;;  %v5124_v59 = vpop.f32.mrf.mxu1 }
 0x72c   : > { %v6199_v25 = vsel %vm6038_vm6, %v5843_v43, 0.0  ;;  %v5310_v53 = vmax.f32 %v5220_v44, 0.0  ;;  %v5121_v62 = vadd.f32 %v5120_v27, %v11371_v23  ;;  %v5222_v7 = vadd.f32 %v10873_v6, %v11327_v32  ;;  %v5422_v6 = vld [vmem:[#allocation9 + $0x220] sm:$0xff]  ;;  %v5233_v27 = vpop.f32.mrf.mxu0 }
 0x72d   : > { %6313 = vadd.xlane.f32.xlu1 %v6312_v51  ;;  %v6070_v8 = vadd.f32 %v10829_v50, %v10869_v24  ;;  %v5745_v11 = vmul.f32 %v5409_v4, %v5297_v2  ;;  %v5857_v54 = vmul.f32 %v5521_v46, %v5297_v2  ;;  %v5969_v60 = vmul.f32 %v5633_v20, %v5297_v2  ;;  %v5534_v24 = vld [vmem:[#allocation9 + $0x5a0] sm:$0xff]  ;;  %v5423_v2 = vld [vmem:[#allocation9 + $0x228] sm:$0xff] }
 0x72e   : > { %v6071_v49 = vsel %vm6038_vm6, %v5731_v45, 0.0  ;;  %v10912_v55 = vadd.f32 %v6116_v12, %v5771_v38  ;;  %v5784_v39 = vmul.f32 %v5448_v48, %v5336_v22  ;;  %v5896_v43 = vmul.f32 %v5560_v0, %v5336_v22  ;;  %v11372_v20 = vld [vmem:[#allocation22_spill] sm:$0xff]  ;;  %v5646_v51 = vld [vmem:[#allocation9 + $0x920] sm:$0xff] }
 0x72f   : > { %v6200_v18 = vadd.f32 %v6199_v25, %v6198_v9  ;;  %v10914_v28 = vadd.f32 %v6244_v13, %v5883_v1  ;;  %v10916_v29 = vadd.f32 %v6372_v15, %v5995_v21  ;;  %v10918_v32 = vmul.f32 %v5672_v16, %v5336_v22  ;;  %v5549_v25 = vld [vmem:[#allocation9 + $0x618] sm:$0xff]  ;;  %v5237_v16 = vpop.f32.mrf.mxu0 }
 0x730   : > { %v5226_v50 = vadd.f32 %v5225_v34, %v11369_v47  ;;  %v10921_v19 = vmax.f32 %v5121_v62, 0.0  ;;  %v5311_v44 = vmax.f32 %v5222_v7, 0.0  ;;  %v5228_v45 = vadd.f32 %v5227_v61, %v11369_v47  ;;  %v5449_v47 = vld [vmem:[#allocation9 + $0x2f8] sm:$0xff]  ;;  %v5535_v61 = vld [vmem:[#allocation9 + $0x5a8] sm:$0xff] }
 0x731   : > { %6201 = vadd.xlane.f32.xlu1 %v6200_v18  ;;  %v6072_v12 = vadd.f32 %v6071_v49, %v6070_v8  ;;  %v6214_v13 = vadd.f32 %v10862_v33, %v5856_v52  ;;  %v6215_v37 = vsel %vm6038_vm6, %v5857_v54, 0.0  ;;  %v6326_v15 = vadd.f32 %v10834_v40, %v10880_v42  ;;  %v5561_v52 = vld [vmem:[#allocation9 + $0x678] sm:$0xff]  ;;  %v5126_v49 = vpop.f32.mrf.mxu1 }
 0x732   : > { %v6327_v38 = vsel %vm6038_vm6, %v5955_v17, 0.0  ;;  %v6132_v34 = vadd.f32 %v10776_v31, %v5784_v39  ;;  %v10931_v4 = vadd.f32 %v10780_v36, %v5896_v43  ;;  %v5758_v46 = vmul.f32 %v5422_v6, %v5310_v53  ;;  %v5548_v17 = vld [vmem:[#allocation9 + $0x610] sm:$0xff]  ;;  %v5661_v6 = vld [vmem:[#allocation9 + $0x998] sm:$0xff] }
 0x733   : > { %v5125_v22 = vadd.f32 %v5124_v59, %v11372_v20  ;;  %6073 = vadd.xlane.f32.xlu0 %v6072_v12  ;;  %v5870_v33 = vmul.f32 %v5534_v24, %v5310_v53  ;;  %v5324_v1 = vmax.f32 %v5226_v50, 0.0  ;;  %v6216_v21 = vadd.f32 %v6215_v37, %v6214_v13  ;;  %v5436_v39 = vld [vmem:[#allocation9 + $0x290] sm:$0xff]  ;;  %v5462_v37 = vld [vmem:[#allocation9 + $0x360] sm:$0xff] }
 0x734   : > { %v6342_v40 = vadd.f32 %v10864_v5, %v10894_v30  ;;  %v5759_v42 = vmul.f32 %v5423_v2, %v5311_v44  ;;  %v5325_v31 = vmax.f32 %v5228_v45, 0.0  ;;  %v6328_v48 = vadd.f32 %v6327_v38, %v6326_v15  ;;  %v5647_v30 = vld [vmem:[#allocation9 + $0x928] sm:$0xff]  ;;  %v5660_v43 = vld [vmem:[#allocation9 + $0x990] sm:$0xff]  ;;  %v5239_v2 = vpop.f32.mrf.mxu0 }
 0x735   : > { %v6343_v36 = vsel %vm6038_vm6, %v5969_v60, 0.0  ;;  %v5785_v0 = vmul.f32 %v5449_v47, %v10921_v19  ;;  %v5871_v9 = vmul.f32 %v5535_v61, %v5311_v44  ;;  %6217 = vadd.xlane.f32.xlu1 %v6216_v21  ;;  %v6086_v62 = vadd.f32 %v10856_v3, %v10892_v63  ;;  %v5450_v47 = vld [vmem:[#allocation9 + $0x300] sm:$0xff] }
 0x736   : > { %v6087_v7 = vsel %vm6038_vm6, %v5745_v11, 0.0  ;;  %v5982_v8 = vmul.f32 %v5646_v51, %v5310_v53  ;;  %v10942_v5 = vmul.f32 %v5561_v52, %v10921_v19  ;;  %v5350_v54 = vmax.f32 %v5125_v22, 0.0 }
 0x737   : > { %v5232_v60 = vadd.f32 %v5231_v26, %v11371_v23  ;;  %6329 = vadd.xlane.f32.xlu0 %v6328_v48  ;;  %v5884_v18 = vmul.f32 %v5548_v17, %v5324_v1  ;;  %v5234_v59 = vadd.f32 %v5233_v27, %v11371_v23  ;;  %v6344_v50 = vadd.f32 %v6343_v36, %v6342_v40  ;;  %v5574_v23 = vld [vmem:[#allocation9 + $0x6e0] sm:$0xff] }
 0x738   : > { %v6102_v3 = vadd.f32 %v10886_v41, %v5758_v46  ;;  %v5885_v63 = vmul.f32 %v5549_v25, %v5325_v31  ;;  %v6088_v53 = vadd.f32 %v6087_v7, %v6086_v62  ;;  %v6230_v11 = vadd.f32 %v10888_v10, %v5870_v33  ;;  %v5437_v41 = vld [vmem:[#allocation9 + $0x298] sm:$0xff]  ;;  %v5686_v10 = vld [vmem:[#allocation9 + $0xa60] sm:$0xff]  ;;  %v5451_v33 = vld [vmem:[#allocation9 + $0x308] sm:$0xff] }
 0x739   : > { %v6103_v24 = vsel %vm6038_vm6, %v5759_v42, 0.0  ;;  %v10949_v45 = vadd.f32 %v6132_v34, %v5785_v0  ;;  %v5983_v12 = vmul.f32 %v5647_v30, %v5311_v44  ;;  %v5127_v26 = vadd.f32 %v5126_v49, %v11372_v20  ;;  %6345 = vadd.xlane.f32.xlu1 %v6344_v50  ;;  %v5562_v34 = vld [vmem:[#allocation9 + $0x680] sm:$0xff]  ;;  %v5575_v25 = vld [vmem:[#allocation9 + $0x6e8] sm:$0xff]  ;;  %v5576_v49 = vld [vmem:[#allocation9 + $0x6f0] sm:$0xff] }
 0x73a   : > { %v6231_v13 = vsel %vm6038_vm6, %v5871_v9, 0.0  ;;  %v5772_v27 = vmul.f32 %v5436_v39, %v5324_v1  ;;  %v5996_v15 = vmul.f32 %v5660_v43, %v5324_v1  ;;  %v5997_v38 = vmul.f32 %v5661_v6, %v5325_v31  ;;  %v5563_v62 = vld [vmem:[#allocation9 + $0x688] sm:$0xff]  ;;  %v5577_v50 = vld [vmem:[#allocation9 + $0x6f8] sm:$0xff] }
 0x73b   : > { %v10953_v46 = vmax.f32 %v5232_v60, 0.0  ;;  %6089 = vadd.xlane.f32.xlu0 %v6088_v53  ;;  %v10955_v61 = vmax.f32 %v5234_v59, 0.0  ;;  %v5238_v44 = vadd.f32 %v5237_v16, %v11372_v20  ;;  %v6104_v22 = vadd.f32 %v6103_v24, %v6102_v3  ;;  %v5465_v24 = vld [vmem:[#allocation9 + $0x378] sm:$0xff] }
 0x73c   : > { %v6246_v51 = vadd.f32 %v10914_v28, %v5884_v18  ;;  %v5240_v52 = vadd.f32 %v5239_v2, %v11372_v20  ;;  %v6232_v21 = vadd.f32 %v6231_v13, %v6230_v11  ;;  %v6358_v1 = vadd.f32 %v10890_v58, %v5982_v8  ;;  %v5463_v20 = vld [vmem:[#allocation9 + $0x368] sm:$0xff] }
 0x73d   : > { %v6247_v40 = vsel %vm6038_vm6, %v5885_v63, 0.0  ;;  %v5910_v42 = vmul.f32 %v5574_v23, %v5350_v54  ;;  %v5351_v17 = vmax.f32 %v5127_v26, 0.0  ;;  %v5773_v48 = vmul.f32 %v5437_v41, %v5325_v31  ;;  %6105 = vadd.xlane.f32.xlu1 %v6104_v22  ;;  %v5464_v31 = vld [vmem:[#allocation9 + $0x370] sm:$0xff]  ;;  %v5687_v11 = vld [vmem:[#allocation9 + $0xa68] sm:$0xff] }
 0x73e   : > { %v6359_v36 = vsel %vm6038_vm6, %v5983_v12, 0.0  ;;  %v5798_v0 = vmul.f32 %v5462_v37, %v5350_v54  ;;  %v6022_v9 = vmul.f32 %v5686_v10, %v5350_v54  ;;  %v5786_v16 = vmul.f32 %v5450_v47, %v10953_v46  ;;  %v5673_v12 = vld [vmem:[#allocation9 + $0x9f8] sm:$0xff]  ;;  %v5674_v37 = vld [vmem:[#allocation9 + $0xa00] sm:$0xff]  ;;  %v5688_v23 = vld [vmem:[#allocation9 + $0xa70] sm:$0xff] }
 0x73f   : > { %v5898_v28 = vmul.f32 %v5562_v34, %v10953_v46  ;;  %6233 = vadd.xlane.f32.xlu0 %v6232_v21  ;;  %v5787_v58 = vmul.f32 %v5451_v33, %v10955_v61  ;;  %v5352_v7 = vmax.f32 %v5238_v44, 0.0  ;;  %v6248_v8 = vadd.f32 %v6247_v40, %v6246_v51  ;;  %v5675_v44 = vld [vmem:[#allocation9 + $0xa08] sm:$0xff] }
 0x740   : > { %v6374_v30 = vadd.f32 %v10916_v29, %v5996_v15  ;;  %v5353_v60 = vmax.f32 %v5240_v52, 0.0  ;;  %v6360_v39 = vadd.f32 %v6359_v36, %v6358_v1  ;;  %v6118_v54 = vadd.f32 %v10912_v55, %v5772_v27 }
 0x741   : > { %v6375_v43 = vsel %vm6038_vm6, %v5997_v38, 0.0  ;;  %v6276_v18 = vadd.f32 %v10793_v57, %v5910_v42  ;;  %v5911_v6 = vmul.f32 %v5575_v25, %v5351_v17  ;;  %v5899_v59 = vmul.f32 %v5563_v62, %v10955_v61  ;;  %6249 = vadd.xlane.f32.xlu1 %v6248_v8 }
 0x742   : > { %v6119_v3 = vsel %vm6038_vm6, %v5773_v48, 0.0  ;;  %v6261_v29 = vadd.f32 %v10931_v4, %v10942_v5  ;;  %v6148_v63 = vadd.f32 %v10791_v56, %v5798_v0  ;;  %v6404_v53 = vadd.f32 %v10803_v14, %v6022_v9  ;;  %v5689_v14 = vld [vmem:[#allocation9 + $0xa78] sm:$0xff] }
 0x743   : > { %v5799_v55 = vmul.f32 %v5463_v20, %v5351_v17  ;;  %6361 = vadd.xlane.f32.xlu0 %v6360_v39  ;;  %v5800_v57 = vmul.f32 %v5464_v31, %v5352_v7  ;;  %v5912_v26 = vmul.f32 %v5576_v49, %v5352_v7  ;;  %v6376_v2 = vadd.f32 %v6375_v43, %v6374_v30 }
 0x744   : > { %v6134_v13 = vadd.f32 %v10949_v45, %v5786_v16  ;;  %v5913_v27 = vmul.f32 %v5577_v50, %v5353_v60  ;;  %v6120_v15 = vadd.f32 %v6119_v3, %v6118_v54  ;;  %v6262_v41 = vadd.f32 %v6261_v29, %v5898_v28 }
 0x745   : > { %v6135_v4 = vsel %vm6038_vm6, %v5787_v58, 0.0  ;;  %v6023_v56 = vmul.f32 %v5687_v11, %v5351_v17  ;;  %v6277_v5 = vadd.f32 %v6276_v18, %v5911_v6  ;;  %v5801_v38 = vmul.f32 %v5465_v24, %v5353_v60  ;;  %6377 = vadd.xlane.f32.xlu1 %v6376_v2  ;;  %v11374_v11 = vld [vmem:[#allocation13_spill] sm:$0xff] }
 0x746   : > { %v6263_v10 = vsel %vm6038_vm6, %v5899_v59, 0.0  ;;  %v6388_v47 = vadd.f32 %v10785_v35, %v10918_v32  ;;  %v6009_v34 = vmul.f32 %v5673_v12, %v10921_v19  ;;  %v6149_v45 = vadd.f32 %v6148_v63, %v5799_v55 }
 0x747   : > { %6121 = vadd.xlane.f32.xlu0 %v6120_v15  ;;  %v6010_v22 = vmul.f32 %v5674_v37, %v10953_v46  ;;  %v6024_v51 = vmul.f32 %v5688_v23, %v5352_v7  ;;  %v6136_v33 = vadd.f32 %v6135_v4, %v6134_v13  ;;  %v6278_v52 = vadd.f32 %v6277_v5, %v5912_v26 }
 0x748   : > { %v6025_v21 = vmul.f32 %v5689_v14, %v5353_v60  ;;  %v6264_v1 = vadd.f32 %v6263_v10, %v6262_v41  ;;  %v6150_v40 = vadd.f32 %v6149_v45, %v5800_v57  ;;  %v6279_v42 = vsel %vm6038_vm6, %v5913_v27, 0.0 }
 0x749   : > { %v6405_v17 = vadd.f32 %v6404_v53, %v6023_v56  ;;  %v6011_v48 = vmul.f32 %v5675_v44, %v10955_v61  ;;  %6137 = vadd.xlane.f32.xlu1 %v6136_v33  ;;  %v6151_v35 = vsel %vm6038_vm6, %v5801_v38, 0.0  ;;  %v6389_v32 = vadd.f32 %v6388_v47, %v6009_v34 }
 0x74a   : > { %v6280_v19 = vadd.f32 %v6279_v42, %v6278_v52  ;;  %v6152_v0 = vadd.f32 %v6151_v35, %v6150_v40  ;;  %v6407_v9 = vsel %vm6038_vm6, %v6025_v21, 0.0  ;;  %v11373_v43 = vlaneseq }
 0x74b   : > { %6265 = vadd.xlane.f32.xlu0 %v6264_v1  ;;  %v6406_v36 = vadd.f32 %v6405_v17, %v6024_v51  ;;  %v6390_v46 = vadd.f32 %v6389_v32, %v6010_v22  ;;  %v6391_v25 = vsel %vm6038_vm6, %v6011_v48, 0.0 }
 0x74c   : > { %v6436_v18 = vand.u32 127, %v11373_v43 }
 0x74d   : > { %6281 = vadd.xlane.f32.xlu1 %v6280_v19  ;;  %v6408_v16 = vadd.f32 %v6407_v9, %v6406_v36  ;;  %v6392_v28 = vadd.f32 %v6391_v25, %v6390_v46 }
 0x74e   : > { %v6441_v50 = vadd.s32 4294967288, %v6436_v18  ;;  %v6448_v3 = vadd.s32 4294967280, %v6436_v18  ;;  %v6455_v63 = vadd.s32 4294967272, %v6436_v18  ;;  %v6462_v12 = vadd.s32 4294967264, %v6436_v18 }
 0x74f   : > { %6153 = vadd.xlane.f32.xlu0 %v6152_v0  ;;  %v6469_v57 = vadd.s32 4294967256, %v6436_v18  ;;  %v6439_v26 = vsub.s32 %v6436_v18, %v11374_v11  ;;  %v6476_v23 = vadd.s32 4294967248, %v6436_v18  ;;  %v6483_v27 = vadd.s32 4294967240, %v6436_v18 }
 0x750   : > { %v6444_v55 = vsub.s32 %v6441_v50, %v11374_v11  ;;  %v6451_v24 = vsub.s32 %v6448_v3, %v11374_v11  ;;  %v6458_v13 = vsub.s32 %v6455_v63, %v11374_v11  ;;  %v6465_v56 = vsub.s32 %v6462_v12, %v11374_v11 }
 0x751   : > { %6409 = vadd.xlane.f32.xlu1 %v6408_v16  ;;  %v6472_v5 = vsub.s32 %v6469_v57, %v11374_v11  ;;  %v6479_v45 = vsub.s32 %v6476_v23, %v11374_v11  ;;  %v6486_v22 = vsub.s32 %v6483_v27, %v11374_v11 }
 0x753   : > { %6393 = vadd.xlane.f32.xlu0 %v6392_v28 }
 0x7a3   : > { %v6170_v61 = vpop.xlane.xlu0 %6169 }
 0x7a4   : > { %v6493_v14 = vrot.slane %v6170_v61, %v6439_v26 }
 0x7a6   : > { %v6042_v62 = vpop.xlane.xlu1 %6041 }
 0x7a7   : > { %v6440_v38 = vrot.slane %v6042_v62, %v6439_v26 }
 0x7a8   : > { %v10988_v20 = vpop.xlane.xlu0 %6297 }
 0x7a9   : > { %v6532_v51 = vrot.slane %v10988_v20, %v6439_v26  ;;  %v6577_v26 = vld [vmem:[%s11070_s10] sm:$0x7] }
 0x7aa   : > { %v6186_v58 = vpop.xlane.xlu1 %6185 }
 0x7ab   : > { %v6497_v15 = vrot.slane %v6186_v58, %v6444_v55 }
 0x7ad   : > { %v6498_v33 = vsel %vm6446_vm7, %v6497_v15, %v6493_v14 }
 0x7b1   : > { %v6058_v7 = vpop.xlane.xlu0 %6057 }
 0x7b2   : > { %v6445_v41 = vrot.slane %v6058_v7, %v6444_v55 }
 0x7b4   : > { %v6447_v52 = vsel %vm6446_vm7, %v6445_v41, %v6440_v38 }
 0x7b6   : > { %v10990_v8 = vpop.xlane.xlu1 %6313 }
 0x7b7   : > { %v6536_v1 = vrot.slane %v10990_v8, %v6444_v55 }
 0x7b9   : > { %v6537_v58 = vsel %vm6446_vm7, %v6536_v1, %v6532_v51 }
 0x7ba   : > { %v6202_v30 = vpop.xlane.xlu1 %6201 }
 0x7bb   : > { %v6502_v4 = vrot.slane %v6202_v30, %v6451_v24 }
 0x7bc   : > { %v6074_v31 = vpop.xlane.xlu0 %6073 }
 0x7bd   : > { %v6452_v10 = vrot.slane %v6074_v31, %v6451_v24  ;;  %v6503_v40 = vsel %vm6453_vm8, %v6502_v4, %v6498_v33 }
 0x7be   : > { %v6218_v49 = vpop.xlane.xlu1 %6217 }
 0x7bf   : > { %v6507_v34 = vrot.slane %v6218_v49, %v6458_v13  ;;  %v6454_v48 = vsel %vm6453_vm8, %v6452_v10, %v6447_v52 }
 0x7c0   : > { %v10992_v60 = vpop.xlane.xlu0 %6329 }
 0x7c1   : > { %v6541_v35 = vrot.slane %v10992_v60, %v6451_v24  ;;  %v6508_v0 = vsel %vm6460_vm9, %v6507_v34, %v6503_v40 }
 0x7c2   : > { %v10994_v39 = vpop.xlane.xlu1 %6345 }
 0x7c3   : > { %v6546_v46 = vrot.slane %v10994_v39, %v6458_v13  ;;  %v6542_v31 = vsel %vm6453_vm8, %v6541_v35, %v6537_v58 }
 0x7c4   : > { %v6090_v54 = vpop.xlane.xlu0 %6089 }
 0x7c5   : > { %v6459_v21 = vrot.slane %v6090_v54, %v6458_v13  ;;  %v6547_v54 = vsel %vm6460_vm9, %v6546_v46, %v6542_v31 }
 0x7c6   : > { %v10997_v6 = vpop.xlane.xlu1 %6105 }
 0x7c7   : > { %v6466_v17 = vrot.slane %v10997_v6, %v6465_v56  ;;  %v6461_v28 = vsel %vm6460_vm9, %v6459_v21, %v6454_v48 }
 0x7c8   : > { %v6234_v59 = vpop.xlane.xlu0 %6233 }
 0x7c9   : > { %v6512_v42 = vrot.slane %v6234_v59, %v6465_v56  ;;  %v6468_v8 = vsel %vm6467_vm10, %v6466_v17, %v6461_v28 }
 0x7ca   : > { %v6250_v29 = vpop.xlane.xlu1 %6249 }
 0x7cb   : > { %v6517_v32 = vrot.slane %v6250_v29, %v6472_v5  ;;  %v6513_v7 = vsel %vm6467_vm10, %v6512_v42, %v6508_v0 }
 0x7cc   : > { %v10999_v53 = vpop.xlane.xlu0 %6361 }
 0x7cd   : > { %v6551_v61 = vrot.slane %v10999_v53, %v6465_v56  ;;  %v6518_v49 = vsel %vm6474_vm11, %v6517_v32, %v6513_v7 }
 0x7ce   : > { %v11004_v2 = vpop.xlane.xlu1 %6377 }
 0x7cf   : > { %v6556_v30 = vrot.slane %v11004_v2, %v6472_v5  ;;  %v6552_v50 = vsel %vm6467_vm10, %v6551_v61, %v6547_v54 }
 0x7d0   : > { %v6122_v37 = vpop.xlane.xlu0 %6121 }
 0x7d1   : > { %v6473_v19 = vrot.slane %v6122_v37, %v6472_v5  ;;  %v6557_v53 = vsel %vm6474_vm11, %v6556_v30, %v6552_v50 }
 0x7d2   : > { %v6138_v47 = vpop.xlane.xlu1 %6137 }
 0x7d3   : > { %v6480_v25 = vrot.slane %v6138_v47, %v6479_v45  ;;  %v6475_v60 = vsel %vm6474_vm11, %v6473_v19, %v6468_v8 }
 0x7d4   : > { %v6266_v44 = vpop.xlane.xlu0 %6265 }
 0x7d5   : > { %v6522_v9 = vrot.slane %v6266_v44, %v6479_v45  ;;  %v6482_v18 = vsel %vm6481_vm12, %v6480_v25, %v6475_v60 }
 0x7d6   : > { %v6282_v36 = vpop.xlane.xlu1 %6281 }
 0x7d7   : > { %v6527_v20 = vrot.slane %v6282_v36, %v6486_v22  ;;  %v6523_v43 = vsel %vm6481_vm12, %v6522_v9, %v6518_v49 }
 0x7d8   : > { %v6154_v16 = vpop.xlane.xlu0 %6153 }
 0x7d9   : > { %v6487_v62 = vrot.slane %v6154_v16, %v6486_v22  ;;  %v6528_v29 = vsel %vm6488_vm13, %v6527_v20, %v6523_v43 }
 0x7da   : > { %v6410_v39 = vpop.xlane.xlu1 %6409 }
 0x7db   : > { %v6566_v59 = vrot.slane %v6410_v39, %v6486_v22  ;;  %v6489_v3 = vsel %vm6488_vm13, %v6487_v62, %v6482_v18 }
 0x7dc   : > { %v6394_v6 = vpop.xlane.xlu0 %6393  ;;  %v6569_v24 = vsel %vm6568_vm14, %v6528_v29, %v6489_v3 }
 0x7dd   : > { %v6561_v63 = vrot.slane %v6394_v6, %v6479_v45 }
 0x7df   : > { %v6562_v11 = vsel %vm6481_vm12, %v6561_v63, %v6557_v53 }
 0x7e0   : > { %v6567_v55 = vsel %vm6488_vm13, %v6566_v59, %v6562_v11 }
 0x7e1   : > { %v6571_v12 = vsel %vm6570_vm15, %v6567_v55, %v6569_v24 }
 0x7e2   : > { %v6574_v57 = vsel %vm6573_vm0, %v6571_v12, 0.0 }
 0x7e3   : > { %6575 = vadd.xlane.f32.xlu0 %v6574_v57 }
 0x86c   : > { %v6576_v2 = vpop.xlane.xlu0 %6575 }
 0x86d   : > { %v6578_v13 = vadd.f32 %v6577_v26, %v6576_v2 }
 0x86f   : > { %6580 = vst.msk [vmem:[%s460_s26] sm:$0x7] %vm6579_vm1, %v6578_v13 }
 0x870 PF: > { %p23_p2 = scmp.ge.s32.totalorder %s7305_s21, 4   ;;  %s11375_s17 = smov %s7134_s18 }
 0x871   : > { %s11376_s18 = smov %s7138_s19  ;;  %s11377_s19 = smov %s7317_s28 }
 0x872   : > { %s11378_s20 = smov %s7305_s21  ;;  %25 = sbr.rel (!%p23_p2) target bundleno = 8 (0x8), region = 120 }
 0x877   :  { %6600 = vsyncpa [#allocation3], 1 }
 0x878   :  { %6602 = vsyncpa [#allocation3 + $0x1], 1 }
 0x879   :  { %6603 = vsyncpa [#allocation5], 1 }
 0x87a   :  { %6604 = vsyncpa [#allocation8], 1 }

</bundles_post_ra>
